<compile_context>
chip_gen: v7x
topology: tpu7x:2x2x1
jax: 0.10.0
libtpu: 0.0.40
codegen_flags: <defaults>
</compile_context>

<pallas_src>
import numpy as np
import jax
import jax.numpy as jnp
from jax.experimental import pallas as pl
from jax.experimental.pallas import tpu as pltpu


# ----------------------------- in-kernel helpers -----------------------------

def _dot(a, b):
    return jnp.dot(a, b, preferred_element_type=jnp.float32)


def _lrelu(x):
    return jnp.maximum(x, 0.2 * x)


def _resnet_core(x, lpool, pwt, bpool, lproj, l1_ref, rw_ref, b1, l2_ref, b2, K):
    """LearnableAdaptiveResnetBlock on a (B*C*H, W) tile, entirely in VMEM.

    pool 1x1 conv + adaptive H-pooling are folded into `lpool` (left matmul), adaptive
    W-pooling into `pwt` (right matmul).  Each KxK conv is sum_k (Lk @ x) @ Rk where Lk
    carries channel mixing + the H tap (with zero padding) and Rk the W tap.
    Residual add + LeakyReLU are fused into the epilogue.
    """
    pooled = _dot(_dot(lpool, x), pwt) + bpool          # LearnableAdaptivePooling2d
    res = _dot(lproj, pooled)                           # projection (1x1, no bias)
    acc = None
    for k in range(K):                                  # conv1 (KxK, 'same')
        t = _dot(_dot(l1_ref[k], pooled), rw_ref[k])
        acc = t if acc is None else acc + t
    h = _lrelu(acc + b1)
    acc = None
    for k in range(K):                                  # conv2 (KxK, 'same')
        t = _dot(_dot(l2_ref[k], h), rw_ref[k])
        acc = t if acc is None else acc + t
    return _lrelu(acc + b2 + res)                       # + residual, LeakyReLU(0.2)


# ----------------------------- Pallas kernels -----------------------------

def _make_block_kernel(K, bn_n):
    inv_n = 1.0 / bn_n

    def kernel(x_ref, gch_ref, gcol_ref, bcol_ref,
               lpool_ref, pwt_ref, bpool_ref, lproj_ref,
               l1_ref, rw_ref, b1_ref, l2_ref, b2_ref, o_ref):
        x = x_ref[...]
        # training-mode BatchNorm2d (batch stats, biased var, eps=1e-5): per-channel
        # reduce + broadcast-back done with one tiny matmul against the 0/1 matrix Gch.
        rs = jnp.sum(x, axis=1, keepdims=True)
        rs2 = jnp.sum(x * x, axis=1, keepdims=True)
        mean = _dot(gch_ref[...], rs) * inv_n
        msq = _dot(gch_ref[...], rs2) * inv_n
        var = msq - mean * mean
        scale = jax.lax.rsqrt(var + 1e-5) * gcol_ref[...]
        xn = x * scale + (bcol_ref[...] - mean * scale)
        o_ref[...] = _resnet_core(xn, lpool_ref[...], pwt_ref[...], bpool_ref[...],
                                  lproj_ref[...], l1_ref, rw_ref, b1_ref[...],
                                  l2_ref, b2_ref[...], K)

    return kernel


def _make_head_kernel(b0, b1, accumulate):
    def head_math(h, mspec, mphase, sre, sim):
        spec = jnp.exp(_dot(mspec, h) + b0)             # torch.exp(out[:, 0])
        ang = jnp.sin(_dot(mphase, h) + b1)             # torch.sin(out[:, 1])
        re = spec * jnp.cos(ang)                        # torch.polar(spec, phase)
        im = spec * jnp.sin(ang)
        # polar + (modeled) ISTFT fused: the (B, S) re/im never leave VMEM.
        return _dot(re, sre) + _dot(im, sim)

    if accumulate:
        def kernel(h_ref, mspec_ref, mphase_ref, sre_ref, sim_ref, y_ref, o_ref):
            o_ref[...] = y_ref[...] + head_math(
                h_ref[...], mspec_ref[...], mphase_ref[...],
                sre_ref[...], sim_ref[...])
    else:
        def kernel(h_ref, mspec_ref, mphase_ref, sre_ref, sim_ref, o_ref):
            o_ref[...] = head_math(
                h_ref[...], mspec_ref[...], mphase_ref[...],
                sre_ref[...], sim_ref[...])
    return kernel


def _make_final_kernel(K, Ho, scale):
    def kernel(x_ref, lpool_ref, pwt_ref, bpool_ref, lproj_ref,
               l1_ref, rw_ref, b1_ref, l2_ref, b2_ref,
               sel_ref, place_ref, y_ref, o_ref):
        h = _resnet_core(x_ref[...], lpool_ref[...], pwt_ref[...], bpool_ref[...],
                         lproj_ref[...], l1_ref, rw_ref, b1_ref[...],
                         l2_ref, b2_ref[...], K)
        # flatten(2,3).squeeze(1): reassemble (B, Ho*Wo) from the (B*Ho, Wo) rows and
        # fuse the final (x + y) / (n_stfts + 1) mix.
        flat = None
        for hh in range(Ho):
            t = _dot(_dot(sel_ref[hh], h), place_ref[hh])
            flat = t if flat is None else flat + t
        o_ref[...] = (flat + y_ref[...]) * scale

    return kernel


# ----------------------------- pallas_call wrappers -----------------------------

_VMEM = pl.BlockSpec(memory_space=pltpu.MemorySpace.VMEM)


def run_block(x, p):
    inputs = [x, p["Gch"], p["gamma_col"], p["beta_col"],
              p["Lpool"], p["PwT"], p["bpool"], p["Lproj"],
              p["L1"], p["Rw"], p["b1"], p["L2"], p["b2"]]
    return pl.pallas_call(
        _make_block_kernel(p["K"], p["bn_n"]),
        out_shape=jax.ShapeDtypeStruct(p["shape_out"], jnp.float32),
        in_specs=[_VMEM] * len(inputs),
        out_specs=_VMEM,
    )(*inputs)


def run_head(h2d, hp, y):
    inputs = [h2d, hp["Mspec"], hp["Mphase"], hp["Sre"], hp["Sim"]]
    if y is not None:
        inputs.append(y)
    return pl.pallas_call(
        _make_head_kernel(hp["b0"], hp["b1"], y is not None),
        out_shape=jax.ShapeDtypeStruct((hp["B"], hp["L"]), jnp.float32),
        in_specs=[_VMEM] * len(inputs),
        out_specs=_VMEM,
    )(*inputs)


def run_final(x, fp, y):
    inputs = [x, fp["Lpool"], fp["PwT"], fp["bpool"], fp["Lproj"],
              fp["L1"], fp["Rw"], fp["b1"], fp["L2"], fp["b2"],
              fp["Sel"], fp["Place"], y]
    return pl.pallas_call(
        _make_final_kernel(fp["K"], fp["Ho"], fp["scale"]),
        out_shape=jax.ShapeDtypeStruct((fp["B"], fp["L"]), jnp.float32),
        in_specs=[_VMEM] * len(inputs),
        out_specs=_VMEM,
    )(*inputs)


def vocoder_forward(x, params):
    # x: (B, nmel, ntimeframes) -> unsqueeze(1) + NCHW flatten -> (B*1*nmel, ntf) rows.
    h = x.astype(jnp.float32).reshape(-1, x.shape[-1])
    y = None
    for bp, hp in zip(params["blocks"], params["heads"]):
        h = run_block(h, bp)                              # (B*C_out*H_out, W_out)
        h2d = h.reshape(hp["B"] * hp["O"], hp["S"])       # free contiguous reshape
        y = run_head(h2d, hp, y)                          # (B, audio_length)
    return run_final(h, params["final"], y)               # (B, audio_length)


# ----------------------------- parameter construction -----------------------------

def pool_matrix(n_in, n_out):
    """AdaptiveAvgPool1d as a matrix: region i = [floor(i*in/out), ceil((i+1)*in/out))."""
    P = np.zeros((n_out, n_in), dtype=np.float32)
    for i in range(n_out):
        s = (i * n_in) // n_out
        e = -((-(i + 1) * n_in) // n_out)
        P[i, s:e] = 1.0 / (e - s)
    return P


def _chan_col(v, H, B):
    """Per-channel values -> (B*C*H, 1) column matching the (b, c, h) row order."""
    return np.tile(np.repeat(np.asarray(v, np.float32), H), B)[:, None]


def _conv_left_mats(W, Ho, B):
    """W: (O, C, K, K) -> stack (K, B*O*Ho, B*C*Ho); tap kw carries channel mix + H tap."""
    O, C, K, _ = W.shape
    p = K // 2
    eyeB = np.eye(B, dtype=np.float32)
    mats = []
    for kw in range(K):
        M = np.zeros((O * Ho, C * Ho), dtype=np.float32)
        for kh in range(K):
            dh = kh - p
            for ho in range(Ho):
                hi = ho + dh
                if 0 <= hi < Ho:
                    M[np.arange(O)[:, None] * Ho + ho,
                      np.arange(C)[None, :] * Ho + hi] += W[:, :, kh, kw]
        mats.append(np.kron(eyeB, M))
    return np.stack(mats, axis=0)


def _conv_right_mats(Wo, K):
    """0/1 W-tap matrices: Rk[w+dw, w] = 1 (zero padding outside [0, Wo))."""
    p = K // 2
    mats = []
    for kw in range(K):
        dw = kw - p
        M = np.zeros((Wo, Wo), dtype=np.float32)
        for w in range(Wo):
            wi = w + dw
            if 0 <= wi < Wo:
                M[wi, w] = 1.0
        mats.append(M)
    return np.stack(mats, axis=0)


def _build_block(key, B, C, O, K, Hi, Wi, Ho, Wo, with_bn):
    ks = jax.random.split(key, 8)
    # module-style weights; weights_init: every Conv weight ~ N(0, 0.02), biases untouched.
    Wpool = 0.02 * np.asarray(jax.random.normal(ks[0], (C, C), jnp.float32))
    bpool = 0.01 * np.asarray(jax.random.normal(ks[1], (C,), jnp.float32))
    Wproj = 0.02 * np.asarray(jax.random.normal(ks[2], (O, C), jnp.float32))
    W1 = 0.02 * np.asarray(jax.random.normal(ks[3], (O, C, K, K), jnp.float32))
    b1 = 0.01 * np.asarray(jax.random.normal(ks[4], (O,), jnp.float32))
    W2 = 0.02 * np.asarray(jax.random.normal(ks[5], (O, O, K, K), jnp.float32))
    b2 = 0.01 * np.asarray(jax.random.normal(ks[6], (O,), jnp.float32))
    Ph = pool_matrix(Hi, Ho)
    Pw = pool_matrix(Wi, Wo)
    eyeB = np.eye(B, dtype=np.float32)
    p = {
        "Lpool": jnp.asarray(np.kron(eyeB, np.kron(Wpool, Ph))),   # 1x1 conv + H-pool
        "PwT": jnp.asarray(Pw.T),                                   # W-pool
        "bpool": jnp.asarray(_chan_col(bpool, Ho, B)),
        "Lproj": jnp.asarray(np.kron(eyeB, np.kron(Wproj, np.eye(Ho, dtype=np.float32)))),
        "L1": jnp.asarray(_conv_left_mats(W1, Ho, B)),
        "Rw": jnp.asarray(_conv_right_mats(Wo, K)),
        "b1": jnp.asarray(_chan_col(b1, Ho, B)),
        "L2": jnp.asarray(_conv_left_mats(W2, Ho, B)),
        "b2": jnp.asarray(_chan_col(b2, Ho, B)),
        "K": K, "B": B, "Ho": Ho, "Wo": Wo,
        "shape_in": (B * C * Hi, Wi), "shape_out": (B * O * Ho, Wo),
    }
    if with_bn:
        # weights_init: BatchNorm2d weight ~ N(1, 0.02), bias = 0.
        gamma = 1.0 + 0.02 * np.asarray(jax.random.normal(ks[7], (C,), jnp.float32))
        beta = np.zeros((C,), np.float32)
        ch = (np.arange(B * C * Hi) // Hi) % C
        p["Gch"] = jnp.asarray((ch[:, None] == ch[None, :]).astype(np.float32))
        p["gamma_col"] = jnp.asarray(_chan_col(gamma, Hi, B))
        p["beta_col"] = jnp.asarray(_chan_col(beta, Hi, B))
        p["bn_n"] = float(B * Hi * Wi)
    return p


def _build_head(key, B, O, S, L):
    ks = jax.random.split(key, 3)
    Wout = 0.02 * np.asarray(jax.random.normal(ks[0], (2, O), jnp.float32))
    bout = 0.01 * np.asarray(jax.random.normal(ks[1], (2,), jnp.float32))
    Mspec = np.zeros((B, B * O), np.float32)
    Mphase = np.zeros((B, B * O), np.float32)
    for b in range(B):
        Mspec[b, b * O:(b + 1) * O] = Wout[0]
        Mphase[b, b * O:(b + 1) * O] = Wout[1]
    # TODO(synk): fixed deterministic linear synthesis standing in for stft.inverse().
    synth = np.asarray(jax.random.normal(ks[2], (2 * S, L), jnp.float32)) / np.sqrt(2.0 * S)
    return {
        "Mspec": jnp.asarray(Mspec),
        "Mphase": jnp.asarray(Mphase),
        "b0": float(bout[0]), "b1": float(bout[1]),
        "Sre": jnp.asarray(synth[:S].astype(np.float32)),
        "Sim": jnp.asarray(synth[S:].astype(np.float32)),
        "B": B, "O": O, "S": S, "L": L,
    }


def init_vocoder_params(key, batch, nmel, ntf, stfts, output_channels, kernel_size,
                        audio_length):
    assert len(stfts) == len(output_channels) == len(kernel_size) - 1
    assert all(l == audio_length for (_, _, l) in stfts)
    blocks, heads = [], []
    C, Hi, Wi = 1, nmel, ntf
    keys = jax.random.split(key, 2 * len(output_channels) + 1)
    for i, O in enumerate(output_channels):
        n, t, _ = stfts[i]
        blocks.append(_build_block(keys[2 * i], batch, C, O, kernel_size[i],
                                   Hi, Wi, n, t, with_bn=True))
        heads.append(_build_head(keys[2 * i + 1], batch, O, n * t, audio_length))
        C, Hi, Wi = O, n, t
    Ho_f, Wo_f = 4, Wi - 1                              # final_block output size
    assert Ho_f * Wo_f == audio_length, "final block output must flatten to audio_length"
    fp = _build_block(keys[-1], batch, C, 1, kernel_size[-1], Hi, Wi, Ho_f, Wo_f,
                      with_bn=False)
    Sel = np.zeros((Ho_f, batch, batch * Ho_f), np.float32)
    Place = np.zeros((Ho_f, Wo_f, audio_length), np.float32)
    for h in range(Ho_f):
        for b in range(batch):
            Sel[h, b, b * Ho_f + h] = 1.0
        for w in range(Wo_f):
            Place[h, w, h * Wo_f + w] = 1.0
    fp["Sel"] = jnp.asarray(Sel)
    fp["Place"] = jnp.asarray(Place)
    fp["L"] = audio_length
    fp["scale"] = 1.0 / (len(stfts) + 1)
    return {"blocks": blocks, "heads": heads, "final": fp}


# ----------------------------- main -----------------------------

if __name__ == "__main__":
    B, NMEL, NTF = 2, 16, 16
    AUDIO_LEN = 64
    # (n, t, l) per STFT; 4 * (t_last - 1) == AUDIO_LEN so the final residual add is valid
    stfts = [(8, 8, AUDIO_LEN), (16, 17, AUDIO_LEN)]
    output_channels = [4, 8]
    kernel_size = [3, 3, 3]

    key = jax.random.PRNGKey(0)
    pkey, xkey = jax.random.split(key)
    params = init_vocoder_params(pkey, B, NMEL, NTF, stfts, output_channels,
                                 kernel_size, AUDIO_LEN)
    x = jax.random.normal(xkey, (B, NMEL, NTF), jnp.float32)

    fwd = jax.jit(lambda inp: vocoder_forward(inp, params))
    out = jax.block_until_ready(fwd(x))

    assert out.shape == (B, AUDIO_LEN), out.shape
    assert bool(jnp.all(jnp.isfinite(out)))
    print("KERNEL_OK")
</pallas_src>

<mosaic_0001>
module attributes {stable_mosaic.version = 11 : i64} {
  func.func @kernel(%arg0: memref<32x16xf32, #tpu.memory_space<vmem>>, %arg1: memref<32x32xf32, #tpu.memory_space<vmem>>, %arg2: memref<32x1xf32, #tpu.memory_space<vmem>>, %arg3: memref<32x1xf32, #tpu.memory_space<vmem>>, %arg4: memref<16x32xf32, #tpu.memory_space<vmem>>, %arg5: memref<16x8xf32, #tpu.memory_space<vmem>>, %arg6: memref<16x1xf32, #tpu.memory_space<vmem>>, %arg7: memref<64x16xf32, #tpu.memory_space<vmem>>, %arg8: memref<3x64x16xf32, #tpu.memory_space<vmem>>, %arg9: memref<3x8x8xf32, #tpu.memory_space<vmem>>, %arg10: memref<64x1xf32, #tpu.memory_space<vmem>>, %arg11: memref<3x64x64xf32, #tpu.memory_space<vmem>>, %arg12: memref<64x1xf32, #tpu.memory_space<vmem>>, %arg13: memref<64x8xf32, #tpu.memory_space<vmem>>) attributes {dimension_semantics = [], scalar_prefetch = 0 : i64, scratch_operands = 0 : i64, tpu.core_type = #tpu.core_type<tc>} {
    %c0 = arith.constant 0 : index
    %c0_0 = arith.constant 0 : index
    %0 = vector.load %arg0[%c0, %c0_0] : memref<32x16xf32, #tpu.memory_space<vmem>>, vector<32x16xf32>
    %cst = arith.constant dense<0.000000e+00> : vector<32xf32>
    %1 = vector.multi_reduction <add>, %0, %cst [1] : vector<32x16xf32> to vector<32xf32>
    %2 = vector.shape_cast %1 : vector<32xf32> to vector<32x1xf32>
    %3 = arith.mulf %0, %0 : vector<32x16xf32>
    %cst_1 = arith.constant dense<0.000000e+00> : vector<32xf32>
    %4 = vector.multi_reduction <add>, %3, %cst_1 [1] : vector<32x16xf32> to vector<32xf32>
    %5 = vector.shape_cast %4 : vector<32xf32> to vector<32x1xf32>
    %c0_2 = arith.constant 0 : index
    %c0_3 = arith.constant 0 : index
    %6 = vector.load %arg1[%c0_2, %c0_3] : memref<32x32xf32, #tpu.memory_space<vmem>>, vector<32x32xf32>
    %cst_4 = arith.constant dense<0.000000e+00> : vector<32x1xf32>
    %7 = tpu.matmul %6, %2, %cst_4 {dimension_numbers = #tpu.dot_dimension_numbers<[1], [0], [0], [1], [0, 0, 1, 1], [], []>} : vector<32x32xf32>, vector<32x1xf32>, vector<32x1xf32> -> vector<32x1xf32>
    %cst_5 = arith.constant 0.001953125 : f32
    %8 = vector.broadcast %cst_5 : f32 to vector<32x1xf32>
    %9 = arith.mulf %7, %8 : vector<32x1xf32>
    %c0_6 = arith.constant 0 : index
    %c0_7 = arith.constant 0 : index
    %10 = vector.load %arg1[%c0_6, %c0_7] : memref<32x32xf32, #tpu.memory_space<vmem>>, vector<32x32xf32>
    %cst_8 = arith.constant dense<0.000000e+00> : vector<32x1xf32>
    %11 = tpu.matmul %10, %5, %cst_8 {dimension_numbers = #tpu.dot_dimension_numbers<[1], [0], [0], [1], [0, 0, 1, 1], [], []>} : vector<32x32xf32>, vector<32x1xf32>, vector<32x1xf32> -> vector<32x1xf32>
    %cst_9 = arith.constant 0.001953125 : f32
    %12 = vector.broadcast %cst_9 : f32 to vector<32x1xf32>
    %13 = arith.mulf %11, %12 : vector<32x1xf32>
    %14 = arith.mulf %9, %9 : vector<32x1xf32>
    %15 = arith.subf %13, %14 : vector<32x1xf32>
    %cst_10 = arith.constant 9.99999974E-6 : f32
    %16 = vector.broadcast %cst_10 : f32 to vector<32x1xf32>
    %17 = arith.addf %15, %16 : vector<32x1xf32>
    %18 = math.rsqrt %17 : vector<32x1xf32>
    %c0_11 = arith.constant 0 : index
    %c0_12 = arith.constant 0 : index
    %19 = vector.load %arg2[%c0_11, %c0_12] : memref<32x1xf32, #tpu.memory_space<vmem>>, vector<32x1xf32>
    %20 = arith.mulf %18, %19 : vector<32x1xf32>
    %21 = vector.broadcast %20 : vector<32x1xf32> to vector<32x16xf32>
    %22 = arith.mulf %0, %21 : vector<32x16xf32>
    %c0_13 = arith.constant 0 : index
    %c0_14 = arith.constant 0 : index
    %23 = vector.load %arg3[%c0_13, %c0_14] : memref<32x1xf32, #tpu.memory_space<vmem>>, vector<32x1xf32>
    %24 = arith.mulf %9, %20 : vector<32x1xf32>
    %25 = arith.subf %23, %24 : vector<32x1xf32>
    %26 = vector.broadcast %25 : vector<32x1xf32> to vector<32x16xf32>
    %27 = arith.addf %22, %26 : vector<32x16xf32>
    %c0_15 = arith.constant 0 : index
    %c0_16 = arith.constant 0 : index
    %28 = vector.load %arg4[%c0_15, %c0_16] : memref<16x32xf32, #tpu.memory_space<vmem>>, vector<16x32xf32>
    %c0_17 = arith.constant 0 : index
    %c0_18 = arith.constant 0 : index
    %29 = vector.load %arg5[%c0_17, %c0_18] : memref<16x8xf32, #tpu.memory_space<vmem>>, vector<16x8xf32>
    %c0_19 = arith.constant 0 : index
    %c0_20 = arith.constant 0 : index
    %30 = vector.load %arg6[%c0_19, %c0_20] : memref<16x1xf32, #tpu.memory_space<vmem>>, vector<16x1xf32>
    %c0_21 = arith.constant 0 : index
    %c0_22 = arith.constant 0 : index
    %31 = vector.load %arg7[%c0_21, %c0_22] : memref<64x16xf32, #tpu.memory_space<vmem>>, vector<64x16xf32>
    %c0_23 = arith.constant 0 : index
    %c0_24 = arith.constant 0 : index
    %32 = vector.load %arg10[%c0_23, %c0_24] : memref<64x1xf32, #tpu.memory_space<vmem>>, vector<64x1xf32>
    %c0_25 = arith.constant 0 : index
    %c0_26 = arith.constant 0 : index
    %33 = vector.load %arg12[%c0_25, %c0_26] : memref<64x1xf32, #tpu.memory_space<vmem>>, vector<64x1xf32>
    %cst_27 = arith.constant dense<0.000000e+00> : vector<16x16xf32>
    %34 = tpu.matmul %28, %27, %cst_27 {dimension_numbers = #tpu.dot_dimension_numbers<[1], [0], [0], [1], [0, 0, 1, 1], [], []>} : vector<16x32xf32>, vector<32x16xf32>, vector<16x16xf32> -> vector<16x16xf32>
    %cst_28 = arith.constant dense<0.000000e+00> : vector<16x8xf32>
    %35 = tpu.matmul %34, %29, %cst_28 {dimension_numbers = #tpu.dot_dimension_numbers<[1], [0], [0], [1], [0, 0, 1, 1], [], []>} : vector<16x16xf32>, vector<16x8xf32>, vector<16x8xf32> -> vector<16x8xf32>
    %36 = vector.broadcast %30 : vector<16x1xf32> to vector<16x8xf32>
    %37 = arith.addf %35, %36 : vector<16x8xf32>
    %cst_29 = arith.constant dense<0.000000e+00> : vector<64x8xf32>
    %38 = tpu.matmul %31, %37, %cst_29 {dimension_numbers = #tpu.dot_dimension_numbers<[1], [0], [0], [1], [0, 0, 1, 1], [], []>} : vector<64x16xf32>, vector<16x8xf32>, vector<64x8xf32> -> vector<64x8xf32>
    %c0_30 = arith.constant 0 : index
    %c0_31 = arith.constant 0 : index
    %c0_32 = arith.constant 0 : index
    %39 = vector.load %arg8[%c0_30, %c0_31, %c0_32] : memref<3x64x16xf32, #tpu.memory_space<vmem>>, vector<1x64x16xf32>
    %40 = vector.shape_cast %39 : vector<1x64x16xf32> to vector<64x16xf32>
    %cst_33 = arith.constant dense<0.000000e+00> : vector<64x8xf32>
    %41 = tpu.matmul %40, %37, %cst_33 {dimension_numbers = #tpu.dot_dimension_numbers<[1], [0], [0], [1], [0, 0, 1, 1], [], []>} : vector<64x16xf32>, vector<16x8xf32>, vector<64x8xf32> -> vector<64x8xf32>
    %c0_34 = arith.constant 0 : index
    %c0_35 = arith.constant 0 : index
    %c0_36 = arith.constant 0 : index
    %42 = vector.load %arg9[%c0_34, %c0_35, %c0_36] : memref<3x8x8xf32, #tpu.memory_space<vmem>>, vector<1x8x8xf32>
    %43 = vector.shape_cast %42 : vector<1x8x8xf32> to vector<8x8xf32>
    %cst_37 = arith.constant dense<0.000000e+00> : vector<64x8xf32>
    %44 = tpu.matmul %41, %43, %cst_37 {dimension_numbers = #tpu.dot_dimension_numbers<[1], [0], [0], [1], [0, 0, 1, 1], [], []>} : vector<64x8xf32>, vector<8x8xf32>, vector<64x8xf32> -> vector<64x8xf32>
    %c1 = arith.constant 1 : index
    %c0_38 = arith.constant 0 : index
    %c0_39 = arith.constant 0 : index
    %45 = vector.load %arg8[%c1, %c0_38, %c0_39] : memref<3x64x16xf32, #tpu.memory_space<vmem>>, vector<1x64x16xf32>
    %46 = vector.shape_cast %45 : vector<1x64x16xf32> to vector<64x16xf32>
    %cst_40 = arith.constant dense<0.000000e+00> : vector<64x8xf32>
    %47 = tpu.matmul %46, %37, %cst_40 {dimension_numbers = #tpu.dot_dimension_numbers<[1], [0], [0], [1], [0, 0, 1, 1], [], []>} : vector<64x16xf32>, vector<16x8xf32>, vector<64x8xf32> -> vector<64x8xf32>
    %c1_41 = arith.constant 1 : index
    %c0_42 = arith.constant 0 : index
    %c0_43 = arith.constant 0 : index
    %48 = vector.load %arg9[%c1_41, %c0_42, %c0_43] : memref<3x8x8xf32, #tpu.memory_space<vmem>>, vector<1x8x8xf32>
    %49 = vector.shape_cast %48 : vector<1x8x8xf32> to vector<8x8xf32>
    %cst_44 = arith.constant dense<0.000000e+00> : vector<64x8xf32>
    %50 = tpu.matmul %47, %49, %cst_44 {dimension_numbers = #tpu.dot_dimension_numbers<[1], [0], [0], [1], [0, 0, 1, 1], [], []>} : vector<64x8xf32>, vector<8x8xf32>, vector<64x8xf32> -> vector<64x8xf32>
    %51 = arith.addf %44, %50 : vector<64x8xf32>
    %c2 = arith.constant 2 : index
    %c0_45 = arith.constant 0 : index
    %c0_46 = arith.constant 0 : index
    %52 = vector.load %arg8[%c2, %c0_45, %c0_46] : memref<3x64x16xf32, #tpu.memory_space<vmem>>, vector<1x64x16xf32>
    %53 = vector.shape_cast %52 : vector<1x64x16xf32> to vector<64x16xf32>
    %cst_47 = arith.constant dense<0.000000e+00> : vector<64x8xf32>
    %54 = tpu.matmul %53, %37, %cst_47 {dimension_numbers = #tpu.dot_dimension_numbers<[1], [0], [0], [1], [0, 0, 1, 1], [], []>} : vector<64x16xf32>, vector<16x8xf32>, vector<64x8xf32> -> vector<64x8xf32>
    %c2_48 = arith.constant 2 : index
    %c0_49 = arith.constant 0 : index
    %c0_50 = arith.constant 0 : index
    %55 = vector.load %arg9[%c2_48, %c0_49, %c0_50] : memref<3x8x8xf32, #tpu.memory_space<vmem>>, vector<1x8x8xf32>
    %56 = vector.shape_cast %55 : vector<1x8x8xf32> to vector<8x8xf32>
    %cst_51 = arith.constant dense<0.000000e+00> : vector<64x8xf32>
    %57 = tpu.matmul %54, %56, %cst_51 {dimension_numbers = #tpu.dot_dimension_numbers<[1], [0], [0], [1], [0, 0, 1, 1], [], []>} : vector<64x8xf32>, vector<8x8xf32>, vector<64x8xf32> -> vector<64x8xf32>
    %58 = arith.addf %51, %57 : vector<64x8xf32>
    %59 = vector.broadcast %32 : vector<64x1xf32> to vector<64x8xf32>
    %60 = arith.addf %58, %59 : vector<64x8xf32>
    %cst_52 = arith.constant 2.000000e-01 : f32
    %61 = vector.broadcast %cst_52 : f32 to vector<64x8xf32>
    %62 = arith.mulf %61, %60 : vector<64x8xf32>
    %63 = arith.maximumf %60, %62 : vector<64x8xf32>
    %c0_53 = arith.constant 0 : index
    %c0_54 = arith.constant 0 : index
    %c0_55 = arith.constant 0 : index
    %64 = vector.load %arg11[%c0_53, %c0_54, %c0_55] : memref<3x64x64xf32, #tpu.memory_space<vmem>>, vector<1x64x64xf32>
    %65 = vector.shape_cast %64 : vector<1x64x64xf32> to vector<64x64xf32>
    %cst_56 = arith.constant dense<0.000000e+00> : vector<64x8xf32>
    %66 = tpu.matmul %65, %63, %cst_56 {dimension_numbers = #tpu.dot_dimension_numbers<[1], [0], [0], [1], [0, 0, 1, 1], [], []>} : vector<64x64xf32>, vector<64x8xf32>, vector<64x8xf32> -> vector<64x8xf32>
    %c0_57 = arith.constant 0 : index
    %c0_58 = arith.constant 0 : index
    %c0_59 = arith.constant 0 : index
    %67 = vector.load %arg9[%c0_57, %c0_58, %c0_59] : memref<3x8x8xf32, #tpu.memory_space<vmem>>, vector<1x8x8xf32>
    %68 = vector.shape_cast %67 : vector<1x8x8xf32> to vector<8x8xf32>
    %cst_60 = arith.constant dense<0.000000e+00> : vector<64x8xf32>
    %69 = tpu.matmul %66, %68, %cst_60 {dimension_numbers = #tpu.dot_dimension_numbers<[1], [0], [0], [1], [0, 0, 1, 1], [], []>} : vector<64x8xf32>, vector<8x8xf32>, vector<64x8xf32> -> vector<64x8xf32>
    %c1_61 = arith.constant 1 : index
    %c0_62 = arith.constant 0 : index
    %c0_63 = arith.constant 0 : index
    %70 = vector.load %arg11[%c1_61, %c0_62, %c0_63] : memref<3x64x64xf32, #tpu.memory_space<vmem>>, vector<1x64x64xf32>
    %71 = vector.shape_cast %70 : vector<1x64x64xf32> to vector<64x64xf32>
    %cst_64 = arith.constant dense<0.000000e+00> : vector<64x8xf32>
    %72 = tpu.matmul %71, %63, %cst_64 {dimension_numbers = #tpu.dot_dimension_numbers<[1], [0], [0], [1], [0, 0, 1, 1], [], []>} : vector<64x64xf32>, vector<64x8xf32>, vector<64x8xf32> -> vector<64x8xf32>
    %c1_65 = arith.constant 1 : index
    %c0_66 = arith.constant 0 : index
    %c0_67 = arith.constant 0 : index
    %73 = vector.load %arg9[%c1_65, %c0_66, %c0_67] : memref<3x8x8xf32, #tpu.memory_space<vmem>>, vector<1x8x8xf32>
    %74 = vector.shape_cast %73 : vector<1x8x8xf32> to vector<8x8xf32>
    %cst_68 = arith.constant dense<0.000000e+00> : vector<64x8xf32>
    %75 = tpu.matmul %72, %74, %cst_68 {dimension_numbers = #tpu.dot_dimension_numbers<[1], [0], [0], [1], [0, 0, 1, 1], [], []>} : vector<64x8xf32>, vector<8x8xf32>, vector<64x8xf32> -> vector<64x8xf32>
    %76 = arith.addf %69, %75 : vector<64x8xf32>
    %c2_69 = arith.constant 2 : index
    %c0_70 = arith.constant 0 : index
    %c0_71 = arith.constant 0 : index
    %77 = vector.load %arg11[%c2_69, %c0_70, %c0_71] : memref<3x64x64xf32, #tpu.memory_space<vmem>>, vector<1x64x64xf32>
    %78 = vector.shape_cast %77 : vector<1x64x64xf32> to vector<64x64xf32>
    %cst_72 = arith.constant dense<0.000000e+00> : vector<64x8xf32>
    %79 = tpu.matmul %78, %63, %cst_72 {dimension_numbers = #tpu.dot_dimension_numbers<[1], [0], [0], [1], [0, 0, 1, 1], [], []>} : vector<64x64xf32>, vector<64x8xf32>, vector<64x8xf32> -> vector<64x8xf32>
    %c2_73 = arith.constant 2 : index
    %c0_74 = arith.constant 0 : index
    %c0_75 = arith.constant 0 : index
    %80 = vector.load %arg9[%c2_73, %c0_74, %c0_75] : memref<3x8x8xf32, #tpu.memory_space<vmem>>, vector<1x8x8xf32>
    %81 = vector.shape_cast %80 : vector<1x8x8xf32> to vector<8x8xf32>
    %cst_76 = arith.constant dense<0.000000e+00> : vector<64x8xf32>
    %82 = tpu.matmul %79, %81, %cst_76 {dimension_numbers = #tpu.dot_dimension_numbers<[1], [0], [0], [1], [0, 0, 1, 1], [], []>} : vector<64x8xf32>, vector<8x8xf32>, vector<64x8xf32> -> vector<64x8xf32>
    %83 = arith.addf %76, %82 : vector<64x8xf32>
    %84 = vector.broadcast %33 : vector<64x1xf32> to vector<64x8xf32>
    %85 = arith.addf %83, %84 : vector<64x8xf32>
    %86 = arith.addf %85, %38 : vector<64x8xf32>
    %cst_77 = arith.constant 2.000000e-01 : f32
    %87 = vector.broadcast %cst_77 : f32 to vector<64x8xf32>
    %88 = arith.mulf %87, %86 : vector<64x8xf32>
    %89 = arith.maximumf %86, %88 : vector<64x8xf32>
    %c0_78 = arith.constant 0 : index
    %c0_79 = arith.constant 0 : index
    %90 = vector.load %arg13[%c0_78, %c0_79] : memref<64x8xf32, #tpu.memory_space<vmem>>, vector<64x8xf32>
    tpu.vector_store %arg13[%c0_78, %c0_79], %89 {strides = array<i32>} : memref<64x8xf32, #tpu.memory_space<vmem>>, vector<64x8xf32>,
    return
  }
}

module attributes {stable_mosaic.version = 11 : i64} {
  func.func @kernel(%arg0: memref<64x8xf32, #tpu.memory_space<vmem>>, %arg1: memref<64x64xf32, #tpu.memory_space<vmem>>, %arg2: memref<64x1xf32, #tpu.memory_space<vmem>>, %arg3: memref<64x1xf32, #tpu.memory_space<vmem>>, %arg4: memref<128x64xf32, #tpu.memory_space<vmem>>, %arg5: memref<8x17xf32, #tpu.memory_space<vmem>>, %arg6: memref<128x1xf32, #tpu.memory_space<vmem>>, %arg7: memref<256x128xf32, #tpu.memory_space<vmem>>, %arg8: memref<3x256x128xf32, #tpu.memory_space<vmem>>, %arg9: memref<3x17x17xf32, #tpu.memory_space<vmem>>, %arg10: memref<256x1xf32, #tpu.memory_space<vmem>>, %arg11: memref<3x256x256xf32, #tpu.memory_space<vmem>>, %arg12: memref<256x1xf32, #tpu.memory_space<vmem>>, %arg13: memref<256x17xf32, #tpu.memory_space<vmem>>) attributes {dimension_semantics = [], scalar_prefetch = 0 : i64, scratch_operands = 0 : i64, tpu.core_type = #tpu.core_type<tc>} {
    %c0 = arith.constant 0 : index
    %c0_0 = arith.constant 0 : index
    %0 = vector.load %arg0[%c0, %c0_0] : memref<64x8xf32, #tpu.memory_space<vmem>>, vector<64x8xf32>
    %cst = arith.constant dense<0.000000e+00> : vector<64xf32>
    %1 = vector.multi_reduction <add>, %0, %cst [1] : vector<64x8xf32> to vector<64xf32>
    %2 = vector.shape_cast %1 : vector<64xf32> to vector<64x1xf32>
    %3 = arith.mulf %0, %0 : vector<64x8xf32>
    %cst_1 = arith.constant dense<0.000000e+00> : vector<64xf32>
    %4 = vector.multi_reduction <add>, %3, %cst_1 [1] : vector<64x8xf32> to vector<64xf32>
    %5 = vector.shape_cast %4 : vector<64xf32> to vector<64x1xf32>
    %c0_2 = arith.constant 0 : index
    %c0_3 = arith.constant 0 : index
    %6 = vector.load %arg1[%c0_2, %c0_3] : memref<64x64xf32, #tpu.memory_space<vmem>>, vector<64x64xf32>
    %cst_4 = arith.constant dense<0.000000e+00> : vector<64x1xf32>
    %7 = tpu.matmul %6, %2, %cst_4 {dimension_numbers = #tpu.dot_dimension_numbers<[1], [0], [0], [1], [0, 0, 1, 1], [], []>} : vector<64x64xf32>, vector<64x1xf32>, vector<64x1xf32> -> vector<64x1xf32>
    %cst_5 = arith.constant 7.812500e-03 : f32
    %8 = vector.broadcast %cst_5 : f32 to vector<64x1xf32>
    %9 = arith.mulf %7, %8 : vector<64x1xf32>
    %c0_6 = arith.constant 0 : index
    %c0_7 = arith.constant 0 : index
    %10 = vector.load %arg1[%c0_6, %c0_7] : memref<64x64xf32, #tpu.memory_space<vmem>>, vector<64x64xf32>
    %cst_8 = arith.constant dense<0.000000e+00> : vector<64x1xf32>
    %11 = tpu.matmul %10, %5, %cst_8 {dimension_numbers = #tpu.dot_dimension_numbers<[1], [0], [0], [1], [0, 0, 1, 1], [], []>} : vector<64x64xf32>, vector<64x1xf32>, vector<64x1xf32> -> vector<64x1xf32>
    %cst_9 = arith.constant 7.812500e-03 : f32
    %12 = vector.broadcast %cst_9 : f32 to vector<64x1xf32>
    %13 = arith.mulf %11, %12 : vector<64x1xf32>
    %14 = arith.mulf %9, %9 : vector<64x1xf32>
    %15 = arith.subf %13, %14 : vector<64x1xf32>
    %cst_10 = arith.constant 9.99999974E-6 : f32
    %16 = vector.broadcast %cst_10 : f32 to vector<64x1xf32>
    %17 = arith.addf %15, %16 : vector<64x1xf32>
    %18 = math.rsqrt %17 : vector<64x1xf32>
    %c0_11 = arith.constant 0 : index
    %c0_12 = arith.constant 0 : index
    %19 = vector.load %arg2[%c0_11, %c0_12] : memref<64x1xf32, #tpu.memory_space<vmem>>, vector<64x1xf32>
    %20 = arith.mulf %18, %19 : vector<64x1xf32>
    %21 = vector.broadcast %20 : vector<64x1xf32> to vector<64x8xf32>
    %22 = arith.mulf %0, %21 : vector<64x8xf32>
    %c0_13 = arith.constant 0 : index
    %c0_14 = arith.constant 0 : index
    %23 = vector.load %arg3[%c0_13, %c0_14] : memref<64x1xf32, #tpu.memory_space<vmem>>, vector<64x1xf32>
    %24 = arith.mulf %9, %20 : vector<64x1xf32>
    %25 = arith.subf %23, %24 : vector<64x1xf32>
    %26 = vector.broadcast %25 : vector<64x1xf32> to vector<64x8xf32>
    %27 = arith.addf %22, %26 : vector<64x8xf32>
    %c0_15 = arith.constant 0 : index
    %c0_16 = arith.constant 0 : index
    %28 = vector.load %arg4[%c0_15, %c0_16] : memref<128x64xf32, #tpu.memory_space<vmem>>, vector<128x64xf32>
    %c0_17 = arith.constant 0 : index
    %c0_18 = arith.constant 0 : index
    %29 = vector.load %arg5[%c0_17, %c0_18] : memref<8x17xf32, #tpu.memory_space<vmem>>, vector<8x17xf32>
    %c0_19 = arith.constant 0 : index
    %c0_20 = arith.constant 0 : index
    %30 = vector.load %arg6[%c0_19, %c0_20] : memref<128x1xf32, #tpu.memory_space<vmem>>, vector<128x1xf32>
    %c0_21 = arith.constant 0 : index
    %c0_22 = arith.constant 0 : index
    %31 = vector.load %arg7[%c0_21, %c0_22] : memref<256x128xf32, #tpu.memory_space<vmem>>, vector<256x128xf32>
    %c0_23 = arith.constant 0 : index
    %c0_24 = arith.constant 0 : index
    %32 = vector.load %arg10[%c0_23, %c0_24] : memref<256x1xf32, #tpu.memory_space<vmem>>, vector<256x1xf32>
    %c0_25 = arith.constant 0 : index
    %c0_26 = arith.constant 0 : index
    %33 = vector.load %arg12[%c0_25, %c0_26] : memref<256x1xf32, #tpu.memory_space<vmem>>, vector<256x1xf32>
    %cst_27 = arith.constant dense<0.000000e+00> : vector<128x8xf32>
    %34 = tpu.matmul %28, %27, %cst_27 {dimension_numbers = #tpu.dot_dimension_numbers<[1], [0], [0], [1], [0, 0, 1, 1], [], []>} : vector<128x64xf32>, vector<64x8xf32>, vector<128x8xf32> -> vector<128x8xf32>
    %cst_28 = arith.constant dense<0.000000e+00> : vector<128x17xf32>
    %35 = tpu.matmul %34, %29, %cst_28 {dimension_numbers = #tpu.dot_dimension_numbers<[1], [0], [0], [1], [0, 0, 1, 1], [], []>} : vector<128x8xf32>, vector<8x17xf32>, vector<128x17xf32> -> vector<128x17xf32>
    %36 = vector.broadcast %30 : vector<128x1xf32> to vector<128x17xf32>
    %37 = arith.addf %35, %36 : vector<128x17xf32>
    %cst_29 = arith.constant dense<0.000000e+00> : vector<256x17xf32>
    %38 = tpu.matmul %31, %37, %cst_29 {dimension_numbers = #tpu.dot_dimension_numbers<[1], [0], [0], [1], [0, 0, 1, 1], [], []>} : vector<256x128xf32>, vector<128x17xf32>, vector<256x17xf32> -> vector<256x17xf32>
    %c0_30 = arith.constant 0 : index
    %c0_31 = arith.constant 0 : index
    %c0_32 = arith.constant 0 : index
    %39 = vector.load %arg8[%c0_30, %c0_31, %c0_32] : memref<3x256x128xf32, #tpu.memory_space<vmem>>, vector<1x256x128xf32>
    %40 = vector.shape_cast %39 : vector<1x256x128xf32> to vector<256x128xf32>
    %cst_33 = arith.constant dense<0.000000e+00> : vector<256x17xf32>
    %41 = tpu.matmul %40, %37, %cst_33 {dimension_numbers = #tpu.dot_dimension_numbers<[1], [0], [0], [1], [0, 0, 1, 1], [], []>} : vector<256x128xf32>, vector<128x17xf32>, vector<256x17xf32> -> vector<256x17xf32>
    %c0_34 = arith.constant 0 : index
    %c0_35 = arith.constant 0 : index
    %c0_36 = arith.constant 0 : index
    %42 = vector.load %arg9[%c0_34, %c0_35, %c0_36] : memref<3x17x17xf32, #tpu.memory_space<vmem>>, vector<1x17x17xf32>
    %43 = vector.shape_cast %42 : vector<1x17x17xf32> to vector<17x17xf32>
    %cst_37 = arith.constant dense<0.000000e+00> : vector<256x17xf32>
    %44 = tpu.matmul %41, %43, %cst_37 {dimension_numbers = #tpu.dot_dimension_numbers<[1], [0], [0], [1], [0, 0, 1, 1], [], []>} : vector<256x17xf32>, vector<17x17xf32>, vector<256x17xf32> -> vector<256x17xf32>
    %c1 = arith.constant 1 : index
    %c0_38 = arith.constant 0 : index
    %c0_39 = arith.constant 0 : index
    %45 = vector.load %arg8[%c1, %c0_38, %c0_39] : memref<3x256x128xf32, #tpu.memory_space<vmem>>, vector<1x256x128xf32>
    %46 = vector.shape_cast %45 : vector<1x256x128xf32> to vector<256x128xf32>
    %cst_40 = arith.constant dense<0.000000e+00> : vector<256x17xf32>
    %47 = tpu.matmul %46, %37, %cst_40 {dimension_numbers = #tpu.dot_dimension_numbers<[1], [0], [0], [1], [0, 0, 1, 1], [], []>} : vector<256x128xf32>, vector<128x17xf32>, vector<256x17xf32> -> vector<256x17xf32>
    %c1_41 = arith.constant 1 : index
    %c0_42 = arith.constant 0 : index
    %c0_43 = arith.constant 0 : index
    %48 = vector.load %arg9[%c1_41, %c0_42, %c0_43] : memref<3x17x17xf32, #tpu.memory_space<vmem>>, vector<1x17x17xf32>
    %49 = vector.shape_cast %48 : vector<1x17x17xf32> to vector<17x17xf32>
    %cst_44 = arith.constant dense<0.000000e+00> : vector<256x17xf32>
    %50 = tpu.matmul %47, %49, %cst_44 {dimension_numbers = #tpu.dot_dimension_numbers<[1], [0], [0], [1], [0, 0, 1, 1], [], []>} : vector<256x17xf32>, vector<17x17xf32>, vector<256x17xf32> -> vector<256x17xf32>
    %51 = arith.addf %44, %50 : vector<256x17xf32>
    %c2 = arith.constant 2 : index
    %c0_45 = arith.constant 0 : index
    %c0_46 = arith.constant 0 : index
    %52 = vector.load %arg8[%c2, %c0_45, %c0_46] : memref<3x256x128xf32, #tpu.memory_space<vmem>>, vector<1x256x128xf32>
    %53 = vector.shape_cast %52 : vector<1x256x128xf32> to vector<256x128xf32>
    %cst_47 = arith.constant dense<0.000000e+00> : vector<256x17xf32>
    %54 = tpu.matmul %53, %37, %cst_47 {dimension_numbers = #tpu.dot_dimension_numbers<[1], [0], [0], [1], [0, 0, 1, 1], [], []>} : vector<256x128xf32>, vector<128x17xf32>, vector<256x17xf32> -> vector<256x17xf32>
    %c2_48 = arith.constant 2 : index
    %c0_49 = arith.constant 0 : index
    %c0_50 = arith.constant 0 : index
    %55 = vector.load %arg9[%c2_48, %c0_49, %c0_50] : memref<3x17x17xf32, #tpu.memory_space<vmem>>, vector<1x17x17xf32>
    %56 = vector.shape_cast %55 : vector<1x17x17xf32> to vector<17x17xf32>
    %cst_51 = arith.constant dense<0.000000e+00> : vector<256x17xf32>
    %57 = tpu.matmul %54, %56, %cst_51 {dimension_numbers = #tpu.dot_dimension_numbers<[1], [0], [0], [1], [0, 0, 1, 1], [], []>} : vector<256x17xf32>, vector<17x17xf32>, vector<256x17xf32> -> vector<256x17xf32>
    %58 = arith.addf %51, %57 : vector<256x17xf32>
    %59 = vector.broadcast %32 : vector<256x1xf32> to vector<256x17xf32>
    %60 = arith.addf %58, %59 : vector<256x17xf32>
    %cst_52 = arith.constant 2.000000e-01 : f32
    %61 = vector.broadcast %cst_52 : f32 to vector<256x17xf32>
    %62 = arith.mulf %61, %60 : vector<256x17xf32>
    %63 = arith.maximumf %60, %62 : vector<256x17xf32>
    %c0_53 = arith.constant 0 : index
    %c0_54 = arith.constant 0 : index
    %c0_55 = arith.constant 0 : index
    %64 = vector.load %arg11[%c0_53, %c0_54, %c0_55] : memref<3x256x256xf32, #tpu.memory_space<vmem>>, vector<1x256x256xf32>
    %65 = vector.shape_cast %64 : vector<1x256x256xf32> to vector<256x256xf32>
    %cst_56 = arith.constant dense<0.000000e+00> : vector<256x17xf32>
    %66 = tpu.matmul %65, %63, %cst_56 {dimension_numbers = #tpu.dot_dimension_numbers<[1], [0], [0], [1], [0, 0, 1, 1], [], []>} : vector<256x256xf32>, vector<256x17xf32>, vector<256x17xf32> -> vector<256x17xf32>
    %c0_57 = arith.constant 0 : index
    %c0_58 = arith.constant 0 : index
    %c0_59 = arith.constant 0 : index
    %67 = vector.load %arg9[%c0_57, %c0_58, %c0_59] : memref<3x17x17xf32, #tpu.memory_space<vmem>>, vector<1x17x17xf32>
    %68 = vector.shape_cast %67 : vector<1x17x17xf32> to vector<17x17xf32>
    %cst_60 = arith.constant dense<0.000000e+00> : vector<256x17xf32>
    %69 = tpu.matmul %66, %68, %cst_60 {dimension_numbers = #tpu.dot_dimension_numbers<[1], [0], [0], [1], [0, 0, 1, 1], [], []>} : vector<256x17xf32>, vector<17x17xf32>, vector<256x17xf32> -> vector<256x17xf32>
    %c1_61 = arith.constant 1 : index
    %c0_62 = arith.constant 0 : index
    %c0_63 = arith.constant 0 : index
    %70 = vector.load %arg11[%c1_61, %c0_62, %c0_63] : memref<3x256x256xf32, #tpu.memory_space<vmem>>, vector<1x256x256xf32>
    %71 = vector.shape_cast %70 : vector<1x256x256xf32> to vector<256x256xf32>
    %cst_64 = arith.constant dense<0.000000e+00> : vector<256x17xf32>
    %72 = tpu.matmul %71, %63, %cst_64 {dimension_numbers = #tpu.dot_dimension_numbers<[1], [0], [0], [1], [0, 0, 1, 1], [], []>} : vector<256x256xf32>, vector<256x17xf32>, vector<256x17xf32> -> vector<256x17xf32>
    %c1_65 = arith.constant 1 : index
    %c0_66 = arith.constant 0 : index
    %c0_67 = arith.constant 0 : index
    %73 = vector.load %arg9[%c1_65, %c0_66, %c0_67] : memref<3x17x17xf32, #tpu.memory_space<vmem>>, vector<1x17x17xf32>
    %74 = vector.shape_cast %73 : vector<1x17x17xf32> to vector<17x17xf32>
    %cst_68 = arith.constant dense<0.000000e+00> : vector<256x17xf32>
    %75 = tpu.matmul %72, %74, %cst_68 {dimension_numbers = #tpu.dot_dimension_numbers<[1], [0], [0], [1], [0, 0, 1, 1], [], []>} : vector<256x17xf32>, vector<17x17xf32>, vector<256x17xf32> -> vector<256x17xf32>
    %76 = arith.addf %69, %75 : vector<256x17xf32>
    %c2_69 = arith.constant 2 : index
    %c0_70 = arith.constant 0 : index
    %c0_71 = arith.constant 0 : index
    %77 = vector.load %arg11[%c2_69, %c0_70, %c0_71] : memref<3x256x256xf32, #tpu.memory_space<vmem>>, vector<1x256x256xf32>
    %78 = vector.shape_cast %77 : vector<1x256x256xf32> to vector<256x256xf32>
    %cst_72 = arith.constant dense<0.000000e+00> : vector<256x17xf32>
    %79 = tpu.matmul %78, %63, %cst_72 {dimension_numbers = #tpu.dot_dimension_numbers<[1], [0], [0], [1], [0, 0, 1, 1], [], []>} : vector<256x256xf32>, vector<256x17xf32>, vector<256x17xf32> -> vector<256x17xf32>
    %c2_73 = arith.constant 2 : index
    %c0_74 = arith.constant 0 : index
    %c0_75 = arith.constant 0 : index
    %80 = vector.load %arg9[%c2_73, %c0_74, %c0_75] : memref<3x17x17xf32, #tpu.memory_space<vmem>>, vector<1x17x17xf32>
    %81 = vector.shape_cast %80 : vector<1x17x17xf32> to vector<17x17xf32>
    %cst_76 = arith.constant dense<0.000000e+00> : vector<256x17xf32>
    %82 = tpu.matmul %79, %81, %cst_76 {dimension_numbers = #tpu.dot_dimension_numbers<[1], [0], [0], [1], [0, 0, 1, 1], [], []>} : vector<256x17xf32>, vector<17x17xf32>, vector<256x17xf32> -> vector<256x17xf32>
    %83 = arith.addf %76, %82 : vector<256x17xf32>
    %84 = vector.broadcast %33 : vector<256x1xf32> to vector<256x17xf32>
    %85 = arith.addf %83, %84 : vector<256x17xf32>
    %86 = arith.addf %85, %38 : vector<256x17xf32>
    %cst_77 = arith.constant 2.000000e-01 : f32
    %87 = vector.broadcast %cst_77 : f32 to vector<256x17xf32>
    %88 = arith.mulf %87, %86 : vector<256x17xf32>
    %89 = arith.maximumf %86, %88 : vector<256x17xf32>
    %c0_78 = arith.constant 0 : index
    %c0_79 = arith.constant 0 : index
    %90 = vector.load %arg13[%c0_78, %c0_79] : memref<256x17xf32, #tpu.memory_space<vmem>>, vector<256x17xf32>
    tpu.vector_store %arg13[%c0_78, %c0_79], %89 {strides = array<i32>} : memref<256x17xf32, #tpu.memory_space<vmem>>, vector<256x17xf32>,
    return
  }
}

module attributes {stable_mosaic.version = 11 : i64} {
  func.func @kernel(%arg0: memref<8x64xf32, #tpu.memory_space<vmem>>, %arg1: memref<2x8xf32, #tpu.memory_space<vmem>>, %arg2: memref<2x8xf32, #tpu.memory_space<vmem>>, %arg3: memref<64x64xf32, #tpu.memory_space<vmem>>, %arg4: memref<64x64xf32, #tpu.memory_space<vmem>>, %arg5: memref<2x64xf32, #tpu.memory_space<vmem>>) attributes {dimension_semantics = [], scalar_prefetch = 0 : i64, scratch_operands = 0 : i64, tpu.core_type = #tpu.core_type<tc>} {
    %c0 = arith.constant 0 : index
    %c0_0 = arith.constant 0 : index
    %0 = vector.load %arg0[%c0, %c0_0] : memref<8x64xf32, #tpu.memory_space<vmem>>, vector<8x64xf32>
    %c0_1 = arith.constant 0 : index
    %c0_2 = arith.constant 0 : index
    %1 = vector.load %arg1[%c0_1, %c0_2] : memref<2x8xf32, #tpu.memory_space<vmem>>, vector<2x8xf32>
    %c0_3 = arith.constant 0 : index
    %c0_4 = arith.constant 0 : index
    %2 = vector.load %arg2[%c0_3, %c0_4] : memref<2x8xf32, #tpu.memory_space<vmem>>, vector<2x8xf32>
    %c0_5 = arith.constant 0 : index
    %c0_6 = arith.constant 0 : index
    %3 = vector.load %arg3[%c0_5, %c0_6] : memref<64x64xf32, #tpu.memory_space<vmem>>, vector<64x64xf32>
    %c0_7 = arith.constant 0 : index
    %c0_8 = arith.constant 0 : index
    %4 = vector.load %arg4[%c0_7, %c0_8] : memref<64x64xf32, #tpu.memory_space<vmem>>, vector<64x64xf32>
    %cst = arith.constant dense<0.000000e+00> : vector<2x64xf32>
    %5 = tpu.matmul %1, %0, %cst {dimension_numbers = #tpu.dot_dimension_numbers<[1], [0], [0], [1], [0, 0, 1, 1], [], []>} : vector<2x8xf32>, vector<8x64xf32>, vector<2x64xf32> -> vector<2x64xf32>
    %cst_9 = arith.constant 0.0106469812 : f32
    %6 = vector.broadcast %cst_9 : f32 to vector<2x64xf32>
    %7 = arith.addf %5, %6 : vector<2x64xf32>
    %8 = math.exp %7 : vector<2x64xf32>
    %cst_10 = arith.constant dense<0.000000e+00> : vector<2x64xf32>
    %9 = tpu.matmul %2, %0, %cst_10 {dimension_numbers = #tpu.dot_dimension_numbers<[1], [0], [0], [1], [0, 0, 1, 1], [], []>} : vector<2x8xf32>, vector<8x64xf32>, vector<2x64xf32> -> vector<2x64xf32>
    %cst_11 = arith.constant -3.497150e-04 : f32
    %10 = vector.broadcast %cst_11 : f32 to vector<2x64xf32>
    %11 = arith.addf %9, %10 : vector<2x64xf32>
    %12 = math.sin %11 : vector<2x64xf32>
    %13 = math.cos %12 : vector<2x64xf32>
    %14 = arith.mulf %8, %13 : vector<2x64xf32>
    %15 = math.sin %12 : vector<2x64xf32>
    %16 = arith.mulf %8, %15 : vector<2x64xf32>
    %cst_12 = arith.constant dense<0.000000e+00> : vector<2x64xf32>
    %17 = tpu.matmul %14, %3, %cst_12 {dimension_numbers = #tpu.dot_dimension_numbers<[1], [0], [0], [1], [0, 0, 1, 1], [], []>} : vector<2x64xf32>, vector<64x64xf32>, vector<2x64xf32> -> vector<2x64xf32>
    %cst_13 = arith.constant dense<0.000000e+00> : vector<2x64xf32>
    %18 = tpu.matmul %16, %4, %cst_13 {dimension_numbers = #tpu.dot_dimension_numbers<[1], [0], [0], [1], [0, 0, 1, 1], [], []>} : vector<2x64xf32>, vector<64x64xf32>, vector<2x64xf32> -> vector<2x64xf32>
    %19 = arith.addf %17, %18 : vector<2x64xf32>
    %c0_14 = arith.constant 0 : index
    %c0_15 = arith.constant 0 : index
    %20 = vector.load %arg5[%c0_14, %c0_15] : memref<2x64xf32, #tpu.memory_space<vmem>>, vector<2x64xf32>
    tpu.vector_store %arg5[%c0_14, %c0_15], %19 {strides = array<i32>} : memref<2x64xf32, #tpu.memory_space<vmem>>, vector<2x64xf32>,
    return
  }
}

module attributes {stable_mosaic.version = 11 : i64} {
  func.func @kernel(%arg0: memref<16x272xf32, #tpu.memory_space<vmem>>, %arg1: memref<2x16xf32, #tpu.memory_space<vmem>>, %arg2: memref<2x16xf32, #tpu.memory_space<vmem>>, %arg3: memref<272x64xf32, #tpu.memory_space<vmem>>, %arg4: memref<272x64xf32, #tpu.memory_space<vmem>>, %arg5: memref<2x64xf32, #tpu.memory_space<vmem>>, %arg6: memref<2x64xf32, #tpu.memory_space<vmem>>) attributes {dimension_semantics = [], scalar_prefetch = 0 : i64, scratch_operands = 0 : i64, tpu.core_type = #tpu.core_type<tc>} {
    %c0 = arith.constant 0 : index
    %c0_0 = arith.constant 0 : index
    %0 = vector.load %arg5[%c0, %c0_0] : memref<2x64xf32, #tpu.memory_space<vmem>>, vector<2x64xf32>
    %c0_1 = arith.constant 0 : index
    %c0_2 = arith.constant 0 : index
    %1 = vector.load %arg0[%c0_1, %c0_2] : memref<16x272xf32, #tpu.memory_space<vmem>>, vector<16x272xf32>
    %c0_3 = arith.constant 0 : index
    %c0_4 = arith.constant 0 : index
    %2 = vector.load %arg1[%c0_3, %c0_4] : memref<2x16xf32, #tpu.memory_space<vmem>>, vector<2x16xf32>
    %c0_5 = arith.constant 0 : index
    %c0_6 = arith.constant 0 : index
    %3 = vector.load %arg2[%c0_5, %c0_6] : memref<2x16xf32, #tpu.memory_space<vmem>>, vector<2x16xf32>
    %c0_7 = arith.constant 0 : index
    %c0_8 = arith.constant 0 : index
    %4 = vector.load %arg3[%c0_7, %c0_8] : memref<272x64xf32, #tpu.memory_space<vmem>>, vector<272x64xf32>
    %c0_9 = arith.constant 0 : index
    %c0_10 = arith.constant 0 : index
    %5 = vector.load %arg4[%c0_9, %c0_10] : memref<272x64xf32, #tpu.memory_space<vmem>>, vector<272x64xf32>
    %cst = arith.constant dense<0.000000e+00> : vector<2x272xf32>
    %6 = tpu.matmul %2, %1, %cst {dimension_numbers = #tpu.dot_dimension_numbers<[1], [0], [0], [1], [0, 0, 1, 1], [], []>} : vector<2x16xf32>, vector<16x272xf32>, vector<2x272xf32> -> vector<2x272xf32>
    %cst_11 = arith.constant 0.00290176482 : f32
    %7 = vector.broadcast %cst_11 : f32 to vector<2x272xf32>
    %8 = arith.addf %6, %7 : vector<2x272xf32>
    %9 = math.exp %8 : vector<2x272xf32>
    %cst_12 = arith.constant dense<0.000000e+00> : vector<2x272xf32>
    %10 = tpu.matmul %3, %1, %cst_12 {dimension_numbers = #tpu.dot_dimension_numbers<[1], [0], [0], [1], [0, 0, 1, 1], [], []>} : vector<2x16xf32>, vector<16x272xf32>, vector<2x272xf32> -> vector<2x272xf32>
    %cst_13 = arith.constant -0.00422200048 : f32
    %11 = vector.broadcast %cst_13 : f32 to vector<2x272xf32>
    %12 = arith.addf %10, %11 : vector<2x272xf32>
    %13 = math.sin %12 : vector<2x272xf32>
    %14 = math.cos %13 : vector<2x272xf32>
    %15 = arith.mulf %9, %14 : vector<2x272xf32>
    %16 = math.sin %13 : vector<2x272xf32>
    %17 = arith.mulf %9, %16 : vector<2x272xf32>
    %cst_14 = arith.constant dense<0.000000e+00> : vector<2x64xf32>
    %18 = tpu.matmul %15, %4, %cst_14 {dimension_numbers = #tpu.dot_dimension_numbers<[1], [0], [0], [1], [0, 0, 1, 1], [], []>} : vector<2x272xf32>, vector<272x64xf32>, vector<2x64xf32> -> vector<2x64xf32>
    %cst_15 = arith.constant dense<0.000000e+00> : vector<2x64xf32>
    %19 = tpu.matmul %17, %5, %cst_15 {dimension_numbers = #tpu.dot_dimension_numbers<[1], [0], [0], [1], [0, 0, 1, 1], [], []>} : vector<2x272xf32>, vector<272x64xf32>, vector<2x64xf32> -> vector<2x64xf32>
    %20 = arith.addf %18, %19 : vector<2x64xf32>
    %21 = arith.addf %0, %20 : vector<2x64xf32>
    %c0_16 = arith.constant 0 : index
    %c0_17 = arith.constant 0 : index
    %22 = vector.load %arg6[%c0_16, %c0_17] : memref<2x64xf32, #tpu.memory_space<vmem>>, vector<2x64xf32>
    tpu.vector_store %arg6[%c0_16, %c0_17], %21 {strides = array<i32>} : memref<2x64xf32, #tpu.memory_space<vmem>>, vector<2x64xf32>,
    return
  }
}

module attributes {stable_mosaic.version = 11 : i64} {
  func.func @kernel(%arg0: memref<256x17xf32, #tpu.memory_space<vmem>>, %arg1: memref<64x256xf32, #tpu.memory_space<vmem>>, %arg2: memref<17x16xf32, #tpu.memory_space<vmem>>, %arg3: memref<64x1xf32, #tpu.memory_space<vmem>>, %arg4: memref<8x64xf32, #tpu.memory_space<vmem>>, %arg5: memref<3x8x64xf32, #tpu.memory_space<vmem>>, %arg6: memref<3x16x16xf32, #tpu.memory_space<vmem>>, %arg7: memref<8x1xf32, #tpu.memory_space<vmem>>, %arg8: memref<3x8x8xf32, #tpu.memory_space<vmem>>, %arg9: memref<8x1xf32, #tpu.memory_space<vmem>>, %arg10: memref<4x2x8xf32, #tpu.memory_space<vmem>>, %arg11: memref<4x16x64xf32, #tpu.memory_space<vmem>>, %arg12: memref<2x64xf32, #tpu.memory_space<vmem>>, %arg13: memref<2x64xf32, #tpu.memory_space<vmem>>) attributes {dimension_semantics = [], scalar_prefetch = 0 : i64, scratch_operands = 0 : i64, tpu.core_type = #tpu.core_type<tc>} {
    %c0 = arith.constant 0 : index
    %c0_0 = arith.constant 0 : index
    %0 = vector.load %arg0[%c0, %c0_0] : memref<256x17xf32, #tpu.memory_space<vmem>>, vector<256x17xf32>
    %c0_1 = arith.constant 0 : index
    %c0_2 = arith.constant 0 : index
    %1 = vector.load %arg1[%c0_1, %c0_2] : memref<64x256xf32, #tpu.memory_space<vmem>>, vector<64x256xf32>
    %c0_3 = arith.constant 0 : index
    %c0_4 = arith.constant 0 : index
    %2 = vector.load %arg2[%c0_3, %c0_4] : memref<17x16xf32, #tpu.memory_space<vmem>>, vector<17x16xf32>
    %c0_5 = arith.constant 0 : index
    %c0_6 = arith.constant 0 : index
    %3 = vector.load %arg3[%c0_5, %c0_6] : memref<64x1xf32, #tpu.memory_space<vmem>>, vector<64x1xf32>
    %c0_7 = arith.constant 0 : index
    %c0_8 = arith.constant 0 : index
    %4 = vector.load %arg4[%c0_7, %c0_8] : memref<8x64xf32, #tpu.memory_space<vmem>>, vector<8x64xf32>
    %c0_9 = arith.constant 0 : index
    %c0_10 = arith.constant 0 : index
    %5 = vector.load %arg7[%c0_9, %c0_10] : memref<8x1xf32, #tpu.memory_space<vmem>>, vector<8x1xf32>
    %c0_11 = arith.constant 0 : index
    %c0_12 = arith.constant 0 : index
    %6 = vector.load %arg9[%c0_11, %c0_12] : memref<8x1xf32, #tpu.memory_space<vmem>>, vector<8x1xf32>
    %cst = arith.constant dense<0.000000e+00> : vector<64x17xf32>
    %7 = tpu.matmul %1, %0, %cst {dimension_numbers = #tpu.dot_dimension_numbers<[1], [0], [0], [1], [0, 0, 1, 1], [], []>} : vector<64x256xf32>, vector<256x17xf32>, vector<64x17xf32> -> vector<64x17xf32>
    %cst_13 = arith.constant dense<0.000000e+00> : vector<64x16xf32>
    %8 = tpu.matmul %7, %2, %cst_13 {dimension_numbers = #tpu.dot_dimension_numbers<[1], [0], [0], [1], [0, 0, 1, 1], [], []>} : vector<64x17xf32>, vector<17x16xf32>, vector<64x16xf32> -> vector<64x16xf32>
    %9 = vector.broadcast %3 : vector<64x1xf32> to vector<64x16xf32>
    %10 = arith.addf %8, %9 : vector<64x16xf32>
    %cst_14 = arith.constant dense<0.000000e+00> : vector<8x16xf32>
    %11 = tpu.matmul %4, %10, %cst_14 {dimension_numbers = #tpu.dot_dimension_numbers<[1], [0], [0], [1], [0, 0, 1, 1], [], []>} : vector<8x64xf32>, vector<64x16xf32>, vector<8x16xf32> -> vector<8x16xf32>
    %c0_15 = arith.constant 0 : index
    %c0_16 = arith.constant 0 : index
    %c0_17 = arith.constant 0 : index
    %12 = vector.load %arg5[%c0_15, %c0_16, %c0_17] : memref<3x8x64xf32, #tpu.memory_space<vmem>>, vector<1x8x64xf32>
    %13 = vector.shape_cast %12 : vector<1x8x64xf32> to vector<8x64xf32>
    %cst_18 = arith.constant dense<0.000000e+00> : vector<8x16xf32>
    %14 = tpu.matmul %13, %10, %cst_18 {dimension_numbers = #tpu.dot_dimension_numbers<[1], [0], [0], [1], [0, 0, 1, 1], [], []>} : vector<8x64xf32>, vector<64x16xf32>, vector<8x16xf32> -> vector<8x16xf32>
    %c0_19 = arith.constant 0 : index
    %c0_20 = arith.constant 0 : index
    %c0_21 = arith.constant 0 : index
    %15 = vector.load %arg6[%c0_19, %c0_20, %c0_21] : memref<3x16x16xf32, #tpu.memory_space<vmem>>, vector<1x16x16xf32>
    %16 = vector.shape_cast %15 : vector<1x16x16xf32> to vector<16x16xf32>
    %cst_22 = arith.constant dense<0.000000e+00> : vector<8x16xf32>
    %17 = tpu.matmul %14, %16, %cst_22 {dimension_numbers = #tpu.dot_dimension_numbers<[1], [0], [0], [1], [0, 0, 1, 1], [], []>} : vector<8x16xf32>, vector<16x16xf32>, vector<8x16xf32> -> vector<8x16xf32>
    %c1 = arith.constant 1 : index
    %c0_23 = arith.constant 0 : index
    %c0_24 = arith.constant 0 : index
    %18 = vector.load %arg5[%c1, %c0_23, %c0_24] : memref<3x8x64xf32, #tpu.memory_space<vmem>>, vector<1x8x64xf32>
    %19 = vector.shape_cast %18 : vector<1x8x64xf32> to vector<8x64xf32>
    %cst_25 = arith.constant dense<0.000000e+00> : vector<8x16xf32>
    %20 = tpu.matmul %19, %10, %cst_25 {dimension_numbers = #tpu.dot_dimension_numbers<[1], [0], [0], [1], [0, 0, 1, 1], [], []>} : vector<8x64xf32>, vector<64x16xf32>, vector<8x16xf32> -> vector<8x16xf32>
    %c1_26 = arith.constant 1 : index
    %c0_27 = arith.constant 0 : index
    %c0_28 = arith.constant 0 : index
    %21 = vector.load %arg6[%c1_26, %c0_27, %c0_28] : memref<3x16x16xf32, #tpu.memory_space<vmem>>, vector<1x16x16xf32>
    %22 = vector.shape_cast %21 : vector<1x16x16xf32> to vector<16x16xf32>
    %cst_29 = arith.constant dense<0.000000e+00> : vector<8x16xf32>
    %23 = tpu.matmul %20, %22, %cst_29 {dimension_numbers = #tpu.dot_dimension_numbers<[1], [0], [0], [1], [0, 0, 1, 1], [], []>} : vector<8x16xf32>, vector<16x16xf32>, vector<8x16xf32> -> vector<8x16xf32>
    %24 = arith.addf %17, %23 : vector<8x16xf32>
    %c2 = arith.constant 2 : index
    %c0_30 = arith.constant 0 : index
    %c0_31 = arith.constant 0 : index
    %25 = vector.load %arg5[%c2, %c0_30, %c0_31] : memref<3x8x64xf32, #tpu.memory_space<vmem>>, vector<1x8x64xf32>
    %26 = vector.shape_cast %25 : vector<1x8x64xf32> to vector<8x64xf32>
    %cst_32 = arith.constant dense<0.000000e+00> : vector<8x16xf32>
    %27 = tpu.matmul %26, %10, %cst_32 {dimension_numbers = #tpu.dot_dimension_numbers<[1], [0], [0], [1], [0, 0, 1, 1], [], []>} : vector<8x64xf32>, vector<64x16xf32>, vector<8x16xf32> -> vector<8x16xf32>
    %c2_33 = arith.constant 2 : index
    %c0_34 = arith.constant 0 : index
    %c0_35 = arith.constant 0 : index
    %28 = vector.load %arg6[%c2_33, %c0_34, %c0_35] : memref<3x16x16xf32, #tpu.memory_space<vmem>>, vector<1x16x16xf32>
    %29 = vector.shape_cast %28 : vector<1x16x16xf32> to vector<16x16xf32>
    %cst_36 = arith.constant dense<0.000000e+00> : vector<8x16xf32>
    %30 = tpu.matmul %27, %29, %cst_36 {dimension_numbers = #tpu.dot_dimension_numbers<[1], [0], [0], [1], [0, 0, 1, 1], [], []>} : vector<8x16xf32>, vector<16x16xf32>, vector<8x16xf32> -> vector<8x16xf32>
    %31 = arith.addf %24, %30 : vector<8x16xf32>
    %32 = vector.broadcast %5 : vector<8x1xf32> to vector<8x16xf32>
    %33 = arith.addf %31, %32 : vector<8x16xf32>
    %cst_37 = arith.constant 2.000000e-01 : f32
    %34 = vector.broadcast %cst_37 : f32 to vector<8x16xf32>
    %35 = arith.mulf %34, %33 : vector<8x16xf32>
    %36 = arith.maximumf %33, %35 : vector<8x16xf32>
    %c0_38 = arith.constant 0 : index
    %c0_39 = arith.constant 0 : index
    %c0_40 = arith.constant 0 : index
    %37 = vector.load %arg8[%c0_38, %c0_39, %c0_40] : memref<3x8x8xf32, #tpu.memory_space<vmem>>, vector<1x8x8xf32>
    %38 = vector.shape_cast %37 : vector<1x8x8xf32> to vector<8x8xf32>
    %cst_41 = arith.constant dense<0.000000e+00> : vector<8x16xf32>
    %39 = tpu.matmul %38, %36, %cst_41 {dimension_numbers = #tpu.dot_dimension_numbers<[1], [0], [0], [1], [0, 0, 1, 1], [], []>} : vector<8x8xf32>, vector<8x16xf32>, vector<8x16xf32> -> vector<8x16xf32>
    %c0_42 = arith.constant 0 : index
    %c0_43 = arith.constant 0 : index
    %c0_44 = arith.constant 0 : index
    %40 = vector.load %arg6[%c0_42, %c0_43, %c0_44] : memref<3x16x16xf32, #tpu.memory_space<vmem>>, vector<1x16x16xf32>
    %41 = vector.shape_cast %40 : vector<1x16x16xf32> to vector<16x16xf32>
    %cst_45 = arith.constant dense<0.000000e+00> : vector<8x16xf32>
    %42 = tpu.matmul %39, %41, %cst_45 {dimension_numbers = #tpu.dot_dimension_numbers<[1], [0], [0], [1], [0, 0, 1, 1], [], []>} : vector<8x16xf32>, vector<16x16xf32>, vector<8x16xf32> -> vector<8x16xf32>
    %c1_46 = arith.constant 1 : index
    %c0_47 = arith.constant 0 : index
    %c0_48 = arith.constant 0 : index
    %43 = vector.load %arg8[%c1_46, %c0_47, %c0_48] : memref<3x8x8xf32, #tpu.memory_space<vmem>>, vector<1x8x8xf32>
    %44 = vector.shape_cast %43 : vector<1x8x8xf32> to vector<8x8xf32>
    %cst_49 = arith.constant dense<0.000000e+00> : vector<8x16xf32>
    %45 = tpu.matmul %44, %36, %cst_49 {dimension_numbers = #tpu.dot_dimension_numbers<[1], [0], [0], [1], [0, 0, 1, 1], [], []>} : vector<8x8xf32>, vector<8x16xf32>, vector<8x16xf32> -> vector<8x16xf32>
    %c1_50 = arith.constant 1 : index
    %c0_51 = arith.constant 0 : index
    %c0_52 = arith.constant 0 : index
    %46 = vector.load %arg6[%c1_50, %c0_51, %c0_52] : memref<3x16x16xf32, #tpu.memory_space<vmem>>, vector<1x16x16xf32>
    %47 = vector.shape_cast %46 : vector<1x16x16xf32> to vector<16x16xf32>
    %cst_53 = arith.constant dense<0.000000e+00> : vector<8x16xf32>
    %48 = tpu.matmul %45, %47, %cst_53 {dimension_numbers = #tpu.dot_dimension_numbers<[1], [0], [0], [1], [0, 0, 1, 1], [], []>} : vector<8x16xf32>, vector<16x16xf32>, vector<8x16xf32> -> vector<8x16xf32>
    %49 = arith.addf %42, %48 : vector<8x16xf32>
    %c2_54 = arith.constant 2 : index
    %c0_55 = arith.constant 0 : index
    %c0_56 = arith.constant 0 : index
    %50 = vector.load %arg8[%c2_54, %c0_55, %c0_56] : memref<3x8x8xf32, #tpu.memory_space<vmem>>, vector<1x8x8xf32>
    %51 = vector.shape_cast %50 : vector<1x8x8xf32> to vector<8x8xf32>
    %cst_57 = arith.constant dense<0.000000e+00> : vector<8x16xf32>
    %52 = tpu.matmul %51, %36, %cst_57 {dimension_numbers = #tpu.dot_dimension_numbers<[1], [0], [0], [1], [0, 0, 1, 1], [], []>} : vector<8x8xf32>, vector<8x16xf32>, vector<8x16xf32> -> vector<8x16xf32>
    %c2_58 = arith.constant 2 : index
    %c0_59 = arith.constant 0 : index
    %c0_60 = arith.constant 0 : index
    %53 = vector.load %arg6[%c2_58, %c0_59, %c0_60] : memref<3x16x16xf32, #tpu.memory_space<vmem>>, vector<1x16x16xf32>
    %54 = vector.shape_cast %53 : vector<1x16x16xf32> to vector<16x16xf32>
    %cst_61 = arith.constant dense<0.000000e+00> : vector<8x16xf32>
    %55 = tpu.matmul %52, %54, %cst_61 {dimension_numbers = #tpu.dot_dimension_numbers<[1], [0], [0], [1], [0, 0, 1, 1], [], []>} : vector<8x16xf32>, vector<16x16xf32>, vector<8x16xf32> -> vector<8x16xf32>
    %56 = arith.addf %49, %55 : vector<8x16xf32>
    %57 = vector.broadcast %6 : vector<8x1xf32> to vector<8x16xf32>
    %58 = arith.addf %56, %57 : vector<8x16xf32>
    %59 = arith.addf %58, %11 : vector<8x16xf32>
    %cst_62 = arith.constant 2.000000e-01 : f32
    %60 = vector.broadcast %cst_62 : f32 to vector<8x16xf32>
    %61 = arith.mulf %60, %59 : vector<8x16xf32>
    %62 = arith.maximumf %59, %61 : vector<8x16xf32>
    %c0_63 = arith.constant 0 : index
    %c0_64 = arith.constant 0 : index
    %c0_65 = arith.constant 0 : index
    %63 = vector.load %arg10[%c0_63, %c0_64, %c0_65] : memref<4x2x8xf32, #tpu.memory_space<vmem>>, vector<1x2x8xf32>
    %64 = vector.shape_cast %63 : vector<1x2x8xf32> to vector<2x8xf32>
    %cst_66 = arith.constant dense<0.000000e+00> : vector<2x16xf32>
    %65 = tpu.matmul %64, %62, %cst_66 {dimension_numbers = #tpu.dot_dimension_numbers<[1], [0], [0], [1], [0, 0, 1, 1], [], []>} : vector<2x8xf32>, vector<8x16xf32>, vector<2x16xf32> -> vector<2x16xf32>
    %c0_67 = arith.constant 0 : index
    %c0_68 = arith.constant 0 : index
    %c0_69 = arith.constant 0 : index
    %66 = vector.load %arg11[%c0_67, %c0_68, %c0_69] : memref<4x16x64xf32, #tpu.memory_space<vmem>>, vector<1x16x64xf32>
    %67 = vector.shape_cast %66 : vector<1x16x64xf32> to vector<16x64xf32>
    %cst_70 = arith.constant dense<0.000000e+00> : vector<2x64xf32>
    %68 = tpu.matmul %65, %67, %cst_70 {dimension_numbers = #tpu.dot_dimension_numbers<[1], [0], [0], [1], [0, 0, 1, 1], [], []>} : vector<2x16xf32>, vector<16x64xf32>, vector<2x64xf32> -> vector<2x64xf32>
    %c1_71 = arith.constant 1 : index
    %c0_72 = arith.constant 0 : index
    %c0_73 = arith.constant 0 : index
    %69 = vector.load %arg10[%c1_71, %c0_72, %c0_73] : memref<4x2x8xf32, #tpu.memory_space<vmem>>, vector<1x2x8xf32>
    %70 = vector.shape_cast %69 : vector<1x2x8xf32> to vector<2x8xf32>
    %cst_74 = arith.constant dense<0.000000e+00> : vector<2x16xf32>
    %71 = tpu.matmul %70, %62, %cst_74 {dimension_numbers = #tpu.dot_dimension_numbers<[1], [0], [0], [1], [0, 0, 1, 1], [], []>} : vector<2x8xf32>, vector<8x16xf32>, vector<2x16xf32> -> vector<2x16xf32>
    %c1_75 = arith.constant 1 : index
    %c0_76 = arith.constant 0 : index
    %c0_77 = arith.constant 0 : index
    %72 = vector.load %arg11[%c1_75, %c0_76, %c0_77] : memref<4x16x64xf32, #tpu.memory_space<vmem>>, vector<1x16x64xf32>
    %73 = vector.shape_cast %72 : vector<1x16x64xf32> to vector<16x64xf32>
    %cst_78 = arith.constant dense<0.000000e+00> : vector<2x64xf32>
    %74 = tpu.matmul %71, %73, %cst_78 {dimension_numbers = #tpu.dot_dimension_numbers<[1], [0], [0], [1], [0, 0, 1, 1], [], []>} : vector<2x16xf32>, vector<16x64xf32>, vector<2x64xf32> -> vector<2x64xf32>
    %75 = arith.addf %68, %74 : vector<2x64xf32>
    %c2_79 = arith.constant 2 : index
    %c0_80 = arith.constant 0 : index
    %c0_81 = arith.constant 0 : index
    %76 = vector.load %arg10[%c2_79, %c0_80, %c0_81] : memref<4x2x8xf32, #tpu.memory_space<vmem>>, vector<1x2x8xf32>
    %77 = vector.shape_cast %76 : vector<1x2x8xf32> to vector<2x8xf32>
    %cst_82 = arith.constant dense<0.000000e+00> : vector<2x16xf32>
    %78 = tpu.matmul %77, %62, %cst_82 {dimension_numbers = #tpu.dot_dimension_numbers<[1], [0], [0], [1], [0, 0, 1, 1], [], []>} : vector<2x8xf32>, vector<8x16xf32>, vector<2x16xf32> -> vector<2x16xf32>
    %c2_83 = arith.constant 2 : index
    %c0_84 = arith.constant 0 : index
    %c0_85 = arith.constant 0 : index
    %79 = vector.load %arg11[%c2_83, %c0_84, %c0_85] : memref<4x16x64xf32, #tpu.memory_space<vmem>>, vector<1x16x64xf32>
    %80 = vector.shape_cast %79 : vector<1x16x64xf32> to vector<16x64xf32>
    %cst_86 = arith.constant dense<0.000000e+00> : vector<2x64xf32>
    %81 = tpu.matmul %78, %80, %cst_86 {dimension_numbers = #tpu.dot_dimension_numbers<[1], [0], [0], [1], [0, 0, 1, 1], [], []>} : vector<2x16xf32>, vector<16x64xf32>, vector<2x64xf32> -> vector<2x64xf32>
    %82 = arith.addf %75, %81 : vector<2x64xf32>
    %c3 = arith.constant 3 : index
    %c0_87 = arith.constant 0 : index
    %c0_88 = arith.constant 0 : index
    %83 = vector.load %arg10[%c3, %c0_87, %c0_88] : memref<4x2x8xf32, #tpu.memory_space<vmem>>, vector<1x2x8xf32>
    %84 = vector.shape_cast %83 : vector<1x2x8xf32> to vector<2x8xf32>
    %cst_89 = arith.constant dense<0.000000e+00> : vector<2x16xf32>
    %85 = tpu.matmul %84, %62, %cst_89 {dimension_numbers = #tpu.dot_dimension_numbers<[1], [0], [0], [1], [0, 0, 1, 1], [], []>} : vector<2x8xf32>, vector<8x16xf32>, vector<2x16xf32> -> vector<2x16xf32>
    %c3_90 = arith.constant 3 : index
    %c0_91 = arith.constant 0 : index
    %c0_92 = arith.constant 0 : index
    %86 = vector.load %arg11[%c3_90, %c0_91, %c0_92] : memref<4x16x64xf32, #tpu.memory_space<vmem>>, vector<1x16x64xf32>
    %87 = vector.shape_cast %86 : vector<1x16x64xf32> to vector<16x64xf32>
    %cst_93 = arith.constant dense<0.000000e+00> : vector<2x64xf32>
    %88 = tpu.matmul %85, %87, %cst_93 {dimension_numbers = #tpu.dot_dimension_numbers<[1], [0], [0], [1], [0, 0, 1, 1], [], []>} : vector<2x16xf32>, vector<16x64xf32>, vector<2x64xf32> -> vector<2x64xf32>
    %89 = arith.addf %82, %88 : vector<2x64xf32>
    %c0_94 = arith.constant 0 : index
    %c0_95 = arith.constant 0 : index
    %90 = vector.load %arg12[%c0_94, %c0_95] : memref<2x64xf32, #tpu.memory_space<vmem>>, vector<2x64xf32>
    %91 = arith.addf %89, %90 : vector<2x64xf32>
    %cst_96 = arith.constant 0.333333343 : f32
    %92 = vector.broadcast %cst_96 : f32 to vector<2x64xf32>
    %93 = arith.mulf %91, %92 : vector<2x64xf32>
    %c0_97 = arith.constant 0 : index
    %c0_98 = arith.constant 0 : index
    %94 = vector.load %arg13[%c0_97, %c0_98] : memref<2x64xf32, #tpu.memory_space<vmem>>, vector<2x64xf32>
    tpu.vector_store %arg13[%c0_97, %c0_98], %93 {strides = array<i32>} : memref<2x64xf32, #tpu.memory_space<vmem>>, vector<2x64xf32>,
    return
  }
}

</mosaic_0001>

<bundles_post_ra>
// kernel: _lambda_.6
= control target key start
LH: loop header
LB: loop body
LE: loop exit
PB: predicated region body
PF: predicated region fallthrough
CT: control target
= control target key end

     0   :  { %vm39_vm0 = vcmask 64512   ;;  %v792_v0 = vmov 0.0   ;;  %vm793_vm1 = vmmov 0   ;;  %v794_v18 = vmov 683565275   ;;  %s961_s0 = inlined_call_operand.vmem [shape: f32[8,64], index: 0, kind: input, shape index: {}]   ;;  %s962_s2 = inlined_call_operand.vmem [shape: f32[2,8], index: 2, kind: input, shape index: {}]   ;;  %s963_s1 = inlined_call_operand.vmem [shape: f32[2,8], index: 1, kind: input, shape index: {}]   ;;  %s964_s4 = inlined_call_operand.vmem [shape: f32[64,64], index: 4, kind: input, shape index: {}]   ;;  %s965_s3 = inlined_call_operand.vmem [shape: f32[64,64], index: 3, kind: input, shape index: {}]   ;;  %s966_s5 = inlined_call_operand.vmem [shape: f32[2,64], index: 5, kind: output, shape index: {}]  }
   0x1   :  { %697 = vmatprep.subr.mxu1 %v792_v0  ;;  %v20_v1 = vld [vmem:[%s961_s0] sm:$0xff]  ;;  %699 = vmatprep.mubr.msk.f32.mxu1 %vm793_vm1, %v792_v0  ;;  %v795_v20 = vmov 2475754826   ;;  %v796_v23 = vmov 2131351028   ;;  %v800_v54 = vmov 0.0|0.0  }
   0x2   :  { %v22_v2 = vld [vmem:[%s962_s2] sm:$0x3]  ;;  %698 = vmatpush3.msra.mxu1 %v20_v1  ;;  %692 = vmatprep.subr.mxu0 %v792_v0  ;;  %v797_v26 = vmov 2102212464   ;;  %v798_v29 = vmov 920167782  }
   0x3   :  { %v21_v3 = vld [vmem:[%s963_s1] sm:$0x3]  ;;  %700 = vmatmul.mubr.msk.f32.vlgmr.msra.gmra.mrb[0].mxu1 %vm39_vm0, %v22_v2  ;;  %693 = vmatpush3.msra.mxu0 %v20_v1  ;;  %v799_v32 = vmov 1326507024   ;;  %v32_v56 = vld [vmem:[%s964_s4 + $0x8] sm:$0xff]  ;;  %v33_v63 = vld [vmem:[%s964_s4 + $0x10] sm:$0xff] }
   0x4   :  { %694 = vmatprep.mubr.msk.f32.mxu0 %vm793_vm1, %v792_v0  ;;  %718 = vmatprep.mubr.msk.f32.mxu1 %vm793_vm1, %v792_v0  ;;  %v31_v55 = vld [vmem:[%s964_s4] sm:$0xff]  ;;  %v24_v62 = vld [vmem:[%s965_s3 + $0x8] sm:$0xff] }
   0x5   :  { %695 = vmatmul.mubr.msk.f32.vlgmr.msra.gmra.mrb[0].mxu0 %vm39_vm0, %v21_v3  ;;  %740 = vmatprep.subr.bf16.mxu1 %v800_v54  ;;  %v23_v57 = vld [vmem:[%s965_s3] sm:$0xff]  ;;  %v741_v1 = vpack.c.bf16 %v32_v56, %v31_v55  ;;  %v25_v3 = vld [vmem:[%s965_s3 + $0x10] sm:$0xff] }
   0x6   :  { %737 = vmatprep.mubr.msk.f32.mxu0 %vm793_vm1, %v792_v0  ;;  %752 = vmatprep.subr.bf16.mxu0 %v800_v54  ;;  %v34_v0 = vld [vmem:[%s964_s4 + $0x18] sm:$0xff]  ;;  %v753_v2 = vpack.c.bf16 %v24_v62, %v23_v57 }
   0x7   :  { %742 = vmatpush3.bf16.msra.mxu1 %v741_v1 }
   0x8   :  { %754 = vmatpush3.bf16.msra.mxu0 %v753_v2  ;;  %743 = vmatprep.subr.bf16.mxu1 %v800_v54 }
   0x9   :  { %755 = vmatprep.subr.bf16.mxu0 %v800_v54 }
  0xd6   :  { %v184_v4 = vpop.f32.mrb[0].mxu1 }
  0xd7   :  { %v840_v5 = vadd.f32 -0.000349715, %v184_v4  ;;  %v701_v6 = vpop.f32.mrb[1].mxu1  ;;  %v26_v4 = vld [vmem:[%s965_s3 + $0x18] sm:$0xff] }
  0xd8   :  { %v857_v49 = vpop.f32.mrb[0].mxu0 }
  0xd9   :  { %v191_v7 = vand.u32 2139095040, %v840_v5  ;;  %v188_v9 = vand.u32 2147483647, %v840_v5  ;;  %v696_v53 = vpop.f32.mrb[1].mxu0  ;;  %vm190_vm9 = vcmp.lt.s32.totalorder %v840_v5, 0  ;;  %vm280_vm14 = vweird.f32 %v840_v5 }
  0xdb   :  { %v192_v8 = vshrl.u32 %v191_v7, 23  ;;  %v195_v12 = vand.u32 8388607, %v188_v9  ;;  %v744_v7 = vpack.c.bf16 %v34_v0, %v33_v63  ;;  %vm189_vm10 = vcmp.le.f32.partialorder %v188_v9, 0.7853982 }
  0xdd   :  { %v656_v10 = vadd.s32 4294967169, %v192_v8  ;;  %v196_v15 = vor.u32 8388608, %v195_v12  ;;  %v756_v8 = vpack.c.bf16 %v26_v4, %v25_v3  ;;  %v36_v12 = vld [vmem:[%s964_s4 + $0x28] sm:$0xff]  ;;  %745 = vmatpush3.bf16.msra.mxu1 %v744_v7 }
  0xde   :  { %746 = vmatprep.subr.bf16.mxu1 %v800_v54 }
  0xdf   :  { %v198_v11 = vadd.s32 1, %v656_v10  ;;  %v236_v37 = vshll.u32 %v196_v15, 8  ;;  %v35_v10 = vld [vmem:[%s964_s4 + $0x20] sm:$0xff]  ;;  %757 = vmatpush3.bf16.msra.mxu0 %v756_v8 }
  0xe0   :  { %758 = vmatprep.subr.bf16.mxu0 %v800_v54 }
  0xe1   :  { %vm199_vm2 = vcmp.gt.s32.totalorder %v198_v11, 0 }
  0xe2   :  { %v200_v13 = vsel %vm199_vm2, %v198_v11, 0 }
  0xe3   :  { %v202_v14 = vand.u32 31, %v200_v13  ;;  %v201_v17 = vshrl.u32 %v200_v13, 5  ;;  %v27_v13 = vld [vmem:[%s965_s3 + $0x20] sm:$0xff] }
  0xe5   :  { %v203_v16 = vsub.s32 32, %v202_v14  ;;  %v205_v19 = vshll.u32 %v794_v18, %v202_v14  ;;  %v208_v21 = vshll.u32 %v795_v20, %v202_v14  ;;  %v211_v25 = vshll.u32 %v796_v23, %v202_v14 }
  0xe6   :  { %v214_v28 = vshll.u32 %v797_v26, %v202_v14  ;;  %v217_v31 = vshll.u32 %v798_v29, %v202_v14  ;;  %vm220_vm3 = vcmp.lt.s32.totalorder %v201_v17, 1  ;;  %vm223_vm4 = vcmp.lt.s32.totalorder %v201_v17, 4  ;;  %v28_v14 = vld [vmem:[%s965_s3 + $0x28] sm:$0xff] }
  0xe7   :  { %v206_v22 = vshrl.u32 %v795_v20, %v203_v16  ;;  %v209_v24 = vshrl.u32 %v796_v23, %v203_v16  ;;  %v212_v27 = vshrl.u32 %v797_v26, %v203_v16  ;;  %v215_v30 = vshrl.u32 %v798_v29, %v203_v16 }
  0xe8   :  { %v218_v33 = vshrl.u32 %v799_v32, %v203_v16  ;;  %v204_v40 = vshrl.u32 %v794_v18, %v203_v16  ;;  %vm221_vm5 = vcmp.lt.s32.totalorder %v201_v17, 2  ;;  %vm222_vm6 = vcmp.lt.s32.totalorder %v201_v17, 3 }
  0xe9   :  { %v207_v34 = vor.u32 %v206_v22, %v205_v19  ;;  %v210_v35 = vor.u32 %v209_v24, %v208_v21  ;;  %v213_v36 = vor.u32 %v212_v27, %v211_v25  ;;  %v216_v38 = vor.u32 %v215_v30, %v214_v28  ;;  %v37_v22 = vld [vmem:[%s964_s4 + $0x30] sm:$0xff]  ;;  %v38_v24 = vld [vmem:[%s964_s4 + $0x38] sm:$0xff] }
  0xea   :  { %v219_v39 = vor.u32 %v218_v33, %v217_v31  ;;  %v747_v19 = vpack.c.bf16 %v36_v12, %v35_v10  ;;  %v759_v21 = vpack.c.bf16 %v28_v14, %v27_v13  ;;  %v29_v25 = vld [vmem:[%s965_s3 + $0x30] sm:$0xff]  ;;  %v30_v27 = vld [vmem:[%s965_s3 + $0x38] sm:$0xff]  ;;  %v750_v31 = vpack.c.bf16 %v38_v24, %v37_v22 }
  0xeb   :  { %v225_v41 = vsel %vm223_vm4, %v213_v36, 2102212464  ;;  %v228_v42 = vsel %vm220_vm3, %v207_v34, %v210_v35  ;;  %v232_v43 = vsel %vm220_vm3, %v210_v35, %v213_v36  ;;  %v229_v44 = vsel %vm223_vm4, %v216_v38, 920167782 }
  0xec   :  { %v233_v45 = vsel %vm223_vm4, %v219_v39, 1326507024  ;;  %v224_v46 = vsel %vm220_vm3, %v204_v40, %v207_v34  ;;  %v230_v47 = vsel %vm222_vm6, %v213_v36, %v229_v44  ;;  %v226_v50 = vsel %vm222_vm6, %v210_v35, %v225_v41  ;;  %748 = vmatpush3.bf16.msra.mxu1 %v747_v19  ;;  %760 = vmatpush3.bf16.msra.mxu0 %v759_v21 }
  0xed   :  { %v234_v48 = vsel %vm222_vm6, %v216_v38, %v233_v45  ;;  %v231_v51 = vsel %vm221_vm5, %v228_v42, %v230_v47  ;;  %v227_v6 = vsel %vm221_vm5, %v224_v46, %v226_v50  ;;  %v762_v33 = vpack.c.bf16 %v30_v27, %v29_v25  ;;  %749 = vmatprep.subr.bf16.mxu1 %v800_v54 }
  0xee   :  { %v235_v52 = vsel %vm221_vm5, %v232_v43, %v234_v48  ;;  %v873_v60 = vmul.u32.u64.low %v236_v37, %v231_v51  ;;  %v874_v61 = vmul.u32.u64.high %v236_v37, %v231_v51, %v873_v60  ;;  %v243_v15 = vmul.u32 %v236_v37, %v227_v6  ;;  %761 = vmatprep.subr.bf16.mxu0 %v800_v54 }
  0xef   :  { %v870_v58 = vmul.u32.u64.low %v236_v37, %v235_v52  ;;  %v871_v59 = vmul.u32.u64.high %v236_v37, %v235_v52, %v870_v58 }
  0xf0   :  { %v246_v11 = vadd.s32 1, %v874_v61  ;;  %751 = vmatpush3.bf16.msra.mxu1 %v750_v31  ;;  %763 = vmatpush3.bf16.msra.mxu0 %v762_v33 }
  0xf1   :  { %vm245_vm7 = vc.u32 %v871_v59, %v873_v60  ;;  %v244_v41 = vadd.s32 %v873_v60, %v871_v59 }
  0xf2   :  { %v247_v16 = vsel %vm245_vm7, %v246_v11, %v874_v61 }
  0xf3   :  { %v248_v17 = vadd.s32 %v247_v16, %v243_v15 }
  0xf5   :  { %v249_v28 = vadd.s32 536870912, %v248_v17 }
  0xf7   :  { %v250_v30 = vshrl.u32 %v249_v28, 30 }
  0xf9   :  { %v251_v34 = vshll.u32 %v250_v30, 30  ;;  %v274_v54 = vsub.s32 4, %v250_v30 }
  0xfb   :  { %v252_v35 = vsub.s32 %v248_v17, %v251_v34  ;;  %v275_v57 = vsel %vm190_vm9, %v274_v54, %v250_v30 }
  0xfc   :  { %v277_v59 = vsel %vm189_vm10, 0, %v275_v57 }
  0xfd   :  { %v254_v36 = vsub.s32 0, %v252_v35  ;;  %v281_v60 = vadd.s32 3, %v277_v59 }
  0xff   :  { %v657_v37 = vmin.u32 %v254_v36, %v252_v35  ;;  %v282_v61 = vand.u32 3, %v281_v60 }
 0x101   :  { %v256_v38 = vclz %v657_v37  ;;  %vm287_vm11 = vcmp.eq.s32.totalorder %v282_v61, 2  ;;  %vm284_vm12 = vcmp.eq.s32.totalorder %v282_v61, 0  ;;  %vm283_vm13 = vcmp.lt.s32.totalorder %v282_v61, 2 }
 0x103   :  { %v658_v39 = vadd.s32 4294967294, %v256_v38 }
 0x105   :  { %vm659_vm8 = vcmp.lt.s32.totalorder %v658_v39, 0 }
 0x106   :  { %v259_v40 = vsel %vm659_vm8, 0, %v658_v39 }
 0x107   :  { %v260_v42 = vsub.s32 32, %v259_v40  ;;  %v264_v43 = vsub.s32 4294967266, %v259_v40  ;;  %v261_v44 = vshll.u32 %v252_v35, %v259_v40 }
 0x109   :  { %v262_v45 = vshrl.u32 %v244_v41, %v260_v42  ;;  %v265_v46 = vadd.s32 127, %v264_v43 }
 0x10b   :  { %v263_v47 = vor.u32 %v262_v45, %v261_v44  ;;  %v266_v48 = vshll.u32 %v265_v46, 23 }
 0x10d   :  { %v267_v50 = vor.u32 4788187, %v266_v48  ;;  %v270_v52 = vcvt.s32.f32 %v263_v47 }
 0x10f   :  { %v268_v51 = vand.u32 2147483647, %v267_v50 }
 0x111   :  { %v271_v53 = vmul.f32 %v270_v52, %v268_v51 }
 0x113   :  { %v272_v55 = vxor.u32 2147483648, %v271_v53 }
 0x115   :  { %v273_v56 = vsel %vm190_vm9, %v272_v55, %v271_v53 }
 0x116   :  { %v276_v58 = vsel %vm189_vm10, %v840_v5, %v273_v56 }
 0x117   :  { %782 = vcosq.f32 %v276_v58 }
 0x118   :  { %784 = vsinq.f32 %v276_v58 }
 0x121   :  { %v783_v62 = vpop.eup %782 }
 0x122   :  { %v785_v63 = vpop.eup %784  ;;  %v288_v0 = vxor.u32 2147483648, %v783_v62 }
 0x123   :  { %v285_v1 = vxor.u32 2147483648, %v785_v63 }
 0x124   :  { %v289_v2 = vsel %vm287_vm11, %v288_v0, %v785_v63 }
 0x125   :  { %v286_v3 = vsel %vm284_vm12, %v783_v62, %v285_v1 }
 0x126   :  { %v290_v9 = vsel %vm283_vm13, %v286_v3, %v289_v2 }
 0x127   :  { %v925_v4 = vsel %vm280_vm14, nan, %v290_v9 }
 0x128   :  { %v295_v6 = vand.u32 2139095040, %v925_v4  ;;  %v292_v11 = vand.u32 2147483647, %v925_v4  ;;  %vm294_vm6 = vcmp.lt.s32.totalorder %v925_v4, 0  ;;  %vm384_vm14 = vweird.f32 %v925_v4 }
 0x12a   :  { %v296_v7 = vshrl.u32 %v295_v6, 23  ;;  %v299_v14 = vand.u32 8388607, %v292_v11  ;;  %vm293_vm7 = vcmp.le.f32.partialorder %v292_v11, 0.7853982 }
 0x12c   :  { %v660_v8 = vadd.s32 4294967169, %v296_v7  ;;  %v300_v31 = vor.u32 8388608, %v299_v14 }
 0x12e   :  { %v302_v10 = vadd.s32 1, %v660_v8 }
 0x130   :  { %vm303_vm15 = vcmp.gt.s32.totalorder %v302_v10, 0 }
 0x131   :  { %v304_v12 = vsel %vm303_vm15, %v302_v10, 0  ;;  %vm501_vm15 = vcmask 523264  }
 0x132   :  { %v306_v13 = vand.u32 31, %v304_v12  ;;  %v305_v16 = vshrl.u32 %v304_v12, 5 }
 0x134   :  { %v307_v15 = vsub.s32 32, %v306_v13  ;;  %v309_v5 = vshll.u32 %v794_v18, %v306_v13  ;;  %v312_v17 = vshll.u32 %v795_v20, %v306_v13  ;;  %v315_v22 = vshll.u32 %v796_v23, %v306_v13 }
 0x135   :  { %v318_v25 = vshll.u32 %v797_v26, %v306_v13  ;;  %v321_v28 = vshll.u32 %v798_v29, %v306_v13  ;;  %vm324_vm0 = vcmp.lt.s32.totalorder %v305_v16, 1  ;;  %vm327_vm1 = vcmp.lt.s32.totalorder %v305_v16, 4 }
 0x136   :  { %v310_v19 = vshrl.u32 %v795_v20, %v307_v15  ;;  %v313_v21 = vshrl.u32 %v796_v23, %v307_v15  ;;  %v316_v24 = vshrl.u32 %v797_v26, %v307_v15  ;;  %v319_v27 = vshrl.u32 %v798_v29, %v307_v15 }
 0x137   :  { %v322_v30 = vshrl.u32 %v799_v32, %v307_v15  ;;  %v308_v39 = vshrl.u32 %v794_v18, %v307_v15  ;;  %vm326_vm2 = vcmp.lt.s32.totalorder %v305_v16, 3  ;;  %vm325_vm3 = vcmp.lt.s32.totalorder %v305_v16, 2 }
 0x138   :  { %v311_v33 = vor.u32 %v310_v19, %v309_v5  ;;  %v314_v34 = vor.u32 %v313_v21, %v312_v17  ;;  %v317_v35 = vor.u32 %v316_v24, %v315_v22  ;;  %v320_v36 = vor.u32 %v319_v27, %v318_v25 }
 0x139   :  { %v323_v20 = vor.u32 %v322_v30, %v321_v28  ;;  %v340_v32 = vshll.u32 %v300_v31, 8  ;;  %v110_v5 = vadd.f32 0.010646981, %v857_v49 }
 0x13a   :  { %v329_v37 = vsel %vm327_vm1, %v317_v35, 2102212464  ;;  %v332_v23 = vsel %vm324_vm0, %v311_v33, %v314_v34  ;;  %v336_v38 = vsel %vm324_vm0, %v314_v34, %v317_v35  ;;  %v333_v26 = vsel %vm327_vm1, %v320_v36, 920167782 }
 0x13b   :  { %v337_v40 = vsel %vm327_vm1, %v323_v20, 1326507024  ;;  %v334_v29 = vsel %vm326_vm2, %v317_v35, %v333_v26  ;;  %v328_v42 = vsel %vm324_vm0, %v308_v39, %v311_v33  ;;  %v330_v43 = vsel %vm326_vm2, %v314_v34, %v329_v37 }
 0x13c   :  { %v338_v41 = vsel %vm326_vm2, %v320_v36, %v337_v40  ;;  %v335_v44 = vsel %vm325_vm3, %v332_v23, %v334_v29  ;;  %v331_v51 = vsel %vm325_vm3, %v328_v42, %v330_v43  ;;  %v113_v22 = vmul.f32 1.442695, %v110_v5 }
 0x13d   :  { %v339_v45 = vsel %vm325_vm3, %v336_v38, %v338_v41  ;;  %v945_v48 = vmul.u32.u64.low %v340_v32, %v335_v44  ;;  %v946_v50 = vmul.u32.u64.high %v340_v32, %v335_v44, %v945_v48  ;;  %v347_v52 = vmul.u32 %v340_v32, %v331_v51 }
 0x13e   :  { %v942_v46 = vmul.u32.u64.low %v340_v32, %v339_v45  ;;  %v943_v47 = vmul.u32.u64.high %v340_v32, %v339_v45, %v942_v46  ;;  %vm648_vm0 = vcmask 517120  }
 0x13f   :  { %v350_v18 = vadd.s32 1, %v946_v50 }
 0x140   :  { %vm349_vm4 = vc.u32 %v943_v47, %v945_v48  ;;  %v348_v0 = vadd.s32 %v945_v48, %v943_v47 }
 0x141   :  { %v351_v53 = vsel %vm349_vm4, %v350_v18, %v946_v50 }
 0x142   :  { %v352_v54 = vadd.s32 %v351_v53, %v347_v52 }
 0x144   :  { %v353_v55 = vadd.s32 536870912, %v352_v54 }
 0x146   :  { %v354_v56 = vshrl.u32 %v353_v55, 30 }
 0x148   :  { %v355_v57 = vshll.u32 %v354_v56, 30  ;;  %v378_v15 = vsub.s32 4, %v354_v56 }
 0x14a   :  { %v356_v58 = vsub.s32 %v352_v54, %v355_v57  ;;  %v379_v19 = vsel %vm294_vm6, %v378_v15, %v354_v56 }
 0x14b   :  { %v381_v24 = vsel %vm293_vm7, 0, %v379_v19 }
 0x14c   :  { %v358_v59 = vsub.s32 0, %v356_v58  ;;  %v489_v25 = vadd.s32 3, %v381_v24  ;;  %v385_v28 = vand.u32 3, %v381_v24 }
 0x14e   :  { %v661_v60 = vmin.u32 %v358_v59, %v356_v58  ;;  %v490_v27 = vand.u32 3, %v489_v25  ;;  %vm390_vm9 = vcmp.eq.s32.totalorder %v385_v28, 2  ;;  %vm387_vm11 = vcmp.eq.s32.totalorder %v385_v28, 0 }
 0x14f   :  { %vm386_vm13 = vcmp.lt.s32.totalorder %v385_v28, 2 }
 0x150   :  { %v360_v61 = vclz %v661_v60  ;;  %vm495_vm8 = vcmp.eq.s32.totalorder %v490_v27, 2  ;;  %vm492_vm10 = vcmp.eq.s32.totalorder %v490_v27, 0  ;;  %vm491_vm12 = vcmp.lt.s32.totalorder %v490_v27, 2 }
 0x152   :  { %v662_v62 = vadd.s32 4294967294, %v360_v61 }
 0x154   :  { %vm663_vm5 = vcmp.lt.s32.totalorder %v662_v62, 0 }
 0x155   :  { %v363_v63 = vsel %vm663_vm5, 0, %v662_v62 }
 0x156   :  { %v364_v1 = vsub.s32 32, %v363_v63  ;;  %v368_v2 = vsub.s32 4294967266, %v363_v63  ;;  %v365_v3 = vshll.u32 %v356_v58, %v363_v63 }
 0x158   :  { %v366_v9 = vshrl.u32 %v348_v0, %v364_v1  ;;  %v369_v6 = vadd.s32 127, %v368_v2 }
 0x15a   :  { %v367_v7 = vor.u32 %v366_v9, %v365_v3  ;;  %v370_v8 = vshll.u32 %v369_v6, 23 }
 0x15c   :  { %v371_v10 = vor.u32 4788187, %v370_v8  ;;  %v374_v13 = vcvt.s32.f32 %v367_v7 }
 0x15e   :  { %v372_v12 = vand.u32 2147483647, %v371_v10 }
 0x160   :  { %v375_v14 = vmul.f32 %v374_v13, %v372_v12 }
 0x162   :  { %v376_v16 = vxor.u32 2147483648, %v375_v14 }
 0x164   :  { %v377_v17 = vsel %vm294_vm6, %v376_v16, %v375_v14 }
 0x165   :  { %v380_v21 = vsel %vm293_vm7, %v925_v4, %v377_v17 }
 0x166   :  { %786 = vcosq.f32 %v380_v21 }
 0x167   :  { %788 = vsinq.f32 %v380_v21 }
 0x168   :  { %790 = vpow2.f32 %v113_v22 }
 0x170   :  { %v787_v30 = vpop.eup %786 }
 0x171   :  { %v789_v31 = vpop.eup %788  ;;  %v391_v49 = vxor.u32 2147483648, %v787_v30 }
 0x172   :  { %v388_v33 = vxor.u32 2147483648, %v789_v31  ;;  %v791_v35 = vpop.eup %790 }
 0x173   :  { %v497_v11 = vsel %vm495_vm8, %v391_v49, %v789_v31  ;;  %v392_v34 = vsel %vm390_vm9, %v391_v49, %v789_v31 }
 0x174   :  { %v494_v36 = vsel %vm492_vm10, %v787_v30, %v388_v33  ;;  %v389_v20 = vsel %vm387_vm11, %v787_v30, %v388_v33 }
 0x175   :  { %v498_v37 = vsel %vm491_vm12, %v494_v36, %v497_v11  ;;  %v393_v23 = vsel %vm386_vm13, %v389_v20, %v392_v34 }
 0x176   :  { %v499_v38 = vsel %vm384_vm14, nan, %v498_v37  ;;  %v394_v39 = vsel %vm384_vm14, nan, %v393_v23 }
 0x177   :  { %v500_v26 = vmul.f32 %v791_v35, %v499_v38  ;;  %v395_v40 = vmul.f32 %v791_v35, %v394_v39 }
 0x179   :  { %719 = vmatmul.mubr.msk.f32.vlgmr.msra.gmra.mrb[2].mxu1 %vm501_vm15, %v500_v26  ;;  %738 = vmatmul.mubr.msk.f32.vlgmr.msra.gmra.mrb[2].mxu0 %vm501_vm15, %v395_v40 }
 0x24c   :  { %v571_v29 = vpop.f32.mrb[2].mxu1  ;;  %v644_v41 = vpop.f32.mrb[2].mxu0 }
 0x24d   :  { %v645_v32 = vadd.f32 %v644_v41, %v571_v29  ;;  %v720_v42 = vpop.f32.mrb[3].mxu1  ;;  %v739_v43 = vpop.f32.mrb[3].mxu0 }
 0x24f   :  { %649 = vst.msk [vmem:[%s966_s5] sm:$0x3] %vm648_vm0, %v645_v32 }

// kernel: _lambda_.8
= control target key start
LH: loop header
LB: loop body
LE: loop exit
PB: predicated region body
PF: predicated region fallthrough
CT: control target
= control target key end

     0   :  { %v1926_v0 = vmov 0.0|0.0   ;;  %vm1927_vm0 = vmmov 0   ;;  %v1928_v4 = vmov 0.0   ;;  %vm100_vm1 = vcmask 130048   ;;  %s2656_s0 = inlined_call_operand.vmem [shape: f32[16,272], index: 0, kind: input, shape index: {}]   ;;  %s2657_s1 = inlined_call_operand.vmem [shape: f32[2,16], index: 1, kind: input, shape index: {}]   ;;  %s2658_s2 = inlined_call_operand.vmem [shape: f32[2,16], index: 2, kind: input, shape index: {}]   ;;  %s2659_s4 = inlined_call_operand.vmem [shape: f32[272,64], index: 4, kind: input, shape index: {}]   ;;  %s2660_s3 = inlined_call_operand.vmem [shape: f32[272,64], index: 3, kind: input, shape index: {}]   ;;  %s2661_s5 = inlined_call_operand.vmem [shape: f32[2,64], index: 5, kind: input, shape index: {}]   ;;  %s2662_s6 = inlined_call_operand.vmem [shape: f32[2,64], index: 6, kind: output, shape index: {}]  }
   0x1   :  { %1783 = vmatprep.subr.bf16.mxu1 %v1926_v0  ;;  %v25_v1 = vld [vmem:[%s2656_s0 + $0x8] sm:$0xff]  ;;  %v28_v2 = vld [vmem:[%s2656_s0 + $0x20] sm:$0xff]  ;;  %v26_v3 = vld [vmem:[%s2656_s0 + $0x10] sm:$0xff]  ;;  %1755 = vmatprep.mubr.msk.f32.mxu1 %vm1927_vm0, %v1928_v4  ;;  %v1929_v50 = vmov 683565275  }
   0x2   :  { %v1779_v5 = vpack.c.bf16 %v28_v2, %v25_v1  ;;  %v29_v6 = vld [vmem:[%s2656_s0 + $0x28] sm:$0xff]  ;;  %v24_v7 = vld [vmem:[%s2656_s0] sm:$0xff]  ;;  %v27_v8 = vld [vmem:[%s2656_s0 + $0x18] sm:$0xff]  ;;  %168 = vmatprep.mubr.f32.mxu0 %v1928_v4  ;;  %v1930_v52 = vmov 2475754826  }
   0x3   :  { %v1784_v9 = vpack.c.bf16 %v29_v6, %v26_v3  ;;  %v1781_v10 = vpack.c.bf16 %v27_v8, %v24_v7  ;;  %v30_v11 = vld [vmem:[%s2657_s1] sm:$0x3]  ;;  %v1931_v55 = vmov 2131351028   ;;  %v1932_v57 = vmov 2102212464  }
   0x4   :  { %1780 = vmatprep.subr.bf16.mxu0 %v1779_v5  ;;  %v31_v12 = vld [vmem:[%s2658_s2] sm:$0x3]  ;;  %v1933_v59 = vmov 920167782   ;;  %v1934_v3 = vmov 1326507024  }
   0x5   :  { %1785 = vmatpush3.bf16.msra.mxu1 %v1784_v9  ;;  %1782 = vmatpush1.bf16.msra.mxu0 %v1781_v10 }
   0x6   :  { %1790 = vmatprep.subr.bf16.mxu1 %v1926_v0  ;;  %1787 = vmatprep.subr.bf16.mxu0 %v1779_v5 }
   0x8   :  { %1756 = vmatmul.mubr.msk.f32.vlgmr.msra.gmra.mrb[0].mxu1 %vm100_vm1, %v30_v11  ;;  %1627 = vmatmul.mubr.msk.f32.vlgmr.msra.gmra.mrb[0].mxu0 %vm100_vm1, %v30_v11 }
   0x9   :  { %1792 = vmatpush3.bf16.msra.mxu1 %v1784_v9  ;;  %1789 = vmatpush1.bf16.msra.mxu0 %v1781_v10 }
   0xa   :  { %1762 = vmatprep.mubr.msk.f32.mxu1 %vm1927_vm0, %v1928_v4  ;;  %318 = vmatprep.mubr.f32.mxu0 %v1928_v4 }
   0xb   :  { %1825 = vmatprep.subr.bf16.mxu1 %v1926_v0 }
   0xc   :  { %1763 = vmatmul.mubr.msk.f32.vlgmr.msra.gmra.mrb[2].mxu1 %vm100_vm1, %v31_v12  ;;  %1629 = vmatmul.mubr.msk.f32.vlgmr.msra.gmra.mrb[2].mxu0 %vm100_vm1, %v31_v12 }
   0xd   :  { %1769 = vmatprep.mubr.msk.f32.mxu1 %vm1927_vm0, %v1928_v4 }
  0xdb   :  { %v2009_v13 = vpop.f32.mrb[0].mxu1  ;;  %v2011_v14 = vpop.f32.mrb[0].mxu0 }
  0xdc   :  { %v1757_v15 = vpop.f32.mrb[1].mxu1  ;;  %v2013_v16 = vpop.f32.mrb[1].mxu0 }
  0xdf   :  { %v391_v17 = vpop.f32.mrb[2].mxu1  ;;  %v320_v18 = vpop.f32.mrb[2].mxu0 }
  0xe0   :  { %v2015_v19 = vadd.f32 -0.0042220005, %v391_v17  ;;  %v2017_v20 = vadd.f32 -0.0042220005, %v320_v18  ;;  %v1764_v21 = vpop.f32.mrb[3].mxu1  ;;  %v322_v22 = vpop.f32.mrb[3].mxu0 }
  0xe1   :  { %v2021_v25 = vadd.f32 -0.0042220005, %v322_v22 }
  0xe2   :  { %v603_v23 = vand.u32 2147483647, %v2015_v19  ;;  %v606_v24 = vand.u32 2139095040, %v2015_v19  ;;  %v395_v26 = vand.u32 2147483647, %v2017_v20  ;;  %v398_v27 = vand.u32 2139095040, %v2017_v20 }
  0xe3   :  { %v502_v33 = vand.u32 2139095040, %v2021_v25 }
  0xe4   :  { %v607_v28 = vshrl.u32 %v606_v24, 23  ;;  %v610_v29 = vand.u32 8388607, %v603_v23  ;;  %v399_v30 = vshrl.u32 %v398_v27, 23  ;;  %v402_v31 = vand.u32 8388607, %v395_v26 }
  0xe5   :  { %v503_v36 = vshrl.u32 %v502_v33, 23 }
  0xe6   :  { %v1639_v32 = vadd.s32 4294967169, %v607_v28  ;;  %v1631_v34 = vadd.s32 4294967169, %v399_v30  ;;  %v611_v37 = vor.u32 8388608, %v610_v29  ;;  %v403_v38 = vor.u32 8388608, %v402_v31 }
  0xe7   :  { %v1635_v40 = vadd.s32 4294967169, %v503_v36 }
  0xe8   :  { %v613_v35 = vadd.s32 1, %v1639_v32  ;;  %v405_v39 = vadd.s32 1, %v1631_v34  ;;  %v2030_v45 = vshll.u32 %v611_v37, 8  ;;  %v2034_v47 = vshll.u32 %v403_v38, 8 }
  0xe9   :  { %v2036_v48 = vadd.s32 1, %v1635_v40 }
  0xea   :  { %vm614_vm2 = vcmp.gt.s32.totalorder %v613_v35, 0  ;;  %vm406_vm3 = vcmp.gt.s32.totalorder %v405_v39, 0 }
  0xeb   :  { %v615_v41 = vsel %vm614_vm2, %v613_v35, 0  ;;  %v407_v44 = vsel %vm406_vm3, %v405_v39, 0  ;;  %vm510_vm13 = vcmp.gt.s32.totalorder %v2036_v48, 0 }
  0xec   :  { %v616_v42 = vshrl.u32 %v615_v41, 5  ;;  %v617_v43 = vand.u32 31, %v615_v41  ;;  %v2032_v46 = vshrl.u32 %v407_v44, 5  ;;  %v409_v54 = vand.u32 31, %v407_v44 }
  0xee   :  { %v618_v49 = vsub.s32 32, %v617_v43  ;;  %v620_v51 = vshll.u32 %v1929_v50, %v617_v43  ;;  %v623_v53 = vshll.u32 %v1930_v52, %v617_v43  ;;  %v626_v56 = vshll.u32 %v1931_v55, %v617_v43 }
  0xef   :  { %v629_v58 = vshll.u32 %v1932_v57, %v617_v43  ;;  %v632_v60 = vshll.u32 %v1933_v59, %v617_v43  ;;  %vm635_vm4 = vcmp.lt.s32.totalorder %v616_v42, 1  ;;  %vm636_vm5 = vcmp.lt.s32.totalorder %v616_v42, 2 }
  0xf0   :  { %v621_v61 = vshrl.u32 %v1930_v52, %v618_v49  ;;  %v624_v62 = vshrl.u32 %v1931_v55, %v618_v49  ;;  %v627_v63 = vshrl.u32 %v1932_v57, %v618_v49  ;;  %v619_v1 = vshrl.u32 %v1929_v50, %v618_v49 }
  0xf1   :  { %v630_v2 = vshrl.u32 %v1933_v59, %v618_v49  ;;  %v633_v5 = vshrl.u32 %v1934_v3, %v618_v49  ;;  %vm637_vm6 = vcmp.lt.s32.totalorder %v616_v42, 3  ;;  %v410_v9 = vsub.s32 32, %v409_v54 }
  0xf2   :  { %v622_v6 = vor.u32 %v621_v61, %v620_v51  ;;  %v625_v7 = vor.u32 %v624_v62, %v623_v53  ;;  %v628_v8 = vor.u32 %v627_v63, %v626_v56  ;;  %vm638_vm7 = vcmp.lt.s32.totalorder %v616_v42, 4 }
  0xf3   :  { %v631_v10 = vor.u32 %v630_v2, %v629_v58  ;;  %v634_v11 = vor.u32 %v633_v5, %v632_v60  ;;  %v412_v12 = vshll.u32 %v1929_v50, %v409_v54  ;;  %v415_v28 = vshll.u32 %v1930_v52, %v409_v54 }
  0xf4   :  { %v639_v15 = vsel %vm635_vm4, %v619_v1, %v622_v6  ;;  %v640_v17 = vsel %vm638_vm7, %v628_v8, 2102212464  ;;  %v643_v18 = vsel %vm635_vm4, %v622_v6, %v625_v7  ;;  %v647_v21 = vsel %vm635_vm4, %v625_v7, %v628_v8 }
  0xf5   :  { %v641_v22 = vsel %vm637_vm6, %v625_v7, %v640_v17  ;;  %v644_v24 = vsel %vm638_vm7, %v631_v10, 920167782  ;;  %v648_v27 = vsel %vm638_vm7, %v634_v11, 1326507024  ;;  %v411_v31 = vshrl.u32 %v1929_v50, %v410_v9 }
  0xf6   :  { %v645_v29 = vsel %vm637_vm6, %v628_v8, %v644_v24  ;;  %v649_v30 = vsel %vm637_vm6, %v631_v10, %v648_v27  ;;  %v413_v32 = vshrl.u32 %v1930_v52, %v410_v9  ;;  %v642_v33 = vsel %vm636_vm5, %v639_v15, %v641_v22 }
  0xf7   :  { %v646_v34 = vsel %vm636_vm5, %v643_v18, %v645_v29  ;;  %v650_v35 = vsel %vm636_vm5, %v647_v21, %v649_v30  ;;  %v416_v36 = vshrl.u32 %v1931_v55, %v410_v9  ;;  %v418_v44 = vshll.u32 %v1931_v55, %v409_v54 }
  0xf8   :  { %v2064_v37 = vmul.u32.u64.low %v2030_v45, %v650_v35  ;;  %v2065_v38 = vmul.u32.u64.high %v2030_v45, %v650_v35, %v2064_v37  ;;  %v2068_v39 = vmul.u32.u64.low %v2030_v45, %v646_v34  ;;  %v2069_v40 = vmul.u32.u64.high %v2030_v45, %v646_v34, %v2068_v39 }
  0xf9   :  { %v414_v41 = vor.u32 %v413_v32, %v412_v12  ;;  %v417_v43 = vor.u32 %v416_v36, %v415_v28  ;;  %v419_v49 = vshrl.u32 %v1932_v57, %v410_v9  ;;  %v421_v42 = vshll.u32 %v1932_v57, %v409_v54 }
  0xfa   :  { %v422_v51 = vshrl.u32 %v1933_v59, %v410_v9  ;;  %v424_v53 = vshll.u32 %v1933_v59, %v409_v54  ;;  %v425_v56 = vshrl.u32 %v1934_v3, %v410_v9  ;;  %v658_v58 = vmul.u32 %v2030_v45, %v642_v33 }
  0xfb   :  { %v420_v60 = vor.u32 %v419_v49, %v418_v44  ;;  %vm427_vm8 = vcmp.lt.s32.totalorder %v2032_v46, 1  ;;  %vm428_vm9 = vcmp.lt.s32.totalorder %v2032_v46, 2  ;;  %vm660_vm10 = vc.u32 %v2065_v38, %v2068_v39 }
  0xfc   :  { %v661_v61 = vadd.s32 1, %v2069_v40  ;;  %v423_v62 = vor.u32 %v422_v51, %v421_v42  ;;  %vm429_vm11 = vcmp.lt.s32.totalorder %v2032_v46, 3  ;;  %v426_v63 = vor.u32 %v425_v56, %v424_v53 }
  0xfd   :  { %vm430_vm12 = vcmp.lt.s32.totalorder %v2032_v46, 4  ;;  %v431_v54 = vsel %vm427_vm8, %v411_v31, %v414_v41  ;;  %v435_v1 = vsel %vm427_vm8, %v414_v41, %v417_v43  ;;  %v439_v6 = vsel %vm427_vm8, %v417_v43, %v420_v60  ;;  %v82_v31 = vld [vmem:[%s2659_s4 + $0x80] sm:$0xff]  ;;  %v83_v46 = vld [vmem:[%s2659_s4 + $0x88] sm:$0xff] }
  0xfe   :  { %v662_v45 = vsel %vm660_vm10, %v661_v61, %v2069_v40  ;;  %v432_v2 = vsel %vm430_vm12, %v420_v60, 2102212464  ;;  %v436_v5 = vsel %vm430_vm12, %v423_v62, 920167782  ;;  %v440_v10 = vsel %vm430_vm12, %v426_v63, 1326507024 }
  0xff   :  { %v663_v7 = vadd.s32 %v662_v45, %v658_v58  ;;  %v433_v8 = vsel %vm429_vm11, %v417_v43, %v432_v2  ;;  %v437_v9 = vsel %vm429_vm11, %v420_v60, %v436_v5  ;;  %v441_v15 = vsel %vm429_vm11, %v423_v62, %v440_v10 }
 0x100   :  { %v434_v11 = vsel %vm428_vm9, %v431_v54, %v433_v8  ;;  %v438_v12 = vsel %vm428_vm9, %v435_v1, %v437_v9  ;;  %v442_v18 = vsel %vm428_vm9, %v439_v6, %v441_v15  ;;  %v511_v28 = vsel %vm510_vm13, %v2036_v48, 0 }
 0x101   :  { %v664_v17 = vadd.s32 536870912, %v663_v7  ;;  %v2095_v21 = vmul.u32.u64.low %v2034_v47, %v438_v12  ;;  %v2096_v22 = vmul.u32.u64.high %v2034_v47, %v438_v12, %v2095_v21  ;;  %v513_v30 = vand.u32 31, %v511_v28 }
 0x102   :  { %v2100_v24 = vmul.u32.u64.low %v2034_v47, %v442_v18  ;;  %v2101_v27 = vmul.u32.u64.high %v2034_v47, %v442_v18, %v2100_v24  ;;  %v450_v32 = vmul.u32 %v2034_v47, %v434_v11  ;;  %v499_v33 = vand.u32 2147483647, %v2021_v25 }
 0x103   :  { %v2104_v29 = vshrl.u32 %v664_v17, 30  ;;  %v1793_v34 = vpack.c.bf16 %v83_v46, %v82_v31  ;;  %v453_v48 = vadd.s32 1, %v2096_v22  ;;  %v514_v36 = vsub.s32 32, %v513_v30 }
 0x104   :  { %vm452_vm14 = vc.u32 %v2101_v27, %v2095_v21  ;;  %v506_v43 = vand.u32 8388607, %v499_v33  ;;  %v516_v44 = vshll.u32 %v1929_v50, %v513_v30  ;;  %v519_v42 = vshll.u32 %v1930_v52, %v513_v30 }
 0x105   :  { %v666_v35 = vshll.u32 %v2104_v29, 30  ;;  %1794 = vmatprep.subr.bf16.mxu0 %v1793_v34  ;;  %v454_v40 = vsel %vm452_vm14, %v453_v48, %v2096_v22  ;;  %v517_v49 = vshrl.u32 %v1930_v52, %v514_v36  ;;  %v520_v53 = vshrl.u32 %v1931_v55, %v514_v36 }
 0x106   :  { %v455_v41 = vadd.s32 %v454_v40, %v450_v32  ;;  %v522_v56 = vshll.u32 %v1931_v55, %v513_v30  ;;  %v523_v58 = vshrl.u32 %v1932_v57, %v514_v36  ;;  %v512_v61 = vshrl.u32 %v511_v28, 5 }
 0x107   :  { %v667_v37 = vsub.s32 %v663_v7, %v666_v35  ;;  %v525_v62 = vshll.u32 %v1932_v57, %v513_v30  ;;  %v526_v63 = vshrl.u32 %v1933_v59, %v514_v36  ;;  %v507_v1 = vor.u32 8388608, %v506_v43 }
 0x108   :  { %v456_v51 = vadd.s32 536870912, %v455_v41  ;;  %v515_v2 = vshrl.u32 %v1929_v50, %v514_v36  ;;  %v528_v5 = vshll.u32 %v1933_v59, %v513_v30  ;;  %v529_v6 = vshrl.u32 %v1934_v3, %v514_v36 }
 0x109   :  { %v669_v47 = vsub.s32 0, %v667_v37  ;;  %v518_v8 = vor.u32 %v517_v49, %v516_v44  ;;  %v521_v9 = vor.u32 %v520_v53, %v519_v42  ;;  %v524_v10 = vor.u32 %v523_v58, %v522_v56  ;;  %v66_v42 = vld [vmem:[%s2659_s4] sm:$0xff]  ;;  %v67_v58 = vld [vmem:[%s2659_s4 + $0x8] sm:$0xff] }
 0x10a   :  { %v2129_v54 = vshrl.u32 %v456_v51, 30  ;;  %v527_v12 = vor.u32 %v526_v63, %v525_v62  ;;  %vm531_vm15 = vcmp.lt.s32.totalorder %v512_v61, 1  ;;  %vm534_vm2 = vcmp.lt.s32.totalorder %v512_v61, 4  ;;  %v85_v62 = vld [vmem:[%s2659_s4 + $0x98] sm:$0xff] }
 0x10b   :  { %v1640_v60 = vmin.u32 %v669_v47, %v667_v37  ;;  %v659_v15 = vadd.s32 %v2068_v39, %v2065_v38  ;;  %v536_v18 = vsel %vm534_vm2, %v524_v10, 2102212464  ;;  %v2140_v22 = vshll.u32 %v507_v1, 8 }
 0x10c   :  { %v458_v7 = vshll.u32 %v2129_v54, 30  ;;  %v530_v24 = vor.u32 %v529_v6, %v528_v5  ;;  %vm532_vm4 = vcmp.lt.s32.totalorder %v512_v61, 2  ;;  %vm533_vm5 = vcmp.lt.s32.totalorder %v512_v61, 3  ;;  %v69_v61 = vld [vmem:[%s2659_s4 + $0x18] sm:$0xff] }
 0x10d   :  { %v671_v45 = vclz %v1640_v60  ;;  %v535_v31 = vsel %vm531_vm15, %v515_v2, %v518_v8  ;;  %v539_v46 = vsel %vm531_vm15, %v518_v8, %v521_v9  ;;  %v537_v38 = vsel %vm533_vm5, %v521_v9, %v536_v18  ;;  %v84_v60 = vld [vmem:[%s2659_s4 + $0x90] sm:$0xff]  ;;  %v87_v18 = vld [vmem:[%s2659_s4 + $0xa8] sm:$0xff] }
 0x10e   :  { %v2137_v17 = vsub.s32 %v455_v41, %v458_v7  ;;  %v540_v39 = vsel %vm534_vm2, %v527_v12, 920167782  ;;  %v543_v40 = vsel %vm531_vm15, %v521_v9, %v524_v10  ;;  %v544_v44 = vsel %vm534_vm2, %v530_v24, 1326507024  ;;  %v68_v9 = vld [vmem:[%s2659_s4 + $0x10] sm:$0xff] }
 0x10f   :  { %v1641_v11 = vadd.s32 4294967294, %v671_v45  ;;  %v541_v36 = vsel %vm533_vm5, %v524_v10, %v540_v39  ;;  %v545_v56 = vsel %vm533_vm5, %v527_v12, %v544_v44  ;;  %v689_v6 = vsub.s32 4, %v2104_v29  ;;  %v70_v39 = vld [vmem:[%s2659_s4 + $0x20] sm:$0xff] }
 0x110   :  { %v461_v30 = vsub.s32 0, %v2137_v17  ;;  %v542_v47 = vsel %vm532_vm4, %v539_v46, %v541_v36  ;;  %v546_v1 = vsel %vm532_vm4, %v543_v40, %v545_v56  ;;  %v451_v10 = vadd.s32 %v2095_v21, %v2101_v27  ;;  %v48_v56 = vld [vmem:[%s2660_s3 + $0x80] sm:$0xff] }
 0x111   :  { %vm1642_vm3 = vcmp.lt.s32.totalorder %v1641_v11, 0  ;;  %v2168_v45 = vmul.u32.u64.low %v2140_v22, %v542_v47  ;;  %v2169_v2 = vmul.u32.u64.high %v2140_v22, %v542_v47, %v2168_v45  ;;  %v1797_v12 = vpack.c.bf16 %v85_v62, %v84_v60  ;;  %v79_v60 = vld [vmem:[%s2659_s4 + $0x68] sm:$0xff] }
 0x112   :  { %v674_v28 = vsel %vm1642_vm3, 0, %v1641_v11  ;;  %v1632_v48 = vmin.u32 %v461_v30, %v2137_v17  ;;  %v2174_v7 = vmul.u32.u64.low %v2140_v22, %v546_v1  ;;  %v2175_v8 = vmul.u32.u64.high %v2140_v22, %v546_v1, %v2174_v7  ;;  %v72_v1 = vld [vmem:[%s2659_s4 + $0x30] sm:$0xff] }
 0x113   :  { %v675_v32 = vsub.s32 32, %v674_v28  ;;  %v679_v34 = vsub.s32 4294967266, %v674_v28  ;;  %v676_v35 = vshll.u32 %v667_v37, %v674_v28  ;;  %v538_v37 = vsel %vm532_vm4, %v535_v31, %v537_v38  ;;  %v91_v7 = vld [vmem:[%s2659_s4 + $0xc8] sm:$0xff] }
 0x114   :  { %v463_v49 = vclz %v1632_v48  ;;  %v1795_v11 = vpack.c.bf16 %v67_v58, %v66_v42  ;;  %v554_v31 = vmul.u32 %v2140_v22, %v538_v37  ;;  %v557_v21 = vadd.s32 1, %v2169_v2  ;;  %v71_v22 = vld [vmem:[%s2659_s4 + $0x28] sm:$0xff] }
 0x115   :  { %v677_v41 = vshrl.u32 %v659_v15, %v675_v32  ;;  %v680_v43 = vadd.s32 127, %v679_v34  ;;  %v86_v15 = vld [vmem:[%s2659_s4 + $0xa0] sm:$0xff]  ;;  %v1799_v27 = vpack.c.bf16 %v69_v61, %v68_v9  ;;  %vm556_vm7 = vc.u32 %v2175_v8, %v2168_v45  ;;  %v49_v58 = vld [vmem:[%s2660_s3 + $0x88] sm:$0xff] }
 0x116   :  { %v1633_v63 = vadd.s32 4294967294, %v463_v49  ;;  %1796 = vmatpush3.bf16.msra.mxu0 %v1795_v11  ;;  %v1801_v38 = vpack.c.bf16 %v87_v18, %v86_v15  ;;  %v558_v40 = vsel %vm556_vm7, %v557_v21, %v2169_v2  ;;  %vm605_vm8 = vcmp.lt.s32.totalorder %v2015_v19, 0  ;;  %v99_v49 = vld [vmem:[%s2659_s4 + $0x108] sm:$0xff]  ;;  %v73_v2 = vld [vmem:[%s2659_s4 + $0x38] sm:$0xff]  ;;  %v92_v21 = vld [vmem:[%s2659_s4 + $0xd0] sm:$0xff] }
 0x117   :  { %v678_v51 = vor.u32 %v677_v41, %v676_v35  ;;  %v681_v53 = vshll.u32 %v680_v43, 23  ;;  %1798 = vmatprep.subr.bf16.mxu0 %v1797_v12  ;;  %v88_v41 = vld [vmem:[%s2659_s4 + $0xb0] sm:$0xff]  ;;  %v89_v43 = vld [vmem:[%s2659_s4 + $0xb8] sm:$0xff]  ;;  %v559_v44 = vadd.s32 %v558_v40, %v554_v31  ;;  %v690_v42 = vsel %vm605_vm8, %v689_v6, %v2104_v29  ;;  %v90_v6 = vld [vmem:[%s2659_s4 + $0xc0] sm:$0xff] }
 0x118   :  { %vm1634_vm6 = vcmp.lt.s32.totalorder %v1633_v63, 0  ;;  %v1803_v37 = vpack.c.bf16 %v71_v22, %v70_v39  ;;  %vm2225_vm9 = vcmp.le.f32.partialorder %v603_v23, 0.7853982  ;;  %v1828_v11 = vpack.c.bf16 %v49_v58, %v48_v56  ;;  %v74_v31 = vld [vmem:[%s2659_s4 + $0x40] sm:$0xff]  ;;  %v76_v40 = vld [vmem:[%s2659_s4 + $0x50] sm:$0xff] }
 0x119   :  { %v682_v5 = vor.u32 4788187, %v681_v53  ;;  %v685_v28 = vcvt.s32.f32 %v678_v51  ;;  %v466_v30 = vsel %vm1634_vm6, 0, %v1633_v63  ;;  %v560_v29 = vadd.s32 536870912, %v559_v44  ;;  %v78_v58 = vld [vmem:[%s2659_s4 + $0x60] sm:$0xff] }
 0x11a   :  { %v467_v46 = vsub.s32 32, %v466_v30  ;;  %v471_v32 = vsub.s32 4294967266, %v466_v30  ;;  %v468_v35 = vshll.u32 %v2137_v17, %v466_v30  ;;  %v98_v17 = vld [vmem:[%s2659_s4 + $0x100] sm:$0xff]  ;;  %1800 = vmatpush3.bf16.msra.mxu0 %v1799_v27  ;;  %v1805_v63 = vpack.c.bf16 %v89_v43, %v88_v41  ;;  %v93_v27 = vld [vmem:[%s2659_s4 + $0xd8] sm:$0xff] }
 0x11b   :  { %v683_v24 = vand.u32 2147483647, %v682_v5  ;;  %1802 = vmatprep.subr.bf16.mxu0 %v1801_v38  ;;  %v1826_v9 = vpack.c.bf16 %v99_v49, %v98_v17  ;;  %v692_v61 = vsel %vm2225_vm9, 0, %v690_v42  ;;  %v1807_v18 = vpack.c.bf16 %v73_v2, %v72_v1  ;;  %v77_v41 = vld [vmem:[%s2659_s4 + $0x58] sm:$0xff] }
 0x11c   :  { %v469_v48 = vshrl.u32 %v451_v10, %v467_v46  ;;  %v472_v36 = vadd.s32 127, %v471_v32  ;;  %v2246_v10 = vshrl.u32 %v560_v29, 30  ;;  %v1809_v30 = vpack.c.bf16 %v91_v7, %v90_v6  ;;  %v75_v46 = vld [vmem:[%s2659_s4 + $0x48] sm:$0xff]  ;;  %v97_v1 = vld [vmem:[%s2659_s4 + $0xf8] sm:$0xff] }
 0x11d   :  { %v686_v34 = vmul.f32 %v685_v28, %v683_v24  ;;  %1827 = vmatpush3.bf16.msra.mxu1 %v1826_v9  ;;  %v481_v24 = vsub.s32 4, %v2129_v54  ;;  %vm397_vm10 = vcmp.lt.s32.totalorder %v2017_v20, 0  ;;  %v1811_v22 = vpack.c.bf16 %v75_v46, %v74_v31 }
 0x11e   :  { %v470_v51 = vor.u32 %v469_v48, %v468_v35  ;;  %v473_v53 = vshll.u32 %v472_v36, 23  ;;  %1804 = vmatpush3.bf16.msra.mxu0 %v1803_v37  ;;  %v562_v28 = vshll.u32 %v2246_v10, 30  ;;  %1829 = vmatprep.subr.bf16.mxu1 %v1828_v11  ;;  %v1813_v36 = vpack.c.bf16 %v93_v27, %v92_v21  ;;  %v80_v11 = vld [vmem:[%s2659_s4 + $0x70] sm:$0xff] }
 0x11f   :  { %v687_v47 = vxor.u32 2147483648, %v686_v34  ;;  %1806 = vmatprep.subr.bf16.mxu0 %v1805_v63  ;;  %v482_v35 = vsel %vm397_vm10, %v481_v24, %v2129_v54  ;;  %vm2275_vm11 = vcmp.le.f32.partialorder %v395_v26, 0.7853982  ;;  %v94_v54 = vld [vmem:[%s2659_s4 + $0xe0] sm:$0xff]  ;;  %v96_v63 = vld [vmem:[%s2659_s4 + $0xf0] sm:$0xff]  ;;  %v1819_v7 = vpack.c.bf16 %v79_v60, %v78_v58 }
 0x120   :  { %v474_v23 = vor.u32 4788187, %v473_v53  ;;  %v477_v15 = vcvt.s32.f32 %v470_v51  ;;  %v2262_v38 = vsub.s32 %v559_v44, %v562_v28  ;;  %v95_v44 = vld [vmem:[%s2659_s4 + $0xe8] sm:$0xff]  ;;  %v484_v26 = vsel %vm2275_vm11, 0, %v482_v35 }
 0x121   :  { %v688_v62 = vsel %vm605_vm8, %v687_v47, %v686_v34  ;;  %v696_v34 = vadd.s32 3, %v692_v61  ;;  %v1815_v51 = vpack.c.bf16 %v77_v41, %v76_v40  ;;  %v1817_v56 = vpack.c.bf16 %v95_v44, %v94_v54 }
 0x122   :  { %v691_v5 = vsel %vm2225_vm9, %v2015_v19, %v688_v62  ;;  %v475_v12 = vand.u32 2147483647, %v474_v23  ;;  %1808 = vmatpush3.bf16.msra.mxu0 %v1807_v18  ;;  %v565_v48 = vsub.s32 0, %v2262_v38  ;;  %v1821_v61 = vpack.c.bf16 %v97_v1, %v96_v63 }
 0x123   :  { %1896 = vcosq.f32 %v691_v5  ;;  %1810 = vmatprep.subr.bf16.mxu0 %v1809_v30  ;;  %v697_v17 = vand.u32 3, %v696_v34  ;;  %vm695_vm2 = vweird.f32 %v2015_v19  ;;  %v555_v21 = vadd.s32 %v2168_v45, %v2175_v8 }
 0x124   :  { %1898 = vsinq.f32 %v691_v5  ;;  %v478_v32 = vmul.f32 %v477_v15, %v475_v12  ;;  %v1636_v42 = vmin.u32 %v565_v48, %v2262_v38  ;;  %v488_v5 = vadd.s32 3, %v484_v26  ;;  %v81_v12 = vld [vmem:[%s2659_s4 + $0x78] sm:$0xff] }
 0x125   :  { %vm702_vm12 = vcmp.eq.s32.totalorder %v697_v17, 2  ;;  %vm699_vm13 = vcmp.eq.s32.totalorder %v697_v17, 0  ;;  %vm698_vm14 = vcmp.lt.s32.totalorder %v697_v17, 2  ;;  %v1823_v27 = vpack.c.bf16 %v81_v12, %v80_v11 }
 0x126   :  { %v479_v39 = vxor.u32 2147483648, %v478_v32  ;;  %1812 = vmatpush3.bf16.msra.mxu0 %v1811_v22  ;;  %v567_v37 = vclz %v1636_v42  ;;  %v489_v28 = vand.u32 3, %v488_v5  ;;  %vm487_vm6 = vweird.f32 %v2017_v20 }
 0x127   :  { %1814 = vmatprep.subr.bf16.mxu0 %v1813_v36  ;;  %vm501_vm8 = vcmp.lt.s32.totalorder %v2021_v25, 0 }
 0x128   :  { %v480_v47 = vsel %vm397_vm10, %v479_v39, %v478_v32  ;;  %v1637_v23 = vadd.s32 4294967294, %v567_v37  ;;  %vm494_vm3 = vcmp.eq.s32.totalorder %v489_v28, 2  ;;  %vm491_vm4 = vcmp.eq.s32.totalorder %v489_v28, 0 }
 0x129   :  { %v483_v49 = vsel %vm2275_vm11, %v2017_v20, %v480_v47  ;;  %vm490_vm5 = vcmp.lt.s32.totalorder %v489_v28, 2 }
 0x12a   :  { %1900 = vcosq.f32 %v483_v49  ;;  %1816 = vmatpush3.bf16.msra.mxu0 %v1815_v51  ;;  %vm1638_vm15 = vcmp.lt.s32.totalorder %v1637_v23, 0 }
 0x12b   :  { %1902 = vsinq.f32 %v483_v49  ;;  %1818 = vmatprep.subr.bf16.mxu0 %v1817_v56  ;;  %v570_v18 = vsel %vm1638_vm15, 0, %v1637_v23 }
 0x12c   :  { %v571_v30 = vsub.s32 32, %v570_v18  ;;  %v575_v31 = vsub.s32 4294967266, %v570_v18  ;;  %v572_v47 = vshll.u32 %v2262_v38, %v570_v18 }
 0x12d   :  { %v1897_v53 = vpop.eup %1896 }
 0x12e   :  { %v1899_v62 = vpop.eup %1898  ;;  %v703_v29 = vxor.u32 2147483648, %v1897_v53  ;;  %1820 = vmatpush3.bf16.msra.mxu0 %v1819_v7  ;;  %v576_v34 = vadd.s32 127, %v575_v31  ;;  %v573_v22 = vshrl.u32 %v555_v21, %v571_v30 }
 0x12f   :  { %v700_v2 = vxor.u32 2147483648, %v1899_v62  ;;  %1822 = vmatprep.subr.bf16.mxu0 %v1821_v61 }
 0x130   :  { %v704_v6 = vsel %vm702_vm12, %v703_v29, %v1899_v62  ;;  %v577_v40 = vshll.u32 %v576_v34, 23  ;;  %v574_v17 = vor.u32 %v573_v22, %v572_v47  ;;  %v585_v62 = vsub.s32 4, %v2246_v10 }
 0x131   :  { %v701_v9 = vsel %vm699_vm13, %v1897_v53, %v700_v2 }
 0x132   :  { %v705_v15 = vsel %vm698_vm14, %v701_v9, %v704_v6  ;;  %1824 = vmatpush3.bf16.msra.mxu0 %v1823_v27  ;;  %v578_v8 = vor.u32 4788187, %v577_v40  ;;  %v581_v58 = vcvt.s32.f32 %v574_v17  ;;  %vm2359_vm14 = vcmp.le.f32.partialorder %v499_v33, 0.7853982 }
 0x133   :  { %v2310_v24 = vsel %vm695_vm2, nan, %v705_v15  ;;  %1860 = vmatprep.subr.bf16.mxu0 %v1926_v0 }
 0x134   :  { %v913_v46 = vand.u32 2147483647, %v2310_v24  ;;  %v916_v32 = vand.u32 2139095040, %v2310_v24  ;;  %v1901_v39 = vpop.eup %1900  ;;  %v579_v51 = vand.u32 2147483647, %v578_v8 }
 0x135   :  { %v1903_v35 = vpop.eup %1902  ;;  %v495_v36 = vxor.u32 2147483648, %v1901_v39 }
 0x136   :  { %v917_v19 = vshrl.u32 %v916_v32, 23  ;;  %v920_v48 = vand.u32 8388607, %v913_v46  ;;  %v492_v43 = vxor.u32 2147483648, %v1903_v35  ;;  %v582_v1 = vmul.f32 %v581_v58, %v579_v51 }
 0x137   :  { %v496_v45 = vsel %vm494_vm3, %v495_v36, %v1903_v35 }
 0x138   :  { %v1651_v41 = vadd.s32 4294967169, %v917_v19  ;;  %v493_v44 = vsel %vm491_vm4, %v1901_v39, %v492_v43  ;;  %v921_v49 = vor.u32 8388608, %v920_v48  ;;  %v583_v36 = vxor.u32 2147483648, %v582_v1 }
 0x139   :  { %v497_v42 = vsel %vm490_vm5, %v493_v44, %v496_v45 }
 0x13a   :  { %v923_v54 = vadd.s32 1, %v1651_v41  ;;  %v2321_v26 = vsel %vm487_vm6, nan, %v497_v42  ;;  %v2325_v60 = vshll.u32 %v921_v49, 8 }
 0x13b   :  { %v707_v38 = vand.u32 2147483647, %v2321_v26  ;;  %v710_v37 = vand.u32 2139095040, %v2321_v26 }
 0x13c   :  { %vm924_vm7 = vcmp.gt.s32.totalorder %v923_v54, 0 }
 0x13d   :  { %v925_v53 = vsel %vm924_vm7, %v923_v54, 0  ;;  %v711_v63 = vshrl.u32 %v710_v37, 23  ;;  %v714_v20 = vand.u32 8388607, %v707_v38 }
 0x13e   :  { %v927_v56 = vand.u32 31, %v925_v53  ;;  %v926_v0 = vshrl.u32 %v925_v53, 5 }
 0x13f   :  { %v1643_v31 = vadd.s32 4294967169, %v711_v63  ;;  %v715_v54 = vor.u32 8388608, %v714_v20 }
 0x140   :  { %v928_v29 = vsub.s32 32, %v927_v56  ;;  %v930_v2 = vshll.u32 %v1929_v50, %v927_v56  ;;  %v933_v5 = vshll.u32 %v1930_v52, %v927_v56  ;;  %v936_v23 = vshll.u32 %v1931_v55, %v927_v56 }
 0x141   :  { %v939_v6 = vshll.u32 %v1932_v57, %v927_v56  ;;  %v942_v11 = vshll.u32 %v1933_v59, %v927_v56  ;;  %vm945_vm9 = vcmp.lt.s32.totalorder %v926_v0, 1  ;;  %vm946_vm10 = vcmp.lt.s32.totalorder %v926_v0, 2 }
 0x142   :  { %v931_v7 = vshrl.u32 %v1930_v52, %v928_v29  ;;  %v934_v9 = vshrl.u32 %v1931_v55, %v928_v29  ;;  %v937_v61 = vshrl.u32 %v1932_v57, %v928_v29  ;;  %v940_v12 = vshrl.u32 %v1933_v59, %v928_v29 }
 0x143   :  { %v943_v15 = vshrl.u32 %v1934_v3, %v928_v29  ;;  %v929_v32 = vshrl.u32 %v1929_v50, %v928_v29  ;;  %vm948_vm11 = vcmp.lt.s32.totalorder %v926_v0, 4  ;;  %vm947_vm12 = vcmp.lt.s32.totalorder %v926_v0, 3 }
 0x144   :  { %v932_v18 = vor.u32 %v931_v7, %v930_v2  ;;  %v935_v28 = vor.u32 %v934_v9, %v933_v5  ;;  %v938_v30 = vor.u32 %v937_v61, %v936_v23  ;;  %v941_v21 = vor.u32 %v940_v12, %v939_v6 }
 0x145   :  { %v944_v27 = vor.u32 %v943_v15, %v942_v11  ;;  %v717_v48 = vadd.s32 1, %v1643_v31  ;;  %v584_v56 = vsel %vm501_vm8, %v583_v36, %v582_v1  ;;  %v2368_v63 = vshll.u32 %v715_v54, 8 }
 0x146   :  { %v950_v34 = vsel %vm948_vm11, %v938_v30, 2102212464  ;;  %v953_v39 = vsel %vm945_vm9, %v932_v18, %v935_v28  ;;  %v957_v19 = vsel %vm945_vm9, %v935_v28, %v938_v30  ;;  %v954_v22 = vsel %vm948_vm11, %v941_v21, 920167782 }
 0x147   :  { %v958_v35 = vsel %vm948_vm11, %v944_v27, 1326507024  ;;  %v949_v40 = vsel %vm945_vm9, %v929_v32, %v932_v18  ;;  %v951_v41 = vsel %vm947_vm12, %v935_v28, %v950_v34  ;;  %v955_v43 = vsel %vm947_vm12, %v938_v30, %v954_v22 }
 0x148   :  { %v959_v47 = vsel %vm947_vm12, %v941_v21, %v958_v35  ;;  %v956_v45 = vsel %vm946_vm10, %v953_v39, %v955_v43  ;;  %vm718_vm13 = vcmp.gt.s32.totalorder %v717_v48, 0  ;;  %v952_v51 = vsel %vm946_vm10, %v949_v40, %v951_v41 }
 0x149   :  { %v960_v8 = vsel %vm946_vm10, %v957_v19, %v959_v47  ;;  %v2352_v49 = vmul.u32.u64.low %v2325_v60, %v956_v45  ;;  %v2353_v42 = vmul.u32.u64.high %v2325_v60, %v956_v45, %v2352_v49  ;;  %v719_v53 = vsel %vm718_vm13, %v717_v48, 0 }
 0x14a   :  { %v2348_v44 = vmul.u32.u64.low %v2325_v60, %v960_v8  ;;  %v2349_v17 = vmul.u32.u64.high %v2325_v60, %v960_v8, %v2348_v44  ;;  %v721_v58 = vand.u32 31, %v719_v53  ;;  %v587_v29 = vsel %vm2359_vm14, %v2021_v25, %v584_v56 }
 0x14b   :  { %v586_v0 = vsel %vm501_vm8, %v585_v62, %v2246_v10  ;;  %v968_v20 = vmul.u32 %v2325_v60, %v952_v51  ;;  %v971_v33 = vadd.s32 1, %v2353_v42  ;;  %v720_v1 = vshrl.u32 %v719_v53, 5 }
 0x14c   :  { %vm970_vm15 = vc.u32 %v2349_v17, %v2352_v49  ;;  %v722_v2 = vsub.s32 32, %v721_v58  ;;  %v724_v5 = vshll.u32 %v1929_v50, %v721_v58  ;;  %v727_v23 = vshll.u32 %v1930_v52, %v721_v58 }
 0x14d   :  { %1904 = vcosq.f32 %v587_v29  ;;  %v972_v6 = vsel %vm970_vm15, %v971_v33, %v2353_v42  ;;  %v730_v60 = vshll.u32 %v1931_v55, %v721_v58  ;;  %v733_v61 = vshll.u32 %v1932_v57, %v721_v58 }
 0x14e   :  { %v725_v7 = vshrl.u32 %v1930_v52, %v722_v2  ;;  %v728_v10 = vshrl.u32 %v1931_v55, %v722_v2  ;;  %v973_v62 = vadd.s32 %v972_v6, %v968_v20  ;;  %v731_v9 = vshrl.u32 %v1932_v57, %v722_v2 }
 0x14f   :  { %v734_v11 = vshrl.u32 %v1933_v59, %v722_v2  ;;  %v736_v18 = vshll.u32 %v1933_v59, %v721_v58  ;;  %v737_v28 = vshrl.u32 %v1934_v3, %v722_v2  ;;  %v723_v31 = vshrl.u32 %v1929_v50, %v722_v2 }
 0x150   :  { %v726_v12 = vor.u32 %v725_v7, %v724_v5  ;;  %v729_v15 = vor.u32 %v728_v10, %v727_v23  ;;  %v974_v30 = vadd.s32 536870912, %v973_v62  ;;  %v732_v32 = vor.u32 %v731_v9, %v730_v60 }
 0x151   :  { %v735_v21 = vor.u32 %v734_v11, %v733_v61  ;;  %v738_v27 = vor.u32 %v737_v28, %v736_v18  ;;  %vm739_vm2 = vcmp.lt.s32.totalorder %v720_v1, 1  ;;  %vm741_vm3 = vcmp.lt.s32.totalorder %v720_v1, 3 }
 0x152   :  { %vm742_vm4 = vcmp.lt.s32.totalorder %v720_v1, 4  ;;  %v2389_v34 = vshrl.u32 %v974_v30, 30  ;;  %v747_v19 = vsel %vm739_vm2, %v726_v12, %v729_v15  ;;  %vm740_vm5 = vcmp.lt.s32.totalorder %v720_v1, 2 }
 0x153   :  { %v744_v39 = vsel %vm742_vm4, %v732_v32, 2102212464  ;;  %v748_v22 = vsel %vm742_vm4, %v735_v21, 920167782  ;;  %v751_v48 = vsel %vm739_vm2, %v729_v15, %v732_v32  ;;  %v752_v36 = vsel %vm742_vm4, %v738_v27, 1326507024 }
 0x154   :  { %v749_v35 = vsel %vm741_vm3, %v732_v32, %v748_v22  ;;  %v976_v40 = vshll.u32 %v2389_v34, 30  ;;  %v743_v41 = vsel %vm739_vm2, %v723_v31, %v726_v12  ;;  %v588_v47 = vsel %vm2359_vm14, 0, %v586_v0 }
 0x155   :  { %v750_v43 = vsel %vm740_vm5, %v747_v19, %v749_v35  ;;  %v745_v45 = vsel %vm741_vm3, %v729_v15, %v744_v39  ;;  %v753_v8 = vsel %vm741_vm3, %v735_v21, %v752_v36  ;;  %1906 = vsinq.f32 %v587_v29 }
 0x156   :  { %v2396_v54 = vmul.u32.u64.low %v2368_v63, %v750_v43  ;;  %v2397_v44 = vmul.u32.u64.high %v2368_v63, %v750_v43, %v2396_v54  ;;  %v977_v51 = vsub.s32 %v973_v62, %v976_v40  ;;  %v754_v53 = vsel %vm740_vm5, %v751_v48, %v753_v8 }
 0x157   :  { %v1905_v42 = vpop.eup %1904  ;;  %v2402_v56 = vmul.u32.u64.low %v2368_v63, %v754_v53  ;;  %v2403_v58 = vmul.u32.u64.high %v2368_v63, %v754_v53, %v2402_v56  ;;  %v746_v37 = vsel %vm740_vm5, %v743_v41, %v745_v45  ;;  %v592_v0 = vadd.s32 3, %v588_v47 }
 0x158   :  { %v979_v20 = vsub.s32 0, %v977_v51  ;;  %v765_v33 = vadd.s32 1, %v2397_v44  ;;  %v762_v5 = vmul.u32 %v2368_v63, %v746_v37  ;;  %v599_v10 = vxor.u32 2147483648, %v1905_v42 }
 0x159   :  { %vm764_vm6 = vc.u32 %v2403_v58, %v2396_v54  ;;  %v593_v29 = vand.u32 3, %v592_v0  ;;  %v969_v63 = vadd.s32 %v2352_v49, %v2349_v17  ;;  %vm591_vm10 = vweird.f32 %v2021_v25 }
 0x15a   :  { %v1652_v2 = vmin.u32 %v979_v20, %v977_v51  ;;  %v766_v6 = vsel %vm764_vm6, %v765_v33, %v2397_v44  ;;  %v999_v17 = vsub.s32 4, %v2389_v34  ;;  %v242_v25 = vadd.f32 0.0029017648, %v2009_v13 }
 0x15b   :  { %v767_v7 = vadd.s32 %v766_v6, %v762_v5  ;;  %vm598_vm8 = vcmp.eq.s32.totalorder %v593_v29, 2  ;;  %vm595_vm9 = vcmp.eq.s32.totalorder %v593_v29, 0  ;;  %vm594_vm11 = vcmp.lt.s32.totalorder %v593_v29, 2 }
 0x15c   :  { %v981_v23 = vclz %v1652_v2  ;;  %vm915_vm12 = vcmp.lt.s32.totalorder %v2310_v24, 0  ;;  %vm2432_vm13 = vcmp.le.f32.partialorder %v913_v46, 0.7853982  ;;  %v249_v53 = vmul.f32 1.442695, %v242_v25  ;;  %v2444_v46 = vld [vmem:[%s2660_s3] sm:$0xff] }
 0x15d   :  { %v768_v62 = vadd.s32 536870912, %v767_v7  ;;  %v1000_v45 = vsel %vm915_vm12, %v999_v17, %v2389_v34  ;;  %v2449_v2 = vld [vmem:[%s2660_s3 + $0x8] sm:$0xff]  ;;  %vm1005_vm3 = vweird.f32 %v2310_v24 }
 0x15e   :  { %v1653_v60 = vadd.s32 4294967294, %v981_v23  ;;  %v1002_v56 = vsel %vm2432_vm13, 0, %v1000_v45  ;;  %1908 = vpow2.f32 %v249_v53 }
 0x15f   :  { %v1907_v9 = vpop.eup %1906  ;;  %v2411_v61 = vshrl.u32 %v768_v62, 30  ;;  %v1320_v33 = vadd.s32 3, %v1002_v56 }
 0x160   :  { %vm1654_vm7 = vcmp.lt.s32.totalorder %v1653_v60, 0  ;;  %v596_v11 = vxor.u32 2147483648, %v1907_v9  ;;  %v600_v12 = vsel %vm598_vm8, %v599_v10, %v1907_v9  ;;  %v2458_v9 = vand.u32 3, %v1002_v56 }
 0x161   :  { %v984_v1 = vsel %vm1654_vm7, 0, %v1653_v60  ;;  %v770_v28 = vshll.u32 %v2411_v61, 30  ;;  %v1321_v10 = vand.u32 3, %v1320_v33 }
 0x162   :  { %v985_v15 = vsub.s32 32, %v984_v1  ;;  %v989_v18 = vsub.s32 4294967266, %v984_v1  ;;  %v597_v30 = vsel %vm595_vm9, %v1905_v42, %v596_v11  ;;  %v986_v31 = vshll.u32 %v977_v51, %v984_v1 }
 0x163   :  { %v601_v27 = vsel %vm594_vm11, %v597_v30, %v600_v12  ;;  %v2417_v39 = vsub.s32 %v767_v7, %v770_v28  ;;  %v1830_v7 = vpack.c.bf16 %v2449_v2, %v2444_v46  ;;  %vm1008_vm2 = vcmp.eq.s32.totalorder %v2458_v9, 0 }
 0x164   :  { %v987_v32 = vshrl.u32 %v969_v63, %v985_v15  ;;  %v990_v21 = vadd.s32 127, %v989_v18  ;;  %v2419_v19 = vsel %vm591_vm10, nan, %v601_v27  ;;  %vm1326_vm4 = vcmp.eq.s32.totalorder %v1321_v10, 2 }
 0x165   :  { %v773_v49 = vsub.s32 0, %v2417_v39  ;;  %v813_v48 = vand.u32 2139095040, %v2419_v19  ;;  %v810_v51 = vand.u32 2147483647, %v2419_v19  ;;  %vm1007_vm6 = vcmp.lt.s32.totalorder %v2458_v9, 2 }
 0x166   :  { %v988_v22 = vor.u32 %v987_v32, %v986_v31  ;;  %v991_v35 = vshll.u32 %v990_v21, 23  ;;  %vm1323_vm10 = vcmp.eq.s32.totalorder %v1321_v10, 0  ;;  %vm1011_vm11 = vcmp.eq.s32.totalorder %v2458_v9, 2  ;;  %v52_v9 = vld [vmem:[%s2660_s3 + $0xa0] sm:$0xff] }
 0x167   :  { %v1644_v40 = vmin.u32 %v773_v49, %v2417_v39  ;;  %v814_v41 = vshrl.u32 %v813_v48, 23  ;;  %v817_v5 = vand.u32 8388607, %v810_v51 }
 0x168   :  { %v992_v36 = vor.u32 4788187, %v991_v35  ;;  %v995_v47 = vcvt.s32.f32 %v988_v22 }
 0x169   :  { %v775_v8 = vclz %v1644_v40  ;;  %v1647_v44 = vadd.s32 4294967169, %v814_v41  ;;  %v818_v60 = vor.u32 8388608, %v817_v5 }
 0x16a   :  { %v993_v43 = vand.u32 2147483647, %v992_v36 }
 0x16b   :  { %v820_v20 = vadd.s32 1, %v1647_v44  ;;  %v1645_v0 = vadd.s32 4294967294, %v775_v8  ;;  %v858_v49 = vshll.u32 %v818_v60, 8 }
 0x16c   :  { %v996_v13 = vmul.f32 %v995_v47, %v993_v43 }
 0x16d   :  { %vm821_vm14 = vcmp.gt.s32.totalorder %v820_v20, 0  ;;  %vm1646_vm15 = vcmp.lt.s32.totalorder %v1645_v0, 0 }
 0x16e   :  { %v997_v37 = vxor.u32 2147483648, %v996_v13  ;;  %v822_v23 = vsel %vm821_vm14, %v820_v20, 0  ;;  %v2460_v1 = vsel %vm1646_vm15, 0, %v1645_v0  ;;  %vm709_vm15 = vcmp.lt.s32.totalorder %v2321_v26, 0 }
 0x16f   :  { %v824_v29 = vand.u32 31, %v822_v23  ;;  %v823_v11 = vshrl.u32 %v822_v23, 5  ;;  %v50_v23 = vld [vmem:[%s2660_s3 + $0x90] sm:$0xff]  ;;  %v780_v46 = vshll.u32 %v2417_v39, %v2460_v1  ;;  %v56_v39 = vld [vmem:[%s2660_s3 + $0xc0] sm:$0xff] }
 0x170   :  { %v998_v34 = vsel %vm915_vm12, %v997_v37, %v996_v13  ;;  %vm1322_vm12 = vcmp.lt.s32.totalorder %v1321_v10, 2 }
 0x171   :  { %v1001_v6 = vsel %vm2432_vm13, %v2310_v24, %v998_v34  ;;  %v825_v62 = vsub.s32 32, %v824_v29  ;;  %v827_v12 = vshll.u32 %v1929_v50, %v824_v29  ;;  %v830_v63 = vshll.u32 %v1930_v52, %v824_v29 }
 0x172   :  { %1910 = vcosq.f32 %v1001_v6  ;;  %v833_v28 = vshll.u32 %v1931_v55, %v824_v29  ;;  %v836_v31 = vshll.u32 %v1932_v57, %v824_v29  ;;  %v839_v21 = vshll.u32 %v1933_v59, %v824_v29 }
 0x173   :  { %1912 = vsinq.f32 %v1001_v6  ;;  %v828_v15 = vshrl.u32 %v1930_v52, %v825_v62  ;;  %v831_v18 = vshrl.u32 %v1931_v55, %v825_v62  ;;  %v834_v30 = vshrl.u32 %v1932_v57, %v825_v62  ;;  %v51_v6 = vld [vmem:[%s2660_s3 + $0x98] sm:$0xff] }
 0x174   :  { %v837_v32 = vshrl.u32 %v1933_v59, %v825_v62  ;;  %v840_v27 = vshrl.u32 %v1934_v3, %v825_v62  ;;  %vm842_vm5 = vcmp.lt.s32.totalorder %v823_v11, 1  ;;  %v783_v57 = vsub.s32 4294967266, %v2460_v1  ;;  %v1909_v3 = vpop.eup %1908 }
 0x175   :  { %v829_v22 = vor.u32 %v828_v15, %v827_v12  ;;  %v832_v35 = vor.u32 %v831_v18, %v830_v63  ;;  %v835_v17 = vor.u32 %v834_v30, %v833_v28  ;;  %vm845_vm7 = vcmp.lt.s32.totalorder %v823_v11, 4 }
 0x176   :  { %v838_v52 = vor.u32 %v837_v32, %v836_v31  ;;  %v841_v55 = vor.u32 %v840_v27, %v839_v21  ;;  %v826_v48 = vshrl.u32 %v1929_v50, %v825_v62  ;;  %vm844_vm8 = vcmp.lt.s32.totalorder %v823_v11, 3  ;;  %v35_v31 = vld [vmem:[%s2660_s3 + $0x18] sm:$0xff] }
 0x177   :  { %v850_v59 = vsel %vm842_vm5, %v829_v22, %v832_v35  ;;  %v847_v36 = vsel %vm845_vm7, %v835_v17, 2102212464  ;;  %vm843_vm9 = vcmp.lt.s32.totalorder %v823_v11, 2  ;;  %v854_v43 = vsel %vm842_vm5, %v832_v35, %v835_v17  ;;  %v34_v11 = vld [vmem:[%s2660_s3 + $0x10] sm:$0xff] }
 0x178   :  { %v851_v25 = vsel %vm845_vm7, %v838_v52, 920167782  ;;  %v855_v47 = vsel %vm845_vm7, %v841_v55, 1326507024  ;;  %v846_v44 = vsel %vm842_vm5, %v826_v48, %v829_v22  ;;  %v848_v42 = vsel %vm844_vm8, %v832_v35, %v847_v36  ;;  %v53_v22 = vld [vmem:[%s2660_s3 + $0xa8] sm:$0xff] }
 0x179   :  { %v852_v41 = vsel %vm844_vm8, %v835_v17, %v851_v25  ;;  %v856_v56 = vsel %vm844_vm8, %v838_v52, %v855_v47  ;;  %v849_v60 = vsel %vm843_vm9, %v846_v44, %v848_v42  ;;  %v784_v10 = vadd.s32 127, %v783_v57 }
 0x17a   :  { %v853_v13 = vsel %vm843_vm9, %v850_v59, %v852_v41  ;;  %v857_v0 = vsel %vm843_vm9, %v854_v43, %v856_v56  ;;  %v1832_v30 = vpack.c.bf16 %v51_v6, %v50_v23  ;;  %v779_v21 = vsub.s32 32, %v2460_v1  ;;  %v38_v41 = vld [vmem:[%s2660_s3 + $0x30] sm:$0xff]  ;;  %v39_v43 = vld [vmem:[%s2660_s3 + $0x38] sm:$0xff]  ;;  %v57_v1 = vld [vmem:[%s2660_s3 + $0xc8] sm:$0xff] }
 0x17b   :  { %v2481_v20 = vmul.u32.u64.low %v858_v49, %v853_v13  ;;  %v2482_v50 = vmul.u32.u64.high %v858_v49, %v853_v13, %v2481_v20  ;;  %v2488_v33 = vmul.u32.u64.low %v858_v49, %v857_v0  ;;  %v2489_v5 = vmul.u32.u64.high %v858_v49, %v857_v0, %v2488_v33  ;;  %v41_v56 = vld [vmem:[%s2660_s3 + $0x48] sm:$0xff]  ;;  %v58_v0 = vld [vmem:[%s2660_s3 + $0xd0] sm:$0xff] }
 0x17c   :  { %v1911_v40 = vpop.eup %1910  ;;  %v865_v27 = vmul.u32 %v858_v49, %v849_v60  ;;  %v763_v17 = vadd.s32 %v2396_v54, %v2403_v58  ;;  %v785_v52 = vshll.u32 %v784_v10, 23  ;;  %v1834_v57 = vpack.c.bf16 %v35_v31, %v34_v11  ;;  %v36_v49 = vld [vmem:[%s2660_s3 + $0x20] sm:$0xff]  ;;  %v54_v54 = vld [vmem:[%s2660_s3 + $0xb0] sm:$0xff]  ;;  %v55_v58 = vld [vmem:[%s2660_s3 + $0xb8] sm:$0xff] }
 0x17d   :  { %v1913_v45 = vpop.eup %1912  ;;  %v1012_v8 = vxor.u32 2147483648, %v1911_v40  ;;  %v868_v15 = vadd.s32 1, %v2482_v50  ;;  %vm867_vm13 = vc.u32 %v2489_v5, %v2481_v20  ;;  %v1836_v59 = vpack.c.bf16 %v53_v22, %v52_v9  ;;  %v42_v60 = vld [vmem:[%s2660_s3 + $0x50] sm:$0xff]  ;;  %v60_v10 = vld [vmem:[%s2660_s3 + $0xe0] sm:$0xff]  ;;  %v45_v11 = vld [vmem:[%s2660_s3 + $0x68] sm:$0xff] }
 0x17e   :  { %v1009_v53 = vxor.u32 2147483648, %v1913_v45  ;;  %v781_v48 = vshrl.u32 %v763_v17, %v779_v21  ;;  %v786_v2 = vor.u32 4788187, %v785_v52  ;;  %v1842_v42 = vpack.c.bf16 %v39_v43, %v38_v41  ;;  %v63_v21 = vld [vmem:[%s2660_s3 + $0xf8] sm:$0xff] }
 0x17f   :  { %v1328_v37 = vsel %vm1326_vm4, %v1012_v8, %v1913_v45  ;;  %v1013_v12 = vsel %vm1011_vm11, %v1012_v8, %v1913_v45  ;;  %v869_v24 = vsel %vm867_vm13, %v868_v15, %v2482_v50  ;;  %v1844_v13 = vpack.c.bf16 %v57_v1, %v56_v39 }
 0x180   :  { %v1325_v34 = vsel %vm1323_vm10, %v1911_v40, %v1009_v53  ;;  %v1010_v62 = vsel %vm1008_vm2, %v1911_v40, %v1009_v53  ;;  %v870_v55 = vadd.s32 %v869_v24, %v865_v27  ;;  %v1840_v40 = vpack.c.bf16 %v55_v58, %v54_v54  ;;  %v40_v53 = vld [vmem:[%s2660_s3 + $0x40] sm:$0xff] }
 0x181   :  { %v1329_v29 = vsel %vm1322_vm12, %v1325_v34, %v1328_v37  ;;  %v1014_v18 = vsel %vm1007_vm6, %v1010_v62, %v1013_v12  ;;  %v782_v47 = vor.u32 %v781_v48, %v780_v46  ;;  %v787_v8 = vand.u32 2147483647, %v786_v2  ;;  %v59_v34 = vld [vmem:[%s2660_s3 + $0xd8] sm:$0xff] }
 0x182   :  { %v1330_v63 = vsel %vm1005_vm3, nan, %v1329_v29  ;;  %v1015_v32 = vsel %vm1005_vm3, nan, %v1014_v18  ;;  %v871_v36 = vadd.s32 536870912, %v870_v55  ;;  %v1846_v6 = vpack.c.bf16 %v41_v56, %v40_v53  ;;  %v43_v62 = vld [vmem:[%s2660_s3 + $0x58] sm:$0xff] }
 0x183   :  { %v1333_v28 = vmul.f32 %v1909_v3, %v1330_v63  ;;  %v2522_v35 = vmul.f32 %v1909_v3, %v1015_v32  ;;  %v37_v3 = vld [vmem:[%s2660_s3 + $0x28] sm:$0xff]  ;;  %v789_v50 = vcvt.s32.f32 %v782_v47  ;;  %v1848_v29 = vpack.c.bf16 %v59_v34, %v58_v0  ;;  %v62_v32 = vld [vmem:[%s2660_s3 + $0xf0] sm:$0xff] }
 0x184   :  { %v1838_v25 = vpack.c.bf16 %v37_v3, %v36_v49  ;;  %v61_v63 = vld [vmem:[%s2660_s3 + $0xe8] sm:$0xff]  ;;  %v866_v24 = vadd.s32 %v2481_v20, %v2489_v5  ;;  %vm2609_vm2 = vcmp.le.f32.partialorder %v707_v38, 0.7853982  ;;  %v793_v46 = vsub.s32 4, %v2411_v61 }
 0x185   :  { %1770 = vmatmul.mubr.msk.f32.vlgmr.msra.gmra.mrb[4].mxu1 %vm100_vm1, %v1333_v28  ;;  %v790_v33 = vmul.f32 %v789_v50, %v787_v8  ;;  %v1850_v28 = vpack.c.bf16 %v43_v62, %v42_v60  ;;  %v1852_v31 = vpack.c.bf16 %v61_v63, %v60_v10  ;;  %v171_v39 = vadd.f32 0.0029017648, %v2011_v14 }
 0x186   :  { %1831 = vmatpush3.bf16.msra.mxu1 %v1830_v7  ;;  %v2545_v7 = vshrl.u32 %v871_v36, 30  ;;  %v794_v38 = vsel %vm709_vm15, %v793_v46, %v2411_v61  ;;  %vm812_vm3 = vcmp.lt.s32.totalorder %v2419_v19, 0  ;;  %v173_v1 = vadd.f32 0.0029017648, %v2013_v16 }
 0x187   :  { %1833 = vmatprep.subr.bf16.mxu1 %v1832_v30  ;;  %v791_v15 = vxor.u32 2147483648, %v790_v33  ;;  %v44_v30 = vld [vmem:[%s2660_s3 + $0x60] sm:$0xff]  ;;  %vm811_vm4 = vcmp.le.f32.partialorder %v810_v51, 0.7853982  ;;  %v245_v56 = vmul.f32 1.442695, %v171_v39  ;;  %vm799_vm9 = vweird.f32 %v2321_v26 }
 0x188   :  { %v873_v45 = vshll.u32 %v2545_v7, 30  ;;  %v1854_v9 = vpack.c.bf16 %v45_v11, %v44_v30  ;;  %v896_v43 = vsub.s32 4, %v2545_v7  ;;  %v247_v14 = vmul.f32 1.442695, %v173_v1 }
 0x189   :  { %v792_v22 = vsel %vm709_vm15, %v791_v15, %v790_v33  ;;  %vm902_vm11 = vweird.f32 %v2419_v19 }
 0x18a   :  { %1835 = vmatpush3.bf16.msra.mxu1 %v1834_v57  ;;  %v874_v44 = vsub.s32 %v870_v55, %v873_v45  ;;  %v1856_v55 = vpack.c.bf16 %v63_v21, %v62_v32  ;;  %v46_v57 = vld [vmem:[%s2660_s3 + $0x70] sm:$0xff]  ;;  %v795_v5 = vsel %vm2609_vm2, %v2321_v26, %v792_v22  ;;  %v796_v45 = vsel %vm2609_vm2, 0, %v794_v38  ;;  %v64_v32 = vld [vmem:[%s2660_s3 + $0x100] sm:$0xff]  ;;  %v65_v21 = vld [vmem:[%s2660_s3 + $0x108] sm:$0xff] }
 0x18b   :  { %1837 = vmatprep.subr.bf16.mxu1 %v1836_v59  ;;  %v47_v59 = vld [vmem:[%s2660_s3 + $0x78] sm:$0xff]  ;;  %1914 = vcosq.f32 %v795_v5  ;;  %v800_v0 = vand.u32 3, %v796_v45 }
 0x18c   :  { %v876_v37 = vsub.s32 0, %v874_v44  ;;  %v1858_v58 = vpack.c.bf16 %v47_v59, %v46_v57  ;;  %1916 = vsinq.f32 %v795_v5 }
 0x18d   :  { %vm802_vm7 = vcmp.eq.s32.totalorder %v800_v0, 0  ;;  %vm805_vm8 = vcmp.eq.s32.totalorder %v800_v0, 2  ;;  %vm801_vm12 = vcmp.lt.s32.totalorder %v800_v0, 2 }
 0x18e   :  { %1839 = vmatpush3.bf16.msra.mxu1 %v1838_v25  ;;  %v1648_v23 = vmin.u32 %v876_v37, %v874_v44 }
 0x18f   :  { %1841 = vmatprep.subr.bf16.mxu1 %v1840_v40 }
 0x190   :  { %v878_v12 = vclz %v1648_v23 }
 0x192   :  { %1843 = vmatpush3.bf16.msra.mxu1 %v1842_v42  ;;  %v1649_v18 = vadd.s32 4294967294, %v878_v12  ;;  %v1112_v42 = vadd.s32 3, %v796_v45 }
 0x193   :  { %1845 = vmatprep.subr.bf16.mxu1 %v1844_v13 }
 0x194   :  { %vm1650_vm14 = vcmp.lt.s32.totalorder %v1649_v18, 0  ;;  %v1113_v37 = vand.u32 3, %v1112_v42 }
 0x195   :  { %v881_v27 = vsel %vm1650_vm14, 0, %v1649_v18  ;;  %v1915_v13 = vpop.eup %1914 }
 0x196   :  { %1847 = vmatpush3.bf16.msra.mxu1 %v1846_v6  ;;  %v882_v17 = vsub.s32 32, %v881_v27  ;;  %v886_v52 = vsub.s32 4294967266, %v881_v27  ;;  %v883_v49 = vshll.u32 %v874_v44, %v881_v27  ;;  %v897_v44 = vsel %vm812_vm3, %v896_v43, %v2545_v7  ;;  %v1917_v53 = vpop.eup %1916  ;;  %v23_v43 = vld [vmem:[%s2661_s5] sm:$0x3] }
 0x197   :  { %1849 = vmatprep.subr.bf16.mxu1 %v1848_v29  ;;  %v899_v50 = vsel %vm811_vm4, 0, %v897_v44  ;;  %v803_v16 = vxor.u32 2147483648, %v1917_v53  ;;  %v806_v33 = vxor.u32 2147483648, %v1915_v13  ;;  %vm1115_vm5 = vcmp.eq.s32.totalorder %v1113_v37, 0 }
 0x198   :  { %v884_v3 = vshrl.u32 %v866_v24, %v882_v17  ;;  %v887_v48 = vadd.s32 127, %v886_v52  ;;  %v1216_v34 = vadd.s32 3, %v899_v50  ;;  %vm1118_vm6 = vcmp.eq.s32.totalorder %v1113_v37, 2 }
 0x199   :  { %v903_v7 = vand.u32 3, %v899_v50  ;;  %v1117_v23 = vsel %vm1115_vm5, %v1915_v13, %v803_v16  ;;  %v1120_v6 = vsel %vm1118_vm6, %v806_v33, %v1917_v53  ;;  %v804_v29 = vsel %vm802_vm7, %v1915_v13, %v803_v16 }
 0x19a   :  { %1851 = vmatpush3.bf16.msra.mxu1 %v1850_v28  ;;  %v885_v36 = vor.u32 %v884_v3, %v883_v49  ;;  %v888_v54 = vshll.u32 %v887_v48, 23  ;;  %v1217_v51 = vand.u32 3, %v1216_v34  ;;  %v807_v60 = vsel %vm805_vm8, %v806_v33, %v1917_v53 }
 0x19b   :  { %1853 = vmatprep.subr.bf16.mxu1 %v1852_v31  ;;  %vm1114_vm10 = vcmp.lt.s32.totalorder %v1113_v37, 2  ;;  %vm908_vm14 = vcmp.eq.s32.totalorder %v903_v7, 2  ;;  %v808_v18 = vsel %vm801_vm12, %v804_v29, %v807_v60  ;;  %vm905_vm2 = vcmp.eq.s32.totalorder %v903_v7, 0 }
 0x19c   :  { %v889_v2 = vor.u32 4788187, %v888_v54  ;;  %v892_v40 = vcvt.s32.f32 %v885_v36  ;;  %v1121_v63 = vsel %vm1114_vm10, %v1117_v23, %v1120_v6  ;;  %vm1222_vm13 = vcmp.eq.s32.totalorder %v1217_v51, 2 }
 0x19d   :  { %vm1219_vm15 = vcmp.eq.s32.totalorder %v1217_v51, 0  ;;  %v1122_v24 = vsel %vm799_vm9, nan, %v1121_v63  ;;  %v809_v17 = vsel %vm799_vm9, nan, %v808_v18  ;;  %v1861_v3 = vpack.c.bf16 %v65_v21, %v64_v32 }
 0x19e   :  { %1855 = vmatpush3.bf16.msra.mxu1 %v1854_v9  ;;  %v890_v25 = vand.u32 2147483647, %v889_v2 }
 0x19f   :  { %1857 = vmatprep.subr.bf16.mxu1 %v1856_v55 }
 0x1a0   :  { %v893_v41 = vmul.f32 %v892_v40, %v890_v25 }
 0x1a2   :  { %1859 = vmatpush3.bf16.msra.mxu1 %v1858_v58  ;;  %v894_v47 = vxor.u32 2147483648, %v893_v41 }
 0x1a4   :  { %v895_v8 = vsel %vm812_vm3, %v894_v47, %v893_v41  ;;  %vm1218_vm3 = vcmp.lt.s32.totalorder %v1217_v51, 2 }
 0x1a5   :  { %v898_v61 = vsel %vm811_vm4, %v2419_v19, %v895_v8  ;;  %vm904_vm4 = vcmp.lt.s32.totalorder %v903_v7, 2 }
 0x1a6   :  { %1918 = vcosq.f32 %v898_v61 }
 0x1a7   :  { %1920 = vsinq.f32 %v898_v61 }
 0x1a8   :  { %1922 = vpow2.f32 %v245_v56 }
 0x1a9   :  { %1924 = vpow2.f32 %v247_v14 }
 0x1b0   :  { %v1919_v62 = vpop.eup %1918 }
 0x1b1   :  { %v1921_v12 = vpop.eup %1920  ;;  %v909_v10 = vxor.u32 2147483648, %v1919_v62 }
 0x1b2   :  { %v906_v15 = vxor.u32 2147483648, %v1921_v12  ;;  %v1923_v27 = vpop.eup %1922 }
 0x1b3   :  { %v1224_v28 = vsel %vm1222_vm13, %v909_v10, %v1921_v12  ;;  %v910_v30 = vsel %vm908_vm14, %v909_v10, %v1921_v12  ;;  %v1925_v52 = vpop.eup %1924  ;;  %v1331_v48 = vmul.f32 %v1923_v27, %v1122_v24  ;;  %v1016_v20 = vmul.f32 %v1923_v27, %v809_v17 }
 0x1b4   :  { %v1221_v11 = vsel %vm1219_vm15, %v1919_v62, %v906_v15  ;;  %v907_v31 = vsel %vm905_vm2, %v1919_v62, %v906_v15 }
 0x1b5   :  { %v1225_v9 = vsel %vm1218_vm3, %v1221_v11, %v1224_v28  ;;  %v911_v22 = vsel %vm904_vm4, %v907_v31, %v910_v30 }
 0x1b6   :  { %v1226_v55 = vsel %vm902_vm11, nan, %v1225_v9  ;;  %v912_v57 = vsel %vm902_vm11, nan, %v911_v22 }
 0x1b7   :  { %v1332_v59 = vmul.f32 %v1925_v52, %v1226_v55  ;;  %v1017_v49 = vmul.f32 %v1925_v52, %v912_v57 }
 0x1b9   :  { %1401 = vmatprep.mubr.f32.mxu0 %v1332_v59  ;;  %1544 = vmatprep.mubr.f32.mxu1 %v1017_v49 }
 0x1ba   :  { %1402 = vmatmul.mubr.f32.vlgmr.msra.gmra.mrb[4].mxu0 %v1331_v48  ;;  %1545 = vmatmul.mubr.f32.vlgmr.msra.gmra.mrb[6].mxu1 %v1016_v20 }
 0x1bb   :  { %1862 = vmatpush3.bf16.msra.mxu0 %v1861_v3  ;;  %1776 = vmatprep.mubr.msk.f32.mxu0 %vm1927_vm0, %v1928_v4  ;;  %vm1621_vm0 = vcmask 517120  }
 0x1be   :  { %1777 = vmatmul.mubr.msk.f32.vlgmr.msra.gmra.mrb[6].mxu0 %vm100_vm1, %v2522_v35 }
 0x258   :  { %v1473_v26 = vpop.f32.mrb[4].mxu1 }
 0x259   :  { %v1771_v5 = vpop.f32.mrb[5].mxu1 }
 0x28d   :  { %v1707_v19 = vpop.f32.mrb[4].mxu0  ;;  %v1745_v36 = vpop.f32.mrb[6].mxu1 }
 0x28e   :  { %v1708_v54 = vpop.f32.mrb[5].mxu0  ;;  %v1746_v58 = vpop.f32.mrb[7].mxu1 }
 0x28f   :  { %v1709_v46 = vadd.f32 %v1708_v54, %v1707_v19  ;;  %v1747_v2 = vadd.f32 %v1746_v58, %v1745_v36 }
 0x291   :  { %v1474_v25 = vadd.f32 %v1709_v46, %v1473_v26  ;;  %v1616_v40 = vpop.f32.mrb[6].mxu0 }
 0x292   :  { %v1778_v38 = vpop.f32.mrb[7].mxu0 }
 0x293   :  { %v1547_v41 = vadd.f32 %v1747_v2, %v1474_v25 }
 0x295   :  { %v1617_v4 = vadd.f32 %v1616_v40, %v1547_v41 }
 0x297   :  { %v1620_v47 = vadd.f32 %v1617_v4, %v23_v43 }
 0x299   :  { %1622 = vst.msk [vmem:[%s2662_s6] sm:$0x3] %vm1621_vm0, %v1620_v47 }

// kernel: _lambda_.5
= control target key start
LH: loop header
LB: loop body
LE: loop exit
PB: predicated region body
PF: predicated region fallthrough
CT: control target
= control target key end

     0   :  { %18 = vsyncpa [#allocation3], 0  ;;  %s3998_s0 = inlined_call_operand.hbm [shape: f32[32,16], index: 0, kind: input, shape index: {}]   ;;  %s3999_s1 = inlined_call_operand.vmem [shape: f32[32,32], index: 1, kind: input, shape index: {}]   ;;  %s4000_s2 = inlined_call_operand.vmem [shape: f32[32,1], index: 2, kind: input, shape index: {}]   ;;  %s4001_s3 = inlined_call_operand.vmem [shape: f32[32,1], index: 3, kind: input, shape index: {}]   ;;  %s4002_s4 = inlined_call_operand.hbm [shape: f32[16,32], index: 4, kind: input, shape index: {}]   ;;  %s4003_s5 = inlined_call_operand.hbm [shape: f32[16,8], index: 5, kind: input, shape index: {}]   ;;  %s4004_s6 = inlined_call_operand.vmem [shape: f32[16,1], index: 6, kind: input, shape index: {}]   ;;  %s4005_s7 = inlined_call_operand.vmem [shape: f32[64,16], index: 7, kind: input, shape index: {}]   ;;  %s4006_s8 = inlined_call_operand.hbm [shape: f32[3,64,16], index: 8, kind: input, shape index: {}]   ;;  %s4007_s9 = inlined_call_operand.hbm [shape: f32[3,8,8], index: 9, kind: input, shape index: {}]   ;;  %s4008_s10 = inlined_call_operand.hbm [shape: f32[64,1], index: 10, kind: input, shape index: {}]   ;;  %s4009_s11 = inlined_call_operand.hbm [shape: f32[3,64,64], index: 11, kind: input, shape index: {}]   ;;  %s4010_s12 = inlined_call_operand.hbm [shape: f32[64,1], index: 12, kind: input, shape index: {}]   ;;  %s4011_s13 = inlined_call_operand.vmem [shape: f32[64,8], index: 13, kind: output, shape index: {}]  }
   0x1   :  { %19 = vsyncpa [#allocation5], 0 }
   0x2   :  { %20 = vsyncpa [#allocation8], 0 }
   0x3   :  { %21 = vsyncpa [#allocation11], 0 }
   0x4   :  { %22 = vsyncpa [#allocation14], 0  ;;  %s3481_s25 = smov [#allocation4]   ;;  %s3482_s27 = smov [#allocation7]  }
   0x5   :  { %s46_s26 = sshll.u32 %s3481_s25, 4  ;;  %s74_s28 = sshll.u32 %s3482_s27, 4  ;;  %s47_s26 = int_to_ptr.vmem [resolvable:$true] %s46_s26  ;;  %s3562_s28 = int_to_ptr.vmem [resolvable:$true] %s74_s28 }
   0x6   :  { %s3295_s14 = scalar_lea.hbm %s4002_s4, 256 }
   0x7   :  { %p3296_p0 = scmp.ne.s32.totalorder %s4002_s4, %s3295_s14  ;;  %p3299_p1 = scmp.lt.u32.totalorder %s3295_s14, %s4002_s4 }
   0x9   :  { %p3301_p2 = pnand %p3299_p1, %p3296_p0 }
   0xb   :  { %3304 = shalt.err (!%p3301_p2)
}
   0xc   :  { %s3305_s19 = scalar_lea.vmem %s47_s26, 256  ;;  %p3310_p4 = scmp.lt.s32.totalorder %s47_s26, %s47_s26 }
   0xd   :  { %p3306_p3 = scmp.ne.s32.totalorder %s47_s26, %s3305_s19  ;;  %p3311_p5 = scmp.lt.s32.totalorder %s3305_s19, %s3305_s19 }
   0xf   :  { %p3312_p6 = por %p3311_p5, %p3310_p4 }
  0x11   :  { %p3313_p7 = pnand %p3312_p6, %p3306_p3 }
  0x13   :  { %3316 = shalt.err (!%p3313_p7)
}
  0x14   :  { %s3483_s20 = smov 128   ;;  %s3484_s21 = smov 8  }
  0x15   :  { %52 = dma.hbm_to_vmem [thread:$0]  %s4002_s4, 256, %s47_s26, [#allocation5], %s3483_s20, %s3483_s20, %s3484_s21  }
  0x16   :  { %s3317_s27 = scalar_lea.hbm %s4006_s8, 3072 }
  0x17   :  { %p3318_p8 = scmp.ne.s32.totalorder %s4006_s8, %s3317_s27  ;;  %p3321_p9 = scmp.lt.u32.totalorder %s3317_s27, %s4006_s8 }
  0x19   :  { %p3323_p10 = pnand %p3321_p9, %p3318_p8 }
  0x1b   :  { %3326 = shalt.err (!%p3323_p10)
}
  0x1c   :  { %s3327_s16 = scalar_lea.vmem %s3562_s28, 3072  ;;  %p3332_p12 = scmp.lt.s32.totalorder %s3562_s28, %s3562_s28 }
  0x1d   :  { %p3328_p11 = scmp.ne.s32.totalorder %s3562_s28, %s3327_s16  ;;  %p3333_p13 = scmp.lt.s32.totalorder %s3327_s16, %s3327_s16 }
  0x1f   :  { %p3334_p0 = por %p3333_p13, %p3332_p12 }
  0x21   :  { %p3335_p1 = pnand %p3334_p0, %p3328_p11 }
  0x23   :  { %3338 = shalt.err (!%p3335_p1)
}
  0x24   :  { %80 = dma.hbm_to_vmem [thread:$0]  %s4006_s8, 3072, %s3562_s28, [#allocation8], %s3483_s20, %s3483_s20, %s3484_s21  }
  0x25   :  { %s3485_s17 = smov [#allocation10]   ;;  %s3486_s19 = smov [#allocation2]  }
  0x26   :  { %s98_s18 = sshll.u32 %s3485_s17, 4  ;;  %s28_s22 = sshll.u32 %s3486_s19, 4  ;;  %s99_s18 = int_to_ptr.vmem [resolvable:$true] %s98_s18  ;;  %s3599_s22 = int_to_ptr.vmem [resolvable:$true] %s28_s22 }
  0x27   :  { %s3339_s25 = scalar_lea.hbm %s4008_s10, 1024 }
  0x28   :  { %p3340_p2 = scmp.ne.s32.totalorder %s4008_s10, %s3339_s25  ;;  %p3343_p3 = scmp.lt.u32.totalorder %s3339_s25, %s4008_s10 }
  0x2a   :  { %p3345_p4 = pnand %p3343_p3, %p3340_p2 }
  0x2c   :  { %3348 = shalt.err (!%p3345_p4)
}
  0x2d   :  { %s3349_s8 = scalar_lea.vmem %s99_s18, 1024  ;;  %p3354_p6 = scmp.lt.s32.totalorder %s99_s18, %s99_s18 }
  0x2e   :  { %p3350_p5 = scmp.ne.s32.totalorder %s99_s18, %s3349_s8  ;;  %p3355_p7 = scmp.lt.s32.totalorder %s3349_s8, %s3349_s8 }
  0x30   :  { %p3356_p8 = por %p3355_p7, %p3354_p6 }
  0x32   :  { %p3357_p9 = pnand %p3356_p8, %p3350_p5 }
  0x34   :  { %3360 = shalt.err (!%p3357_p9)
}
  0x35   :  { %104 = dma.hbm_to_vmem [thread:$0]  %s4008_s10, 1024, %s99_s18, [#allocation11], %s3483_s20, %s3483_s20, %s3484_s21  }
  0x36   :  { %s3361_s26 = scalar_lea.hbm %s3998_s0, 512 }
  0x37   :  { %p3362_p10 = scmp.ne.s32.totalorder %s3998_s0, %s3361_s26  ;;  %p3365_p11 = scmp.lt.u32.totalorder %s3361_s26, %s3998_s0 }
  0x39   :  { %p3367_p12 = pnand %p3365_p11, %p3362_p10 }
  0x3b   :  { %3370 = shalt.err (!%p3367_p12)
}
  0x3c   :  { %s3371_s25 = scalar_lea.vmem %s3599_s22, 512  ;;  %p3376_p0 = scmp.lt.s32.totalorder %s3599_s22, %s3599_s22 }
  0x3d   :  { %p3372_p13 = scmp.ne.s32.totalorder %s3599_s22, %s3371_s25  ;;  %p3377_p1 = scmp.lt.s32.totalorder %s3371_s25, %s3371_s25 }
  0x3f   :  { %p3378_p2 = por %p3377_p1, %p3376_p0 }
  0x41   :  { %p3379_p3 = pnand %p3378_p2, %p3372_p13 }
  0x43   :  { %3382 = shalt.err (!%p3379_p3)
}
  0x44   :  { %34 = dma.hbm_to_vmem [thread:$0]  %s3998_s0, 512, %s3599_s22, [#allocation3], %s3483_s20, %s3483_s20, %s3484_s21  }
  0x45   :  { %s3487_s27 = smov [#allocation6]   ;;  %s3488_s30 = smov [#allocation9]  }
  0x46   :  { %s58_s29 = sshll.u32 %s3487_s27, 4  ;;  %s86_s14 = sshll.u32 %s3488_s30, 4  ;;  %s59_s29 = int_to_ptr.vmem [resolvable:$true] %s58_s29  ;;  %s3636_s14 = int_to_ptr.vmem [resolvable:$true] %s86_s14 }
  0x47   :  { %s3383_s15 = scalar_lea.hbm %s4003_s5, 256 }
  0x48   :  { %p3384_p4 = scmp.ne.s32.totalorder %s4003_s5, %s3383_s15  ;;  %p3387_p5 = scmp.lt.u32.totalorder %s3383_s15, %s4003_s5 }
  0x4a   :  { %p3389_p6 = pnand %p3387_p5, %p3384_p4 }
  0x4c   :  { %3392 = shalt.err (!%p3389_p6)
}
  0x4d   :  { %s3393_s0 = scalar_lea.vmem %s59_s29, 256  ;;  %p3398_p8 = scmp.lt.s32.totalorder %s59_s29, %s59_s29 }
  0x4e   :  { %p3394_p7 = scmp.ne.s32.totalorder %s59_s29, %s3393_s0  ;;  %p3399_p9 = scmp.lt.s32.totalorder %s3393_s0, %s3393_s0 }
  0x50   :  { %p3400_p10 = por %p3399_p9, %p3398_p8 }
  0x52   :  { %p3401_p11 = pnand %p3400_p10, %p3394_p7 }
  0x54   :  { %3404 = shalt.err (!%p3401_p11)
}
  0x55   :  { %64 = dma.hbm_to_vmem [thread:$0]  %s4003_s5, 256, %s59_s29, [#allocation5], %s3483_s20, %s3483_s20, %s3484_s21  }
  0x56   :  { %s3405_s25 = scalar_lea.hbm %s4007_s9, 384 }
  0x57   :  { %p3406_p12 = scmp.ne.s32.totalorder %s4007_s9, %s3405_s25  ;;  %p3409_p13 = scmp.lt.u32.totalorder %s3405_s25, %s4007_s9 }
  0x59   :  { %p3411_p0 = pnand %p3409_p13, %p3406_p12 }
  0x5b   :  { %3414 = shalt.err (!%p3411_p0)
}
  0x5c   :  { %s3415_s8 = scalar_lea.vmem %s3636_s14, 384  ;;  %p3420_p2 = scmp.lt.s32.totalorder %s3636_s14, %s3636_s14 }
  0x5d   :  { %p3416_p1 = scmp.ne.s32.totalorder %s3636_s14, %s3415_s8  ;;  %p3421_p3 = scmp.lt.s32.totalorder %s3415_s8, %s3415_s8 }
  0x5f   :  { %p3422_p4 = por %p3421_p3, %p3420_p2 }
  0x61   :  { %p3423_p5 = pnand %p3422_p4, %p3416_p1 }
  0x63   :  { %3426 = shalt.err (!%p3423_p5)
}
  0x64   :  { %92 = dma.hbm_to_vmem [thread:$0]  %s4007_s9, 384, %s3636_s14, [#allocation8], %s3483_s20, %s3483_s20, %s3484_s21  }
  0x65   :  { %s3489_s28 = smov [#allocation12]   ;;  %s3490_s16 = smov [#allocation13]  }
  0x66   :  { %s110_s15 = sshll.u32 %s3489_s28, 4  ;;  %s122_s4 = sshll.u32 %s3490_s16, 4  ;;  %s111_s15 = int_to_ptr.vmem [resolvable:$true] %s110_s15  ;;  %s3673_s4 = int_to_ptr.vmem [resolvable:$true] %s122_s4 }
  0x67   :  { %s3427_s0 = scalar_lea.hbm %s4009_s11, 3072 }
  0x68   :  { %p3428_p6 = scmp.ne.s32.totalorder %s4009_s11, %s3427_s0  ;;  %p3431_p7 = scmp.lt.u32.totalorder %s3427_s0, %s4009_s11 }
  0x6a   :  { %p3433_p8 = pnand %p3431_p7, %p3428_p6 }
  0x6c   :  { %3436 = shalt.err (!%p3433_p8)
}
  0x6d   :  { %s3437_s9 = scalar_lea.vmem %s111_s15, 3072  ;;  %p3442_p10 = scmp.lt.s32.totalorder %s111_s15, %s111_s15 }
  0x6e   :  { %p3438_p9 = scmp.ne.s32.totalorder %s111_s15, %s3437_s9  ;;  %p3443_p11 = scmp.lt.s32.totalorder %s3437_s9, %s3437_s9 }
  0x70   :  { %p3444_p12 = por %p3443_p11, %p3442_p10 }
  0x72   :  { %p3445_p13 = pnand %p3444_p12, %p3438_p9 }
  0x74   :  { %3448 = shalt.err (!%p3445_p13)
}
  0x75   :  { %116 = dma.hbm_to_vmem [thread:$0]  %s4009_s11, 3072, %s111_s15, [#allocation11], %s3483_s20, %s3483_s20, %s3484_s21  }
  0x76   :  { %s3449_s27 = scalar_lea.hbm %s4010_s12, 1024 }
  0x77   :  { %p3450_p0 = scmp.ne.s32.totalorder %s4010_s12, %s3449_s27  ;;  %p3453_p1 = scmp.lt.u32.totalorder %s3449_s27, %s4010_s12 }
  0x79   :  { %p3455_p2 = pnand %p3453_p1, %p3450_p0 }
  0x7b   :  { %3458 = shalt.err (!%p3455_p2)
}
  0x7c   :  { %s3459_s28 = scalar_lea.vmem %s3673_s4, 1024  ;;  %p3464_p4 = scmp.lt.s32.totalorder %s3673_s4, %s3673_s4 }
  0x7d   :  { %p3460_p3 = scmp.ne.s32.totalorder %s3673_s4, %s3459_s28  ;;  %p3465_p5 = scmp.lt.s32.totalorder %s3459_s28, %s3459_s28 }
  0x7f   :  { %p3466_p6 = por %p3465_p5, %p3464_p4 }
  0x81   :  { %p3467_p7 = pnand %p3466_p6, %p3460_p3 }
  0x83   :  { %3470 = shalt.err (!%p3467_p7)
}
  0x84   :  { %128 = dma.hbm_to_vmem [thread:$0]  %s4010_s12, 1024, %s3673_s4, [#allocation14], %s3483_s20, %s3483_s20, %s3484_s21  }
  0x85   :  { %3471 = dma.done.wait [#allocation3], 512  }
  0x86   :  { %3472 = vsyncadd [#allocation3], 4294966784 }
  0x87   :  { %3473 = dma.done.wait [#allocation5], 512  }
  0x88   :  { %3474 = vsyncadd [#allocation5], 4294966784 }
  0x89   :  { %3475 = dma.done.wait [#allocation8], 3456  }
  0x8a   :  { %3476 = vsyncadd [#allocation8], 4294963840 }
  0x8b   :  { %3477 = dma.done.wait [#allocation11], 4096  }
  0x8c   :  { %3478 = vsyncadd [#allocation11], 4294963200 }
  0x8d   :  { %3479 = dma.done.wait [#allocation14], 1024  }
  0x8e   :  { %3480 = vsyncadd [#allocation14], 4294966272  ;;  %vm157_vm0 = vcmask 130048   ;;  %v3710_v0 = vld [vmem:[#allocation2 + $0x10] sm:$0xff]  ;;  %v3712_v1 = vld [vmem:[#allocation2] sm:$0xff]  ;;  %vm190_vm1 = vcmask 261120  }
  0x8f   :  { %v3714_v2 = vld [vmem:[#allocation2 + $0x18] sm:$0xff]  ;;  %v164_v3 = vsel %vm157_vm0, %v3710_v0, 0.0  ;;  %v158_v4 = vsel %vm157_vm0, %v3712_v1, 0.0  ;;  %v3720_v5 = vld [vmem:[#allocation2 + $0x8] sm:$0xff]  ;;  %v170_v9 = vmul.f32 %v3712_v1, %v3712_v1  ;;  %v172_v13 = vmul.f32 %v3710_v0, %v3710_v0  ;;  %v186_v16 = vld [vmem:[%s3999_s1] sm:$0xff] }
  0x90   :  { %165 = vadd.xlane.f32.xlu1 %v164_v3  ;;  %159 = vadd.xlane.f32.xlu0 %v158_v4  ;;  %v167_v6 = vsel %vm157_vm0, %v3714_v2, 0.0  ;;  %v161_v7 = vsel %vm157_vm0, %v3720_v5, 0.0  ;;  %v171_v8 = vmul.f32 %v3720_v5, %v3720_v5  ;;  %v173_v12 = vmul.f32 %v3714_v2, %v3714_v2  ;;  %v187_v26 = vld [vmem:[%s3999_s1 + $0x8] sm:$0xff]  ;;  %v188_v30 = vld [vmem:[%s3999_s1 + $0x10] sm:$0xff]  ;;  %v189_v31 = vld [vmem:[%s3999_s1 + $0x18] sm:$0xff] }
  0x91   :  { %v174_v11 = vsel %vm157_vm0, %v170_v9, 0.0  ;;  %v180_v15 = vsel %vm157_vm0, %v172_v13, 0.0  ;;  %2864 = vmatprep.mubr.msk.f32.mxu1 %vm190_vm1, %v186_v16  ;;  %v3491_v32 = vmov 0   ;;  %v398_v61 = vld [vmem:[%s4000_s2 + $0x8] sm:$0xff]  ;;  %v397_v62 = vld [vmem:[%s4000_s2] sm:$0xff]  ;;  %vm1074_vm2 = vcmask 64512  }
  0x92   :  { %v177_v10 = vsel %vm157_vm0, %v171_v8, 0.0  ;;  %v183_v14 = vsel %vm157_vm0, %v173_v12, 0.0  ;;  %3286 = vset.pattern.permute.xlu1 %v3491_v32  ;;  %3285 = vset.pattern.permute.xlu0 %v3491_v32  ;;  %v400_v8 = vld [vmem:[%s4000_s2 + $0x18] sm:$0xff]  ;;  %v490_v32 = vld [vmem:[#allocation13 + $0x18] sm:$0xff]  ;;  %vm1682_vm3 = vcmask 523264  }
  0x94   :  { %168 = vadd.xlane.f32.xlu1 %v167_v6  ;;  %162 = vadd.xlane.f32.xlu0 %v161_v7  ;;  %v430_v7 = vld [vmem:[%s4001_s3 + $0x8] sm:$0xff] }
  0x98   :  { %178 = vadd.xlane.f32.xlu1 %v177_v10  ;;  %175 = vadd.xlane.f32.xlu0 %v174_v11  ;;  %v399_v10 = vld [vmem:[%s4000_s2 + $0x10] sm:$0xff] }
  0x9c   :  { %184 = vadd.xlane.f32.xlu1 %v183_v14  ;;  %181 = vadd.xlane.f32.xlu0 %v180_v15  ;;  %v470_v15 = vld [vmem:[%s4004_s6 + $0x8] sm:$0xff] }
 0x11d   :  { %v166_v17 = vpop.xlane.xlu1 %165  ;;  %v160_v18 = vpop.xlane.xlu0 %159 }
 0x121   :  { %v169_v19 = vpop.xlane.xlu1 %168  ;;  %v163_v20 = vpop.xlane.xlu0 %162 }
 0x122   :  { %v3134_v21 = vpack.c.bf16 %v163_v20, %v160_v18  ;;  %v3138_v22 = vpack.c.bf16 %v169_v19, %v166_v17  ;;  %v480_v20 = vld [vmem:[#allocation10 + $0x8] sm:$0xff] }
 0x124   :  { %3135 = vmatprep.subr.bf16.mxu1 %v3134_v21 }
 0x125   :  { %3137 = vmatpush3.bf16.msra.mxu1 %v3134_v21  ;;  %v179_v23 = vpop.xlane.xlu1 %178  ;;  %v176_v24 = vpop.xlane.xlu0 %175  ;;  %v429_v21 = vld [vmem:[%s4001_s3] sm:$0xff] }
 0x126   :  { %3139 = vmatprep.subr.bf16.mxu1 %v3138_v22  ;;  %v3142_v25 = vpack.c.bf16 %v179_v23, %v176_v24  ;;  %v482_v23 = vld [vmem:[#allocation10 + $0x18] sm:$0xff]  ;;  %v484_v24 = vld [vmem:[#allocation10 + $0x28] sm:$0xff] }
 0x129   :  { %3141 = vmatpush3.bf16.msra.mxu1 %v3138_v22  ;;  %v185_v27 = vpop.xlane.xlu1 %184  ;;  %v182_v28 = vpop.xlane.xlu0 %181 }
 0x12a   :  { %3143 = vmatprep.subr.bf16.mxu1 %v3142_v25  ;;  %v3146_v29 = vpack.c.bf16 %v185_v27, %v182_v28  ;;  %v486_v27 = vld [vmem:[#allocation10 + $0x38] sm:$0xff]  ;;  %v432_v28 = vld [vmem:[%s4001_s3 + $0x18] sm:$0xff] }
 0x12c   :  { %2865 = vmatmul.mubr.msk.f32.vlgmr.msra.gmra.mrb[0].mxu1 %vm190_vm1, %v187_v26 }
 0x12d   :  { %3145 = vmatpush3.bf16.msra.mxu1 %v3142_v25  ;;  %2867 = vmatprep.mubr.msk.f32.mxu1 %vm190_vm1, %v188_v30  ;;  %v431_v25 = vld [vmem:[%s4001_s3 + $0x10] sm:$0xff] }
 0x12e   :  { %3147 = vmatprep.subr.bf16.mxu1 %v3146_v29 }
 0x130   :  { %2868 = vmatmul.mubr.msk.f32.gmra.mrb[2].mxu1 %vm190_vm1, %v189_v31 }
 0x131   :  { %3149 = vmatpush3.bf16.msra.mxu1 %v3146_v29  ;;  %2878 = vmatprep.mubr.msk.f32.mxu1 %vm190_vm1, %v186_v16 }
 0x134   :  { %2879 = vmatmul.mubr.msk.f32.vlgmr.msra.gmra.mrb[4].mxu1 %vm190_vm1, %v187_v26 }
 0x135   :  { %2881 = vmatprep.mubr.msk.f32.mxu1 %vm190_vm1, %v188_v30  ;;  %v488_v30 = vld [vmem:[#allocation13 + $0x8] sm:$0xff] }
 0x138   :  { %2882 = vmatmul.mubr.msk.f32.gmra.mrb[6].mxu1 %vm190_vm1, %v189_v31  ;;  %v469_v31 = vld [vmem:[%s4004_s6] sm:$0xff] }
 0x1ff   :  { %v2866_v33 = vpop.f32.mrb[0].mxu1 }
 0x200   :  { %v269_v34 = vpop.f32.mrb[1].mxu1  ;;  %v289_v36 = vmul.f32 0.001953125, %v2866_v33  ;;  %v479_v33 = vld [vmem:[#allocation10] sm:$0xff] }
 0x201   :  { %v288_v38 = vmul.f32 0.001953125, %v269_v34  ;;  %v465_v34 = vld [vmem:[#allocation4] sm:$0xff] }
 0x202   :  { %v382_v40 = vmul.f32 %v289_v36, %v289_v36  ;;  %2892 = vmatprep.mubr.msk.f32.mxu0 %vm190_vm1, %v465_v34  ;;  %v799_v34 = vld [vmem:[#allocation7 + $0x18] sm:$0xff] }
 0x203   :  { %v2869_v35 = vpop.f32.mrb[2].mxu1  ;;  %v381_v44 = vmul.f32 %v288_v38, %v288_v38 }
 0x204   :  { %v279_v37 = vpop.f32.mrb[3].mxu1  ;;  %v291_v41 = vmul.f32 0.001953125, %v2869_v35  ;;  %v492_v35 = vld [vmem:[#allocation13 + $0x28] sm:$0xff] }
 0x205   :  { %v290_v45 = vmul.f32 0.001953125, %v279_v37  ;;  %v494_v37 = vld [vmem:[#allocation13 + $0x38] sm:$0xff] }
 0x206   :  { %v384_v50 = vmul.f32 %v291_v41, %v291_v41 }
 0x207   :  { %v2880_v39 = vpop.f32.mrb[4].mxu1  ;;  %v383_v54 = vmul.f32 %v290_v45, %v290_v45 }
 0x208   :  { %v378_v42 = vmul.f32 0.001953125, %v2880_v39  ;;  %v358_v43 = vpop.f32.mrb[5].mxu1  ;;  %v485_v39 = vld [vmem:[#allocation10 + $0x30] sm:$0xff] }
 0x209   :  { %v377_v46 = vmul.f32 0.001953125, %v358_v43  ;;  %v493_v43 = vld [vmem:[#allocation13 + $0x30] sm:$0xff] }
 0x20a   :  { %v386_v47 = vsub.f32 %v378_v42, %v382_v40  ;;  %v487_v40 = vld [vmem:[#allocation13] sm:$0xff] }
 0x20b   :  { %v385_v48 = vsub.f32 %v377_v46, %v381_v44  ;;  %v2883_v49 = vpop.f32.mrb[6].mxu1  ;;  %v491_v42 = vld [vmem:[#allocation13 + $0x20] sm:$0xff]  ;;  %v467_v44 = vld [vmem:[#allocation6] sm:$0xff] }
 0x20c   :  { %v390_v51 = vadd.f32 1e-05, %v386_v47  ;;  %v380_v52 = vmul.f32 0.001953125, %v2883_v49  ;;  %v368_v53 = vpop.f32.mrb[7].mxu1 }
 0x20d   :  { %v389_v55 = vadd.f32 1e-05, %v385_v48  ;;  %v379_v56 = vmul.f32 0.001953125, %v368_v53 }
 0x20e   :  { %3287 = vrsqrt.f32 %v390_v51  ;;  %v388_v57 = vsub.f32 %v380_v52, %v384_v50 }
 0x20f   :  { %3289 = vrsqrt.f32 %v389_v55  ;;  %v387_v58 = vsub.f32 %v379_v56, %v383_v54 }
 0x210   :  { %v392_v59 = vadd.f32 1e-05, %v388_v57 }
 0x211   :  { %v391_v60 = vadd.f32 1e-05, %v387_v58 }
 0x212   :  { %3291 = vrsqrt.f32 %v392_v59 }
 0x213   :  { %3293 = vrsqrt.f32 %v391_v60 }
 0x218   :  { %v3288_v63 = vpop.eup %3287 }
 0x219   :  { %v3290_v3 = vpop.eup %3289  ;;  %v402_v4 = vmul.f32 %v3288_v63, %v398_v61 }
 0x21a   :  { %v401_v6 = vmul.f32 %v3290_v3, %v397_v62 }
 0x21b   :  { %412 = vperm.xlu1 %3286, %v402_v4   ;;  %v434_v9 = vmul.f32 %v402_v4, %v289_v36  ;;  %v481_v36 = vld [vmem:[#allocation10 + $0x10] sm:$0xff] }
 0x21c   :  { %v3292_v11 = vpop.eup %3291  ;;  %407 = vperm.xlu0 %3285, %v401_v6   ;;  %v433_v12 = vmul.f32 %v401_v6, %v288_v38  ;;  %v483_v38 = vld [vmem:[#allocation10 + $0x20] sm:$0xff] }
 0x21d   :  { %v3294_v13 = vpop.eup %3293  ;;  %v438_v14 = vsub.f32 %v430_v7, %v434_v9  ;;  %v404_v16 = vmul.f32 %v3292_v11, %v400_v8 }
 0x21e   :  { %v403_v17 = vmul.f32 %v3294_v13, %v399_v10  ;;  %v437_v22 = vsub.f32 %v429_v21, %v433_v12  ;;  %v472_v13 = vld [vmem:[%s4005_s7 + $0x8] sm:$0xff]  ;;  %v939_v21 = vld [vmem:[#allocation7 + $0x60] sm:$0xff] }
 0x21f   :  { %448 = vperm.xlu1 %3286, %v438_v14   ;;  %v436_v18 = vmul.f32 %v404_v16, %v291_v41  ;;  %v489_v41 = vld [vmem:[#allocation13 + $0x10] sm:$0xff] }
 0x220   :  { %583 = vperm.xlu0 %3285, %v470_v15   ;;  %v435_v19 = vmul.f32 %v403_v17, %v290_v45  ;;  %v468_v45 = vld [vmem:[#allocation6 + $0x8] sm:$0xff]  ;;  %v936_v14 = vld [vmem:[#allocation7 + $0x48] sm:$0xff]  ;;  %v473_v15 = vld [vmem:[%s4005_s7 + $0x10] sm:$0xff] }
 0x221   :  { %v440_v29 = vsub.f32 %v432_v28, %v436_v18  ;;  %v3158_v46 = vpack.c.bf16 %v468_v45, %v467_v44  ;;  %v474_v18 = vld [vmem:[%s4005_s7 + $0x18] sm:$0xff]  ;;  %v796_v28 = vld [vmem:[#allocation7] sm:$0xff] }
 0x222   :  { %v439_v26 = vsub.f32 %v431_v25, %v435_v19  ;;  %v938_v19 = vld [vmem:[#allocation7 + $0x58] sm:$0xff]  ;;  %v941_v25 = vld [vmem:[#allocation7 + $0x70] sm:$0xff]  ;;  %v3856_v44 = vld [vmem:[#allocation9] sm:$0xff] }
 0x223   :  { %422 = vperm.xlu1 %3286, %v404_v16   ;;  %3159 = vmatprep.subr.bf16.mxu1 %v3158_v46  ;;  %v937_v16 = vld [vmem:[#allocation7 + $0x50] sm:$0xff] }
 0x224   :  { %1617 = vperm.xlu0 %3285, %v480_v20   ;;  %3161 = vmatpush3.bf16.msra.mxu1 %v3158_v46  ;;  %v475_v20 = vld [vmem:[%s4005_s7 + $0x20] sm:$0xff] }
 0x227   :  { %443 = vperm.xlu1 %3286, %v437_v22   ;;  %v476_v22 = vld [vmem:[%s4005_s7 + $0x28] sm:$0xff] }
 0x228   :  { %1627 = vperm.xlu0 %3285, %v482_v23   ;;  %v940_v23 = vld [vmem:[#allocation7 + $0x68] sm:$0xff] }
 0x22b   :  { %417 = vperm.xlu1 %3286, %v403_v17   ;;  %v3809_v17 = vld [vmem:[#allocation9 + $0x8] sm:$0xff] }
 0x22c   :  { %1637 = vperm.xlu0 %3285, %v484_v24   ;;  %v477_v24 = vld [vmem:[%s4005_s7 + $0x30] sm:$0xff] }
 0x22f   :  { %453 = vperm.xlu1 %3286, %v439_v26   ;;  %v478_v26 = vld [vmem:[%s4005_s7 + $0x38] sm:$0xff] }
 0x230   :  { %1647 = vperm.xlu0 %3285, %v486_v27   ;;  %v942_v27 = vld [vmem:[#allocation7 + $0x78] sm:$0xff] }
 0x233   :  { %458 = vperm.xlu1 %3286, %v440_v29   ;;  %v1334_v29 = vld [vmem:[#allocation7 + $0x80] sm:$0xff] }
 0x234   :  { %2490 = vperm.xlu0 %3285, %v488_v30   ;;  %v797_v30 = vld [vmem:[#allocation7 + $0x8] sm:$0xff] }
 0x237   :  { %578 = vperm.xlu1 %3286, %v469_v31   ;;  %v1335_v31 = vld [vmem:[#allocation7 + $0x88] sm:$0xff] }
 0x238   :  { %2500 = vperm.xlu0 %3285, %v490_v32   ;;  %v798_v32 = vld [vmem:[#allocation7 + $0x10] sm:$0xff] }
 0x23b   :  { %1612 = vperm.xlu1 %3286, %v479_v33   ;;  %v1336_v33 = vld [vmem:[#allocation7 + $0x90] sm:$0xff] }
 0x23c   :  { %2510 = vperm.xlu0 %3285, %v492_v35   ;;  %v1337_v35 = vld [vmem:[#allocation7 + $0x98] sm:$0xff] }
 0x23f   :  { %1622 = vperm.xlu1 %3286, %v481_v36   ;;  %v800_v36 = vld [vmem:[#allocation7 + $0x20] sm:$0xff] }
 0x240   :  { %2520 = vperm.xlu0 %3285, %v494_v37   ;;  %v1338_v37 = vld [vmem:[#allocation7 + $0xa0] sm:$0xff] }
 0x243   :  { %1632 = vperm.xlu1 %3286, %v483_v38   ;;  %v801_v38 = vld [vmem:[#allocation7 + $0x28] sm:$0xff] }
 0x247   :  { %1642 = vperm.xlu1 %3286, %v485_v39   ;;  %v1339_v39 = vld [vmem:[#allocation7 + $0xa8] sm:$0xff] }
 0x24b   :  { %2485 = vperm.xlu1 %3286, %v487_v40   ;;  %v802_v40 = vld [vmem:[#allocation7 + $0x30] sm:$0xff] }
 0x24f   :  { %2495 = vperm.xlu1 %3286, %v489_v41   ;;  %v1340_v41 = vld [vmem:[#allocation7 + $0xb0] sm:$0xff] }
 0x253   :  { %2505 = vperm.xlu1 %3286, %v491_v42   ;;  %v803_v42 = vld [vmem:[#allocation7 + $0x38] sm:$0xff] }
 0x257   :  { %2515 = vperm.xlu1 %3286, %v493_v43   ;;  %v1341_v43 = vld [vmem:[#allocation7 + $0xb8] sm:$0xff] }
 0x29a   :  { %v413_v47 = vpop.permute.xlu1 %412 }
 0x29b   :  { %v408_v49 = vpop.permute.xlu0 %407  ;;  %v426_v51 = vmul.f32 %v413_v47, %v3720_v5  ;;  %v466_v5 = vld [vmem:[#allocation4 + $0x8] sm:$0xff] }
 0x29c   :  { %v425_v52 = vmul.f32 %v408_v49, %v3712_v1  ;;  %v3864_v49 = vld [vmem:[#allocation9 + $0x10] sm:$0xff] }
 0x29e   :  { %v449_v48 = vpop.permute.xlu1 %448 }
 0x29f   :  { %v462_v54 = vadd.f32 %v449_v48, %v426_v51  ;;  %v584_v6 = vpop.permute.xlu0 %583 }
 0x2a2   :  { %v423_v50 = vpop.permute.xlu1 %422 }
 0x2a3   :  { %v428_v59 = vmul.f32 %v423_v50, %v3714_v2  ;;  %v471_v2 = vld [vmem:[%s4005_s7] sm:$0xff] }
 0x2a6   :  { %v444_v53 = vpop.permute.xlu1 %443 }
 0x2a7   :  { %v461_v55 = vadd.f32 %v444_v53, %v425_v52 }
 0x2a9   :  { %v3150_v56 = vpack.c.bf16 %v462_v54, %v461_v55 }
 0x2aa   :  { %v418_v57 = vpop.permute.xlu1 %417 }
 0x2ab   :  { %3151 = vmatprep.subr.bf16.mxu0 %v3150_v56  ;;  %v427_v60 = vmul.f32 %v418_v57, %v3710_v0  ;;  %v935_v0 = vld [vmem:[#allocation7 + $0x40] sm:$0xff] }
 0x2ac   :  { %3153 = vmatpush3.bf16.msra.mxu0 %v3150_v56 }
 0x2ae   :  { %v454_v58 = vpop.permute.xlu1 %453 }
 0x2af   :  { %v463_v62 = vadd.f32 %v454_v58, %v427_v60 }
 0x2b2   :  { %v459_v61 = vpop.permute.xlu1 %458 }
 0x2b3   :  { %v464_v63 = vadd.f32 %v459_v61, %v428_v59 }
 0x2b5   :  { %v3154_v3 = vpack.c.bf16 %v464_v63, %v463_v62 }
 0x2b6   :  { %v579_v8 = vpop.permute.xlu1 %578 }
 0x2b7   :  { %3155 = vmatprep.subr.bf16.mxu0 %v3154_v3 }
 0x2b8   :  { %3157 = vmatpush3.bf16.msra.mxu0 %v3154_v3 }
 0x2bb   :  { %2893 = vmatmul.mubr.msk.f32.vlgmr.msra.gmra.mrb[0].mxu0 %vm190_vm1, %v466_v5 }
 0x2bc   :  { %2938 = vmatprep.mubr.msk.f32.mxu0 %vm157_vm0, %v935_v0 }
 0x38e   :  { %v2894_v1 = vpop.f32.mrb[0].mxu0 }
 0x38f   :  { %v567_v4 = vpop.f32.mrb[1].mxu0 }
 0x390   :  { %2899 = vmatprep.mubr.msk.f32.mxu1 %vm157_vm0, %v567_v4 }
 0x391   :  { %2900 = vmatmul.mubr.msk.f32.vlgmr.msra.gmra.mrb[8].mxu1 %vm157_vm0, %v2894_v1 }
 0x392   :  { %2906 = vmatprep.mubr.msk.f32.mxu1 %vm157_vm0, %v471_v2 }
 0x464   :  { %v2901_v7 = vpop.f32.mrb[8].mxu1 }
 0x465   :  { %v664_v9 = vadd.f32 %v2901_v7, %v584_v6  ;;  %v658_v10 = vpop.f32.mrb[9].mxu1 }
 0x466   :  { %v659_v11 = vadd.f32 %v658_v10, %v579_v8 }
 0x468   :  { %v3162_v12 = vpack.c.bf16 %v664_v9, %v659_v11 }
 0x46a   :  { %3163 = vmatprep.subr.bf16.mxu1 %v3162_v12  ;;  %3171 = vmatprep.subr.bf16.mxu0 %v3162_v12 }
 0x46b   :  { %3165 = vmatpush3.bf16.msra.mxu1 %v3162_v12  ;;  %3173 = vmatpush3.bf16.msra.mxu0 %v3162_v12 }
 0x46c   :  { %3167 = vmatprep.subr.bf16.mxu1 %v3162_v12  ;;  %3175 = vmatprep.subr.bf16.mxu0 %v3162_v12 }
 0x46e   :  { %2907 = vmatmul.mubr.msk.f32.vlgmr.msra.gmra.mrb[10].mxu1 %vm157_vm0, %v472_v13  ;;  %2939 = vmatmul.mubr.msk.f32.vlgmr.msra.gmra.mrb[2].mxu0 %vm157_vm0, %v936_v14  ;;  %v1674_v14 = vld [vmem:[#allocation12] sm:$0xff] }
 0x46f   :  { %3169 = vmatpush3.bf16.msra.mxu1 %v3162_v12  ;;  %3177 = vmatpush3.bf16.msra.mxu0 %v3162_v12 }
 0x470   :  { %2909 = vmatprep.mubr.msk.f32.mxu1 %vm157_vm0, %v473_v15  ;;  %2941 = vmatprep.mubr.msk.f32.mxu0 %vm157_vm0, %v937_v16  ;;  %v2209_v15 = vld [vmem:[#allocation12 + $0x80] sm:$0xff]  ;;  %v1618_v16 = vpop.permute.xlu0 %1617 }
 0x471   :  { %2950 = vmatprep.subr.mxu1 %v3809_v17 }
 0x472   :  { %2910 = vmatmul.mubr.msk.f32.gmra.mrb[12].mxu1 %vm157_vm0, %v474_v18  ;;  %2942 = vmatmul.mubr.msk.f32.gmra.mrb[4].mxu0 %vm157_vm0, %v938_v19  ;;  %v1613_v18 = vpop.permute.xlu1 %1612 }
 0x473   :  { %2912 = vmatprep.mubr.msk.f32.mxu1 %vm157_vm0, %v475_v20  ;;  %2944 = vmatprep.mubr.msk.f32.mxu0 %vm157_vm0, %v939_v21 }
 0x474   :  { %v1628_v19 = vpop.permute.xlu0 %1627 }
 0x476   :  { %2913 = vmatmul.mubr.msk.f32.gmra.mrb[14].mxu1 %vm157_vm0, %v476_v22  ;;  %2945 = vmatmul.mubr.msk.f32.gmra.mrb[6].mxu0 %vm157_vm0, %v940_v23  ;;  %v1623_v21 = vpop.permute.xlu1 %1622 }
 0x477   :  { %2915 = vmatprep.mubr.msk.f32.mxu1 %vm157_vm0, %v477_v24  ;;  %2947 = vmatprep.mubr.msk.f32.mxu0 %vm157_vm0, %v941_v25 }
 0x47a   :  { %2916 = vmatmul.mubr.msk.f32.gmra.mrb[16].mxu1 %vm157_vm0, %v478_v26  ;;  %2948 = vmatmul.mubr.msk.f32.gmra.mrb[8].mxu0 %vm157_vm0, %v942_v27 }
 0x47b   :  { %2922 = vmatprep.mubr.msk.f32.mxu1 %vm157_vm0, %v796_v28  ;;  %2982 = vmatprep.mubr.msk.f32.mxu0 %vm157_vm0, %v1334_v29 }
 0x47e   :  { %2923 = vmatmul.mubr.msk.f32.vlgmr.msra.gmra.mrb[18].mxu1 %vm157_vm0, %v797_v30  ;;  %2983 = vmatmul.mubr.msk.f32.vlgmr.msra.gmra.mrb[10].mxu0 %vm157_vm0, %v1335_v31  ;;  %v1638_v31 = vpop.permute.xlu0 %1637 }
 0x47f   :  { %2925 = vmatprep.mubr.msk.f32.mxu1 %vm157_vm0, %v798_v32  ;;  %2985 = vmatprep.mubr.msk.f32.mxu0 %vm157_vm0, %v1336_v33 }
 0x480   :  { %2951 = vmatpush3.msra.mxu1 %v3809_v17 }
 0x481   :  { %2964 = vmatprep.subr.mxu1 %v3856_v44 }
 0x482   :  { %2926 = vmatmul.mubr.msk.f32.gmra.mrb[20].mxu1 %vm157_vm0, %v799_v34  ;;  %2986 = vmatmul.mubr.msk.f32.gmra.mrb[12].mxu0 %vm157_vm0, %v1337_v35  ;;  %v1633_v34 = vpop.permute.xlu1 %1632 }
 0x483   :  { %2928 = vmatprep.mubr.msk.f32.mxu1 %vm157_vm0, %v800_v36  ;;  %2988 = vmatprep.mubr.msk.f32.mxu0 %vm157_vm0, %v1338_v37 }
 0x486   :  { %2929 = vmatmul.mubr.msk.f32.gmra.mrb[22].mxu1 %vm157_vm0, %v801_v38  ;;  %2989 = vmatmul.mubr.msk.f32.gmra.mrb[14].mxu0 %vm157_vm0, %v1339_v39 }
 0x487   :  { %2931 = vmatprep.mubr.msk.f32.mxu1 %vm157_vm0, %v802_v40  ;;  %2991 = vmatprep.mubr.msk.f32.mxu0 %vm157_vm0, %v1340_v41 }
 0x48a   :  { %2932 = vmatmul.mubr.msk.f32.gmra.mrb[24].mxu1 %vm157_vm0, %v803_v42  ;;  %2992 = vmatmul.mubr.msk.f32.gmra.mrb[16].mxu0 %vm157_vm0, %v1341_v43 }
 0x48b   :  { %3024 = vmatprep.mubr.msk.f32.mxu0 %vm1682_vm3, %v1674_v14  ;;  %v2213_v14 = vld [vmem:[#allocation12 + $0xa0] sm:$0xff] }
 0x541   :  { %v3859_v45 = vpop.f32.mrb[10].mxu1  ;;  %v2940_v46 = vpop.f32.mrb[2].mxu0 }
 0x542   :  { %v3861_v47 = vpop.f32.mrb[11].mxu1  ;;  %v1033_v48 = vpop.f32.mrb[3].mxu0 }
 0x543   :  { %2952 = vmatprep.mubr.msk.f32.mxu1 %vm1074_vm2, %v1033_v48  ;;  %v1648_v48 = vpop.permute.xlu0 %1647 }
 0x544   :  { %2953 = vmatmul.mubr.msk.f32.vlgmr.msra.gmra.mrb[26].mxu1 %vm1074_vm2, %v2940_v46 }
 0x545   :  { %v3867_v50 = vpop.f32.mrb[12].mxu1  ;;  %v2943_v51 = vpop.f32.mrb[4].mxu0  ;;  %2965 = vmatpush3.msra.mxu1 %v3856_v44 }
 0x546   :  { %v3870_v52 = vpop.f32.mrb[13].mxu1  ;;  %v1043_v53 = vpop.f32.mrb[5].mxu0  ;;  %2994 = vmatprep.subr.mxu1 %v3864_v49 }
 0x547   :  { %2955 = vmatprep.mubr.msk.f32.mxu1 %vm1074_vm2, %v1043_v53 }
 0x548   :  { %2956 = vmatmul.mubr.msk.f32.gmra.mrb[28].mxu1 %vm1074_vm2, %v2943_v51 }
 0x549   :  { %v3875_v54 = vpop.f32.mrb[14].mxu1  ;;  %v2946_v55 = vpop.f32.mrb[6].mxu0 }
 0x54a   :  { %v3877_v56 = vpop.f32.mrb[15].mxu1  ;;  %v1053_v57 = vpop.f32.mrb[7].mxu0 }
 0x54b   :  { %2958 = vmatprep.mubr.msk.f32.mxu1 %vm1074_vm2, %v1053_v57  ;;  %v1643_v57 = vpop.permute.xlu1 %1642 }
 0x54c   :  { %2959 = vmatmul.mubr.msk.f32.gmra.mrb[30].mxu1 %vm1074_vm2, %v2946_v55 }
 0x54d   :  { %v3881_v58 = vpop.f32.mrb[16].mxu1  ;;  %v2949_v59 = vpop.f32.mrb[8].mxu0 }
 0x54e   :  { %v3883_v60 = vpop.f32.mrb[17].mxu1  ;;  %v1063_v61 = vpop.f32.mrb[9].mxu0 }
 0x54f   :  { %2961 = vmatprep.mubr.msk.f32.mxu1 %vm1074_vm2, %v1063_v61 }
 0x550   :  { %2962 = vmatmul.mubr.msk.f32.gmra.mrb[32].mxu1 %vm1074_vm2, %v2949_v59 }
 0x551   :  { %v2924_v62 = vpop.f32.mrb[18].mxu1  ;;  %v2984_v63 = vpop.f32.mrb[10].mxu0 }
 0x552   :  { %v894_v3 = vpop.f32.mrb[19].mxu1  ;;  %v1432_v5 = vpop.f32.mrb[11].mxu0 }
 0x553   :  { %2966 = vmatprep.mubr.msk.f32.mxu1 %vm1074_vm2, %v894_v3 }
 0x554   :  { %2967 = vmatmul.mubr.msk.f32.vlgmr.msra.gmra.mrb[26].mxu1 %vm1074_vm2, %v2924_v62 }
 0x555   :  { %v2927_v1 = vpop.f32.mrb[20].mxu1  ;;  %2995 = vmatpush3.msra.mxu1 %v3864_v49  ;;  %v2987_v4 = vpop.f32.mrb[12].mxu0 }
 0x556   :  { %v904_v2 = vpop.f32.mrb[21].mxu1  ;;  %v1442_v0 = vpop.f32.mrb[13].mxu0 }
 0x557   :  { %2969 = vmatprep.mubr.msk.f32.mxu1 %vm1074_vm2, %v904_v2 }
 0x558   :  { %2970 = vmatmul.mubr.msk.f32.gmra.mrb[28].mxu1 %vm1074_vm2, %v2927_v1 }
 0x559   :  { %v2930_v6 = vpop.f32.mrb[22].mxu1  ;;  %v2990_v7 = vpop.f32.mrb[14].mxu0 }
 0x55a   :  { %v914_v8 = vpop.f32.mrb[23].mxu1  ;;  %v1452_v9 = vpop.f32.mrb[15].mxu0 }
 0x55b   :  { %2972 = vmatprep.mubr.msk.f32.mxu1 %vm1074_vm2, %v914_v8  ;;  %v2210_v8 = vld [vmem:[#allocation12 + $0x88] sm:$0xff] }
 0x55c   :  { %2973 = vmatmul.mubr.msk.f32.gmra.mrb[30].mxu1 %vm1074_vm2, %v2930_v6 }
 0x55d   :  { %v2933_v10 = vpop.f32.mrb[24].mxu1  ;;  %v2993_v11 = vpop.f32.mrb[16].mxu0 }
 0x55e   :  { %v924_v12 = vpop.f32.mrb[25].mxu1  ;;  %v1462_v13 = vpop.f32.mrb[17].mxu0 }
 0x55f   :  { %2975 = vmatprep.mubr.msk.f32.mxu1 %vm1074_vm2, %v924_v12  ;;  %v2212_v12 = vld [vmem:[#allocation12 + $0x98] sm:$0xff] }
 0x560   :  { %2976 = vmatmul.mubr.msk.f32.gmra.mrb[32].mxu1 %vm1074_vm2, %v2933_v10  ;;  %v2211_v10 = vld [vmem:[#allocation12 + $0x90] sm:$0xff] }
 0x561   :  { %2996 = vmatprep.mubr.msk.f32.mxu1 %vm1074_vm2, %v1432_v5 }
 0x564   :  { %2997 = vmatmul.mubr.msk.f32.vlgmr.msra.gmra.mrb[26].mxu1 %vm1074_vm2, %v2984_v63 }
 0x565   :  { %2999 = vmatprep.mubr.msk.f32.mxu1 %vm1074_vm2, %v1442_v0 }
 0x568   :  { %3000 = vmatmul.mubr.msk.f32.gmra.mrb[28].mxu1 %vm1074_vm2, %v2987_v4 }
 0x569   :  { %3002 = vmatprep.mubr.msk.f32.mxu1 %vm1074_vm2, %v1452_v9  ;;  %v1676_v9 = vld [vmem:[#allocation12 + $0x10] sm:$0xff] }
 0x56c   :  { %3003 = vmatmul.mubr.msk.f32.gmra.mrb[30].mxu1 %vm1074_vm2, %v2990_v7  ;;  %v1675_v7 = vld [vmem:[#allocation12 + $0x8] sm:$0xff] }
 0x56d   :  { %3005 = vmatprep.mubr.msk.f32.mxu1 %vm1074_vm2, %v1462_v13  ;;  %v1678_v13 = vld [vmem:[#allocation12 + $0x20] sm:$0xff] }
 0x570   :  { %3006 = vmatmul.mubr.msk.f32.gmra.mrb[32].mxu1 %vm1074_vm2, %v2993_v11  ;;  %v1677_v11 = vld [vmem:[#allocation12 + $0x18] sm:$0xff] }
 0x571   :  { %3108 = vmatprep.mubr.msk.f32.mxu1 %vm1682_vm3, %v2209_v15  ;;  %v1679_v15 = vld [vmem:[#allocation12 + $0x28] sm:$0xff] }
 0x637   :  { %v2998_v20 = vpop.f32.mrb[26].mxu1 }
 0x638   :  { %v1651_v22 = vadd.f32 %v2998_v20, %v1618_v16  ;;  %v1563_v23 = vpop.f32.mrb[27].mxu1  ;;  %v2214_v16 = vld [vmem:[#allocation12 + $0xa8] sm:$0xff]  ;;  %v1681_v20 = vld [vmem:[#allocation12 + $0x38] sm:$0xff] }
 0x639   :  { %v1650_v24 = vadd.f32 %v1613_v18, %v1563_v23  ;;  %v1680_v18 = vld [vmem:[#allocation12 + $0x30] sm:$0xff]  ;;  %v1814_v23 = vld [vmem:[#allocation12 + $0x48] sm:$0xff] }
 0x63a   :  { %v1659_v25 = vmul.f32 0.2, %v1651_v22 }
 0x63b   :  { %v1658_v26 = vmul.f32 0.2, %v1650_v24  ;;  %v3001_v27 = vpop.f32.mrb[28].mxu1 }
 0x63c   :  { %v1667_v28 = vmax.f32 %v1651_v22, %v1659_v25  ;;  %v1653_v29 = vadd.f32 %v3001_v27, %v1628_v19  ;;  %v1573_v30 = vpop.f32.mrb[29].mxu1  ;;  %v2215_v19 = vld [vmem:[#allocation12 + $0xb0] sm:$0xff]  ;;  %v1813_v22 = vld [vmem:[#allocation12 + $0x40] sm:$0xff]  ;;  %v1816_v25 = vld [vmem:[#allocation12 + $0x58] sm:$0xff] }
 0x63d   :  { %v1666_v32 = vmax.f32 %v1650_v24, %v1658_v26  ;;  %v1652_v33 = vadd.f32 %v1623_v21, %v1573_v30  ;;  %v2216_v21 = vld [vmem:[#allocation12 + $0xb8] sm:$0xff]  ;;  %v1815_v24 = vld [vmem:[#allocation12 + $0x50] sm:$0xff]  ;;  %v1817_v26 = vld [vmem:[#allocation12 + $0x60] sm:$0xff] }
 0x63e   :  { %v1661_v35 = vmul.f32 0.2, %v1653_v29  ;;  %v1818_v27 = vld [vmem:[#allocation12 + $0x68] sm:$0xff] }
 0x63f   :  { %v3178_v36 = vpack.c.bf16 %v1667_v28, %v1666_v32  ;;  %v1660_v37 = vmul.f32 0.2, %v1652_v33  ;;  %v3004_v38 = vpop.f32.mrb[30].mxu1  ;;  %v1819_v28 = vld [vmem:[#allocation12 + $0x70] sm:$0xff] }
 0x640   :  { %v1669_v39 = vmax.f32 %v1653_v29, %v1661_v35  ;;  %v1655_v40 = vadd.f32 %v3004_v38, %v1638_v31  ;;  %v1583_v41 = vpop.f32.mrb[31].mxu1  ;;  %v1820_v29 = vld [vmem:[#allocation12 + $0x78] sm:$0xff] }
 0x641   :  { %v1668_v42 = vmax.f32 %v1652_v33, %v1660_v37  ;;  %v1654_v43 = vadd.f32 %v1633_v34, %v1583_v41  ;;  %3179 = vmatprep.subr.bf16.mxu0 %v3178_v36  ;;  %3211 = vmatprep.subr.bf16.mxu1 %v3178_v36 }
 0x642   :  { %v1663_v46 = vmul.f32 0.2, %v1655_v40  ;;  %3181 = vmatpush3.bf16.msra.mxu0 %v3178_v36  ;;  %3213 = vmatpush3.bf16.msra.mxu1 %v3178_v36 }
 0x643   :  { %v3182_v51 = vpack.c.bf16 %v1669_v39, %v1668_v42  ;;  %v1662_v53 = vmul.f32 0.2, %v1654_v43  ;;  %v3007_v55 = vpop.f32.mrb[32].mxu1 }
 0x644   :  { %v1671_v59 = vmax.f32 %v1655_v40, %v1663_v46  ;;  %v1657_v61 = vadd.f32 %v3007_v55, %v1648_v48  ;;  %v1593_v62 = vpop.f32.mrb[33].mxu1 }
 0x645   :  { %v1670_v63 = vmax.f32 %v1654_v43, %v1662_v53  ;;  %v1656_v3 = vadd.f32 %v1643_v57, %v1593_v62  ;;  %3183 = vmatprep.subr.bf16.mxu0 %v3182_v51  ;;  %3215 = vmatprep.subr.bf16.mxu1 %v3182_v51 }
 0x646   :  { %v1665_v5 = vmul.f32 0.2, %v1657_v61  ;;  %3185 = vmatpush3.bf16.msra.mxu0 %v3182_v51  ;;  %3217 = vmatpush3.bf16.msra.mxu1 %v3182_v51 }
 0x647   :  { %v3186_v1 = vpack.c.bf16 %v1671_v59, %v1670_v63  ;;  %v1664_v4 = vmul.f32 0.2, %v1656_v3 }
 0x648   :  { %v1673_v2 = vmax.f32 %v1657_v61, %v1665_v5 }
 0x649   :  { %v1672_v0 = vmax.f32 %v1656_v3, %v1664_v4  ;;  %3187 = vmatprep.subr.bf16.mxu0 %v3186_v1  ;;  %3219 = vmatprep.subr.bf16.mxu1 %v3186_v1 }
 0x64a   :  { %3189 = vmatpush3.bf16.msra.mxu0 %v3186_v1  ;;  %3221 = vmatpush3.bf16.msra.mxu1 %v3186_v1 }
 0x64b   :  { %v3190_v6 = vpack.c.bf16 %v1673_v2, %v1672_v0 }
 0x64d   :  { %3191 = vmatprep.subr.bf16.mxu0 %v3190_v6  ;;  %3223 = vmatprep.subr.bf16.mxu1 %v3190_v6 }
 0x64e   :  { %3193 = vmatpush3.bf16.msra.mxu0 %v3190_v6  ;;  %3225 = vmatpush3.bf16.msra.mxu1 %v3190_v6 }
 0x64f   :  { %3195 = vmatprep.subr.bf16.mxu0 %v3178_v36 }
 0x651   :  { %3025 = vmatmul.mubr.msk.f32.vlgmr.msra.gmra.mrb[18].mxu0 %vm1682_vm3, %v1675_v7  ;;  %3109 = vmatmul.mubr.msk.f32.vlgmr.msra.gmra.mrb[34].mxu1 %vm1682_vm3, %v2210_v8 }
 0x652   :  { %3197 = vmatpush3.bf16.msra.mxu0 %v3178_v36  ;;  %3027 = vmatprep.mubr.msk.f32.mxu0 %vm1682_vm3, %v1676_v9 }
 0x653   :  { %3199 = vmatprep.subr.bf16.mxu0 %v3182_v51  ;;  %3111 = vmatprep.mubr.msk.f32.mxu1 %vm1682_vm3, %v2211_v10 }
 0x655   :  { %3028 = vmatmul.mubr.msk.f32.gmra.mrb[20].mxu0 %vm1682_vm3, %v1677_v11  ;;  %3112 = vmatmul.mubr.msk.f32.gmra.mrb[36].mxu1 %vm1682_vm3, %v2212_v12 }
 0x656   :  { %3201 = vmatpush3.bf16.msra.mxu0 %v3182_v51  ;;  %3030 = vmatprep.mubr.msk.f32.mxu0 %vm1682_vm3, %v1678_v13 }
 0x657   :  { %3203 = vmatprep.subr.bf16.mxu0 %v3186_v1  ;;  %3114 = vmatprep.mubr.msk.f32.mxu1 %vm1682_vm3, %v2213_v14 }
 0x659   :  { %3031 = vmatmul.mubr.msk.f32.gmra.mrb[22].mxu0 %vm1682_vm3, %v1679_v15  ;;  %3115 = vmatmul.mubr.msk.f32.gmra.mrb[38].mxu1 %vm1682_vm3, %v2214_v16 }
 0x65a   :  { %3205 = vmatpush3.bf16.msra.mxu0 %v3186_v1  ;;  %3033 = vmatprep.mubr.msk.f32.mxu0 %vm1682_vm3, %v1680_v18 }
 0x65b   :  { %3207 = vmatprep.subr.bf16.mxu0 %v3190_v6  ;;  %3117 = vmatprep.mubr.msk.f32.mxu1 %vm1682_vm3, %v2215_v19 }
 0x65d   :  { %3034 = vmatmul.mubr.msk.f32.gmra.mrb[24].mxu0 %vm1682_vm3, %v1681_v20  ;;  %3118 = vmatmul.mubr.msk.f32.gmra.mrb[40].mxu1 %vm1682_vm3, %v2216_v21 }
 0x65e   :  { %3209 = vmatpush3.bf16.msra.mxu0 %v3190_v6  ;;  %3052 = vmatprep.mubr.msk.f32.mxu0 %vm1682_vm3, %v1813_v22 }
 0x65f   :  { %3064 = vmatprep.subr.mxu0 %v3809_v17 }
 0x661   :  { %3053 = vmatmul.mubr.msk.f32.vlgmr.msra.gmra.mrb[26].mxu0 %vm1682_vm3, %v1814_v23 }
 0x662   :  { %3055 = vmatprep.mubr.msk.f32.mxu0 %vm1682_vm3, %v1815_v24  ;;  %3065 = vmatpush3.msra.mxu0 %v3809_v17 }
 0x663   :  { %3078 = vmatprep.subr.mxu0 %v3856_v44 }
 0x665   :  { %3056 = vmatmul.mubr.msk.f32.gmra.mrb[28].mxu0 %vm1682_vm3, %v1816_v25 }
 0x666   :  { %3058 = vmatprep.mubr.msk.f32.mxu0 %vm1682_vm3, %v1817_v26 }
 0x669   :  { %3059 = vmatmul.mubr.msk.f32.gmra.mrb[30].mxu0 %vm1682_vm3, %v1818_v27 }
 0x66a   :  { %3061 = vmatprep.mubr.msk.f32.mxu0 %vm1682_vm3, %v1819_v28 }
 0x66d   :  { %3062 = vmatmul.mubr.msk.f32.gmra.mrb[32].mxu0 %vm1682_vm3, %v1820_v29 }
 0x724   :  { %v3026_v30 = vpop.f32.mrb[18].mxu0  ;;  %v3110_v31 = vpop.f32.mrb[34].mxu1 }
 0x725   :  { %v1773_v32 = vpop.f32.mrb[19].mxu0  ;;  %v2307_v17 = vpop.f32.mrb[35].mxu1 }
 0x728   :  { %v3029_v33 = vpop.f32.mrb[20].mxu0  ;;  %v3113_v34 = vpop.f32.mrb[36].mxu1 }
 0x729   :  { %v1783_v35 = vpop.f32.mrb[21].mxu0  ;;  %v2317_v36 = vpop.f32.mrb[37].mxu1 }
 0x72c   :  { %v3032_v37 = vpop.f32.mrb[22].mxu0  ;;  %v3116_v38 = vpop.f32.mrb[38].mxu1 }
 0x72d   :  { %v1793_v39 = vpop.f32.mrb[23].mxu0  ;;  %v2327_v40 = vpop.f32.mrb[39].mxu1 }
 0x730   :  { %v3035_v41 = vpop.f32.mrb[24].mxu0  ;;  %v3119_v42 = vpop.f32.mrb[40].mxu1 }
 0x731   :  { %v1803_v43 = vpop.f32.mrb[25].mxu0  ;;  %v2337_v46 = vpop.f32.mrb[41].mxu1 }
 0x734   :  { %v3054_v48 = vpop.f32.mrb[26].mxu0 }
 0x735   :  { %v1911_v51 = vpop.f32.mrb[27].mxu0 }
 0x736   :  { %3066 = vmatprep.mubr.msk.f32.mxu0 %vm1074_vm2, %v1911_v51 }
 0x737   :  { %3067 = vmatmul.mubr.msk.f32.vlgmr.msra.gmra.mrb[34].mxu0 %vm1074_vm2, %v3054_v48 }
 0x738   :  { %v3057_v53 = vpop.f32.mrb[28].mxu0  ;;  %3079 = vmatpush3.msra.mxu0 %v3856_v44  ;;  %v2491_v44 = vpop.permute.xlu0 %2490 }
 0x739   :  { %v1921_v55 = vpop.f32.mrb[29].mxu0  ;;  %3120 = vmatprep.subr.mxu0 %v3864_v49 }
 0x73a   :  { %3069 = vmatprep.mubr.msk.f32.mxu0 %vm1074_vm2, %v1921_v55 }
 0x73b   :  { %3070 = vmatmul.mubr.msk.f32.gmra.mrb[36].mxu0 %vm1074_vm2, %v3057_v53 }
 0x73c   :  { %v3060_v57 = vpop.f32.mrb[30].mxu0  ;;  %v2501_v1 = vpop.permute.xlu0 %2500 }
 0x73d   :  { %v1931_v59 = vpop.f32.mrb[31].mxu0 }
 0x73e   :  { %3072 = vmatprep.mubr.msk.f32.mxu0 %vm1074_vm2, %v1931_v59 }
 0x73f   :  { %3073 = vmatmul.mubr.msk.f32.gmra.mrb[38].mxu0 %vm1074_vm2, %v3060_v57 }
 0x740   :  { %v3063_v61 = vpop.f32.mrb[32].mxu0  ;;  %v2511_v15 = vpop.permute.xlu0 %2510 }
 0x741   :  { %v1941_v62 = vpop.f32.mrb[33].mxu0 }
 0x742   :  { %3075 = vmatprep.mubr.msk.f32.mxu0 %vm1074_vm2, %v1941_v62 }
 0x743   :  { %3076 = vmatmul.mubr.msk.f32.gmra.mrb[40].mxu0 %vm1074_vm2, %v3063_v61 }
 0x744   :  { %3080 = vmatprep.mubr.msk.f32.mxu0 %vm1074_vm2, %v1773_v32  ;;  %v2521_v29 = vpop.permute.xlu0 %2520 }
 0x747   :  { %3081 = vmatmul.mubr.msk.f32.vlgmr.msra.gmra.mrb[34].mxu0 %vm1074_vm2, %v3026_v30 }
 0x748   :  { %3083 = vmatprep.mubr.msk.f32.mxu0 %vm1074_vm2, %v1783_v35  ;;  %3121 = vmatpush3.msra.mxu0 %v3864_v49  ;;  %v2486_v49 = vpop.permute.xlu1 %2485 }
 0x74b   :  { %3084 = vmatmul.mubr.msk.f32.gmra.mrb[36].mxu0 %vm1074_vm2, %v3029_v33 }
 0x74c   :  { %3086 = vmatprep.mubr.msk.f32.mxu0 %vm1074_vm2, %v1793_v39  ;;  %v2496_v2 = vpop.permute.xlu1 %2495 }
 0x74f   :  { %3087 = vmatmul.mubr.msk.f32.gmra.mrb[38].mxu0 %vm1074_vm2, %v3032_v37 }
 0x750   :  { %3089 = vmatprep.mubr.msk.f32.mxu0 %vm1074_vm2, %v1803_v43  ;;  %v2506_v19 = vpop.permute.xlu1 %2505 }
 0x753   :  { %3090 = vmatmul.mubr.msk.f32.gmra.mrb[40].mxu0 %vm1074_vm2, %v3035_v41 }
 0x754   :  { %3122 = vmatprep.mubr.msk.f32.mxu0 %vm1074_vm2, %v2307_v17 }
 0x757   :  { %3123 = vmatmul.mubr.msk.f32.vlgmr.msra.gmra.mrb[34].mxu0 %vm1074_vm2, %v3110_v31  ;;  %v2516_v31 = vpop.permute.xlu1 %2515 }
 0x758   :  { %3125 = vmatprep.mubr.msk.f32.mxu0 %vm1074_vm2, %v2317_v36 }
 0x75b   :  { %3126 = vmatmul.mubr.msk.f32.gmra.mrb[36].mxu0 %vm1074_vm2, %v3113_v34 }
 0x75c   :  { %3128 = vmatprep.mubr.msk.f32.mxu0 %vm1074_vm2, %v2327_v40 }
 0x75f   :  { %3129 = vmatmul.mubr.msk.f32.gmra.mrb[38].mxu0 %vm1074_vm2, %v3116_v38 }
 0x760   :  { %3131 = vmatprep.mubr.msk.f32.mxu0 %vm1074_vm2, %v2337_v46 }
 0x763   :  { %3132 = vmatmul.mubr.msk.f32.gmra.mrb[40].mxu0 %vm1074_vm2, %v3119_v42 }
 0x82a   :  { %v3124_v63 = vpop.f32.mrb[34].mxu0 }
 0x82b   :  { %v3226_v3 = vadd.f32 %v3124_v63, %v3859_v45  ;;  %v2436_v5 = vpop.f32.mrb[35].mxu0 }
 0x82c   :  { %v3228_v4 = vadd.f32 %v2436_v5, %v3861_v47 }
 0x82d   :  { %v3227_v0 = vadd.f32 %v3226_v3, %v2491_v44 }
 0x82e   :  { %v3229_v6 = vadd.f32 %v3228_v4, %v2486_v49  ;;  %v3127_v7 = vpop.f32.mrb[36].mxu0 }
 0x82f   :  { %v2540_v8 = vmul.f32 0.2, %v3227_v0  ;;  %v3230_v9 = vadd.f32 %v3127_v7, %v3867_v50  ;;  %v2446_v10 = vpop.f32.mrb[37].mxu0 }
 0x830   :  { %v2539_v11 = vmul.f32 0.2, %v3229_v6  ;;  %v3232_v12 = vadd.f32 %v2446_v10, %v3870_v52 }
 0x831   :  { %v2548_v13 = vmax.f32 %v3227_v0, %v2540_v8  ;;  %v3231_v14 = vadd.f32 %v3230_v9, %v2501_v1 }
 0x832   :  { %v2547_v16 = vmax.f32 %v3229_v6, %v2539_v11  ;;  %v3233_v45 = vadd.f32 %v3232_v12, %v2496_v2  ;;  %v3130_v18 = vpop.f32.mrb[38].mxu0 }
 0x833   :  { %2556 = vst.msk [vmem:[%s4011_s13 + $0x8] sm:$0xff] %vm1074_vm2, %v2548_v13  ;;  %v2542_v47 = vmul.f32 0.2, %v3231_v14  ;;  %v3234_v20 = vadd.f32 %v3130_v18, %v3875_v54  ;;  %v2456_v50 = vpop.f32.mrb[39].mxu0 }
 0x834   :  { %2555 = vst.msk [vmem:[%s4011_s13] sm:$0xff] %vm1074_vm2, %v2547_v16  ;;  %v2541_v52 = vmul.f32 0.2, %v3233_v45  ;;  %v3236_v21 = vadd.f32 %v2456_v50, %v3877_v56 }
 0x835   :  { %v2550_v22 = vmax.f32 %v3231_v14, %v2542_v47  ;;  %v3235_v23 = vadd.f32 %v3234_v20, %v2511_v15 }
 0x836   :  { %v2549_v24 = vmax.f32 %v3233_v45, %v2541_v52  ;;  %v3237_v25 = vadd.f32 %v3236_v21, %v2506_v19  ;;  %v3133_v26 = vpop.f32.mrb[40].mxu0 }
 0x837   :  { %2558 = vst.msk [vmem:[%s4011_s13 + $0x18] sm:$0xff] %vm1074_vm2, %v2550_v22  ;;  %v2544_v54 = vmul.f32 0.2, %v3235_v23  ;;  %v3238_v27 = vadd.f32 %v3133_v26, %v3881_v58  ;;  %v2466_v28 = vpop.f32.mrb[41].mxu0 }
 0x838   :  { %2557 = vst.msk [vmem:[%s4011_s13 + $0x10] sm:$0xff] %vm1074_vm2, %v2549_v24  ;;  %v2543_v56 = vmul.f32 0.2, %v3237_v25  ;;  %v3240_v30 = vadd.f32 %v2466_v28, %v3883_v60 }
 0x839   :  { %v2552_v32 = vmax.f32 %v3235_v23, %v2544_v54  ;;  %v3239_v17 = vadd.f32 %v3238_v27, %v2521_v29 }
 0x83a   :  { %v2551_v33 = vmax.f32 %v3237_v25, %v2543_v56  ;;  %v3241_v34 = vadd.f32 %v3240_v30, %v2516_v31 }
 0x83b   :  { %2560 = vst.msk [vmem:[%s4011_s13 + $0x28] sm:$0xff] %vm1074_vm2, %v2552_v32  ;;  %v2546_v58 = vmul.f32 0.2, %v3239_v17 }
 0x83c   :  { %2559 = vst.msk [vmem:[%s4011_s13 + $0x20] sm:$0xff] %vm1074_vm2, %v2551_v33  ;;  %v2545_v35 = vmul.f32 0.2, %v3241_v34 }
 0x83d   :  { %v2554_v36 = vmax.f32 %v3239_v17, %v2546_v58 }
 0x83e   :  { %v2553_v37 = vmax.f32 %v3241_v34, %v2545_v35 }
 0x83f   :  { %2562 = vst.msk [vmem:[%s4011_s13 + $0x38] sm:$0xff] %vm1074_vm2, %v2554_v36 }
 0x840   :  { %2561 = vst.msk [vmem:[%s4011_s13 + $0x30] sm:$0xff] %vm1074_vm2, %v2553_v37 }
 0x841   :  { %2567 = vsyncpa [#allocation3], 1 }
 0x842   :  { %2568 = vsyncpa [#allocation5], 1 }
 0x843   :  { %2569 = vsyncpa [#allocation8], 1 }
 0x844   :  { %2570 = vsyncpa [#allocation11], 1 }
 0x845   :  { %2571 = vsyncpa [#allocation14], 1 }

// kernel: _lambda_.9
= control target key start
LH: loop header
LB: loop body
LE: loop exit
PB: predicated region body
PF: predicated region fallthrough
CT: control target
= control target key end

     0   :  { %s2995_s0 = inlined_call_operand.vmem [shape: f32[256,17], index: 0, kind: input, shape index: {}]   ;;  %s2996_s1 = inlined_call_operand.vmem [shape: f32[64,256], index: 1, kind: input, shape index: {}]   ;;  %s2997_s2 = inlined_call_operand.vmem [shape: f32[17,16], index: 2, kind: input, shape index: {}]   ;;  %s2998_s3 = inlined_call_operand.vmem [shape: f32[64,1], index: 3, kind: input, shape index: {}]   ;;  %s2999_s4 = inlined_call_operand.vmem [shape: f32[8,64], index: 4, kind: input, shape index: {}]   ;;  %s3000_s5 = inlined_call_operand.vmem [shape: f32[3,8,64], index: 5, kind: input, shape index: {}]   ;;  %s3001_s6 = inlined_call_operand.vmem [shape: f32[3,16,16], index: 6, kind: input, shape index: {}]   ;;  %s3002_s7 = inlined_call_operand.vmem [shape: f32[8,1], index: 7, kind: input, shape index: {}]   ;;  %s3003_s8 = inlined_call_operand.vmem [shape: f32[3,8,8], index: 8, kind: input, shape index: {}]   ;;  %s3004_s9 = inlined_call_operand.vmem [shape: f32[8,1], index: 9, kind: input, shape index: {}]   ;;  %s3005_s10 = inlined_call_operand.vmem [shape: f32[4,2,8], index: 10, kind: input, shape index: {}]   ;;  %s3006_s11 = inlined_call_operand.vmem [shape: f32[4,16,64], index: 11, kind: input, shape index: {}]   ;;  %s3007_s12 = inlined_call_operand.vmem [shape: f32[2,64], index: 12, kind: input, shape index: {}]   ;;  %s3008_s13 = inlined_call_operand.hbm [shape: f32[2,64], index: 13, kind: output, shape index: {}]  }
   0x1   :  { %v61_v0 = vld [vmem:[%s2995_s0 + $0x80] sm:$0xff]  ;;  %v62_v1 = vld [vmem:[%s2995_s0 + $0x88] sm:$0xff]  ;;  %v63_v5 = vld [vmem:[%s2995_s0 + $0x90] sm:$0xff] }
   0x2   :  { %v45_v2 = vld [vmem:[%s2995_s0] sm:$0xff]  ;;  %v2391_v3 = vpack.c.bf16 %v62_v1, %v61_v0  ;;  %v46_v4 = vld [vmem:[%s2995_s0 + $0x8] sm:$0xff]  ;;  %v64_v6 = vld [vmem:[%s2995_s0 + $0x98] sm:$0xff] }
   0x3   :  { %v2393_v7 = vpack.c.bf16 %v46_v4, %v45_v2  ;;  %v2395_v8 = vpack.c.bf16 %v64_v6, %v63_v5  ;;  %v47_v9 = vld [vmem:[%s2995_s0 + $0x10] sm:$0xff]  ;;  %v48_v10 = vld [vmem:[%s2995_s0 + $0x18] sm:$0xff]  ;;  %v65_v11 = vld [vmem:[%s2995_s0 + $0xa0] sm:$0xff] }
   0x4   :  { %2392 = vmatprep.subr.bf16.mxu0 %v2391_v3  ;;  %v66_v12 = vld [vmem:[%s2995_s0 + $0xa8] sm:$0xff]  ;;  %v2397_v13 = vpack.c.bf16 %v48_v10, %v47_v9  ;;  %v49_v15 = vld [vmem:[%s2995_s0 + $0x20] sm:$0xff]  ;;  %v67_v17 = vld [vmem:[%s2995_s0 + $0xb0] sm:$0xff] }
   0x5   :  { %2394 = vmatpush3.bf16.msra.mxu0 %v2393_v7  ;;  %v2399_v14 = vpack.c.bf16 %v66_v12, %v65_v11  ;;  %v50_v16 = vld [vmem:[%s2995_s0 + $0x28] sm:$0xff]  ;;  %v68_v18 = vld [vmem:[%s2995_s0 + $0xb8] sm:$0xff]  ;;  %v51_v21 = vld [vmem:[%s2995_s0 + $0x30] sm:$0xff] }
   0x6   :  { %2396 = vmatprep.subr.bf16.mxu0 %v2395_v8  ;;  %v2401_v19 = vpack.c.bf16 %v50_v16, %v49_v15  ;;  %v2403_v20 = vpack.c.bf16 %v68_v18, %v67_v17  ;;  %v52_v22 = vld [vmem:[%s2995_s0 + $0x38] sm:$0xff]  ;;  %v69_v23 = vld [vmem:[%s2995_s0 + $0xc0] sm:$0xff]  ;;  %v70_v24 = vld [vmem:[%s2995_s0 + $0xc8] sm:$0xff] }
   0x7   :  { %v78_v25 = vld [vmem:[%s2996_s1 + $0x8] sm:$0xff]  ;;  %v2405_v26 = vpack.c.bf16 %v52_v22, %v51_v21  ;;  %v2407_v27 = vpack.c.bf16 %v70_v24, %v69_v23  ;;  %v53_v28 = vld [vmem:[%s2995_s0 + $0x40] sm:$0xff]  ;;  %v71_v30 = vld [vmem:[%s2995_s0 + $0xd0] sm:$0xff] }
   0x8   :  { %171 = vmatprep.mubr.f32.mxu0 %v78_v25  ;;  %v54_v29 = vld [vmem:[%s2995_s0 + $0x48] sm:$0xff]  ;;  %v72_v31 = vld [vmem:[%s2995_s0 + $0xd8] sm:$0xff] }
   0x9   :  { %2398 = vmatpush3.bf16.msra.mxu0 %v2397_v13  ;;  %v2409_v32 = vpack.c.bf16 %v54_v29, %v53_v28 }
   0xa   :  { %2400 = vmatprep.subr.bf16.mxu0 %v2399_v14 }
   0xd   :  { %2402 = vmatpush3.bf16.msra.mxu0 %v2401_v19 }
   0xe   :  { %2404 = vmatprep.subr.bf16.mxu0 %v2403_v20 }
  0x11   :  { %2406 = vmatpush3.bf16.msra.mxu0 %v2405_v26 }
  0x12   :  { %18 = vsyncpa [#allocation3], 0  ;;  %2408 = vmatprep.subr.bf16.mxu0 %v2407_v27  ;;  %v2411_v33 = vpack.c.bf16 %v72_v31, %v71_v30  ;;  %v55_v34 = vld [vmem:[%s2995_s0 + $0x50] sm:$0xff]  ;;  %v56_v35 = vld [vmem:[%s2995_s0 + $0x58] sm:$0xff]  ;;  %vm277_vm0 = vcmask 1040384   ;;  %v2543_v6 = vmov 0  }
  0x13   :  { %v73_v36 = vld [vmem:[%s2995_s0 + $0xe0] sm:$0xff]  ;;  %v74_v37 = vld [vmem:[%s2995_s0 + $0xe8] sm:$0xff]  ;;  %v2413_v38 = vpack.c.bf16 %v56_v35, %v55_v34  ;;  %v75_v42 = vld [vmem:[%s2995_s0 + $0xf0] sm:$0xff]  ;;  %2517 = vset.pattern.permute.xlu0 %v2543_v6  ;;  %2518 = vset.pattern.permute.xlu1 %v2543_v6  ;;  %vm252_vm1 = vcmask 138240   ;;  %vm2545_vm2 = vmmov 0   ;;  %vm386_vm3 = vcmask 523264  }
  0x14   :  { %v2415_v39 = vpack.c.bf16 %v74_v37, %v73_v36  ;;  %v57_v40 = vld [vmem:[%s2995_s0 + $0x60] sm:$0xff]  ;;  %v58_v41 = vld [vmem:[%s2995_s0 + $0x68] sm:$0xff]  ;;  %v76_v43 = vld [vmem:[%s2995_s0 + $0xf8] sm:$0xff]  ;;  %vm614_vm4 = vcmask 130048   ;;  %vm922_vm5 = vcmask 64512   ;;  %s2547_s20 = smov [#allocation2]  }
  0x15   :  { %2410 = vmatpush3.bf16.msra.mxu0 %v2409_v32  ;;  %v2417_v44 = vpack.c.bf16 %v58_v41, %v57_v40  ;;  %v2419_v45 = vpack.c.bf16 %v76_v43, %v75_v42  ;;  %v59_v46 = vld [vmem:[%s2995_s0 + $0x70] sm:$0xff]  ;;  %v60_v47 = vld [vmem:[%s2995_s0 + $0x78] sm:$0xff]  ;;  %v77_v49 = vld [vmem:[%s2996_s1] sm:$0xff]  ;;  %v2546_v40 = vmov 0.0   ;;  %s1990_s21 = sshll.u32 %s2547_s20, 4  ;;  %vm1982_vm6 = vcmask 517120   ;;  %s1991_s21 = int_to_ptr.vmem [resolvable:$true] %s1990_s21 }
  0x16   :  { %2412 = vmatprep.subr.bf16.mxu0 %v2411_v33  ;;  %v2421_v48 = vpack.c.bf16 %v60_v47, %v59_v46  ;;  %v80_v50 = vld [vmem:[%s2996_s1 + $0x18] sm:$0xff]  ;;  %v79_v51 = vld [vmem:[%s2996_s1 + $0x10] sm:$0xff]  ;;  %v82_v52 = vld [vmem:[%s2996_s1 + $0x28] sm:$0xff]  ;;  %s2519_s22 = scalar_lea.vmem %s1991_s21, 32  ;;  %p2524_p1 = scmp.lt.s32.totalorder %s1991_s21, %s1991_s21 }
  0x17   :  { %v81_v53 = vld [vmem:[%s2996_s1 + $0x20] sm:$0xff]  ;;  %v84_v54 = vld [vmem:[%s2996_s1 + $0x38] sm:$0xff]  ;;  %v83_v55 = vld [vmem:[%s2996_s1 + $0x30] sm:$0xff]  ;;  %p2520_p0 = scmp.ne.s32.totalorder %s1991_s21, %s2519_s22  ;;  %p2525_p2 = scmp.lt.s32.totalorder %s2519_s22, %s2519_s22 }
  0x18   :  { %v86_v56 = vld [vmem:[%s2996_s1 + $0x48] sm:$0xff]  ;;  %v85_v57 = vld [vmem:[%s2996_s1 + $0x40] sm:$0xff]  ;;  %v88_v58 = vld [vmem:[%s2996_s1 + $0x58] sm:$0xff] }
  0x19   :  { %2414 = vmatpush3.bf16.msra.mxu0 %v2413_v38  ;;  %v87_v59 = vld [vmem:[%s2996_s1 + $0x50] sm:$0xff]  ;;  %v90_v60 = vld [vmem:[%s2996_s1 + $0x68] sm:$0xff]  ;;  %v89_v61 = vld [vmem:[%s2996_s1 + $0x60] sm:$0xff]  ;;  %p2526_p3 = por %p2525_p2, %p2524_p1 }
  0x1a   :  { %2416 = vmatprep.subr.bf16.mxu0 %v2415_v39  ;;  %v92_v62 = vld [vmem:[%s2996_s1 + $0x78] sm:$0xff]  ;;  %v91_v63 = vld [vmem:[%s2996_s1 + $0x70] sm:$0xff]  ;;  %v93_v0 = vld [vmem:[%s2997_s2] sm:$0xff]  ;;  %v2544_v39 = vmov 0.0|0.0  }
  0x1b   :  { %v94_v1 = vld [vmem:[%s2997_s2 + $0x8] sm:$0xff]  ;;  %v95_v3 = vld [vmem:[%s2997_s2 + $0x10] sm:$0x1]  ;;  %v96_v4 = vld [vmem:[%s2998_s3] sm:$0xff]  ;;  %p2527_p4 = pnand %p2526_p3, %p2520_p0 }
  0x1c   :  { %v2423_v2 = vpack.c.bf16 %v94_v1, %v93_v0  ;;  %v98_v5 = vld [vmem:[%s2998_s3 + $0x10] sm:$0xff]  ;;  %214 = vperm.xlu0 %2517, %v96_v4   ;;  %v97_v7 = vld [vmem:[%s2998_s3 + $0x8] sm:$0xff]  ;;  %v99_v8 = vld [vmem:[%s2998_s3 + $0x18] sm:$0xff] }
  0x1d   :  { %2418 = vmatpush3.bf16.msra.mxu0 %v2417_v44  ;;  %224 = vperm.xlu1 %2518, %v98_v5   ;;  %v100_v9 = vld [vmem:[%s2998_s3 + $0x20] sm:$0xff]  ;;  %v101_v10 = vld [vmem:[%s2998_s3 + $0x28] sm:$0xff]  ;;  %v102_v11 = vld [vmem:[%s2998_s3 + $0x30] sm:$0xff] }
  0x1e   :  { %2420 = vmatprep.subr.bf16.mxu0 %v2419_v45  ;;  %2424 = vmatprep.subr.bf16.mxu1 %v2423_v2  ;;  %v103_v12 = vld [vmem:[%s2998_s3 + $0x38] sm:$0xff]  ;;  %v105_v13 = vld [vmem:[%s3002_s7] sm:$0xff]  ;;  %v2015_v6 = vld [vmem:[%s3000_s5 + $0x10] sm:$0xff] }
  0x1f   :  { %2426 = vmatpush3.bf16.msra.mxu1 %v2423_v2  ;;  %v106_v14 = vld [vmem:[%s3004_s9] sm:$0xff] }
  0x20   :  { %2196 = vmatprep.subr.msk.mxu1 %vm277_vm0, %v95_v3  ;;  %219 = vperm.xlu0 %2517, %v97_v7   ;;  %v104_v5 = vld [vmem:[%s2999_s4] sm:$0xff] }
  0x21   :  { %2422 = vmatpush3.bf16.msra.mxu0 %v2421_v48  ;;  %229 = vperm.xlu1 %2518, %v99_v8   ;;  %v460_v7 = vld [vmem:[%s3000_s5] sm:$0xff]  ;;  %v2009_v8 = vld [vmem:[%s3000_s5 + $0x8] sm:$0xff] }
  0x22   :  { %2469 = vmatprep.subr.bf16.mxu0 %v2544_v39 }
  0x23   :  { %2197 = vmatpush3.msk.msra.mxu1 %vm277_vm0, %v95_v3 }
  0x24   :  { %172 = vmatmul.mubr.f32.vlgmr.msra.gmra.mrb[0].mxu0 %v77_v49  ;;  %234 = vperm.xlu0 %2517, %v100_v9   ;;  %v2011_v9 = vld [vmem:[%s3001_s6 + $0x10] sm:$0xff] }
  0x25   :  { %176 = vmatprep.mubr.f32.mxu0 %v80_v50  ;;  %239 = vperm.xlu1 %2518, %v101_v10   ;;  %v2012_v10 = vld [vmem:[%s3001_s6 + $0x18] sm:$0xff] }
  0x26   :  { %2427 = vmatprep.subr.bf16.mxu1 %v2544_v39 }
  0x28   :  { %177 = vmatmul.mubr.f32.gmra.mrb[2].mxu0 %v79_v51  ;;  %244 = vperm.xlu0 %2517, %v102_v11   ;;  %v2464_v11 = vpack.c.bf16 %v2012_v10, %v2011_v9  ;;  %v2043_v9 = vld [vmem:[%s3006_s11 + $0x38] sm:$0xff] }
  0x29   :  { %181 = vmatprep.mubr.f32.mxu0 %v82_v52  ;;  %249 = vperm.xlu1 %2518, %v103_v12  }
  0x2c   :  { %182 = vmatmul.mubr.f32.gmra.mrb[4].mxu0 %v81_v53  ;;  %915 = vperm.xlu0 %2517, %v105_v13  }
  0x2d   :  { %186 = vmatprep.mubr.f32.mxu0 %v84_v54  ;;  %1368 = vperm.xlu1 %2518, %v106_v14  }
  0x30   :  { %187 = vmatmul.mubr.f32.gmra.mrb[6].mxu0 %v83_v55 }
  0x31   :  { %191 = vmatprep.mubr.f32.mxu0 %v86_v56 }
  0x34   :  { %192 = vmatmul.mubr.f32.gmra.mrb[8].mxu0 %v85_v57 }
  0x35   :  { %196 = vmatprep.mubr.f32.mxu0 %v88_v58 }
  0x38   :  { %197 = vmatmul.mubr.f32.gmra.mrb[10].mxu0 %v87_v59 }
  0x39   :  { %201 = vmatprep.mubr.f32.mxu0 %v90_v60 }
  0x3c   :  { %202 = vmatmul.mubr.f32.gmra.mrb[12].mxu0 %v89_v61 }
  0x3d   :  { %206 = vmatprep.mubr.f32.mxu0 %v92_v62 }
  0x40   :  { %207 = vmatmul.mubr.f32.gmra.mrb[14].mxu0 %v91_v63 }
  0x41   :  { %2297 = vmatprep.mubr.msk.f32.mxu0 %vm2545_vm2, %v2546_v40 }
  0x9b   :  { %v215_v41 = vpop.permute.xlu0 %214 }
  0x9c   :  { %v225_v46 = vpop.permute.xlu1 %224 }
  0x9f   :  { %v220_v42 = vpop.permute.xlu0 %219 }
  0xa0   :  { %v230_v49 = vpop.permute.xlu1 %229 }
  0xa3   :  { %v235_v57 = vpop.permute.xlu0 %234 }
  0xa4   :  { %v240_v55 = vpop.permute.xlu1 %239 }
  0xa7   :  { %v245_v0 = vpop.permute.xlu0 %244 }
  0xa8   :  { %v250_v62 = vpop.permute.xlu1 %249 }
  0xf7   :  { %v2077_v15 = vpop.f32.mrb[0].mxu0 }
  0xf8   :  { %v2078_v16 = vpop.f32.mrb[1].mxu0 }
  0xf9   :  { %v2079_v17 = vadd.f32 %v2078_v16, %v2077_v15  ;;  %v534_v16 = vld [vmem:[%s3001_s6] sm:$0xff] }
  0xfb   :  { %v2080_v18 = vpop.f32.mrb[2].mxu0  ;;  %2198 = vmatprep.mubr.msk.f32.mxu1 %vm252_vm1, %v2079_v17  ;;  %v535_v17 = vld [vmem:[%s3001_s6 + $0x8] sm:$0xff] }
  0xfc   :  { %v2081_v19 = vpop.f32.mrb[3].mxu0 }
  0xfd   :  { %v2082_v20 = vadd.f32 %v2081_v19, %v2080_v18  ;;  %v2467_v18 = vpack.c.bf16 %v535_v17, %v534_v16  ;;  %v2017_v19 = vld [vmem:[%s3001_s6 + $0x20] sm:$0xff] }
  0xff   :  { %v2083_v21 = vpop.f32.mrb[4].mxu0  ;;  %2199 = vmatmul.mubr.msk.f32.vlgmr.msra.gmra.mrb[0].mxu1 %vm252_vm1, %v2082_v20  ;;  %v2018_v20 = vld [vmem:[%s3001_s6 + $0x28] sm:$0xff] }
 0x100   :  { %v2084_v22 = vpop.f32.mrb[5].mxu0 }
 0x101   :  { %v2085_v23 = vadd.f32 %v2084_v22, %v2083_v21 }
 0x103   :  { %v2086_v24 = vpop.f32.mrb[6].mxu0  ;;  %2201 = vmatprep.mubr.msk.f32.mxu1 %vm252_vm1, %v2085_v23  ;;  %v2482_v23 = vpack.c.bf16 %v2018_v20, %v2017_v19 }
 0x104   :  { %v2087_v25 = vpop.f32.mrb[7].mxu0 }
 0x105   :  { %v2088_v26 = vadd.f32 %v2087_v25, %v2086_v24 }
 0x107   :  { %v2089_v27 = vpop.f32.mrb[8].mxu0  ;;  %2202 = vmatmul.mubr.msk.f32.gmra.mrb[2].mxu1 %vm252_vm1, %v2088_v26 }
 0x108   :  { %v2090_v28 = vpop.f32.mrb[9].mxu0 }
 0x109   :  { %v2091_v29 = vadd.f32 %v2090_v28, %v2089_v27 }
 0x10b   :  { %v2092_v30 = vpop.f32.mrb[10].mxu0  ;;  %2204 = vmatprep.mubr.msk.f32.mxu1 %vm252_vm1, %v2091_v29 }
 0x10c   :  { %v2093_v31 = vpop.f32.mrb[11].mxu0 }
 0x10d   :  { %v2094_v32 = vadd.f32 %v2093_v31, %v2092_v30 }
 0x10f   :  { %v2095_v33 = vpop.f32.mrb[12].mxu0  ;;  %2205 = vmatmul.mubr.msk.f32.gmra.mrb[4].mxu1 %vm252_vm1, %v2094_v32  ;;  %v916_v32 = vpop.permute.xlu0 %915 }
 0x110   :  { %v2096_v34 = vpop.f32.mrb[13].mxu0 }
 0x111   :  { %v2097_v35 = vadd.f32 %v2096_v34, %v2095_v33 }
 0x113   :  { %v2098_v36 = vpop.f32.mrb[14].mxu0  ;;  %2207 = vmatprep.mubr.msk.f32.mxu1 %vm252_vm1, %v2097_v35 }
 0x114   :  { %v2099_v37 = vpop.f32.mrb[15].mxu0 }
 0x115   :  { %v2100_v38 = vadd.f32 %v2099_v37, %v2098_v36  ;;  %v2021_v36 = vld [vmem:[%s3003_s8 + $0x8] sm:$0xff]  ;;  %v921_v37 = vld [vmem:[%s3003_s8] sm:$0xff] }
 0x117   :  { %2208 = vmatmul.mubr.msk.f32.gmra.mrb[6].mxu1 %vm252_vm1, %v2100_v38  ;;  %v2025_v38 = vld [vmem:[%s3003_s8 + $0x10] sm:$0xff] }
 0x118   :  { %2226 = vmatprep.mubr.msk.f32.mxu1 %vm2545_vm2, %v2546_v40 }
 0x1d2   :  { %v2200_v43 = vpop.f32.mrb[0].mxu1 }
 0x1d3   :  { %v353_v44 = vadd.f32 %v2200_v43, %v220_v42  ;;  %v347_v45 = vpop.f32.mrb[1].mxu1 }
 0x1d4   :  { %v348_v47 = vadd.f32 %v347_v45, %v215_v41 }
 0x1d6   :  { %v2428_v48 = vpack.c.bf16 %v353_v44, %v348_v47  ;;  %v1449_v47 = vld [vmem:[%s3006_s11] sm:$0xff] }
 0x1d8   :  { %2429 = vmatpush3.bf16.msra.mxu1 %v2428_v48  ;;  %2471 = vmatpush3.bf16.msra.mxu0 %v2428_v48 }
 0x1d9   :  { %2430 = vmatprep.subr.bf16.mxu1 %v2544_v39  ;;  %2472 = vmatprep.subr.bf16.mxu0 %v2544_v39 }
 0x1da   :  { %v2203_v50 = vpop.f32.mrb[2].mxu1 }
 0x1db   :  { %v363_v51 = vadd.f32 %v2203_v50, %v230_v49  ;;  %v357_v52 = vpop.f32.mrb[3].mxu1  ;;  %v1369_v50 = vpop.permute.xlu1 %1368 }
 0x1dc   :  { %v358_v53 = vadd.f32 %v357_v52, %v225_v46 }
 0x1de   :  { %v2431_v54 = vpack.c.bf16 %v363_v51, %v358_v53 }
 0x1e0   :  { %2432 = vmatpush3.bf16.msra.mxu1 %v2431_v54  ;;  %2474 = vmatpush3.bf16.msra.mxu0 %v2431_v54 }
 0x1e1   :  { %2433 = vmatprep.subr.bf16.mxu1 %v2544_v39  ;;  %2475 = vmatprep.subr.bf16.mxu0 %v2544_v39 }
 0x1e2   :  { %v2206_v56 = vpop.f32.mrb[4].mxu1 }
 0x1e3   :  { %v373_v58 = vadd.f32 %v2206_v56, %v240_v55  ;;  %v367_v59 = vpop.f32.mrb[5].mxu1  ;;  %v1375_v56 = vld [vmem:[%s3005_s10] sm:$0x3] }
 0x1e4   :  { %v368_v60 = vadd.f32 %v367_v59, %v235_v57  ;;  %v2031_v57 = vld [vmem:[%s3006_s11 + $0x10] sm:$0xff]  ;;  %v2029_v59 = vld [vmem:[%s3005_s10 + $0x2] sm:$0x3] }
 0x1e6   :  { %v2434_v61 = vpack.c.bf16 %v373_v58, %v368_v60  ;;  %v2032_v58 = vld [vmem:[%s3006_s11 + $0x18] sm:$0xff] }
 0x1e7   :  { %v2494_v60 = vpack.c.bf16 %v2032_v58, %v2031_v57 }
 0x1e8   :  { %2435 = vmatpush3.bf16.msra.mxu1 %v2434_v61  ;;  %2477 = vmatpush3.bf16.msra.mxu0 %v2434_v61 }
 0x1e9   :  { %2436 = vmatprep.subr.bf16.mxu1 %v2544_v39  ;;  %2478 = vmatprep.subr.bf16.mxu0 %v2544_v39 }
 0x1ea   :  { %v2209_v63 = vpop.f32.mrb[6].mxu1 }
 0x1eb   :  { %v383_v1 = vadd.f32 %v2209_v63, %v250_v62  ;;  %v377_v2 = vpop.f32.mrb[7].mxu1 }
 0x1ec   :  { %v378_v3 = vadd.f32 %v377_v2, %v245_v0  ;;  %v2040_v2 = vld [vmem:[%s3005_s10 + $0x6] sm:$0x3] }
 0x1ee   :  { %v2437_v4 = vpack.c.bf16 %v383_v1, %v378_v3  ;;  %v2035_v1 = vld [vmem:[%s3005_s10 + $0x4] sm:$0x3] }
 0x1ef   :  { %v2037_v3 = vld [vmem:[%s3006_s11 + $0x20] sm:$0xff] }
 0x1f0   :  { %2438 = vmatpush3.bf16.msra.mxu1 %v2437_v4  ;;  %2480 = vmatpush3.bf16.msra.mxu0 %v2437_v4 }
 0x1f1   :  { %2439 = vmatprep.subr.bf16.mxu1 %v2544_v39  ;;  %2307 = vmatprep.subr.mxu0 %v2546_v40 }
 0x1f3   :  { %2227 = vmatmul.mubr.msk.f32.vlgmr.msra.gmra.mrb[8].mxu1 %vm386_vm3, %v104_v5  ;;  %2298 = vmatmul.mubr.msk.f32.vlgmr.msra.gmra.mrb[16].mxu0 %vm386_vm3, %v2015_v6 }
 0x1f4   :  { %2441 = vmatpush3.bf16.msra.mxu1 %v2428_v48  ;;  %2245 = vmatprep.mubr.msk.f32.mxu1 %vm2545_vm2, %v2546_v40 }
 0x1f5   :  { %2442 = vmatprep.subr.bf16.mxu1 %v2544_v39  ;;  %2309 = vmatprep.mubr.msk.f32.mxu0 %vm2545_vm2, %v2546_v40 }
 0x1f8   :  { %2444 = vmatpush3.bf16.msra.mxu1 %v2431_v54 }
 0x1f9   :  { %2445 = vmatprep.subr.bf16.mxu1 %v2544_v39 }
 0x1fc   :  { %2447 = vmatpush3.bf16.msra.mxu1 %v2434_v61 }
 0x1fd   :  { %2448 = vmatprep.subr.bf16.mxu1 %v2544_v39 }
 0x200   :  { %2450 = vmatpush3.bf16.msra.mxu1 %v2437_v4 }
 0x201   :  { %2451 = vmatprep.subr.bf16.mxu1 %v2544_v39 }
 0x203   :  { %2246 = vmatmul.mubr.msk.f32.vlgmr.msra.gmra.mrb[10].mxu1 %vm386_vm3, %v460_v7 }
 0x204   :  { %2453 = vmatpush3.bf16.msra.mxu1 %v2428_v48  ;;  %2264 = vmatprep.mubr.msk.f32.mxu1 %vm2545_vm2, %v2546_v40  ;;  %v1450_v48 = vld [vmem:[%s3006_s11 + $0x8] sm:$0xff] }
 0x205   :  { %2454 = vmatprep.subr.bf16.mxu1 %v2544_v39  ;;  %v2497_v49 = vpack.c.bf16 %v1450_v48, %v1449_v47 }
 0x208   :  { %2456 = vmatpush3.bf16.msra.mxu1 %v2431_v54 }
 0x209   :  { %2457 = vmatprep.subr.bf16.mxu1 %v2544_v39 }
 0x20c   :  { %2459 = vmatpush3.bf16.msra.mxu1 %v2434_v61 }
 0x20d   :  { %2460 = vmatprep.subr.bf16.mxu1 %v2544_v39 }
 0x210   :  { %2462 = vmatpush3.bf16.msra.mxu1 %v2437_v4  ;;  %v2038_v4 = vld [vmem:[%s3006_s11 + $0x28] sm:$0xff] }
 0x211   :  { %2463 = vmatprep.subr.bf16.mxu1 %v2544_v39  ;;  %v2500_v5 = vpack.c.bf16 %v2038_v4, %v2037_v3 }
 0x213   :  { %2265 = vmatmul.mubr.msk.f32.vlgmr.msra.gmra.mrb[12].mxu1 %vm386_vm3, %v2009_v8  ;;  %v2042_v8 = vld [vmem:[%s3006_s11 + $0x30] sm:$0xff] }
 0x214   :  { %2271 = vmatprep.mubr.msk.f32.mxu1 %vm2545_vm2, %v2546_v40  ;;  %2465 = vmatpush3.bf16.msra.mxu1 %v2464_v11 }
 0x215   :  { %2466 = vmatprep.subr.bf16.mxu1 %v2544_v39 }
 0x2c6   :  { %v832_v12 = vpop.f32.mrb[16].mxu0 }
 0x2c7   :  { %v2299_v13 = vpop.f32.mrb[17].mxu0 }
 0x2c8   :  { %v2503_v13 = vpack.c.bf16 %v2043_v9, %v2042_v8 }
 0x2d6   :  { %v530_v14 = vpop.f32.mrb[10].mxu1 }
 0x2d7   :  { %v2247_v15 = vpop.f32.mrb[11].mxu1 }
 0x2e6   :  { %v607_v21 = vpop.f32.mrb[12].mxu1 }
 0x2e7   :  { %v2266_v22 = vpop.f32.mrb[13].mxu1  ;;  %2272 = vmatmul.mubr.msk.f32.vlgmr.msra.gmra.mrb[14].mxu1 %vm614_vm4, %v607_v21  ;;  %v1979_v21 = vld [vmem:[%s3007_s12] sm:$0x3] }
 0x2e8   :  { %2468 = vmatpush3.bf16.msra.mxu1 %v2467_v18  ;;  %2278 = vmatprep.mubr.msk.f32.mxu1 %vm2545_vm2, %v2546_v40 }
 0x2e9   :  { %2481 = vmatprep.subr.bf16.mxu1 %v2544_v39 }
 0x2eb   :  { %2279 = vmatmul.mubr.msk.f32.vlgmr.msra.gmra.mrb[16].mxu1 %vm614_vm4, %v530_v14 }
 0x2ec   :  { %2483 = vmatpush3.bf16.msra.mxu1 %v2482_v23  ;;  %2304 = vmatprep.mubr.msk.f32.mxu1 %vm2545_vm2, %v2546_v40 }
 0x2ed   :  { %2312 = vmatprep.subr.mxu1 %v2546_v40 }
 0x2ef   :  { %2305 = vmatmul.mubr.msk.f32.vlgmr.msra.gmra.mrb[18].mxu1 %vm614_vm4, %v832_v12 }
 0x2f0   :  { %2314 = vmatprep.mubr.msk.f32.mxu1 %vm2545_vm2, %v2546_v40 }
 0x3ba   :  { %v684_v24 = vpop.f32.mrb[14].mxu1 }
 0x3bb   :  { %v2273_v25 = vpop.f32.mrb[15].mxu1 }
 0x3be   :  { %v757_v26 = vpop.f32.mrb[16].mxu1 }
 0x3bf   :  { %v758_v27 = vadd.f32 %v757_v26, %v684_v24  ;;  %v2280_v28 = vpop.f32.mrb[17].mxu1 }
 0x3c2   :  { %v908_v29 = vpop.f32.mrb[18].mxu1 }
 0x3c3   :  { %v912_v30 = vadd.f32 %v908_v29, %v758_v27  ;;  %v2306_v31 = vpop.f32.mrb[19].mxu1 }
 0x3c5   :  { %v918_v33 = vadd.f32 %v916_v32, %v912_v30 }
 0x3c7   :  { %v919_v34 = vmul.f32 0.2, %v918_v33 }
 0x3c9   :  { %v920_v35 = vmax.f32 %v918_v33, %v919_v34 }
 0x3cb   :  { %2308 = vmatpush3.msra.mxu0 %v920_v35  ;;  %2313 = vmatpush3.msra.mxu1 %v920_v35 }
 0x3cc   :  { %2315 = vmatmul.mubr.msk.f32.vlgmr.msra.gmra.mrb[20].mxu1 %vm922_vm5, %v2021_v36  ;;  %2331 = vmatprep.subr.mxu0 %v2546_v40 }
 0x3cd   :  { %2310 = vmatmul.mubr.msk.f32.vlgmr.msra.gmra.mrb[18].mxu0 %vm922_vm5, %v921_v37  ;;  %2484 = vmatprep.subr.bf16.mxu1 %v2544_v39 }
 0x3ce   :  { %2332 = vmatpush3.msra.mxu0 %v920_v35  ;;  %2333 = vmatprep.mubr.msk.f32.mxu0 %vm2545_vm2, %v2546_v40 }
 0x3cf   :  { %2486 = vmatpush3.bf16.msra.mxu1 %v2464_v11  ;;  %2321 = vmatprep.mubr.msk.f32.mxu1 %vm2545_vm2, %v2546_v40 }
 0x3d0   :  { %2487 = vmatprep.subr.bf16.mxu1 %v2544_v39  ;;  %2343 = vmatprep.subr.mxu0 %v2546_v40 }
 0x3d1   :  { %2334 = vmatmul.mubr.msk.f32.vlgmr.msra.gmra.mrb[20].mxu0 %vm922_vm5, %v2025_v38 }
 0x3d2   :  { %2345 = vmatprep.mubr.msk.f32.mxu0 %vm2545_vm2, %v2546_v40 }
 0x49f   :  { %v1067_v41 = vpop.f32.mrb[20].mxu1 }
 0x4a0   :  { %v2316_v42 = vpop.f32.mrb[21].mxu1  ;;  %2322 = vmatmul.mubr.msk.f32.vlgmr.msra.gmra.mrb[8].mxu1 %vm614_vm4, %v1067_v41  ;;  %v992_v43 = vpop.f32.mrb[18].mxu0 }
 0x4a1   :  { %2489 = vmatpush3.bf16.msra.mxu1 %v2467_v18  ;;  %v2311_v44 = vpop.f32.mrb[19].mxu0  ;;  %2328 = vmatprep.mubr.msk.f32.mxu1 %vm2545_vm2, %v2546_v40 }
 0x4a2   :  { %2490 = vmatprep.subr.bf16.mxu1 %v2544_v39 }
 0x4a4   :  { %v1288_v45 = vpop.f32.mrb[20].mxu0 }
 0x4a5   :  { %v2335_v46 = vpop.f32.mrb[21].mxu0 }
 0x4a8   :  { %2329 = vmatmul.mubr.msk.f32.vlgmr.msra.gmra.mrb[8].mxu1 %vm614_vm4, %v992_v43 }
 0x4a9   :  { %2492 = vmatpush3.bf16.msra.mxu1 %v2482_v23  ;;  %2340 = vmatprep.mubr.msk.f32.mxu1 %vm2545_vm2, %v2546_v40 }
 0x4aa   :  { %2496 = vmatprep.subr.bf16.mxu1 %v2544_v39 }
 0x4b0   :  { %2341 = vmatmul.mubr.msk.f32.vlgmr.msra.gmra.mrb[8].mxu1 %vm614_vm4, %v1288_v45 }
 0x4b1   :  { %2364 = vmatprep.mubr.msk.f32.mxu1 %vm2545_vm2, %v2546_v40  ;;  %2498 = vmatpush3.bf16.msra.mxu1 %v2497_v49 }
 0x4b2   :  { %2499 = vmatprep.subr.bf16.mxu1 %v2544_v39 }
 0x583   :  { %v1361_v51 = vpop.f32.mrb[8].mxu1 }
 0x584   :  { %v2505_v52 = vadd.f32 %v1369_v50, %v1361_v51  ;;  %v2342_v53 = vpop.f32.mrb[9].mxu1 }
 0x586   :  { %v1373_v54 = vmul.f32 0.2, %v2505_v52 }
 0x588   :  { %v1374_v55 = vmax.f32 %v2505_v52, %v1373_v54 }
 0x58a   :  { %2344 = vmatpush3.msra.mxu0 %v1374_v55 }
 0x58b   :  { %2346 = vmatmul.mubr.msk.f32.vlgmr.msra.gmra.mrb[22].mxu0 %vm922_vm5, %v1375_v56  ;;  %2348 = vmatprep.subr.mxu0 %v2546_v40 }
 0x58c   :  { %2349 = vmatpush3.msra.mxu0 %v1374_v55  ;;  %2350 = vmatprep.mubr.msk.f32.mxu0 %vm2545_vm2, %v2546_v40 }
 0x58d   :  { %2493 = vmatprep.subr.bf16.mxu0 %v2544_v39 }
 0x58f   :  { %2351 = vmatmul.mubr.msk.f32.vlgmr.msra.gmra.mrb[24].mxu0 %vm922_vm5, %v2029_v59 }
 0x590   :  { %2495 = vmatpush3.bf16.msra.mxu0 %v2494_v60  ;;  %2357 = vmatprep.mubr.msk.f32.mxu0 %vm2545_vm2, %v2546_v40 }
 0x591   :  { %2367 = vmatprep.subr.mxu0 %v2546_v40 }
 0x65e   :  { %v1445_v61 = vpop.f32.mrb[22].mxu0 }
 0x65f   :  { %v2347_v62 = vpop.f32.mrb[23].mxu0  ;;  %2365 = vmatmul.mubr.msk.f32.vlgmr.msra.gmra.mrb[22].mxu1 %vm614_vm4, %v1445_v61 }
 0x660   :  { %2376 = vmatprep.mubr.msk.f32.mxu1 %vm2545_vm2, %v2546_v40  ;;  %2501 = vmatpush3.bf16.msra.mxu1 %v2500_v5 }
 0x661   :  { %2502 = vmatprep.subr.bf16.mxu1 %v2544_v39 }
 0x662   :  { %v1522_v63 = vpop.f32.mrb[24].mxu0 }
 0x663   :  { %2358 = vmatmul.mubr.msk.f32.vlgmr.msra.gmra.mrb[26].mxu0 %vm614_vm4, %v1522_v63  ;;  %v2352_v0 = vpop.f32.mrb[25].mxu0 }
 0x664   :  { %2368 = vmatpush3.msra.mxu0 %v1374_v55  ;;  %2369 = vmatprep.mubr.msk.f32.mxu0 %vm2545_vm2, %v2546_v40 }
 0x665   :  { %2379 = vmatprep.subr.mxu0 %v2546_v40 }
 0x667   :  { %2370 = vmatmul.mubr.msk.f32.vlgmr.msra.gmra.mrb[28].mxu0 %vm922_vm5, %v2035_v1 }
 0x668   :  { %2380 = vmatpush3.msra.mxu0 %v1374_v55  ;;  %2381 = vmatprep.mubr.msk.f32.mxu0 %vm2545_vm2, %v2546_v40 }
 0x66b   :  { %2382 = vmatmul.mubr.msk.f32.vlgmr.msra.gmra.mrb[30].mxu0 %vm922_vm5, %v2040_v2 }
 0x732   :  { %v1671_v6 = vpop.f32.mrb[22].mxu1 }
 0x733   :  { %v2366_v7 = vpop.f32.mrb[23].mxu1 }
 0x736   :  { %v1598_v10 = vpop.f32.mrb[26].mxu0 }
 0x737   :  { %v1672_v11 = vadd.f32 %v1671_v6, %v1598_v10  ;;  %v2359_v12 = vpop.f32.mrb[27].mxu0 }
 0x73a   :  { %v1746_v14 = vpop.f32.mrb[28].mxu0 }
 0x73b   :  { %2377 = vmatmul.mubr.msk.f32.vlgmr.msra.gmra.mrb[24].mxu1 %vm614_vm4, %v1746_v14  ;;  %v2371_v15 = vpop.f32.mrb[29].mxu0 }
 0x73c   :  { %2504 = vmatpush3.bf16.msra.mxu1 %v2503_v13  ;;  %2388 = vmatprep.mubr.msk.f32.mxu1 %vm2545_vm2, %v2546_v40 }
 0x73e   :  { %v1898_v39 = vpop.f32.mrb[30].mxu0 }
 0x73f   :  { %2389 = vmatmul.mubr.msk.f32.vlgmr.msra.gmra.mrb[26].mxu1 %vm614_vm4, %v1898_v39  ;;  %v2383_v16 = vpop.f32.mrb[31].mxu0 }
 0x80e   :  { %v1822_v17 = vpop.f32.mrb[24].mxu1 }
 0x80f   :  { %v1826_v18 = vadd.f32 %v1822_v17, %v1672_v11  ;;  %v2378_v19 = vpop.f32.mrb[25].mxu1 }
 0x812   :  { %v1974_v20 = vpop.f32.mrb[26].mxu1 }
 0x813   :  { %v1978_v22 = vadd.f32 %v1974_v20, %v1826_v18  ;;  %v2390_v23 = vpop.f32.mrb[27].mxu1 }
 0x815   :  { %v1980_v24 = vadd.f32 %v1979_v21, %v1978_v22 }
 0x817   :  { %v1981_v25 = vmul.f32 0.33333334, %v1980_v24 }
 0x819   :  { %1983 = vst.msk [vmem:[#allocation2] sm:$0x3] %vm1982_vm6, %v1981_v25 }
 0x81a   :  { %2530 = shalt.err (!%p2527_p4)
}
 0x81b   :  { %s2531_s12 = scalar_lea.hbm %s3008_s13, 32 }
 0x81c   :  { %p2532_p5 = scmp.ne.s32.totalorder %s3008_s13, %s2531_s12  ;;  %p2535_p6 = scmp.lt.u32.totalorder %s2531_s12, %s3008_s13 }
 0x81e   :  { %p2537_p7 = pnand %p2535_p6, %p2532_p5 }
 0x820   :  { %2540 = shalt.err (!%p2537_p7)
}
 0x821   :  { %1993 = dma.vmem_to_hbm [thread:$0]  %s1991_s21, 32, %s3008_s13, [#allocation3]  }
 0x822   :  { %2541 = dma.done.wait [#allocation3], 32  }
 0x823   :  { %2542 = vsyncadd [#allocation3], 4294967264 }
 0x824   :  { %1997 = vsyncpa [#allocation3], 1 }

// kernel: _lambda_.7
= control target key start
LH: loop header
LB: loop body
LE: loop exit
PB: predicated region body
PF: predicated region fallthrough
CT: control target
= control target key end

     0   :  { %18 = vsyncpa [#allocation3], 0  ;;  %s9625_s0 = inlined_call_operand.vmem [shape: f32[64,8], index: 0, kind: input, shape index: {}]   ;;  %s9626_s1 = inlined_call_operand.hbm [shape: f32[64,64], index: 1, kind: input, shape index: {}]   ;;  %s9627_s2 = inlined_call_operand.hbm [shape: f32[64,1], index: 2, kind: input, shape index: {}]   ;;  %s9628_s3 = inlined_call_operand.vmem [shape: f32[64,1], index: 3, kind: input, shape index: {}]   ;;  %s9629_s4 = inlined_call_operand.hbm [shape: f32[128,64], index: 4, kind: input, shape index: {}]   ;;  %s9630_s5 = inlined_call_operand.hbm [shape: f32[8,17], index: 5, kind: input, shape index: {}]   ;;  %s9631_s6 = inlined_call_operand.hbm [shape: f32[128,1], index: 6, kind: input, shape index: {}]   ;;  %s9632_s7 = inlined_call_operand.vmem [shape: f32[256,128], index: 7, kind: input, shape index: {}]   ;;  %s9633_s8 = inlined_call_operand.vmem [shape: f32[3,256,128], index: 8, kind: input, shape index: {}]   ;;  %s9634_s9 = inlined_call_operand.vmem [shape: f32[3,17,17], index: 9, kind: input, shape index: {}]   ;;  %s9635_s10 = inlined_call_operand.hbm [shape: f32[256,1], index: 10, kind: input, shape index: {}]   ;;  %s9636_s11 = inlined_call_operand.hbm [shape: f32[3,256,256], index: 11, kind: input, shape index: {}]   ;;  %s9637_s12 = inlined_call_operand.hbm [shape: f32[256,1], index: 12, kind: input, shape index: {}]   ;;  %s9638_s13 = inlined_call_operand.vmem [shape: f32[256,17], index: 13, kind: output, shape index: {}]  }
   0x1   :  { %19 = vsyncpa [#allocation5], 0 }
   0x2   :  { %20 = vsyncpa [#allocation8], 0 }
   0x3   :  { %21 = vsyncpa [#allocation11], 0 }
   0x4   :  { %22 = vsyncpa [#allocation14], 0  ;;  %s8016_s25 = smov [#allocation4]   ;;  %s8017_s27 = smov [#allocation7]  }
   0x5   :  { %s42_s26 = sshll.u32 %s8016_s25, 4  ;;  %s69_s28 = sshll.u32 %s8017_s27, 4  ;;  %s43_s26 = int_to_ptr.vmem [resolvable:$true] %s42_s26  ;;  %s70_s28 = int_to_ptr.vmem [resolvable:$true] %s69_s28 }
   0x6   :  { %s7830_s14 = scalar_lea.hbm %s9627_s2, 1024 }
   0x7   :  { %p7831_p0 = scmp.ne.s32.totalorder %s9627_s2, %s7830_s14  ;;  %p7834_p1 = scmp.lt.u32.totalorder %s7830_s14, %s9627_s2 }
   0x9   :  { %p7836_p2 = pnand %p7834_p1, %p7831_p0 }
   0xb   :  { %7839 = shalt.err (!%p7836_p2)
}
   0xc   :  { %s7840_s19 = scalar_lea.vmem %s43_s26, 1024  ;;  %p7845_p4 = scmp.lt.s32.totalorder %s43_s26, %s43_s26 }
   0xd   :  { %p7841_p3 = scmp.ne.s32.totalorder %s43_s26, %s7840_s19  ;;  %p7846_p5 = scmp.lt.s32.totalorder %s7840_s19, %s7840_s19 }
   0xf   :  { %p7847_p6 = por %p7846_p5, %p7845_p4 }
  0x11   :  { %p7848_p7 = pnand %p7847_p6, %p7841_p3 }
  0x13   :  { %7851 = shalt.err (!%p7848_p7)
}
  0x14   :  { %s8018_s20 = smov 128   ;;  %s8019_s21 = smov 8  }
  0x15   :  { %48 = dma.hbm_to_vmem [thread:$0]  %s9627_s2, 1024, %s43_s26, [#allocation5], %s8018_s20, %s8018_s20, %s8019_s21  }
  0x16   :  { %s7852_s27 = scalar_lea.hbm %s9630_s5, 128 }
  0x17   :  { %p7853_p8 = scmp.ne.s32.totalorder %s9630_s5, %s7852_s27  ;;  %p7856_p9 = scmp.lt.u32.totalorder %s7852_s27, %s9630_s5 }
  0x19   :  { %p7858_p10 = pnand %p7856_p9, %p7853_p8 }
  0x1b   :  { %7861 = shalt.err (!%p7858_p10)
}
  0x1c   :  { %s7862_s16 = scalar_lea.vmem %s70_s28, 128  ;;  %p7867_p12 = scmp.lt.s32.totalorder %s70_s28, %s70_s28 }
  0x1d   :  { %p7863_p11 = scmp.ne.s32.totalorder %s70_s28, %s7862_s16  ;;  %p7868_p13 = scmp.lt.s32.totalorder %s7862_s16, %s7862_s16 }
  0x1f   :  { %p7869_p0 = por %p7868_p13, %p7867_p12 }
  0x21   :  { %p7870_p1 = pnand %p7869_p0, %p7863_p11 }
  0x23   :  { %7873 = shalt.err (!%p7870_p1)
}
  0x24   :  { %72 = dma.hbm_to_vmem [thread:$0]  %s9630_s5, 128, %s70_s28, [#allocation8]  }
  0x25   :  { %s8020_s17 = smov [#allocation10]   ;;  %s8021_s19 = smov [#allocation2]  }
  0x26   :  { %s96_s18 = sshll.u32 %s8020_s17, 4  ;;  %s30_s22 = sshll.u32 %s8021_s19, 4  ;;  %s97_s18 = int_to_ptr.vmem [resolvable:$true] %s96_s18  ;;  %s8127_s22 = int_to_ptr.vmem [resolvable:$true] %s30_s22 }
  0x27   :  { %s7874_s25 = scalar_lea.hbm %s9635_s10, 4096 }
  0x28   :  { %p7875_p2 = scmp.ne.s32.totalorder %s9635_s10, %s7874_s25  ;;  %p7878_p3 = scmp.lt.u32.totalorder %s7874_s25, %s9635_s10 }
  0x2a   :  { %p7880_p4 = pnand %p7878_p3, %p7875_p2 }
  0x2c   :  { %7883 = shalt.err (!%p7880_p4)
}
  0x2d   :  { %s7884_s5 = scalar_lea.vmem %s97_s18, 4096  ;;  %p7889_p6 = scmp.lt.s32.totalorder %s97_s18, %s97_s18 }
  0x2e   :  { %p7885_p5 = scmp.ne.s32.totalorder %s97_s18, %s7884_s5  ;;  %p7890_p7 = scmp.lt.s32.totalorder %s7884_s5, %s7884_s5 }
  0x30   :  { %p7891_p8 = por %p7890_p7, %p7889_p6 }
  0x32   :  { %p7892_p9 = pnand %p7891_p8, %p7885_p5 }
  0x34   :  { %7895 = shalt.err (!%p7892_p9)
}
  0x35   :  { %102 = dma.hbm_to_vmem [thread:$0]  %s9635_s10, 4096, %s97_s18, [#allocation11], %s8018_s20, %s8018_s20, %s8019_s21  }
  0x36   :  { %s7896_s26 = scalar_lea.hbm %s9626_s1, 1024 }
  0x37   :  { %p7897_p10 = scmp.ne.s32.totalorder %s9626_s1, %s7896_s26  ;;  %p7900_p11 = scmp.lt.u32.totalorder %s7896_s26, %s9626_s1 }
  0x39   :  { %p7902_p12 = pnand %p7900_p11, %p7897_p10 }
  0x3b   :  { %7905 = shalt.err (!%p7902_p12)
}
  0x3c   :  { %s7906_s25 = scalar_lea.vmem %s8127_s22, 1024  ;;  %p7911_p0 = scmp.lt.s32.totalorder %s8127_s22, %s8127_s22 }
  0x3d   :  { %p7907_p13 = scmp.ne.s32.totalorder %s8127_s22, %s7906_s25  ;;  %p7912_p1 = scmp.lt.s32.totalorder %s7906_s25, %s7906_s25 }
  0x3f   :  { %p7913_p2 = por %p7912_p1, %p7911_p0 }
  0x41   :  { %p7914_p3 = pnand %p7913_p2, %p7907_p13 }
  0x43   :  { %7917 = shalt.err (!%p7914_p3)
}
  0x44   :  { %36 = dma.hbm_to_vmem [thread:$0]  %s9626_s1, 1024, %s8127_s22, [#allocation3], %s8018_s20, %s8018_s20, %s8019_s21  }
  0x45   :  { %s8022_s27 = smov [#allocation6]   ;;  %s8023_s30 = smov [#allocation9]  }
  0x46   :  { %s56_s29 = sshll.u32 %s8022_s27, 4  ;;  %s78_s14 = sshll.u32 %s8023_s30, 4  ;;  %s57_s29 = int_to_ptr.vmem [resolvable:$true] %s56_s29  ;;  %s8164_s14 = int_to_ptr.vmem [resolvable:$true] %s78_s14 }
  0x47   :  { %s7918_s15 = scalar_lea.hbm %s9629_s4, 2048 }
  0x48   :  { %p7919_p4 = scmp.ne.s32.totalorder %s9629_s4, %s7918_s15  ;;  %p7922_p5 = scmp.lt.u32.totalorder %s7918_s15, %s9629_s4 }
  0x4a   :  { %p7924_p6 = pnand %p7922_p5, %p7919_p4 }
  0x4c   :  { %7927 = shalt.err (!%p7924_p6)
}
  0x4d   :  { %s7928_s1 = scalar_lea.vmem %s57_s29, 2048  ;;  %p7933_p8 = scmp.lt.s32.totalorder %s57_s29, %s57_s29 }
  0x4e   :  { %p7929_p7 = scmp.ne.s32.totalorder %s57_s29, %s7928_s1  ;;  %p7934_p9 = scmp.lt.s32.totalorder %s7928_s1, %s7928_s1 }
  0x50   :  { %p7935_p10 = por %p7934_p9, %p7933_p8 }
  0x52   :  { %p7936_p11 = pnand %p7935_p10, %p7929_p7 }
  0x54   :  { %7939 = shalt.err (!%p7936_p11)
}
  0x55   :  { %62 = dma.hbm_to_vmem [thread:$0]  %s9629_s4, 2048, %s57_s29, [#allocation5], %s8018_s20, %s8018_s20, %s8019_s21  }
  0x56   :  { %s7940_s25 = scalar_lea.hbm %s9631_s6, 2048 }
  0x57   :  { %p7941_p12 = scmp.ne.s32.totalorder %s9631_s6, %s7940_s25  ;;  %p7944_p13 = scmp.lt.u32.totalorder %s7940_s25, %s9631_s6 }
  0x59   :  { %p7946_p0 = pnand %p7944_p13, %p7941_p12 }
  0x5b   :  { %7949 = shalt.err (!%p7946_p0)
}
  0x5c   :  { %s7950_s5 = scalar_lea.vmem %s8164_s14, 2048  ;;  %p7955_p2 = scmp.lt.s32.totalorder %s8164_s14, %s8164_s14 }
  0x5d   :  { %p7951_p1 = scmp.ne.s32.totalorder %s8164_s14, %s7950_s5  ;;  %p7956_p3 = scmp.lt.s32.totalorder %s7950_s5, %s7950_s5 }
  0x5f   :  { %p7957_p4 = por %p7956_p3, %p7955_p2 }
  0x61   :  { %p7958_p5 = pnand %p7957_p4, %p7951_p1 }
  0x63   :  { %7961 = shalt.err (!%p7958_p5)
}
  0x64   :  { %84 = dma.hbm_to_vmem [thread:$0]  %s9631_s6, 2048, %s8164_s14, [#allocation8], %s8018_s20, %s8018_s20, %s8019_s21  }
  0x65   :  { %s8024_s28 = smov [#allocation12]   ;;  %s7962_s26 = scalar_lea.hbm %s9636_s11, 24576 }
  0x66   :  { %s108_s15 = sshll.u32 %s8024_s28, 4  ;;  %p7963_p6 = scmp.ne.s32.totalorder %s9636_s11, %s7962_s26  ;;  %s109_s15 = int_to_ptr.vmem [resolvable:$true] %s108_s15 }
  0x67   :  { %p7966_p7 = scmp.lt.u32.totalorder %s7962_s26, %s9636_s11 }
  0x69   :  { %p7968_p8 = pnand %p7966_p7, %p7963_p6 }
  0x6b   :  { %7971 = shalt.err (!%p7968_p8)
}
  0x6c   :  { %s7972_s23 = scalar_lea.vmem %s109_s15, 24576  ;;  %p7977_p10 = scmp.lt.s32.totalorder %s109_s15, %s109_s15 }
  0x6d   :  { %p7973_p9 = scmp.ne.s32.totalorder %s109_s15, %s7972_s23  ;;  %p7978_p11 = scmp.lt.s32.totalorder %s7972_s23, %s7972_s23 }
  0x6f   :  { %p7979_p12 = por %p7978_p11, %p7977_p10 }
  0x71   :  { %p7980_p13 = pnand %p7979_p12, %p7973_p9 }
  0x73   :  { %7983 = shalt.err (!%p7980_p13)
}
  0x74   :  { %s8025_s6 = smov 256   ;;  %s8026_s14 = smov 16  }
  0x75   :  { %114 = dma.hbm_to_vmem [thread:$0]  %s9636_s11, 24576, %s109_s15, [#allocation11], %s8025_s6, %s8025_s6, %s8026_s14  }
  0x76   :  { %s8027_s10 = smov [#allocation13]   ;;  %s7984_s5 = scalar_lea.hbm %s9637_s12, 4096 }
  0x77   :  { %s120_s18 = sshll.u32 %s8027_s10, 4  ;;  %p7985_p0 = scmp.ne.s32.totalorder %s9637_s12, %s7984_s5  ;;  %s121_s18 = int_to_ptr.vmem [resolvable:$true] %s120_s18 }
  0x78   :  { %p7988_p1 = scmp.lt.u32.totalorder %s7984_s5, %s9637_s12 }
  0x7a   :  { %p7990_p2 = pnand %p7988_p1, %p7985_p0 }
  0x7c   :  { %7993 = shalt.err (!%p7990_p2)
}
  0x7d   :  { %s7994_s2 = scalar_lea.vmem %s121_s18, 4096  ;;  %p7999_p4 = scmp.lt.s32.totalorder %s121_s18, %s121_s18 }
  0x7e   :  { %p7995_p3 = scmp.ne.s32.totalorder %s121_s18, %s7994_s2  ;;  %p8000_p5 = scmp.lt.s32.totalorder %s7994_s2, %s7994_s2 }
  0x80   :  { %p8001_p6 = por %p8000_p5, %p7999_p4 }
  0x82   :  { %p8002_p7 = pnand %p8001_p6, %p7995_p3 }
  0x84   :  { %8005 = shalt.err (!%p8002_p7)
}
  0x85   :  { %126 = dma.hbm_to_vmem [thread:$0]  %s9637_s12, 4096, %s121_s18, [#allocation14], %s8018_s20, %s8018_s20, %s8019_s21  }
  0x86   :  { %8006 = dma.done.wait [#allocation3], 1024  }
  0x87   :  { %8007 = vsyncadd [#allocation3], 4294966272 }
  0x88   :  { %8008 = dma.done.wait [#allocation5], 3072  }
  0x89   :  { %8009 = vsyncadd [#allocation5], 4294964224 }
  0x8a   :  { %8010 = dma.done.wait [#allocation8], 2176  }
  0x8b   :  { %8011 = vsyncadd [#allocation8], 4294965120 }
  0x8c   :  { %8012 = dma.done.wait [#allocation11], 28672  }
  0x8d   :  { %8013 = vsyncadd [#allocation11], 4294938624 }
  0x8e   :  { %8014 = dma.done.wait [#allocation14], 4096  }
  0x8f   :  { %8015 = vsyncadd [#allocation14], 4294963200  ;;  %vm159_vm0 = vcmask 64512   ;;  %v8231_v0 = vld [vmem:[%s9625_s0 + $0x18] sm:$0xff]  ;;  %v8236_v1 = vld [vmem:[%s9625_s0] sm:$0xff]  ;;  %vm224_vm1 = vcmask 523264  }
  0x90   :  { %v8241_v2 = vld [vmem:[%s9625_s0 + $0x8] sm:$0xff]  ;;  %v169_v3 = vsel %vm159_vm0, %v8231_v0, 0.0  ;;  %v160_v4 = vsel %vm159_vm0, %v8236_v1, 0.0  ;;  %v184_v5 = vmul.f32 %v8236_v1, %v8236_v1  ;;  %v8257_v9 = vld [vmem:[%s9625_s0 + $0x10] sm:$0xff]  ;;  %v187_v12 = vmul.f32 %v8231_v0, %v8231_v0  ;;  %v8276_v17 = vld [vmem:[%s9625_s0 + $0x20] sm:$0xff] }
  0x91   :  { %170 = vadd.xlane.f32.xlu1 %v169_v3  ;;  %161 = vadd.xlane.f32.xlu0 %v160_v4  ;;  %v163_v7 = vsel %vm159_vm0, %v8241_v2, 0.0  ;;  %v185_v8 = vmul.f32 %v8241_v2, %v8241_v2  ;;  %v166_v11 = vsel %vm159_vm0, %v8257_v9, 0.0  ;;  %v186_v13 = vmul.f32 %v8257_v9, %v8257_v9  ;;  %v8271_v16 = vld [vmem:[%s9625_s0 + $0x28] sm:$0xff]  ;;  %v8291_v24 = vld [vmem:[%s9625_s0 + $0x38] sm:$0xff]  ;;  %v8296_v25 = vld [vmem:[%s9625_s0 + $0x30] sm:$0xff] }
  0x92   :  { %v192_v6 = vsel %vm159_vm0, %v184_v5, 0.0  ;;  %v201_v14 = vsel %vm159_vm0, %v187_v12, 0.0  ;;  %v175_v18 = vsel %vm159_vm0, %v8271_v16, 0.0  ;;  %v172_v19 = vsel %vm159_vm0, %v8276_v17, 0.0  ;;  %v216_v32 = vld [vmem:[#allocation2] sm:$0xff]  ;;  %v217_v56 = vld [vmem:[#allocation2 + $0x8] sm:$0xff] }
  0x93   :  { %v195_v10 = vsel %vm159_vm0, %v185_v8, 0.0  ;;  %v198_v15 = vsel %vm159_vm0, %v186_v13, 0.0  ;;  %v189_v20 = vmul.f32 %v8271_v16, %v8271_v16  ;;  %v188_v21 = vmul.f32 %v8276_v17, %v8276_v17  ;;  %6509 = vmatprep.mubr.msk.f32.mxu0 %vm224_vm1, %v216_v32  ;;  %6537 = vmatprep.mubr.msk.f32.mxu1 %vm224_vm1, %v216_v32  ;;  %v218_v58 = vld [vmem:[#allocation2 + $0x10] sm:$0xff]  ;;  %v219_v59 = vld [vmem:[#allocation2 + $0x18] sm:$0xff]  ;;  %v220_v60 = vld [vmem:[#allocation2 + $0x20] sm:$0xff] }
  0x94   :  { %v181_v26 = vsel %vm159_vm0, %v8291_v24, 0.0  ;;  %v178_v27 = vsel %vm159_vm0, %v8296_v25, 0.0  ;;  %v191_v28 = vmul.f32 %v8291_v24, %v8291_v24  ;;  %v190_v29 = vmul.f32 %v8296_v25, %v8296_v25  ;;  %v221_v61 = vld [vmem:[#allocation2 + $0x28] sm:$0xff]  ;;  %v222_v62 = vld [vmem:[#allocation2 + $0x30] sm:$0xff]  ;;  %v223_v63 = vld [vmem:[#allocation2 + $0x38] sm:$0xff] }
  0x95   :  { %193 = vadd.xlane.f32.xlu1 %v192_v6  ;;  %164 = vadd.xlane.f32.xlu0 %v163_v7  ;;  %v207_v22 = vsel %vm159_vm0, %v189_v20, 0.0  ;;  %v204_v23 = vsel %vm159_vm0, %v188_v21, 0.0  ;;  %v8028_v3 = vmov 0   ;;  %vm2082_vm2 = vcmask 1040384  }
  0x96   :  { %v213_v30 = vsel %vm159_vm0, %v191_v28, 0.0  ;;  %v210_v31 = vsel %vm159_vm0, %v190_v29, 0.0  ;;  %7809 = vset.pattern.permute.xlu1 %v8028_v3  ;;  %7810 = vset.pattern.permute.xlu0 %v8028_v3  ;;  %v507_v3 = vld [vmem:[#allocation4] sm:$0xff]  ;;  %vm1985_vm3 = vcmask 138240  }
  0x99   :  { %196 = vadd.xlane.f32.xlu1 %v195_v10  ;;  %167 = vadd.xlane.f32.xlu0 %v166_v11 }
  0x9d   :  { %202 = vadd.xlane.f32.xlu1 %v201_v14  ;;  %199 = vadd.xlane.f32.xlu0 %v198_v15 }
  0xa1   :  { %176 = vadd.xlane.f32.xlu1 %v175_v18  ;;  %173 = vadd.xlane.f32.xlu0 %v172_v19 }
  0xa5   :  { %208 = vadd.xlane.f32.xlu1 %v207_v22  ;;  %205 = vadd.xlane.f32.xlu0 %v204_v23 }
  0xa9   :  { %182 = vadd.xlane.f32.xlu1 %v181_v26  ;;  %179 = vadd.xlane.f32.xlu0 %v178_v27 }
  0xad   :  { %214 = vadd.xlane.f32.xlu1 %v213_v30  ;;  %211 = vadd.xlane.f32.xlu0 %v210_v31 }
 0x11e   :  { %v171_v33 = vpop.xlane.xlu1 %170  ;;  %v162_v34 = vpop.xlane.xlu0 %161 }
 0x122   :  { %v194_v35 = vpop.xlane.xlu1 %193  ;;  %v165_v36 = vpop.xlane.xlu0 %164 }
 0x123   :  { %v7259_v37 = vpack.c.bf16 %v165_v36, %v162_v34 }
 0x125   :  { %7260 = vmatprep.subr.bf16.mxu0 %v7259_v37 }
 0x126   :  { %v197_v38 = vpop.xlane.xlu1 %196  ;;  %7262 = vmatpush3.bf16.msra.mxu0 %v7259_v37  ;;  %v168_v39 = vpop.xlane.xlu0 %167 }
 0x127   :  { %v7263_v40 = vpack.c.bf16 %v171_v33, %v168_v39  ;;  %v7275_v41 = vpack.c.bf16 %v197_v38, %v194_v35 }
 0x129   :  { %7264 = vmatprep.subr.bf16.mxu0 %v7263_v40  ;;  %7276 = vmatprep.subr.bf16.mxu1 %v7275_v41 }
 0x12a   :  { %7278 = vmatpush3.bf16.msra.mxu1 %v7275_v41  ;;  %v203_v42 = vpop.xlane.xlu1 %202  ;;  %7266 = vmatpush3.bf16.msra.mxu0 %v7263_v40  ;;  %v200_v43 = vpop.xlane.xlu0 %199 }
 0x12b   :  { %v7279_v44 = vpack.c.bf16 %v203_v42, %v200_v43 }
 0x12d   :  { %7280 = vmatprep.subr.bf16.mxu1 %v7279_v44 }
 0x12e   :  { %v177_v45 = vpop.xlane.xlu1 %176  ;;  %7282 = vmatpush3.bf16.msra.mxu1 %v7279_v44  ;;  %v174_v46 = vpop.xlane.xlu0 %173 }
 0x12f   :  { %v7267_v47 = vpack.c.bf16 %v177_v45, %v174_v46 }
 0x131   :  { %7268 = vmatprep.subr.bf16.mxu0 %v7267_v47 }
 0x132   :  { %v209_v48 = vpop.xlane.xlu1 %208  ;;  %7270 = vmatpush3.bf16.msra.mxu0 %v7267_v47  ;;  %v206_v49 = vpop.xlane.xlu0 %205 }
 0x133   :  { %v7283_v50 = vpack.c.bf16 %v209_v48, %v206_v49 }
 0x135   :  { %7284 = vmatprep.subr.bf16.mxu1 %v7283_v50 }
 0x136   :  { %v183_v51 = vpop.xlane.xlu1 %182  ;;  %7286 = vmatpush3.bf16.msra.mxu1 %v7283_v50  ;;  %v180_v52 = vpop.xlane.xlu0 %179 }
 0x137   :  { %v7271_v53 = vpack.c.bf16 %v183_v51, %v180_v52 }
 0x139   :  { %7272 = vmatprep.subr.bf16.mxu0 %v7271_v53 }
 0x13a   :  { %v215_v54 = vpop.xlane.xlu1 %214  ;;  %7274 = vmatpush3.bf16.msra.mxu0 %v7271_v53  ;;  %v212_v55 = vpop.xlane.xlu0 %211 }
 0x13b   :  { %v7287_v57 = vpack.c.bf16 %v215_v54, %v212_v55 }
 0x13d   :  { %7288 = vmatprep.subr.bf16.mxu1 %v7287_v57  ;;  %6510 = vmatmul.mubr.msk.f32.vlgmr.msra.gmra.mrb[0].mxu0 %vm224_vm1, %v217_v56 }
 0x13e   :  { %7290 = vmatpush3.bf16.msra.mxu1 %v7287_v57  ;;  %6512 = vmatprep.mubr.msk.f32.mxu0 %vm224_vm1, %v218_v58 }
 0x141   :  { %6538 = vmatmul.mubr.msk.f32.vlgmr.msra.gmra.mrb[0].mxu1 %vm224_vm1, %v217_v56  ;;  %6513 = vmatmul.mubr.msk.f32.gmra.mrb[2].mxu0 %vm224_vm1, %v219_v59 }
 0x142   :  { %6540 = vmatprep.mubr.msk.f32.mxu1 %vm224_vm1, %v218_v58  ;;  %6515 = vmatprep.mubr.msk.f32.mxu0 %vm224_vm1, %v220_v60 }
 0x145   :  { %6541 = vmatmul.mubr.msk.f32.gmra.mrb[2].mxu1 %vm224_vm1, %v219_v59  ;;  %6516 = vmatmul.mubr.msk.f32.gmra.mrb[4].mxu0 %vm224_vm1, %v221_v61 }
 0x146   :  { %6543 = vmatprep.mubr.msk.f32.mxu1 %vm224_vm1, %v220_v60  ;;  %6518 = vmatprep.mubr.msk.f32.mxu0 %vm224_vm1, %v222_v62 }
 0x149   :  { %6544 = vmatmul.mubr.msk.f32.gmra.mrb[4].mxu1 %vm224_vm1, %v221_v61  ;;  %6519 = vmatmul.mubr.msk.f32.gmra.mrb[6].mxu0 %vm224_vm1, %v223_v63 }
 0x14a   :  { %6546 = vmatprep.mubr.msk.f32.mxu1 %vm224_vm1, %v222_v62  ;;  %v508_v62 = vld [vmem:[#allocation4 + $0x8] sm:$0xff] }
 0x14d   :  { %6547 = vmatmul.mubr.msk.f32.gmra.mrb[6].mxu1 %vm224_vm1, %v223_v63 }
 0x210   :  { %v6511_v4 = vpop.f32.mrb[0].mxu0 }
 0x211   :  { %v8324_v5 = vmul.f32 0.0078125, %v6511_v4  ;;  %v315_v6 = vpop.f32.mrb[1].mxu0 }
 0x212   :  { %v8326_v7 = vmul.f32 0.0078125, %v315_v6 }
 0x213   :  { %v476_v8 = vmul.f32 %v8324_v5, %v8324_v5 }
 0x214   :  { %v475_v10 = vmul.f32 %v8326_v7, %v8326_v7  ;;  %v6539_v11 = vpop.f32.mrb[0].mxu1  ;;  %v6514_v12 = vpop.f32.mrb[2].mxu0 }
 0x215   :  { %v468_v13 = vmul.f32 0.0078125, %v6539_v11  ;;  %v428_v14 = vpop.f32.mrb[1].mxu1  ;;  %v8332_v15 = vmul.f32 0.0078125, %v6514_v12  ;;  %v325_v18 = vpop.f32.mrb[3].mxu0 }
 0x216   :  { %v467_v19 = vmul.f32 0.0078125, %v428_v14  ;;  %v8334_v20 = vmul.f32 0.0078125, %v325_v18  ;;  %v510_v14 = vld [vmem:[#allocation4 + $0x18] sm:$0xff] }
 0x217   :  { %v484_v21 = vsub.f32 %v468_v13, %v476_v8  ;;  %v478_v22 = vmul.f32 %v8332_v15, %v8332_v15  ;;  %v572_v13 = vld [vmem:[%s9628_s3 + $0x8] sm:$0xff] }
 0x218   :  { %v483_v23 = vsub.f32 %v467_v19, %v475_v10  ;;  %v477_v26 = vmul.f32 %v8334_v20, %v8334_v20  ;;  %v6542_v27 = vpop.f32.mrb[2].mxu1  ;;  %v6517_v28 = vpop.f32.mrb[4].mxu0  ;;  %v509_v19 = vld [vmem:[#allocation4 + $0x10] sm:$0xff] }
 0x219   :  { %v492_v29 = vadd.f32 1e-05, %v484_v21  ;;  %v470_v30 = vmul.f32 0.0078125, %v6542_v27  ;;  %v438_v31 = vpop.f32.mrb[3].mxu1  ;;  %v8340_v32 = vmul.f32 0.0078125, %v6517_v28  ;;  %v335_v33 = vpop.f32.mrb[5].mxu0 }
 0x21a   :  { %v491_v34 = vadd.f32 1e-05, %v483_v23  ;;  %v469_v35 = vmul.f32 0.0078125, %v438_v31  ;;  %v8342_v36 = vmul.f32 0.0078125, %v335_v33  ;;  %v512_v28 = vld [vmem:[#allocation4 + $0x28] sm:$0xff]  ;;  %v511_v31 = vld [vmem:[#allocation4 + $0x20] sm:$0xff] }
 0x21b   :  { %7811 = vrsqrt.f32 %v492_v29  ;;  %v486_v37 = vsub.f32 %v470_v30, %v478_v22  ;;  %v480_v38 = vmul.f32 %v8340_v32, %v8340_v32 }
 0x21c   :  { %7813 = vrsqrt.f32 %v491_v34  ;;  %v485_v39 = vsub.f32 %v469_v35, %v477_v26  ;;  %v479_v40 = vmul.f32 %v8342_v36, %v8342_v36  ;;  %v6545_v41 = vpop.f32.mrb[4].mxu1  ;;  %v6520_v42 = vpop.f32.mrb[6].mxu0 }
 0x21d   :  { %v494_v43 = vadd.f32 1e-05, %v486_v37  ;;  %v472_v44 = vmul.f32 0.0078125, %v6545_v41  ;;  %v448_v45 = vpop.f32.mrb[5].mxu1  ;;  %v8348_v46 = vmul.f32 0.0078125, %v6520_v42  ;;  %v345_v47 = vpop.f32.mrb[7].mxu0 }
 0x21e   :  { %v493_v48 = vadd.f32 1e-05, %v485_v39  ;;  %v471_v49 = vmul.f32 0.0078125, %v448_v45  ;;  %v8350_v50 = vmul.f32 0.0078125, %v345_v47 }
 0x21f   :  { %7815 = vrsqrt.f32 %v494_v43  ;;  %v488_v51 = vsub.f32 %v472_v44, %v480_v38  ;;  %v482_v52 = vmul.f32 %v8348_v46, %v8348_v46  ;;  %v514_v38 = vld [vmem:[#allocation4 + $0x38] sm:$0xff] }
 0x220   :  { %7817 = vrsqrt.f32 %v493_v48  ;;  %v487_v53 = vsub.f32 %v471_v49, %v479_v40  ;;  %v481_v54 = vmul.f32 %v8350_v50, %v8350_v50  ;;  %v6548_v55 = vpop.f32.mrb[6].mxu1  ;;  %v513_v40 = vld [vmem:[#allocation4 + $0x30] sm:$0xff]  ;;  %v578_v49 = vld [vmem:[%s9628_s3 + $0x38] sm:$0xff] }
 0x221   :  { %v496_v56 = vadd.f32 1e-05, %v488_v51  ;;  %v474_v57 = vmul.f32 0.0078125, %v6548_v55  ;;  %v458_v58 = vpop.f32.mrb[7].mxu1  ;;  %v663_v55 = vld [vmem:[#allocation9 + $0x18] sm:$0xff] }
 0x222   :  { %v495_v59 = vadd.f32 1e-05, %v487_v53  ;;  %v473_v60 = vmul.f32 0.0078125, %v458_v58  ;;  %v573_v53 = vld [vmem:[%s9628_s3 + $0x10] sm:$0xff]  ;;  %v667_v58 = vld [vmem:[#allocation9 + $0x38] sm:$0xff] }
 0x223   :  { %7819 = vrsqrt.f32 %v496_v56  ;;  %v490_v61 = vsub.f32 %v474_v57, %v482_v52  ;;  %v665_v56 = vld [vmem:[#allocation9 + $0x28] sm:$0xff] }
 0x224   :  { %7821 = vrsqrt.f32 %v495_v59  ;;  %v489_v63 = vsub.f32 %v473_v60, %v481_v54  ;;  %v577_v59 = vld [vmem:[%s9628_s3 + $0x30] sm:$0xff] }
 0x225   :  { %v7812_v4 = vpop.eup %7811  ;;  %v498_v6 = vadd.f32 1e-05, %v490_v61  ;;  %v669_v60 = vld [vmem:[#allocation9 + $0x48] sm:$0xff] }
 0x226   :  { %v7814_v8 = vpop.eup %7813  ;;  %v497_v10 = vadd.f32 1e-05, %v489_v63  ;;  %v516_v11 = vmul.f32 %v7812_v4, %v508_v62  ;;  %v671_v62 = vld [vmem:[#allocation9 + $0x58] sm:$0xff]  ;;  %v660_v63 = vld [vmem:[#allocation9] sm:$0xff]  ;;  %v662_v4 = vld [vmem:[#allocation9 + $0x10] sm:$0xff] }
 0x227   :  { %7823 = vrsqrt.f32 %v498_v6  ;;  %v515_v12 = vmul.f32 %v7814_v8, %v507_v3  ;;  %v673_v3 = vld [vmem:[#allocation9 + $0x68] sm:$0xff]  ;;  %v643_v6 = vld [vmem:[#allocation6] sm:$0xff] }
 0x228   :  { %7825 = vrsqrt.f32 %v497_v10  ;;  %530 = vperm.xlu1 %7809, %v516_v11   ;;  %v580_v18 = vmul.f32 %v516_v11, %v8324_v5  ;;  %v571_v5 = vld [vmem:[%s9628_s3] sm:$0xff]  ;;  %6565 = vmatprep.mubr.msk.f32.mxu0 %vm224_vm1, %v643_v6  ;;  %v664_v10 = vld [vmem:[#allocation9 + $0x20] sm:$0xff]  ;;  %v709_v11 = vld [vmem:[#allocation10 + $0x8] sm:$0xff] }
 0x229   :  { %v7816_v21 = vpop.eup %7815  ;;  %525 = vperm.xlu0 %7810, %v515_v12   ;;  %v579_v22 = vmul.f32 %v515_v12, %v8326_v7  ;;  %v576_v7 = vld [vmem:[%s9628_s3 + $0x28] sm:$0xff]  ;;  %v675_v8 = vld [vmem:[#allocation9 + $0x78] sm:$0xff]  ;;  %v666_v12 = vld [vmem:[#allocation9 + $0x30] sm:$0xff] }
 0x22a   :  { %v7818_v23 = vpop.eup %7817  ;;  %v588_v26 = vsub.f32 %v572_v13, %v580_v18  ;;  %v518_v27 = vmul.f32 %v7816_v21, %v510_v14  ;;  %v711_v13 = vld [vmem:[#allocation10 + $0x18] sm:$0xff]  ;;  %v668_v14 = vld [vmem:[#allocation9 + $0x40] sm:$0xff]  ;;  %v713_v18 = vld [vmem:[#allocation10 + $0x28] sm:$0xff] }
 0x22b   :  { %v517_v29 = vmul.f32 %v7818_v23, %v509_v19  ;;  %v587_v43 = vsub.f32 %v571_v5, %v579_v22  ;;  %v670_v19 = vld [vmem:[#allocation9 + $0x50] sm:$0xff]  ;;  %v715_v21 = vld [vmem:[#allocation10 + $0x38] sm:$0xff]  ;;  %v672_v22 = vld [vmem:[#allocation9 + $0x60] sm:$0xff] }
 0x22c   :  { %602 = vperm.xlu1 %7809, %v588_v26   ;;  %v582_v30 = vmul.f32 %v518_v27, %v8332_v15  ;;  %v717_v23 = vld [vmem:[#allocation10 + $0x48] sm:$0xff]  ;;  %v674_v26 = vld [vmem:[#allocation9 + $0x70] sm:$0xff]  ;;  %v716_v5 = vld [vmem:[#allocation10 + $0x40] sm:$0xff] }
 0x22d   :  { %v7820_v33 = vpop.eup %7819  ;;  %v581_v34 = vmul.f32 %v517_v29, %v8334_v20  ;;  %v753_v6 = vld [vmem:[#allocation13 + $0x68] sm:$0xff] }
 0x22e   :  { %v7822_v35 = vpop.eup %7821  ;;  %v520_v37 = vmul.f32 %v7820_v33, %v512_v28  ;;  %v708_v28 = vld [vmem:[#allocation10] sm:$0xff] }
 0x22f   :  { %v519_v39 = vmul.f32 %v7822_v35, %v511_v31  ;;  %v589_v54 = vsub.f32 %v573_v53, %v581_v34  ;;  %v723_v31 = vld [vmem:[#allocation10 + $0x78] sm:$0xff]  ;;  %v712_v33 = vld [vmem:[#allocation10 + $0x20] sm:$0xff]  ;;  %v725_v34 = vld [vmem:[#allocation10 + $0x88] sm:$0xff] }
 0x230   :  { %540 = vperm.xlu1 %7809, %v518_v27   ;;  %550 = vperm.xlu0 %7810, %v520_v37   ;;  %v584_v15 = vmul.f32 %v520_v37, %v8340_v32  ;;  %v574_v32 = vld [vmem:[%s9628_s3 + $0x18] sm:$0xff]  ;;  %v719_v27 = vld [vmem:[#allocation10 + $0x58] sm:$0xff] }
 0x231   :  { %v7824_v41 = vpop.eup %7823  ;;  %v583_v20 = vmul.f32 %v519_v39, %v8342_v36  ;;  %v590_v52 = vsub.f32 %v574_v32, %v582_v30  ;;  %v710_v30 = vld [vmem:[#allocation10 + $0x10] sm:$0xff]  ;;  %v727_v37 = vld [vmem:[#allocation10 + $0x98] sm:$0xff]  ;;  %v732_v32 = vld [vmem:[#allocation10 + $0xc0] sm:$0xff] }
 0x232   :  { %v7826_v42 = vpop.eup %7825  ;;  %v592_v44 = vsub.f32 %v576_v7, %v584_v15  ;;  %v522_v45 = vmul.f32 %v7824_v41, %v514_v38  ;;  %v714_v35 = vld [vmem:[#allocation10 + $0x30] sm:$0xff]  ;;  %v729_v7 = vld [vmem:[#allocation10 + $0xa8] sm:$0xff]  ;;  %v720_v15 = vld [vmem:[#allocation10 + $0x60] sm:$0xff] }
 0x233   :  { %v521_v47 = vmul.f32 %v7826_v42, %v513_v40  ;;  %v718_v38 = vld [vmem:[#allocation10 + $0x50] sm:$0xff]  ;;  %v733_v40 = vld [vmem:[#allocation10 + $0xc8] sm:$0xff]  ;;  %v724_v42 = vld [vmem:[#allocation10 + $0x80] sm:$0xff] }
 0x234   :  { %597 = vperm.xlu1 %7809, %v587_v43   ;;  %622 = vperm.xlu0 %7810, %v592_v44   ;;  %v586_v48 = vmul.f32 %v522_v45, %v8348_v46  ;;  %v661_v46 = vld [vmem:[#allocation9 + $0x8] sm:$0xff]  ;;  %v722_v41 = vld [vmem:[#allocation10 + $0x70] sm:$0xff] }
 0x235   :  { %v585_v51 = vmul.f32 %v521_v47, %v8350_v50  ;;  %v575_v50 = vld [vmem:[%s9628_s3 + $0x20] sm:$0xff]  ;;  %v737_v43 = vld [vmem:[#allocation10 + $0xe8] sm:$0xff]  ;;  %v726_v44 = vld [vmem:[#allocation10 + $0x90] sm:$0xff] }
 0x236   :  { %v594_v36 = vsub.f32 %v578_v49, %v586_v48  ;;  %v591_v57 = vsub.f32 %v575_v50, %v583_v20  ;;  %v735_v20 = vld [vmem:[#allocation10 + $0xd8] sm:$0xff]  ;;  %v741_v48 = vld [vmem:[#allocation13 + $0x8] sm:$0xff]  ;;  %v730_v49 = vld [vmem:[#allocation10 + $0xb0] sm:$0xff] }
 0x237   :  { %v593_v61 = vsub.f32 %v577_v59, %v585_v51  ;;  %v743_v51 = vld [vmem:[#allocation13 + $0x18] sm:$0xff]  ;;  %v749_v50 = vld [vmem:[#allocation13 + $0x48] sm:$0xff] }
 0x238   :  { %535 = vperm.xlu1 %7809, %v517_v29   ;;  %560 = vperm.xlu0 %7810, %v522_v45   ;;  %v721_v29 = vld [vmem:[#allocation10 + $0x68] sm:$0xff]  ;;  %v739_v45 = vld [vmem:[#allocation10 + $0xf8] sm:$0xff] }
 0x239   :  { %v751_v59 = vld [vmem:[#allocation13 + $0x58] sm:$0xff] }
 0x23c   :  { %612 = vperm.xlu1 %7809, %v590_v52   ;;  %632 = vperm.xlu0 %7810, %v594_v36   ;;  %v745_v36 = vld [vmem:[#allocation13 + $0x28] sm:$0xff]  ;;  %v734_v52 = vld [vmem:[#allocation10 + $0xd0] sm:$0xff] }
 0x240   :  { %607 = vperm.xlu1 %7809, %v589_v54   ;;  %972 = vperm.xlu0 %7810, %v661_v46   ;;  %v747_v46 = vld [vmem:[#allocation13 + $0x38] sm:$0xff]  ;;  %v736_v54 = vld [vmem:[#allocation10 + $0xe0] sm:$0xff] }
 0x244   :  { %545 = vperm.xlu1 %7809, %v519_v39   ;;  %982 = vperm.xlu0 %7810, %v663_v55   ;;  %v731_v39 = vld [vmem:[#allocation10 + $0xb8] sm:$0xff] }
 0x248   :  { %617 = vperm.xlu1 %7809, %v591_v57   ;;  %992 = vperm.xlu0 %7810, %v665_v56   ;;  %v738_v56 = vld [vmem:[#allocation10 + $0xf0] sm:$0xff] }
 0x24c   :  { %1002 = vperm.xlu0 %7810, %v667_v58   ;;  %555 = vperm.xlu1 %7809, %v521_v47   ;;  %v728_v47 = vld [vmem:[#allocation10 + $0xa0] sm:$0xff] }
 0x250   :  { %1012 = vperm.xlu0 %7810, %v669_v60   ;;  %627 = vperm.xlu1 %7809, %v593_v61   ;;  %v740_v60 = vld [vmem:[#allocation13] sm:$0xff] }
 0x254   :  { %1022 = vperm.xlu0 %7810, %v671_v62   ;;  %967 = vperm.xlu1 %7809, %v660_v63  }
 0x258   :  { %1032 = vperm.xlu0 %7810, %v673_v3   ;;  %977 = vperm.xlu1 %7809, %v662_v4  }
 0x25c   :  { %1042 = vperm.xlu0 %7810, %v675_v8   ;;  %987 = vperm.xlu1 %7809, %v664_v10   ;;  %v742_v10 = vld [vmem:[#allocation13 + $0x10] sm:$0xff] }
 0x260   :  { %3260 = vperm.xlu0 %7810, %v709_v11   ;;  %997 = vperm.xlu1 %7809, %v666_v12   ;;  %v755_v12 = vld [vmem:[#allocation13 + $0x78] sm:$0xff] }
 0x264   :  { %3270 = vperm.xlu0 %7810, %v711_v13   ;;  %1007 = vperm.xlu1 %7809, %v668_v14   ;;  %v744_v13 = vld [vmem:[#allocation13 + $0x20] sm:$0xff] }
 0x268   :  { %3280 = vperm.xlu0 %7810, %v713_v18   ;;  %1017 = vperm.xlu1 %7809, %v670_v19  }
 0x26c   :  { %3290 = vperm.xlu0 %7810, %v715_v21   ;;  %1027 = vperm.xlu1 %7809, %v672_v22   ;;  %v746_v21 = vld [vmem:[#allocation13 + $0x30] sm:$0xff] }
 0x270   :  { %3300 = vperm.xlu0 %7810, %v717_v23   ;;  %1037 = vperm.xlu1 %7809, %v674_v26  }
 0x274   :  { %3310 = vperm.xlu0 %7810, %v719_v27   ;;  %3255 = vperm.xlu1 %7809, %v708_v28   ;;  %v759_v28 = vld [vmem:[#allocation13 + $0x98] sm:$0xff] }
 0x278   :  { %3320 = vperm.xlu0 %7810, %v721_v29   ;;  %3265 = vperm.xlu1 %7809, %v710_v30   ;;  %v748_v30 = vld [vmem:[#allocation13 + $0x40] sm:$0xff] }
 0x27c   :  { %3330 = vperm.xlu0 %7810, %v723_v31   ;;  %3275 = vperm.xlu1 %7809, %v712_v33  }
 0x280   :  { %3340 = vperm.xlu0 %7810, %v725_v34   ;;  %3285 = vperm.xlu1 %7809, %v714_v35   ;;  %v750_v34 = vld [vmem:[#allocation13 + $0x50] sm:$0xff] }
 0x284   :  { %3350 = vperm.xlu0 %7810, %v727_v37   ;;  %3295 = vperm.xlu1 %7809, %v716_v5  }
 0x288   :  { %3360 = vperm.xlu0 %7810, %v729_v7   ;;  %3305 = vperm.xlu1 %7809, %v718_v38   ;;  %v763_v38 = vld [vmem:[#allocation13 + $0xb8] sm:$0xff] }
 0x28c   :  { %3370 = vperm.xlu0 %7810, %v731_v39   ;;  %3315 = vperm.xlu1 %7809, %v720_v15   ;;  %v752_v15 = vld [vmem:[#allocation13 + $0x60] sm:$0xff] }
 0x290   :  { %3380 = vperm.xlu0 %7810, %v733_v40   ;;  %3325 = vperm.xlu1 %7809, %v722_v41  }
 0x294   :  { %3390 = vperm.xlu0 %7810, %v735_v20   ;;  %3335 = vperm.xlu1 %7809, %v724_v42   ;;  %v765_v20 = vld [vmem:[#allocation13 + $0xc8] sm:$0xff]  ;;  %v754_v42 = vld [vmem:[#allocation13 + $0x70] sm:$0xff] }
 0x298   :  { %3400 = vperm.xlu0 %7810, %v737_v43   ;;  %3345 = vperm.xlu1 %7809, %v726_v44  }
 0x29c   :  { %3410 = vperm.xlu0 %7810, %v739_v45   ;;  %3355 = vperm.xlu1 %7809, %v728_v47   ;;  %v767_v47 = vld [vmem:[#allocation13 + $0xd8] sm:$0xff] }
 0x2a0   :  { %5380 = vperm.xlu0 %7810, %v741_v48   ;;  %3365 = vperm.xlu1 %7809, %v730_v49   ;;  %v756_v49 = vld [vmem:[#allocation13 + $0x80] sm:$0xff] }
 0x2a4   :  { %5390 = vperm.xlu0 %7810, %v743_v51   ;;  %3375 = vperm.xlu1 %7809, %v732_v32   ;;  %v644_v51 = vld [vmem:[#allocation6 + $0x8] sm:$0xff]  ;;  %v758_v32 = vld [vmem:[#allocation13 + $0x90] sm:$0xff] }
 0x2a7   :  { %v531_v53 = vpop.permute.xlu1 %530 }
 0x2a8   :  { %5400 = vperm.xlu0 %7810, %v745_v36   ;;  %3385 = vperm.xlu1 %7809, %v734_v52   ;;  %v526_v57 = vpop.permute.xlu0 %525  ;;  %v564_v61 = vmul.f32 %v531_v53, %v8241_v2  ;;  %v645_v36 = vld [vmem:[#allocation6 + $0x10] sm:$0xff]  ;;  %v646_v52 = vld [vmem:[#allocation6 + $0x18] sm:$0xff]  ;;  %v760_v53 = vld [vmem:[#allocation13 + $0xa0] sm:$0xff] }
 0x2a9   :  { %v563_v62 = vmul.f32 %v526_v57, %v8236_v1  ;;  %v757_v1 = vld [vmem:[#allocation13 + $0x88] sm:$0xff]  ;;  %v764_v57 = vld [vmem:[#allocation13 + $0xc0] sm:$0xff] }
 0x2ab   :  { %v603_v55 = vpop.permute.xlu1 %602 }
 0x2ac   :  { %5410 = vperm.xlu0 %7810, %v747_v46   ;;  %3395 = vperm.xlu1 %7809, %v736_v54   ;;  %v636_v3 = vadd.f32 %v603_v55, %v564_v61  ;;  %v647_v46 = vld [vmem:[#allocation6 + $0x20] sm:$0xff]  ;;  %v648_v54 = vld [vmem:[#allocation6 + $0x28] sm:$0xff]  ;;  %v762_v55 = vld [vmem:[#allocation13 + $0xb0] sm:$0xff] }
 0x2ad   :  { %v653_v61 = vld [vmem:[#allocation6 + $0x50] sm:$0xff] }
 0x2af   :  { %v541_v58 = vpop.permute.xlu1 %540  ;;  %v551_v14 = vpop.permute.xlu0 %550 }
 0x2b0   :  { %5420 = vperm.xlu0 %7810, %v749_v50   ;;  %3405 = vperm.xlu1 %7809, %v738_v56   ;;  %v566_v2 = vmul.f32 %v541_v58, %v8231_v0  ;;  %v568_v33 = vmul.f32 %v551_v14, %v8271_v16  ;;  %v761_v0 = vld [vmem:[#allocation13 + $0xa8] sm:$0xff]  ;;  %v650_v56 = vld [vmem:[#allocation6 + $0x38] sm:$0xff]  ;;  %v651_v58 = vld [vmem:[#allocation6 + $0x40] sm:$0xff] }
 0x2b1   :  { %v649_v50 = vld [vmem:[#allocation6 + $0x30] sm:$0xff] }
 0x2b3   :  { %v598_v63 = vpop.permute.xlu1 %597  ;;  %v623_v27 = vpop.permute.xlu0 %622 }
 0x2b4   :  { %v635_v4 = vadd.f32 %v598_v63, %v563_v62  ;;  %5430 = vperm.xlu0 %7810, %v751_v59   ;;  %5375 = vperm.xlu1 %7809, %v740_v60   ;;  %v640_v5 = vadd.f32 %v623_v27, %v568_v33  ;;  %v652_v59 = vld [vmem:[#allocation6 + $0x48] sm:$0xff]  ;;  %v766_v60 = vld [vmem:[#allocation13 + $0xd0] sm:$0xff]  ;;  %v676_v33 = vld [vmem:[%s9632_s7] sm:$0xff] }
 0x2b5   :  { %v654_v62 = vld [vmem:[#allocation6 + $0x58] sm:$0xff]  ;;  %v768_v63 = vld [vmem:[#allocation13 + $0xe0] sm:$0xff] }
 0x2b6   :  { %v7291_v8 = vpack.c.bf16 %v636_v3, %v635_v4  ;;  %v655_v3 = vld [vmem:[#allocation6 + $0x60] sm:$0xff]  ;;  %v656_v4 = vld [vmem:[#allocation6 + $0x68] sm:$0xff] }
 0x2b7   :  { %v536_v11 = vpop.permute.xlu1 %535  ;;  %v561_v35 = vpop.permute.xlu0 %560 }
 0x2b8   :  { %7292 = vmatprep.subr.bf16.mxu0 %v7291_v8  ;;  %5440 = vperm.xlu0 %7810, %v753_v6   ;;  %v565_v19 = vmul.f32 %v536_v11, %v8257_v9  ;;  %v570_v16 = vmul.f32 %v561_v35, %v8291_v24  ;;  %v769_v24 = vld [vmem:[#allocation13 + $0xe8] sm:$0xff]  ;;  %v770_v6 = vld [vmem:[#allocation13 + $0xf0] sm:$0xff] }
 0x2b9   :  { %5385 = vperm.xlu1 %7809, %v742_v10   ;;  %7294 = vmatpush3.bf16.msra.mxu0 %v7291_v8  ;;  %v657_v8 = vld [vmem:[#allocation6 + $0x70] sm:$0xff]  ;;  %v659_v10 = vld [vmem:[#allocation7] sm:$0xff]  ;;  %v658_v11 = vld [vmem:[#allocation6 + $0x78] sm:$0xff] }
 0x2ba   :  { %6589 = vmatprep.subr.mxu1 %v659_v10 }
 0x2bb   :  { %v613_v18 = vpop.permute.xlu1 %612  ;;  %v633_v41 = vpop.permute.xlu0 %632  ;;  %6590 = vmatpush3.msra.mxu1 %v659_v10 }
 0x2bc   :  { %5450 = vperm.xlu0 %7810, %v755_v12   ;;  %v638_v23 = vadd.f32 %v613_v18, %v566_v2  ;;  %v642_v44 = vadd.f32 %v633_v41, %v570_v16 }
 0x2bd   :  { %5395 = vperm.xlu1 %7809, %v744_v13  }
 0x2bf   :  { %v608_v22 = vpop.permute.xlu1 %607 }
 0x2c0   :  { %v637_v26 = vadd.f32 %v608_v22, %v565_v19  ;;  %5460 = vperm.xlu0 %7810, %v757_v1  }
 0x2c1   :  { %5405 = vperm.xlu1 %7809, %v746_v21  }
 0x2c2   :  { %v7295_v29 = vpack.c.bf16 %v638_v23, %v637_v26 }
 0x2c3   :  { %v546_v31 = vpop.permute.xlu1 %545 }
 0x2c4   :  { %7296 = vmatprep.subr.bf16.mxu0 %v7295_v29  ;;  %5470 = vperm.xlu0 %7810, %v759_v28   ;;  %v567_v9 = vmul.f32 %v546_v31, %v8276_v17 }
 0x2c5   :  { %5415 = vperm.xlu1 %7809, %v748_v30   ;;  %7298 = vmatpush3.bf16.msra.mxu0 %v7295_v29 }
 0x2c7   :  { %v618_v37 = vpop.permute.xlu1 %617 }
 0x2c8   :  { %v639_v7 = vadd.f32 %v618_v37, %v567_v9  ;;  %5480 = vperm.xlu0 %7810, %v761_v0   ;;  %v973_v0 = vpop.permute.xlu0 %972 }
 0x2c9   :  { %5425 = vperm.xlu1 %7809, %v750_v34  }
 0x2ca   :  { %v7299_v39 = vpack.c.bf16 %v640_v5, %v639_v7 }
 0x2cb   :  { %v556_v40 = vpop.permute.xlu1 %555 }
 0x2cc   :  { %7300 = vmatprep.subr.bf16.mxu0 %v7299_v39  ;;  %5490 = vperm.xlu0 %7810, %v763_v38   ;;  %v569_v17 = vmul.f32 %v556_v40, %v8296_v25  ;;  %v771_v25 = vld [vmem:[#allocation13 + $0xf8] sm:$0xff]  ;;  %v983_v34 = vpop.permute.xlu0 %982 }
 0x2cd   :  { %5435 = vperm.xlu1 %7809, %v752_v15   ;;  %7302 = vmatpush3.bf16.msra.mxu0 %v7299_v39 }
 0x2cf   :  { %v628_v43 = vpop.permute.xlu1 %627 }
 0x2d0   :  { %v641_v45 = vadd.f32 %v628_v43, %v569_v17  ;;  %5500 = vperm.xlu0 %7810, %v765_v20   ;;  %v993_v37 = vpop.permute.xlu0 %992 }
 0x2d1   :  { %5445 = vperm.xlu1 %7809, %v754_v42  }
 0x2d2   :  { %v7303_v48 = vpack.c.bf16 %v642_v44, %v641_v45 }
 0x2d3   :  { %v968_v9 = vpop.permute.xlu1 %967 }
 0x2d4   :  { %5510 = vperm.xlu0 %7810, %v767_v47   ;;  %7304 = vmatprep.subr.bf16.mxu0 %v7303_v48  ;;  %v1003_v40 = vpop.permute.xlu0 %1002 }
 0x2d5   :  { %5455 = vperm.xlu1 %7809, %v756_v49   ;;  %7306 = vmatpush3.bf16.msra.mxu0 %v7303_v48 }
 0x2d7   :  { %v978_v35 = vpop.permute.xlu1 %977 }
 0x2d8   :  { %5520 = vperm.xlu0 %7810, %v769_v24   ;;  %6566 = vmatmul.mubr.msk.f32.vlgmr.msra.gmra.mrb[8].mxu0 %vm224_vm1, %v644_v51  ;;  %v1013_v49 = vpop.permute.xlu0 %1012 }
 0x2d9   :  { %5465 = vperm.xlu1 %7809, %v758_v32   ;;  %6568 = vmatprep.mubr.msk.f32.mxu0 %vm224_vm1, %v645_v36 }
 0x2db   :  { %v988_v5 = vpop.permute.xlu1 %987 }
 0x2dc   :  { %5530 = vperm.xlu0 %7810, %v771_v25   ;;  %6569 = vmatmul.mubr.msk.f32.gmra.mrb[10].mxu0 %vm224_vm1, %v646_v52 }
 0x2dd   :  { %5475 = vperm.xlu1 %7809, %v760_v53   ;;  %6571 = vmatprep.mubr.msk.f32.mxu0 %vm224_vm1, %v647_v46  ;;  %v1023_v46 = vpop.permute.xlu0 %1022 }
 0x2df   :  { %v998_v20 = vpop.permute.xlu1 %997 }
 0x2e0   :  { %6572 = vmatmul.mubr.msk.f32.gmra.mrb[12].mxu0 %vm224_vm1, %v648_v54 }
 0x2e1   :  { %5485 = vperm.xlu1 %7809, %v762_v55   ;;  %6574 = vmatprep.mubr.msk.f32.mxu0 %vm224_vm1, %v649_v50 }
 0x2e3   :  { %v1008_v51 = vpop.permute.xlu1 %1007 }
 0x2e4   :  { %6575 = vmatmul.mubr.msk.f32.gmra.mrb[14].mxu0 %vm224_vm1, %v650_v56 }
 0x2e5   :  { %5495 = vperm.xlu1 %7809, %v764_v57   ;;  %6577 = vmatprep.mubr.msk.f32.mxu0 %vm224_vm1, %v651_v58 }
 0x2e7   :  { %v1018_v50 = vpop.permute.xlu1 %1017 }
 0x2e8   :  { %6578 = vmatmul.mubr.msk.f32.gmra.mrb[16].mxu0 %vm224_vm1, %v652_v59 }
 0x2e9   :  { %5505 = vperm.xlu1 %7809, %v766_v60   ;;  %6580 = vmatprep.mubr.msk.f32.mxu0 %vm224_vm1, %v653_v61 }
 0x2ec   :  { %6581 = vmatmul.mubr.msk.f32.gmra.mrb[18].mxu0 %vm224_vm1, %v654_v62 }
 0x2ed   :  { %5515 = vperm.xlu1 %7809, %v768_v63   ;;  %6583 = vmatprep.mubr.msk.f32.mxu0 %vm224_vm1, %v655_v3  ;;  %v1033_v63 = vpop.permute.xlu0 %1032 }
 0x2f0   :  { %6584 = vmatmul.mubr.msk.f32.gmra.mrb[20].mxu0 %vm224_vm1, %v656_v4  ;;  %v1028_v4 = vpop.permute.xlu1 %1027 }
 0x2f1   :  { %5525 = vperm.xlu1 %7809, %v770_v6   ;;  %6586 = vmatprep.mubr.msk.f32.mxu0 %vm224_vm1, %v657_v8 }
 0x2f4   :  { %6587 = vmatmul.mubr.msk.f32.gmra.mrb[22].mxu0 %vm224_vm1, %v658_v11 }
 0x2f5   :  { %6647 = vmatprep.mubr.f32.mxu0 %v676_v33  ;;  %v680_v33 = vld [vmem:[%s9632_s7 + $0x20] sm:$0xff] }
 0x3ab   :  { %v6567_v12 = vpop.f32.mrb[8].mxu0 }
 0x3ac   :  { %v886_v13 = vpop.f32.mrb[9].mxu0 }
 0x3ad   :  { %6591 = vmatprep.mubr.msk.f32.mxu1 %vm159_vm0, %v886_v13  ;;  %v1043_v13 = vpop.permute.xlu0 %1042 }
 0x3ae   :  { %6592 = vmatmul.mubr.msk.f32.vlgmr.msra.gmra.mrb[8].mxu1 %vm159_vm0, %v6567_v12 }
 0x3af   :  { %v6570_v14 = vpop.f32.mrb[10].mxu0 }
 0x3b0   :  { %v896_v18 = vpop.f32.mrb[11].mxu0 }
 0x3b1   :  { %6594 = vmatprep.mubr.msk.f32.mxu1 %vm159_vm0, %v896_v18 }
 0x3b2   :  { %6595 = vmatmul.mubr.msk.f32.gmra.mrb[10].mxu1 %vm159_vm0, %v6570_v14 }
 0x3b3   :  { %v6573_v1 = vpop.f32.mrb[12].mxu0 }
 0x3b4   :  { %v906_v2 = vpop.f32.mrb[13].mxu0 }
 0x3b5   :  { %6597 = vmatprep.mubr.msk.f32.mxu1 %vm159_vm0, %v906_v2 }
 0x3b6   :  { %6598 = vmatmul.mubr.msk.f32.gmra.mrb[12].mxu1 %vm159_vm0, %v6573_v1  ;;  %v1038_v1 = vpop.permute.xlu1 %1037 }
 0x3b7   :  { %v6576_v19 = vpop.f32.mrb[14].mxu0 }
 0x3b8   :  { %v916_v21 = vpop.f32.mrb[15].mxu0 }
 0x3b9   :  { %6600 = vmatprep.mubr.msk.f32.mxu1 %vm159_vm0, %v916_v21 }
 0x3ba   :  { %6601 = vmatmul.mubr.msk.f32.gmra.mrb[14].mxu1 %vm159_vm0, %v6576_v19 }
 0x3bb   :  { %v6579_v22 = vpop.f32.mrb[16].mxu0 }
 0x3bc   :  { %v926_v23 = vpop.f32.mrb[17].mxu0 }
 0x3bd   :  { %6603 = vmatprep.mubr.msk.f32.mxu1 %vm159_vm0, %v926_v23  ;;  %v1463_v23 = vld [vmem:[%s9633_s8] sm:$0xff] }
 0x3be   :  { %6604 = vmatmul.mubr.msk.f32.gmra.mrb[16].mxu1 %vm159_vm0, %v6579_v22 }
 0x3bf   :  { %v6582_v26 = vpop.f32.mrb[18].mxu0 }
 0x3c0   :  { %v936_v27 = vpop.f32.mrb[19].mxu0 }
 0x3c1   :  { %6606 = vmatprep.mubr.msk.f32.mxu1 %vm159_vm0, %v936_v27  ;;  %v1464_v27 = vld [vmem:[%s9633_s8 + $0x8] sm:$0xff] }
 0x3c2   :  { %6607 = vmatmul.mubr.msk.f32.gmra.mrb[18].mxu1 %vm159_vm0, %v6582_v26  ;;  %v677_v26 = vld [vmem:[%s9632_s7 + $0x8] sm:$0xff] }
 0x3c3   :  { %v6585_v28 = vpop.f32.mrb[20].mxu0 }
 0x3c4   :  { %v946_v29 = vpop.f32.mrb[21].mxu0 }
 0x3c5   :  { %6609 = vmatprep.mubr.msk.f32.mxu1 %vm159_vm0, %v946_v29  ;;  %v1465_v29 = vld [vmem:[%s9633_s8 + $0x10] sm:$0xff] }
 0x3c6   :  { %6610 = vmatmul.mubr.msk.f32.gmra.mrb[20].mxu1 %vm159_vm0, %v6585_v28  ;;  %v678_v28 = vld [vmem:[%s9632_s7 + $0x10] sm:$0xff] }
 0x3c7   :  { %v6588_v30 = vpop.f32.mrb[22].mxu0 }
 0x3c8   :  { %v956_v31 = vpop.f32.mrb[23].mxu0 }
 0x3c9   :  { %6612 = vmatprep.mubr.msk.f32.mxu1 %vm159_vm0, %v956_v31  ;;  %v1466_v31 = vld [vmem:[%s9633_s8 + $0x18] sm:$0xff] }
 0x3ca   :  { %6613 = vmatmul.mubr.msk.f32.gmra.mrb[22].mxu1 %vm159_vm0, %v6588_v30  ;;  %v679_v30 = vld [vmem:[%s9632_s7 + $0x18] sm:$0xff] }
 0x3cb   :  { %6727 = vmatprep.mubr.f32.mxu1 %v1463_v23  ;;  %v703_v23 = vld [vmem:[%s9632_s7 + $0xd8] sm:$0xff] }
 0x481   :  { %v6593_v7 = vpop.f32.mrb[8].mxu1 }
 0x482   :  { %v1165_v38 = vadd.f32 %v6593_v7, %v973_v0  ;;  %v1159_v39 = vpop.f32.mrb[9].mxu1  ;;  %v1467_v0 = vld [vmem:[%s9633_s8 + $0x20] sm:$0xff]  ;;  %v1470_v7 = vld [vmem:[%s9633_s8 + $0x38] sm:$0xff] }
 0x483   :  { %v1160_v15 = vadd.f32 %v1159_v39, %v968_v9  ;;  %v681_v9 = vld [vmem:[%s9632_s7 + $0x28] sm:$0xff]  ;;  %v1471_v39 = vld [vmem:[%s9633_s8 + $0x40] sm:$0xff] }
 0x485   :  { %v8431_v16 = vpack.c.bf16 %v1165_v38, %v1160_v15  ;;  %v6596_v41 = vpop.f32.mrb[10].mxu1  ;;  %v684_v38 = vld [vmem:[%s9632_s7 + $0x40] sm:$0xff]  ;;  %v685_v15 = vld [vmem:[%s9632_s7 + $0x48] sm:$0xff] }
 0x486   :  { %v1175_v17 = vadd.f32 %v6596_v41, %v983_v34  ;;  %v1169_v42 = vpop.f32.mrb[11].mxu1  ;;  %v1468_v34 = vld [vmem:[%s9633_s8 + $0x28] sm:$0xff]  ;;  %v686_v41 = vld [vmem:[%s9632_s7 + $0x50] sm:$0xff] }
 0x487   :  { %v1170_v43 = vadd.f32 %v1169_v42, %v978_v35  ;;  %7308 = vmatprep.subr.bf16.mxu0 %v8431_v16  ;;  %7340 = vmatprep.subr.bf16.mxu1 %v8431_v16  ;;  %v682_v35 = vld [vmem:[%s9632_s7 + $0x30] sm:$0xff]  ;;  %v1474_v42 = vld [vmem:[%s9633_s8 + $0x58] sm:$0xff] }
 0x488   :  { %7310 = vmatpush3.bf16.msra.mxu0 %v8431_v16  ;;  %7342 = vmatpush3.bf16.msra.mxu1 %v8431_v16 }
 0x489   :  { %v8437_v44 = vpack.c.bf16 %v1175_v17, %v1170_v43  ;;  %v6599_v45 = vpop.f32.mrb[12].mxu1  ;;  %v687_v17 = vld [vmem:[%s9632_s7 + $0x58] sm:$0xff]  ;;  %v688_v43 = vld [vmem:[%s9632_s7 + $0x60] sm:$0xff] }
 0x48a   :  { %v1185_v47 = vadd.f32 %v6599_v45, %v993_v37  ;;  %v1179_v48 = vpop.f32.mrb[13].mxu1  ;;  %v1469_v37 = vld [vmem:[%s9633_s8 + $0x30] sm:$0xff]  ;;  %v1475_v45 = vld [vmem:[%s9633_s8 + $0x60] sm:$0xff] }
 0x48b   :  { %v1180_v24 = vadd.f32 %v1179_v48, %v988_v5  ;;  %7312 = vmatprep.subr.bf16.mxu0 %v8437_v44  ;;  %7344 = vmatprep.subr.bf16.mxu1 %v8437_v44  ;;  %v683_v5 = vld [vmem:[%s9632_s7 + $0x38] sm:$0xff]  ;;  %v5783_v48 = vld [vmem:[%s9634_s9 + $0x20] sm:$0xff] }
 0x48c   :  { %7314 = vmatpush3.bf16.msra.mxu0 %v8437_v44  ;;  %7346 = vmatpush3.bf16.msra.mxu1 %v8437_v44 }
 0x48d   :  { %v8443_v32 = vpack.c.bf16 %v1185_v47, %v1180_v24  ;;  %v6602_v36 = vpop.f32.mrb[14].mxu1  ;;  %v5782_v47 = vld [vmem:[%s9634_s9 + $0x18] sm:$0xff]  ;;  %v1476_v24 = vld [vmem:[%s9633_s8 + $0x68] sm:$0xff] }
 0x48e   :  { %v1195_v25 = vadd.f32 %v6602_v36, %v1003_v40  ;;  %v1189_v52 = vpop.f32.mrb[15].mxu1  ;;  %v1472_v40 = vld [vmem:[%s9633_s8 + $0x48] sm:$0xff]  ;;  %v690_v36 = vld [vmem:[%s9632_s7 + $0x70] sm:$0xff] }
 0x48f   :  { %v1190_v53 = vadd.f32 %v1189_v52, %v998_v20  ;;  %7316 = vmatprep.subr.bf16.mxu0 %v8443_v32  ;;  %7348 = vmatprep.subr.bf16.mxu1 %v8443_v32  ;;  %v1473_v20 = vld [vmem:[%s9633_s8 + $0x50] sm:$0xff]  ;;  %v691_v52 = vld [vmem:[%s9632_s7 + $0x78] sm:$0xff] }
 0x490   :  { %7318 = vmatpush3.bf16.msra.mxu0 %v8443_v32  ;;  %7350 = vmatpush3.bf16.msra.mxu1 %v8443_v32 }
 0x491   :  { %v8449_v54 = vpack.c.bf16 %v1195_v25, %v1190_v53  ;;  %v6605_v55 = vpop.f32.mrb[16].mxu1  ;;  %v1477_v25 = vld [vmem:[%s9633_s8 + $0x70] sm:$0xff]  ;;  %v1478_v53 = vld [vmem:[%s9633_s8 + $0x78] sm:$0xff] }
 0x492   :  { %v1205_v56 = vadd.f32 %v6605_v55, %v1013_v49  ;;  %v1199_v57 = vpop.f32.mrb[17].mxu1  ;;  %v689_v49 = vld [vmem:[%s9632_s7 + $0x68] sm:$0xff]  ;;  %v1479_v55 = vld [vmem:[%s9633_s8 + $0x80] sm:$0xff] }
 0x493   :  { %v1200_v58 = vadd.f32 %v1199_v57, %v1008_v51  ;;  %7320 = vmatprep.subr.bf16.mxu0 %v8449_v54  ;;  %7352 = vmatprep.subr.bf16.mxu1 %v8449_v54  ;;  %v8578_v51 = vpack.c.bf16 %v5783_v48, %v5782_v47  ;;  %v694_v57 = vld [vmem:[%s9632_s7 + $0x90] sm:$0xff]  ;;  %v5773_v48 = vld [vmem:[%s9633_s8 + $0x1b8] sm:$0xff] }
 0x494   :  { %7322 = vmatpush3.bf16.msra.mxu0 %v8449_v54  ;;  %7354 = vmatpush3.bf16.msra.mxu1 %v8449_v54  ;;  %v5772_v47 = vld [vmem:[%s9633_s8 + $0x1b0] sm:$0xff] }
 0x495   :  { %v8455_v59 = vpack.c.bf16 %v1205_v56, %v1200_v58  ;;  %v6608_v60 = vpop.f32.mrb[18].mxu1  ;;  %v1480_v56 = vld [vmem:[%s9633_s8 + $0x88] sm:$0xff]  ;;  %v1481_v58 = vld [vmem:[%s9633_s8 + $0x90] sm:$0xff] }
 0x496   :  { %v1215_v61 = vadd.f32 %v6608_v60, %v1023_v46  ;;  %v1209_v62 = vpop.f32.mrb[19].mxu1  ;;  %v692_v46 = vld [vmem:[%s9632_s7 + $0x80] sm:$0xff]  ;;  %v695_v60 = vld [vmem:[%s9632_s7 + $0x98] sm:$0xff] }
 0x497   :  { %v1210_v3 = vadd.f32 %v1209_v62, %v1018_v50  ;;  %7324 = vmatprep.subr.bf16.mxu0 %v8455_v59  ;;  %7356 = vmatprep.subr.bf16.mxu1 %v8455_v59  ;;  %v693_v50 = vld [vmem:[%s9632_s7 + $0x88] sm:$0xff]  ;;  %v696_v62 = vld [vmem:[%s9632_s7 + $0xa0] sm:$0xff] }
 0x498   :  { %7326 = vmatpush3.bf16.msra.mxu0 %v8455_v59  ;;  %7358 = vmatpush3.bf16.msra.mxu1 %v8455_v59 }
 0x499   :  { %v8461_v6 = vpack.c.bf16 %v1215_v61, %v1210_v3  ;;  %v6611_v8 = vpop.f32.mrb[20].mxu1  ;;  %v1482_v61 = vld [vmem:[%s9633_s8 + $0x98] sm:$0xff]  ;;  %v697_v3 = vld [vmem:[%s9632_s7 + $0xa8] sm:$0xff] }
 0x49a   :  { %v1225_v10 = vadd.f32 %v6611_v8, %v1033_v63  ;;  %v1219_v11 = vpop.f32.mrb[21].mxu1  ;;  %v1483_v63 = vld [vmem:[%s9633_s8 + $0xa0] sm:$0xff]  ;;  %v698_v8 = vld [vmem:[%s9632_s7 + $0xb0] sm:$0xff] }
 0x49b   :  { %v1220_v12 = vadd.f32 %v1219_v11, %v1028_v4  ;;  %7328 = vmatprep.subr.bf16.mxu0 %v8461_v6  ;;  %7360 = vmatprep.subr.bf16.mxu1 %v8461_v6  ;;  %v1484_v4 = vld [vmem:[%s9633_s8 + $0xa8] sm:$0xff]  ;;  %v699_v11 = vld [vmem:[%s9632_s7 + $0xb8] sm:$0xff] }
 0x49c   :  { %7330 = vmatpush3.bf16.msra.mxu0 %v8461_v6  ;;  %7362 = vmatpush3.bf16.msra.mxu1 %v8461_v6 }
 0x49d   :  { %v8467_v14 = vpack.c.bf16 %v1225_v10, %v1220_v12  ;;  %v6614_v18 = vpop.f32.mrb[22].mxu1  ;;  %v1485_v10 = vld [vmem:[%s9633_s8 + $0xb0] sm:$0xff]  ;;  %v1486_v12 = vld [vmem:[%s9633_s8 + $0xb8] sm:$0xff] }
 0x49e   :  { %v1235_v2 = vadd.f32 %v6614_v18, %v1043_v13  ;;  %v1229_v19 = vpop.f32.mrb[23].mxu1  ;;  %v700_v13 = vld [vmem:[%s9632_s7 + $0xc0] sm:$0xff] }
 0x49f   :  { %v1230_v21 = vadd.f32 %v1229_v19, %v1038_v1  ;;  %7332 = vmatprep.subr.bf16.mxu0 %v8467_v14  ;;  %7364 = vmatprep.subr.bf16.mxu1 %v8467_v14  ;;  %v1487_v18 = vld [vmem:[%s9633_s8 + $0xc0] sm:$0xff]  ;;  %v701_v1 = vld [vmem:[%s9632_s7 + $0xc8] sm:$0xff]  ;;  %v702_v19 = vld [vmem:[%s9632_s7 + $0xd0] sm:$0xff] }
 0x4a0   :  { %7334 = vmatpush3.bf16.msra.mxu0 %v8467_v14  ;;  %7366 = vmatpush3.bf16.msra.mxu1 %v8467_v14 }
 0x4a1   :  { %v8473_v22 = vpack.c.bf16 %v1235_v2, %v1230_v21  ;;  %v1488_v2 = vld [vmem:[%s9633_s8 + $0xc8] sm:$0xff]  ;;  %v1489_v21 = vld [vmem:[%s9633_s8 + $0xd0] sm:$0xff] }
 0x4a3   :  { %7336 = vmatprep.subr.bf16.mxu0 %v8473_v22  ;;  %7368 = vmatprep.subr.bf16.mxu1 %v8473_v22 }
 0x4a4   :  { %7338 = vmatpush3.bf16.msra.mxu0 %v8473_v22  ;;  %7370 = vmatpush3.bf16.msra.mxu1 %v8473_v22 }
 0x4a5   :  { %7372 = vmatprep.subr.bf16.mxu0 %v8431_v16  ;;  %7404 = vmatprep.subr.bf16.mxu1 %v8578_v51 }
 0x4a7   :  { %6648 = vmatmul.mubr.f32.vlgmr.msra.gmra.mrb[24].mxu0 %v677_v26  ;;  %6728 = vmatmul.mubr.f32.vlgmr.msra.gmra.mrb[24].mxu1 %v1464_v27  ;;  %v1490_v26 = vld [vmem:[%s9633_s8 + $0xd8] sm:$0xff]  ;;  %v704_v27 = vld [vmem:[%s9632_s7 + $0xe0] sm:$0xff] }
 0x4a8   :  { %7374 = vmatpush3.bf16.msra.mxu0 %v8431_v16  ;;  %6650 = vmatprep.mubr.f32.mxu0 %v678_v28  ;;  %v1491_v28 = vld [vmem:[%s9633_s8 + $0xe0] sm:$0xff] }
 0x4a9   :  { %7376 = vmatprep.subr.bf16.mxu0 %v8437_v44  ;;  %6730 = vmatprep.mubr.f32.mxu1 %v1465_v29  ;;  %v5784_v29 = vld [vmem:[%s9634_s9 + $0x28] sm:$0x1] }
 0x4aa   :  { %7406 = vmatpush3.bf16.msra.mxu1 %v8578_v51 }
 0x4ab   :  { %6651 = vmatmul.mubr.f32.gmra.mrb[26].mxu0 %v679_v30  ;;  %6731 = vmatmul.mubr.f32.gmra.mrb[26].mxu1 %v1466_v31  ;;  %v705_v30 = vld [vmem:[%s9632_s7 + $0xe8] sm:$0xff] }
 0x4ac   :  { %7378 = vmatpush3.bf16.msra.mxu0 %v8437_v44  ;;  %6653 = vmatprep.mubr.f32.mxu0 %v680_v33  ;;  %v1492_v31 = vld [vmem:[%s9633_s8 + $0xe8] sm:$0xff]  ;;  %v706_v33 = vld [vmem:[%s9632_s7 + $0xf0] sm:$0xff] }
 0x4ad   :  { %7380 = vmatprep.subr.bf16.mxu0 %v8443_v32  ;;  %6733 = vmatprep.mubr.f32.mxu1 %v1467_v0  ;;  %v1493_v0 = vld [vmem:[%s9633_s8 + $0xf0] sm:$0xff] }
 0x4ae   :  { %6859 = vmatprep.subr.msk.mxu1 %vm2082_vm2, %v5784_v29 }
 0x4af   :  { %6654 = vmatmul.mubr.f32.gmra.mrb[28].mxu0 %v681_v9  ;;  %6734 = vmatmul.mubr.f32.gmra.mrb[28].mxu1 %v1468_v34  ;;  %v707_v9 = vld [vmem:[%s9632_s7 + $0xf8] sm:$0xff] }
 0x4b0   :  { %7382 = vmatpush3.bf16.msra.mxu0 %v8443_v32  ;;  %6656 = vmatprep.mubr.f32.mxu0 %v682_v35  ;;  %v1494_v34 = vld [vmem:[%s9633_s8 + $0xf8] sm:$0xff]  ;;  %v5750_v35 = vld [vmem:[%s9633_s8 + $0x100] sm:$0xff] }
 0x4b1   :  { %7384 = vmatprep.subr.bf16.mxu0 %v8449_v54  ;;  %6736 = vmatprep.mubr.f32.mxu1 %v1469_v37  ;;  %v5751_v37 = vld [vmem:[%s9633_s8 + $0x108] sm:$0xff] }
 0x4b2   :  { %6860 = vmatpush3.msk.msra.mxu1 %vm2082_vm2, %v5784_v29  ;;  %v5872_v29 = vld [vmem:[%s9633_s8 + $0x2a8] sm:$0xff] }
 0x4b3   :  { %6657 = vmatmul.mubr.f32.gmra.mrb[30].mxu0 %v683_v5  ;;  %6737 = vmatmul.mubr.f32.gmra.mrb[30].mxu1 %v1470_v7  ;;  %v5752_v5 = vld [vmem:[%s9633_s8 + $0x110] sm:$0xff]  ;;  %v5753_v7 = vld [vmem:[%s9633_s8 + $0x118] sm:$0xff] }
 0x4b4   :  { %7386 = vmatpush3.bf16.msra.mxu0 %v8449_v54  ;;  %6659 = vmatprep.mubr.f32.mxu0 %v684_v38  ;;  %v5754_v38 = vld [vmem:[%s9633_s8 + $0x120] sm:$0xff] }
 0x4b5   :  { %7388 = vmatprep.subr.bf16.mxu0 %v8455_v59  ;;  %6739 = vmatprep.mubr.f32.mxu1 %v1471_v39  ;;  %v5755_v39 = vld [vmem:[%s9633_s8 + $0x128] sm:$0xff] }
 0x4b7   :  { %6660 = vmatmul.mubr.f32.gmra.mrb[32].mxu0 %v685_v15  ;;  %6740 = vmatmul.mubr.f32.gmra.mrb[32].mxu1 %v1472_v40  ;;  %v5757_v15 = vld [vmem:[%s9633_s8 + $0x138] sm:$0xff]  ;;  %v5759_v40 = vld [vmem:[%s9633_s8 + $0x148] sm:$0xff] }
 0x4b8   :  { %7390 = vmatpush3.bf16.msra.mxu0 %v8455_v59  ;;  %6662 = vmatprep.mubr.f32.mxu0 %v686_v41  ;;  %v5761_v41 = vld [vmem:[%s9633_s8 + $0x158] sm:$0xff] }
 0x4b9   :  { %7392 = vmatprep.subr.bf16.mxu0 %v8461_v6  ;;  %6742 = vmatprep.mubr.f32.mxu1 %v1473_v20  ;;  %v5763_v20 = vld [vmem:[%s9633_s8 + $0x168] sm:$0xff] }
 0x4bb   :  { %6663 = vmatmul.mubr.f32.gmra.mrb[34].mxu0 %v687_v17  ;;  %6743 = vmatmul.mubr.f32.gmra.mrb[34].mxu1 %v1474_v42  ;;  %v5765_v17 = vld [vmem:[%s9633_s8 + $0x178] sm:$0xff]  ;;  %v5767_v42 = vld [vmem:[%s9633_s8 + $0x188] sm:$0xff] }
 0x4bc   :  { %7394 = vmatpush3.bf16.msra.mxu0 %v8461_v6  ;;  %6665 = vmatprep.mubr.f32.mxu0 %v688_v43  ;;  %v5769_v43 = vld [vmem:[%s9633_s8 + $0x198] sm:$0xff] }
 0x4bd   :  { %7396 = vmatprep.subr.bf16.mxu0 %v8467_v14  ;;  %6745 = vmatprep.mubr.f32.mxu1 %v1475_v45  ;;  %v5770_v45 = vld [vmem:[%s9633_s8 + $0x1a0] sm:$0xff] }
 0x4bf   :  { %6666 = vmatmul.mubr.f32.gmra.mrb[36].mxu0 %v689_v49  ;;  %6746 = vmatmul.mubr.f32.gmra.mrb[36].mxu1 %v1476_v24  ;;  %v5774_v49 = vld [vmem:[%s9633_s8 + $0x1c0] sm:$0xff]  ;;  %v5775_v24 = vld [vmem:[%s9633_s8 + $0x1c8] sm:$0xff] }
 0x4c0   :  { %7398 = vmatpush3.bf16.msra.mxu0 %v8467_v14  ;;  %6668 = vmatprep.mubr.f32.mxu0 %v690_v36  ;;  %v5776_v36 = vld [vmem:[%s9633_s8 + $0x1d0] sm:$0xff] }
 0x4c1   :  { %7400 = vmatprep.subr.bf16.mxu0 %v8473_v22  ;;  %6748 = vmatprep.mubr.f32.mxu1 %v1477_v25  ;;  %v5777_v25 = vld [vmem:[%s9633_s8 + $0x1d8] sm:$0xff] }
 0x4c3   :  { %6669 = vmatmul.mubr.f32.gmra.mrb[38].mxu0 %v691_v52  ;;  %6749 = vmatmul.mubr.f32.gmra.mrb[38].mxu1 %v1478_v53  ;;  %v5778_v52 = vld [vmem:[%s9633_s8 + $0x1e0] sm:$0xff]  ;;  %v5779_v53 = vld [vmem:[%s9633_s8 + $0x1e8] sm:$0xff] }
 0x4c4   :  { %7402 = vmatpush3.bf16.msra.mxu0 %v8473_v22  ;;  %6671 = vmatprep.mubr.f32.mxu0 %v692_v46  ;;  %v5780_v46 = vld [vmem:[%s9633_s8 + $0x1f0] sm:$0xff] }
 0x4c5   :  { %7412 = vmatprep.subr.bf16.mxu0 %v8431_v16  ;;  %6751 = vmatprep.mubr.f32.mxu1 %v1479_v55  ;;  %v5781_v55 = vld [vmem:[%s9633_s8 + $0x1f8] sm:$0xff] }
 0x4c7   :  { %6672 = vmatmul.mubr.f32.gmra.mrb[40].mxu0 %v693_v50  ;;  %6752 = vmatmul.mubr.f32.gmra.mrb[40].mxu1 %v1480_v56  ;;  %v5851_v50 = vld [vmem:[%s9633_s8 + $0x200] sm:$0xff]  ;;  %v5852_v56 = vld [vmem:[%s9633_s8 + $0x208] sm:$0xff] }
 0x4c8   :  { %6674 = vmatprep.mubr.f32.mxu0 %v694_v57  ;;  %6754 = vmatprep.mubr.f32.mxu1 %v1481_v58  ;;  %v5853_v57 = vld [vmem:[%s9633_s8 + $0x210] sm:$0xff]  ;;  %v5854_v58 = vld [vmem:[%s9633_s8 + $0x218] sm:$0xff] }
 0x4cb   :  { %6675 = vmatmul.mubr.f32.gmra.mrb[42].mxu0 %v695_v60  ;;  %6755 = vmatmul.mubr.f32.gmra.mrb[42].mxu1 %v1482_v61  ;;  %v5855_v60 = vld [vmem:[%s9633_s8 + $0x220] sm:$0xff]  ;;  %v5856_v61 = vld [vmem:[%s9633_s8 + $0x228] sm:$0xff] }
 0x4cc   :  { %6677 = vmatprep.mubr.f32.mxu0 %v696_v62  ;;  %6757 = vmatprep.mubr.f32.mxu1 %v1483_v63  ;;  %v5857_v62 = vld [vmem:[%s9633_s8 + $0x230] sm:$0xff]  ;;  %v5858_v63 = vld [vmem:[%s9633_s8 + $0x238] sm:$0xff] }
 0x4cf   :  { %6678 = vmatmul.mubr.f32.gmra.mrb[44].mxu0 %v697_v3  ;;  %6758 = vmatmul.mubr.f32.gmra.mrb[44].mxu1 %v1484_v4  ;;  %v5859_v3 = vld [vmem:[%s9633_s8 + $0x240] sm:$0xff]  ;;  %v5860_v4 = vld [vmem:[%s9633_s8 + $0x248] sm:$0xff] }
 0x4d0   :  { %6680 = vmatprep.mubr.f32.mxu0 %v698_v8  ;;  %6760 = vmatprep.mubr.f32.mxu1 %v1485_v10  ;;  %v5861_v8 = vld [vmem:[%s9633_s8 + $0x250] sm:$0xff]  ;;  %v5862_v10 = vld [vmem:[%s9633_s8 + $0x258] sm:$0xff] }
 0x4d3   :  { %6681 = vmatmul.mubr.f32.gmra.mrb[46].mxu0 %v699_v11  ;;  %6761 = vmatmul.mubr.f32.gmra.mrb[46].mxu1 %v1486_v12  ;;  %v5863_v11 = vld [vmem:[%s9633_s8 + $0x260] sm:$0xff]  ;;  %v5864_v12 = vld [vmem:[%s9633_s8 + $0x268] sm:$0xff] }
 0x4d4   :  { %6683 = vmatprep.mubr.f32.mxu0 %v700_v13  ;;  %6763 = vmatprep.mubr.f32.mxu1 %v1487_v18  ;;  %v5865_v13 = vld [vmem:[%s9633_s8 + $0x270] sm:$0xff]  ;;  %v1720_v18 = vld [vmem:[%s9634_s9] sm:$0xff] }
 0x4d7   :  { %6684 = vmatmul.mubr.f32.gmra.mrb[48].mxu0 %v701_v1  ;;  %6764 = vmatmul.mubr.f32.gmra.mrb[48].mxu1 %v1488_v2  ;;  %v1721_v1 = vld [vmem:[%s9634_s9 + $0x8] sm:$0xff] }
 0x4d8   :  { %6686 = vmatprep.mubr.f32.mxu0 %v702_v19  ;;  %6766 = vmatprep.mubr.f32.mxu1 %v1489_v21  ;;  %v8862_v2 = vpack.c.bf16 %v1721_v1, %v1720_v18  ;;  %v5866_v19 = vld [vmem:[%s9633_s8 + $0x278] sm:$0xff]  ;;  %v5867_v21 = vld [vmem:[%s9633_s8 + $0x280] sm:$0xff] }
 0x4da   :  { %7408 = vmatprep.subr.bf16.mxu1 %v8862_v2 }
 0x4db   :  { %6687 = vmatmul.mubr.f32.gmra.mrb[50].mxu0 %v703_v23  ;;  %6767 = vmatmul.mubr.f32.gmra.mrb[50].mxu1 %v1490_v26  ;;  %v5868_v23 = vld [vmem:[%s9633_s8 + $0x288] sm:$0xff]  ;;  %v5869_v26 = vld [vmem:[%s9633_s8 + $0x290] sm:$0xff] }
 0x4dc   :  { %6689 = vmatprep.mubr.f32.mxu0 %v704_v27  ;;  %6769 = vmatprep.mubr.f32.mxu1 %v1491_v28  ;;  %v5870_v27 = vld [vmem:[%s9633_s8 + $0x298] sm:$0xff]  ;;  %v5871_v28 = vld [vmem:[%s9633_s8 + $0x2a0] sm:$0xff] }
 0x4df   :  { %6690 = vmatmul.mubr.f32.gmra.mrb[52].mxu0 %v705_v30  ;;  %6770 = vmatmul.mubr.f32.gmra.mrb[52].mxu1 %v1492_v31  ;;  %v5873_v30 = vld [vmem:[%s9633_s8 + $0x2b0] sm:$0xff]  ;;  %v5874_v31 = vld [vmem:[%s9633_s8 + $0x2b8] sm:$0xff] }
 0x4e0   :  { %6692 = vmatprep.mubr.f32.mxu0 %v706_v33  ;;  %6772 = vmatprep.mubr.f32.mxu1 %v1493_v0  ;;  %v5875_v33 = vld [vmem:[%s9633_s8 + $0x2c0] sm:$0xff]  ;;  %v5876_v0 = vld [vmem:[%s9633_s8 + $0x2c8] sm:$0xff] }
 0x4e3   :  { %6693 = vmatmul.mubr.f32.gmra.mrb[54].mxu0 %v707_v9  ;;  %6773 = vmatmul.mubr.f32.gmra.mrb[54].mxu1 %v1494_v34  ;;  %v5877_v9 = vld [vmem:[%s9633_s8 + $0x2d0] sm:$0xff]  ;;  %v5878_v34 = vld [vmem:[%s9633_s8 + $0x2d8] sm:$0xff] }
 0x4e4   :  { %6807 = vmatprep.mubr.f32.mxu0 %v5750_v35  ;;  %v5879_v35 = vld [vmem:[%s9633_s8 + $0x2e0] sm:$0xff] }
 0x4e7   :  { %6808 = vmatmul.mubr.f32.vlgmr.msra.gmra.mrb[56].mxu0 %v5751_v37  ;;  %v5880_v37 = vld [vmem:[%s9633_s8 + $0x2e8] sm:$0xff] }
 0x4e8   :  { %7414 = vmatpush3.bf16.msra.mxu0 %v8431_v16  ;;  %6810 = vmatprep.mubr.f32.mxu0 %v5752_v5  ;;  %v5756_v16 = vld [vmem:[%s9633_s8 + $0x130] sm:$0xff] }
 0x4e9   :  { %7416 = vmatprep.subr.bf16.mxu0 %v8437_v44  ;;  %v5881_v5 = vld [vmem:[%s9633_s8 + $0x2f0] sm:$0xff] }
 0x4eb   :  { %6811 = vmatmul.mubr.f32.gmra.mrb[58].mxu0 %v5753_v7  ;;  %v5882_v7 = vld [vmem:[%s9633_s8 + $0x2f8] sm:$0xff] }
 0x4ec   :  { %7418 = vmatpush3.bf16.msra.mxu0 %v8437_v44  ;;  %6813 = vmatprep.mubr.f32.mxu0 %v5754_v38  ;;  %v5758_v44 = vld [vmem:[%s9633_s8 + $0x140] sm:$0xff] }
 0x4ed   :  { %7420 = vmatprep.subr.bf16.mxu0 %v8443_v32 }
 0x4ef   :  { %6814 = vmatmul.mubr.f32.gmra.mrb[60].mxu0 %v5755_v39 }
 0x4f0   :  { %7422 = vmatpush3.bf16.msra.mxu0 %v8443_v32  ;;  %6816 = vmatprep.mubr.f32.mxu0 %v5756_v16  ;;  %v5760_v32 = vld [vmem:[%s9633_s8 + $0x150] sm:$0xff] }
 0x4f1   :  { %7424 = vmatprep.subr.bf16.mxu0 %v8449_v54 }
 0x4f3   :  { %6817 = vmatmul.mubr.f32.gmra.mrb[62].mxu0 %v5757_v15 }
 0x4f4   :  { %7426 = vmatpush3.bf16.msra.mxu0 %v8449_v54  ;;  %6819 = vmatprep.mubr.f32.mxu0 %v5758_v44  ;;  %v5762_v54 = vld [vmem:[%s9633_s8 + $0x160] sm:$0xff] }
 0x4f5   :  { %7428 = vmatprep.subr.bf16.mxu0 %v8455_v59 }
 0x4f7   :  { %6820 = vmatmul.mubr.f32.gmra.mrb[64].mxu0 %v5759_v40 }
 0x4f8   :  { %7430 = vmatpush3.bf16.msra.mxu0 %v8455_v59  ;;  %6822 = vmatprep.mubr.f32.mxu0 %v5760_v32  ;;  %v5764_v59 = vld [vmem:[%s9633_s8 + $0x170] sm:$0xff] }
 0x4f9   :  { %7432 = vmatprep.subr.bf16.mxu0 %v8461_v6 }
 0x4fb   :  { %6823 = vmatmul.mubr.f32.gmra.mrb[66].mxu0 %v5761_v41 }
 0x4fc   :  { %7434 = vmatpush3.bf16.msra.mxu0 %v8461_v6  ;;  %6825 = vmatprep.mubr.f32.mxu0 %v5762_v54  ;;  %v5766_v6 = vld [vmem:[%s9633_s8 + $0x180] sm:$0xff] }
 0x4fd   :  { %7436 = vmatprep.subr.bf16.mxu0 %v8467_v14 }
 0x4ff   :  { %6826 = vmatmul.mubr.f32.gmra.mrb[68].mxu0 %v5763_v20 }
 0x500   :  { %7438 = vmatpush3.bf16.msra.mxu0 %v8467_v14  ;;  %6828 = vmatprep.mubr.f32.mxu0 %v5764_v59  ;;  %v5768_v14 = vld [vmem:[%s9633_s8 + $0x190] sm:$0xff] }
 0x501   :  { %7440 = vmatprep.subr.bf16.mxu0 %v8473_v22 }
 0x503   :  { %6829 = vmatmul.mubr.f32.gmra.mrb[70].mxu0 %v5765_v17 }
 0x504   :  { %7442 = vmatpush3.bf16.msra.mxu0 %v8473_v22  ;;  %6831 = vmatprep.mubr.f32.mxu0 %v5766_v6  ;;  %v5771_v22 = vld [vmem:[%s9633_s8 + $0x1a8] sm:$0xff] }
 0x507   :  { %6832 = vmatmul.mubr.f32.gmra.mrb[72].mxu0 %v5767_v42 }
 0x508   :  { %6834 = vmatprep.mubr.f32.mxu0 %v5768_v14 }
 0x50b   :  { %6835 = vmatmul.mubr.f32.gmra.mrb[74].mxu0 %v5769_v43 }
 0x50c   :  { %6837 = vmatprep.mubr.f32.mxu0 %v5770_v45 }
 0x50f   :  { %6838 = vmatmul.mubr.f32.gmra.mrb[76].mxu0 %v5771_v22 }
 0x510   :  { %6840 = vmatprep.mubr.f32.mxu0 %v5772_v47 }
 0x513   :  { %6841 = vmatmul.mubr.f32.gmra.mrb[78].mxu0 %v5773_v48 }
 0x514   :  { %6843 = vmatprep.mubr.f32.mxu0 %v5774_v49 }
 0x517   :  { %6844 = vmatmul.mubr.f32.gmra.mrb[80].mxu0 %v5775_v24 }
 0x518   :  { %6846 = vmatprep.mubr.f32.mxu0 %v5776_v36 }
 0x51b   :  { %6847 = vmatmul.mubr.f32.gmra.mrb[82].mxu0 %v5777_v25 }
 0x51c   :  { %6849 = vmatprep.mubr.f32.mxu0 %v5778_v52 }
 0x51f   :  { %6850 = vmatmul.mubr.f32.gmra.mrb[84].mxu0 %v5779_v53 }
 0x520   :  { %6852 = vmatprep.mubr.f32.mxu0 %v5780_v46 }
 0x523   :  { %6853 = vmatmul.mubr.f32.gmra.mrb[86].mxu0 %v5781_v55 }
 0x524   :  { %6995 = vmatprep.mubr.f32.mxu0 %v5851_v50 }
 0x527   :  { %6996 = vmatmul.mubr.f32.vlgmr.msra.gmra.mrb[88].mxu0 %v5852_v56 }
 0x528   :  { %6998 = vmatprep.mubr.f32.mxu0 %v5853_v57 }
 0x52b   :  { %6999 = vmatmul.mubr.f32.gmra.mrb[90].mxu0 %v5854_v58 }
 0x52c   :  { %7001 = vmatprep.mubr.f32.mxu0 %v5855_v60 }
 0x52f   :  { %7002 = vmatmul.mubr.f32.gmra.mrb[92].mxu0 %v5856_v61 }
 0x530   :  { %7004 = vmatprep.mubr.f32.mxu0 %v5857_v62  ;;  %v1722_v62 = vld [vmem:[%s9634_s9 + $0x10] sm:$0x1] }
 0x533   :  { %7005 = vmatmul.mubr.f32.gmra.mrb[94].mxu0 %v5858_v63  ;;  %v5883_v63 = vld [vmem:[%s9634_s9 + $0x30] sm:$0xff] }
 0x534   :  { %7007 = vmatprep.mubr.f32.mxu0 %v5859_v3  ;;  %v5884_v3 = vld [vmem:[%s9634_s9 + $0x38] sm:$0xff] }
 0x537   :  { %7008 = vmatmul.mubr.f32.gmra.mrb[96].mxu0 %v5860_v4 }
 0x538   :  { %7010 = vmatprep.mubr.f32.mxu0 %v5861_v8 }
 0x53b   :  { %7011 = vmatmul.mubr.f32.gmra.mrb[98].mxu0 %v5862_v10  ;;  %v8993_v10 = vpack.c.bf16 %v5884_v3, %v5883_v63 }
 0x53c   :  { %7013 = vmatprep.mubr.f32.mxu0 %v5863_v11 }
 0x53f   :  { %7014 = vmatmul.mubr.f32.gmra.mrb[100].mxu0 %v5864_v12 }
 0x540   :  { %7016 = vmatprep.mubr.f32.mxu0 %v5865_v13 }
 0x543   :  { %7017 = vmatmul.mubr.f32.gmra.mrb[102].mxu0 %v5866_v19 }
 0x544   :  { %7019 = vmatprep.mubr.f32.mxu0 %v5867_v21 }
 0x547   :  { %7020 = vmatmul.mubr.f32.gmra.mrb[104].mxu0 %v5868_v23 }
 0x548   :  { %7022 = vmatprep.mubr.f32.mxu0 %v5869_v26 }
 0x54b   :  { %7023 = vmatmul.mubr.f32.gmra.mrb[106].mxu0 %v5870_v27 }
 0x54c   :  { %7025 = vmatprep.mubr.f32.mxu0 %v5871_v28 }
 0x54f   :  { %7026 = vmatmul.mubr.f32.gmra.mrb[108].mxu0 %v5872_v29 }
 0x550   :  { %7028 = vmatprep.mubr.f32.mxu0 %v5873_v30 }
 0x553   :  { %7029 = vmatmul.mubr.f32.gmra.mrb[110].mxu0 %v5874_v31 }
 0x554   :  { %7031 = vmatprep.mubr.f32.mxu0 %v5875_v33 }
 0x557   :  { %7032 = vmatmul.mubr.f32.gmra.mrb[112].mxu0 %v5876_v0 }
 0x558   :  { %7034 = vmatprep.mubr.f32.mxu0 %v5877_v9 }
 0x55b   :  { %7035 = vmatmul.mubr.f32.gmra.mrb[114].mxu0 %v5878_v34 }
 0x55c   :  { %7037 = vmatprep.mubr.f32.mxu0 %v5879_v35 }
 0x55f   :  { %7038 = vmatmul.mubr.f32.gmra.mrb[116].mxu0 %v5880_v37 }
 0x560   :  { %7040 = vmatprep.mubr.f32.mxu0 %v5881_v5 }
 0x563   :  { %7041 = vmatmul.mubr.f32.gmra.mrb[118].mxu0 %v5882_v7 }
 0x57a   :  { %v8916_v38 = vpop.f32.mrb[24].mxu1 }
 0x57b   :  { %v8918_v39 = vpop.f32.mrb[25].mxu1 }
 0x57e   :  { %v8920_v16 = vpop.f32.mrb[26].mxu1 }
 0x57f   :  { %v8922_v15 = vpop.f32.mrb[27].mxu1 }
 0x582   :  { %v8924_v44 = vpop.f32.mrb[28].mxu1 }
 0x583   :  { %v8926_v40 = vpop.f32.mrb[29].mxu1 }
 0x586   :  { %v8928_v32 = vpop.f32.mrb[30].mxu1 }
 0x587   :  { %v8930_v41 = vpop.f32.mrb[31].mxu1 }
 0x58a   :  { %v8932_v54 = vpop.f32.mrb[32].mxu1 }
 0x58b   :  { %v8934_v20 = vpop.f32.mrb[33].mxu1 }
 0x58e   :  { %v8936_v59 = vpop.f32.mrb[34].mxu1 }
 0x58f   :  { %v8938_v17 = vpop.f32.mrb[35].mxu1 }
 0x592   :  { %v8940_v6 = vpop.f32.mrb[36].mxu1 }
 0x593   :  { %v8942_v42 = vpop.f32.mrb[37].mxu1 }
 0x596   :  { %v8944_v14 = vpop.f32.mrb[38].mxu1 }
 0x597   :  { %v8946_v43 = vpop.f32.mrb[39].mxu1 }
 0x59a   :  { %v8948_v45 = vpop.f32.mrb[40].mxu1 }
 0x59b   :  { %v8950_v22 = vpop.f32.mrb[41].mxu1 }
 0x59e   :  { %v8952_v47 = vpop.f32.mrb[42].mxu1 }
 0x59f   :  { %v8954_v48 = vpop.f32.mrb[43].mxu1 }
 0x5a2   :  { %v8956_v49 = vpop.f32.mrb[44].mxu1 }
 0x5a3   :  { %v8958_v24 = vpop.f32.mrb[45].mxu1 }
 0x5a6   :  { %v8960_v36 = vpop.f32.mrb[46].mxu1 }
 0x5a7   :  { %v8962_v25 = vpop.f32.mrb[47].mxu1 }
 0x5aa   :  { %v8964_v52 = vpop.f32.mrb[48].mxu1 }
 0x5ab   :  { %v8966_v53 = vpop.f32.mrb[49].mxu1 }
 0x5ae   :  { %v8968_v46 = vpop.f32.mrb[50].mxu1 }
 0x5af   :  { %v8970_v55 = vpop.f32.mrb[51].mxu1 }
 0x5b2   :  { %v8972_v50 = vpop.f32.mrb[52].mxu1 }
 0x5b3   :  { %v8974_v56 = vpop.f32.mrb[53].mxu1 }
 0x5b6   :  { %v8976_v57 = vpop.f32.mrb[54].mxu1 }
 0x5b7   :  { %v8978_v58 = vpop.f32.mrb[55].mxu1 }
 0x5ba   :  { %v6809_v60 = vpop.f32.mrb[56].mxu0 }
 0x5bb   :  { %v1822_v61 = vpop.f32.mrb[57].mxu0 }
 0x5bc   :  { %6861 = vmatprep.mubr.msk.f32.mxu1 %vm1985_vm3, %v1822_v61 }
 0x5bd   :  { %6862 = vmatmul.mubr.msk.f32.vlgmr.msra.gmra.mrb[56].mxu1 %vm1985_vm3, %v6809_v60 }
 0x5be   :  { %v6812_v4 = vpop.f32.mrb[58].mxu0  ;;  %7410 = vmatpush3.bf16.msra.mxu1 %v8862_v2 }
 0x5bf   :  { %v1832_v8 = vpop.f32.mrb[59].mxu0  ;;  %6913 = vmatprep.subr.msk.mxu1 %vm2082_vm2, %v1722_v62 }
 0x5c0   :  { %6864 = vmatprep.mubr.msk.f32.mxu1 %vm1985_vm3, %v1832_v8 }
 0x5c1   :  { %6865 = vmatmul.mubr.msk.f32.gmra.mrb[58].mxu1 %vm1985_vm3, %v6812_v4 }
 0x5c2   :  { %v6815_v11 = vpop.f32.mrb[60].mxu0  ;;  %6914 = vmatpush3.msk.msra.mxu1 %vm2082_vm2, %v1722_v62 }
 0x5c3   :  { %v1842_v12 = vpop.f32.mrb[61].mxu0  ;;  %7444 = vmatprep.subr.bf16.mxu1 %v8993_v10 }
 0x5c4   :  { %6867 = vmatprep.mubr.msk.f32.mxu1 %vm1985_vm3, %v1842_v12  ;;  %v5885_v12 = vld [vmem:[%s9634_s9 + $0x40] sm:$0x1] }
 0x5c5   :  { %6868 = vmatmul.mubr.msk.f32.gmra.mrb[60].mxu1 %vm1985_vm3, %v6815_v11 }
 0x5c6   :  { %v6818_v13 = vpop.f32.mrb[62].mxu0 }
 0x5c7   :  { %v1852_v18 = vpop.f32.mrb[63].mxu0 }
 0x5c8   :  { %6870 = vmatprep.mubr.msk.f32.mxu1 %vm1985_vm3, %v1852_v18 }
 0x5c9   :  { %6871 = vmatmul.mubr.msk.f32.gmra.mrb[62].mxu1 %vm1985_vm3, %v6818_v13 }
 0x5ca   :  { %v6821_v1 = vpop.f32.mrb[64].mxu0 }
 0x5cb   :  { %v1862_v19 = vpop.f32.mrb[65].mxu0 }
 0x5cc   :  { %6873 = vmatprep.mubr.msk.f32.mxu1 %vm1985_vm3, %v1862_v19 }
 0x5cd   :  { %6874 = vmatmul.mubr.msk.f32.gmra.mrb[64].mxu1 %vm1985_vm3, %v6821_v1 }
 0x5ce   :  { %v6824_v21 = vpop.f32.mrb[66].mxu0 }
 0x5cf   :  { %v1872_v23 = vpop.f32.mrb[67].mxu0 }
 0x5d0   :  { %6876 = vmatprep.mubr.msk.f32.mxu1 %vm1985_vm3, %v1872_v23 }
 0x5d1   :  { %6877 = vmatmul.mubr.msk.f32.gmra.mrb[66].mxu1 %vm1985_vm3, %v6824_v21 }
 0x5d2   :  { %v6827_v26 = vpop.f32.mrb[68].mxu0 }
 0x5d3   :  { %v1882_v27 = vpop.f32.mrb[69].mxu0 }
 0x5d4   :  { %6879 = vmatprep.mubr.msk.f32.mxu1 %vm1985_vm3, %v1882_v27 }
 0x5d5   :  { %6880 = vmatmul.mubr.msk.f32.gmra.mrb[68].mxu1 %vm1985_vm3, %v6827_v26 }
 0x5d6   :  { %v6830_v28 = vpop.f32.mrb[70].mxu0 }
 0x5d7   :  { %v1892_v29 = vpop.f32.mrb[71].mxu0 }
 0x5d8   :  { %6882 = vmatprep.mubr.msk.f32.mxu1 %vm1985_vm3, %v1892_v29 }
 0x5d9   :  { %6883 = vmatmul.mubr.msk.f32.gmra.mrb[70].mxu1 %vm1985_vm3, %v6830_v28 }
 0x5da   :  { %v6833_v30 = vpop.f32.mrb[72].mxu0 }
 0x5db   :  { %v1902_v31 = vpop.f32.mrb[73].mxu0 }
 0x5dc   :  { %6885 = vmatprep.mubr.msk.f32.mxu1 %vm1985_vm3, %v1902_v31 }
 0x5dd   :  { %6886 = vmatmul.mubr.msk.f32.gmra.mrb[72].mxu1 %vm1985_vm3, %v6833_v30 }
 0x5de   :  { %v6836_v33 = vpop.f32.mrb[74].mxu0 }
 0x5df   :  { %v1912_v0 = vpop.f32.mrb[75].mxu0 }
 0x5e0   :  { %6888 = vmatprep.mubr.msk.f32.mxu1 %vm1985_vm3, %v1912_v0 }
 0x5e1   :  { %6889 = vmatmul.mubr.msk.f32.gmra.mrb[74].mxu1 %vm1985_vm3, %v6836_v33 }
 0x5e2   :  { %v6839_v9 = vpop.f32.mrb[76].mxu0 }
 0x5e3   :  { %v1922_v34 = vpop.f32.mrb[77].mxu0 }
 0x5e4   :  { %6891 = vmatprep.mubr.msk.f32.mxu1 %vm1985_vm3, %v1922_v34 }
 0x5e5   :  { %6892 = vmatmul.mubr.msk.f32.gmra.mrb[76].mxu1 %vm1985_vm3, %v6839_v9 }
 0x5e6   :  { %v6842_v35 = vpop.f32.mrb[78].mxu0 }
 0x5e7   :  { %v1932_v37 = vpop.f32.mrb[79].mxu0 }
 0x5e8   :  { %6894 = vmatprep.mubr.msk.f32.mxu1 %vm1985_vm3, %v1932_v37 }
 0x5e9   :  { %6895 = vmatmul.mubr.msk.f32.gmra.mrb[78].mxu1 %vm1985_vm3, %v6842_v35 }
 0x5ea   :  { %v6845_v5 = vpop.f32.mrb[80].mxu0 }
 0x5eb   :  { %v1942_v7 = vpop.f32.mrb[81].mxu0 }
 0x5ec   :  { %6897 = vmatprep.mubr.msk.f32.mxu1 %vm1985_vm3, %v1942_v7 }
 0x5ed   :  { %6898 = vmatmul.mubr.msk.f32.gmra.mrb[80].mxu1 %vm1985_vm3, %v6845_v5 }
 0x5ee   :  { %v6848_v60 = vpop.f32.mrb[82].mxu0 }
 0x5ef   :  { %v1952_v61 = vpop.f32.mrb[83].mxu0 }
 0x5f0   :  { %6900 = vmatprep.mubr.msk.f32.mxu1 %vm1985_vm3, %v1952_v61 }
 0x5f1   :  { %6901 = vmatmul.mubr.msk.f32.gmra.mrb[82].mxu1 %vm1985_vm3, %v6848_v60 }
 0x5f2   :  { %v6851_v62 = vpop.f32.mrb[84].mxu0 }
 0x5f3   :  { %v1962_v63 = vpop.f32.mrb[85].mxu0 }
 0x5f4   :  { %6903 = vmatprep.mubr.msk.f32.mxu1 %vm1985_vm3, %v1962_v63 }
 0x5f5   :  { %6904 = vmatmul.mubr.msk.f32.gmra.mrb[84].mxu1 %vm1985_vm3, %v6851_v62 }
 0x5f6   :  { %v6854_v3 = vpop.f32.mrb[86].mxu0 }
 0x5f7   :  { %v1972_v4 = vpop.f32.mrb[87].mxu0 }
 0x5f8   :  { %6906 = vmatprep.mubr.msk.f32.mxu1 %vm1985_vm3, %v1972_v4  ;;  %v3510_v4 = vld [vmem:[#allocation12 + $0x8] sm:$0xff] }
 0x5f9   :  { %6907 = vmatmul.mubr.msk.f32.gmra.mrb[86].mxu1 %vm1985_vm3, %v6854_v3  ;;  %3637 = vmatprep.mubr.f32.mxu0 %v3510_v4 }
 0x5fa   :  { %6915 = vmatprep.mubr.msk.f32.mxu1 %vm1985_vm3, %v8918_v39  ;;  %v9029_v8 = vpop.f32.mrb[88].mxu0 }
 0x5fb   :  { %v9031_v11 = vpop.f32.mrb[89].mxu0 }
 0x5fd   :  { %6916 = vmatmul.mubr.msk.f32.vlgmr.msra.gmra.mrb[56].mxu1 %vm1985_vm3, %v8916_v38 }
 0x5fe   :  { %7446 = vmatpush3.bf16.msra.mxu1 %v8993_v10  ;;  %6918 = vmatprep.mubr.msk.f32.mxu1 %vm1985_vm3, %v8922_v15  ;;  %v9041_v13 = vpop.f32.mrb[90].mxu0 }
 0x5ff   :  { %7047 = vmatprep.subr.msk.mxu1 %vm2082_vm2, %v5885_v12  ;;  %v2744_v39 = vpop.f32.mrb[91].mxu0 }
 0x601   :  { %6919 = vmatmul.mubr.msk.f32.gmra.mrb[58].mxu1 %vm1985_vm3, %v8920_v16 }
 0x602   :  { %6921 = vmatprep.mubr.msk.f32.mxu1 %vm1985_vm3, %v8926_v40  ;;  %7048 = vmatpush3.msk.msra.mxu1 %vm2082_vm2, %v5885_v12  ;;  %v7003_v18 = vpop.f32.mrb[92].mxu0 }
 0x603   :  { %v2754_v38 = vpop.f32.mrb[93].mxu0 }
 0x605   :  { %6922 = vmatmul.mubr.msk.f32.gmra.mrb[60].mxu1 %vm1985_vm3, %v8924_v44 }
 0x606   :  { %6924 = vmatprep.mubr.msk.f32.mxu1 %vm1985_vm3, %v8930_v41  ;;  %v7006_v15 = vpop.f32.mrb[94].mxu0 }
 0x607   :  { %v2764_v1 = vpop.f32.mrb[95].mxu0 }
 0x609   :  { %6925 = vmatmul.mubr.msk.f32.gmra.mrb[62].mxu1 %vm1985_vm3, %v8928_v32 }
 0x60a   :  { %6927 = vmatprep.mubr.msk.f32.mxu1 %vm1985_vm3, %v8934_v20  ;;  %v7009_v16 = vpop.f32.mrb[96].mxu0 }
 0x60b   :  { %v2774_v40 = vpop.f32.mrb[97].mxu0 }
 0x60d   :  { %6928 = vmatmul.mubr.msk.f32.gmra.mrb[64].mxu1 %vm1985_vm3, %v8932_v54 }
 0x60e   :  { %6930 = vmatprep.mubr.msk.f32.mxu1 %vm1985_vm3, %v8938_v17  ;;  %v7012_v44 = vpop.f32.mrb[98].mxu0 }
 0x60f   :  { %v2784_v19 = vpop.f32.mrb[99].mxu0 }
 0x611   :  { %6931 = vmatmul.mubr.msk.f32.gmra.mrb[66].mxu1 %vm1985_vm3, %v8936_v59 }
 0x612   :  { %6933 = vmatprep.mubr.msk.f32.mxu1 %vm1985_vm3, %v8942_v42  ;;  %v7015_v32 = vpop.f32.mrb[100].mxu0 }
 0x613   :  { %v2794_v41 = vpop.f32.mrb[101].mxu0 }
 0x615   :  { %6934 = vmatmul.mubr.msk.f32.gmra.mrb[68].mxu1 %vm1985_vm3, %v8940_v6 }
 0x616   :  { %6936 = vmatprep.mubr.msk.f32.mxu1 %vm1985_vm3, %v8946_v43  ;;  %v7018_v54 = vpop.f32.mrb[102].mxu0 }
 0x617   :  { %v2804_v20 = vpop.f32.mrb[103].mxu0 }
 0x619   :  { %6937 = vmatmul.mubr.msk.f32.gmra.mrb[70].mxu1 %vm1985_vm3, %v8944_v14 }
 0x61a   :  { %6939 = vmatprep.mubr.msk.f32.mxu1 %vm1985_vm3, %v8950_v22  ;;  %v7021_v59 = vpop.f32.mrb[104].mxu0 }
 0x61b   :  { %v2814_v17 = vpop.f32.mrb[105].mxu0 }
 0x61d   :  { %6940 = vmatmul.mubr.msk.f32.gmra.mrb[72].mxu1 %vm1985_vm3, %v8948_v45 }
 0x61e   :  { %6942 = vmatprep.mubr.msk.f32.mxu1 %vm1985_vm3, %v8954_v48  ;;  %v7024_v6 = vpop.f32.mrb[106].mxu0 }
 0x61f   :  { %v2824_v42 = vpop.f32.mrb[107].mxu0 }
 0x621   :  { %6943 = vmatmul.mubr.msk.f32.gmra.mrb[74].mxu1 %vm1985_vm3, %v8952_v47 }
 0x622   :  { %6945 = vmatprep.mubr.msk.f32.mxu1 %vm1985_vm3, %v8958_v24  ;;  %v7027_v14 = vpop.f32.mrb[108].mxu0 }
 0x623   :  { %v2834_v43 = vpop.f32.mrb[109].mxu0 }
 0x625   :  { %6946 = vmatmul.mubr.msk.f32.gmra.mrb[76].mxu1 %vm1985_vm3, %v8956_v49 }
 0x626   :  { %6948 = vmatprep.mubr.msk.f32.mxu1 %vm1985_vm3, %v8962_v25  ;;  %v7030_v45 = vpop.f32.mrb[110].mxu0 }
 0x627   :  { %v2844_v22 = vpop.f32.mrb[111].mxu0 }
 0x629   :  { %6949 = vmatmul.mubr.msk.f32.gmra.mrb[78].mxu1 %vm1985_vm3, %v8960_v36 }
 0x62a   :  { %6951 = vmatprep.mubr.msk.f32.mxu1 %vm1985_vm3, %v8966_v53  ;;  %v7033_v47 = vpop.f32.mrb[112].mxu0 }
 0x62b   :  { %v2854_v48 = vpop.f32.mrb[113].mxu0 }
 0x62d   :  { %6952 = vmatmul.mubr.msk.f32.gmra.mrb[80].mxu1 %vm1985_vm3, %v8964_v52 }
 0x62e   :  { %6954 = vmatprep.mubr.msk.f32.mxu1 %vm1985_vm3, %v8970_v55  ;;  %v7036_v49 = vpop.f32.mrb[114].mxu0  ;;  %v3800_v55 = vld [vmem:[#allocation12 + $0x208] sm:$0xff] }
 0x62f   :  { %v2864_v24 = vpop.f32.mrb[115].mxu0 }
 0x631   :  { %6955 = vmatmul.mubr.msk.f32.gmra.mrb[82].mxu1 %vm1985_vm3, %v8968_v46  ;;  %v8029_v46 = vmov 0.0|0.0  }
 0x632   :  { %6957 = vmatprep.mubr.msk.f32.mxu1 %vm1985_vm3, %v8974_v56  ;;  %v7039_v36 = vpop.f32.mrb[116].mxu0  ;;  %7447 = vmatprep.subr.bf16.mxu0 %v8029_v46  ;;  %v3256_v56 = vpop.permute.xlu1 %3255 }
 0x633   :  { %v2874_v25 = vpop.f32.mrb[117].mxu0  ;;  %7495 = vmatprep.subr.bf16.mxu1 %v8029_v46 }
 0x635   :  { %6958 = vmatmul.mubr.msk.f32.gmra.mrb[84].mxu1 %vm1985_vm3, %v8972_v50  ;;  %v3261_v50 = vpop.permute.xlu0 %3260 }
 0x636   :  { %6960 = vmatprep.mubr.msk.f32.mxu1 %vm1985_vm3, %v8978_v58  ;;  %v7042_v52 = vpop.f32.mrb[118].mxu0  ;;  %v3266_v58 = vpop.permute.xlu1 %3265 }
 0x637   :  { %v2884_v53 = vpop.f32.mrb[119].mxu0 }
 0x639   :  { %6961 = vmatmul.mubr.msk.f32.gmra.mrb[86].mxu1 %vm1985_vm3, %v8976_v57  ;;  %v3271_v57 = vpop.permute.xlu0 %3270 }
 0x63a   :  { %7049 = vmatprep.mubr.msk.f32.mxu1 %vm1985_vm3, %v9031_v11  ;;  %v3276_v23 = vpop.permute.xlu1 %3275 }
 0x63d   :  { %7050 = vmatmul.mubr.msk.f32.vlgmr.msra.gmra.mrb[56].mxu1 %vm1985_vm3, %v9029_v8  ;;  %v3281_v21 = vpop.permute.xlu0 %3280 }
 0x63e   :  { %7052 = vmatprep.mubr.msk.f32.mxu1 %vm1985_vm3, %v2744_v39  ;;  %v3286_v27 = vpop.permute.xlu1 %3285 }
 0x641   :  { %7053 = vmatmul.mubr.msk.f32.gmra.mrb[58].mxu1 %vm1985_vm3, %v9041_v13  ;;  %v3291_v26 = vpop.permute.xlu0 %3290 }
 0x642   :  { %7055 = vmatprep.mubr.msk.f32.mxu1 %vm1985_vm3, %v2754_v38  ;;  %v3296_v29 = vpop.permute.xlu1 %3295 }
 0x645   :  { %7056 = vmatmul.mubr.msk.f32.gmra.mrb[60].mxu1 %vm1985_vm3, %v7003_v18  ;;  %v3301_v28 = vpop.permute.xlu0 %3300 }
 0x646   :  { %7058 = vmatprep.mubr.msk.f32.mxu1 %vm1985_vm3, %v2764_v1  ;;  %v9142_v33 = vpop.permute.xlu1 %3305 }
 0x649   :  { %7059 = vmatmul.mubr.msk.f32.gmra.mrb[62].mxu1 %vm1985_vm3, %v7006_v15  ;;  %v9140_v30 = vpop.permute.xlu0 %3310 }
 0x64a   :  { %7061 = vmatprep.mubr.msk.f32.mxu1 %vm1985_vm3, %v2774_v40  ;;  %v9146_v8 = vpop.permute.xlu1 %3315 }
 0x64d   :  { %7062 = vmatmul.mubr.msk.f32.gmra.mrb[64].mxu1 %vm1985_vm3, %v7009_v16  ;;  %v9144_v62 = vpop.permute.xlu0 %3320 }
 0x64e   :  { %7064 = vmatprep.mubr.msk.f32.mxu1 %vm1985_vm3, %v2784_v19 }
 0x651   :  { %7065 = vmatmul.mubr.msk.f32.gmra.mrb[66].mxu1 %vm1985_vm3, %v7012_v44  ;;  %v3331_v44 = vpop.permute.xlu0 %3330 }
 0x652   :  { %7067 = vmatprep.mubr.msk.f32.mxu1 %vm1985_vm3, %v2794_v41 }
 0x655   :  { %7068 = vmatmul.mubr.msk.f32.gmra.mrb[68].mxu1 %vm1985_vm3, %v7015_v32 }
 0x656   :  { %7070 = vmatprep.mubr.msk.f32.mxu1 %vm1985_vm3, %v2804_v20 }
 0x659   :  { %7071 = vmatmul.mubr.msk.f32.gmra.mrb[70].mxu1 %vm1985_vm3, %v7018_v54  ;;  %v3326_v54 = vpop.permute.xlu1 %3325 }
 0x65a   :  { %7073 = vmatprep.mubr.msk.f32.mxu1 %vm1985_vm3, %v2814_v17 }
 0x65d   :  { %7074 = vmatmul.mubr.msk.f32.gmra.mrb[72].mxu1 %vm1985_vm3, %v7021_v59 }
 0x65e   :  { %7076 = vmatprep.mubr.msk.f32.mxu1 %vm1985_vm3, %v2824_v42 }
 0x661   :  { %7077 = vmatmul.mubr.msk.f32.gmra.mrb[74].mxu1 %vm1985_vm3, %v7024_v6 }
 0x662   :  { %7079 = vmatprep.mubr.msk.f32.mxu1 %vm1985_vm3, %v2834_v43 }
 0x665   :  { %7080 = vmatmul.mubr.msk.f32.gmra.mrb[76].mxu1 %vm1985_vm3, %v7027_v14 }
 0x666   :  { %7082 = vmatprep.mubr.msk.f32.mxu1 %vm1985_vm3, %v2844_v22 }
 0x669   :  { %7083 = vmatmul.mubr.msk.f32.gmra.mrb[78].mxu1 %vm1985_vm3, %v7030_v45 }
 0x66a   :  { %7085 = vmatprep.mubr.msk.f32.mxu1 %vm1985_vm3, %v2854_v48 }
 0x66d   :  { %7086 = vmatmul.mubr.msk.f32.gmra.mrb[80].mxu1 %vm1985_vm3, %v7033_v47 }
 0x66e   :  { %7088 = vmatprep.mubr.msk.f32.mxu1 %vm1985_vm3, %v2864_v24  ;;  %v3341_v24 = vpop.permute.xlu0 %3340 }
 0x671   :  { %7089 = vmatmul.mubr.msk.f32.gmra.mrb[82].mxu1 %vm1985_vm3, %v7036_v49 }
 0x672   :  { %7091 = vmatprep.mubr.msk.f32.mxu1 %vm1985_vm3, %v2874_v25 }
 0x675   :  { %7092 = vmatmul.mubr.msk.f32.gmra.mrb[84].mxu1 %vm1985_vm3, %v7039_v36 }
 0x676   :  { %7094 = vmatprep.mubr.msk.f32.mxu1 %vm1985_vm3, %v2884_v53 }
 0x679   :  { %7095 = vmatmul.mubr.msk.f32.gmra.mrb[86].mxu1 %vm1985_vm3, %v7042_v52  ;;  %v3336_v52 = vpop.permute.xlu1 %3335 }
 0x67a   :  { %3927 = vmatprep.mubr.f32.mxu1 %v3800_v55 }
 0x710   :  { %v7051_v31 = vpop.f32.mrb[56].mxu1 }
 0x711   :  { %v3414_v0 = vadd.f32 %v7051_v31, %v3261_v50  ;;  %v3062_v9 = vpop.f32.mrb[57].mxu1 }
 0x712   :  { %v3413_v34 = vadd.f32 %v3256_v56, %v3062_v9  ;;  %v3346_v9 = vpop.permute.xlu1 %3345 }
 0x713   :  { %v3446_v35 = vmul.f32 0.2, %v3414_v0 }
 0x714   :  { %v3445_v37 = vmul.f32 0.2, %v3413_v34  ;;  %v7054_v5 = vpop.f32.mrb[58].mxu1 }
 0x715   :  { %v3478_v7 = vmax.f32 %v3414_v0, %v3446_v35  ;;  %v3416_v60 = vadd.f32 %v7054_v5, %v3271_v57  ;;  %v3072_v61 = vpop.f32.mrb[59].mxu1 }
 0x716   :  { %v3477_v63 = vmax.f32 %v3413_v34, %v3445_v37  ;;  %v3415_v3 = vadd.f32 %v3266_v58, %v3072_v61 }
 0x717   :  { %v3448_v11 = vmul.f32 0.2, %v3416_v60 }
 0x718   :  { %v9148_v12 = vpack.c.bf16 %v3478_v7, %v3477_v63  ;;  %v3447_v13 = vmul.f32 0.2, %v3415_v3  ;;  %v7057_v39 = vpop.f32.mrb[60].mxu1 }
 0x719   :  { %v3480_v18 = vmax.f32 %v3416_v60, %v3448_v11  ;;  %v3418_v38 = vadd.f32 %v7057_v39, %v3281_v21  ;;  %v3082_v15 = vpop.f32.mrb[61].mxu1 }
 0x71a   :  { %v3479_v1 = vmax.f32 %v3415_v3, %v3447_v13  ;;  %v3417_v16 = vadd.f32 %v3276_v23, %v3082_v15  ;;  %7449 = vmatpush1.bf16.msra.mxu0 %v9148_v12  ;;  %7497 = vmatpush1.bf16.msra.mxu1 %v9148_v12 }
 0x71b   :  { %v3450_v40 = vmul.f32 0.2, %v3418_v38  ;;  %7450 = vmatprep.subr.bf16.mxu0 %v8029_v46  ;;  %7498 = vmatprep.subr.bf16.mxu1 %v8029_v46 }
 0x71c   :  { %v9154_v19 = vpack.c.bf16 %v3480_v18, %v3479_v1  ;;  %v3449_v32 = vmul.f32 0.2, %v3417_v16  ;;  %v7060_v41 = vpop.f32.mrb[62].mxu1 }
 0x71d   :  { %v3482_v20 = vmax.f32 %v3418_v38, %v3450_v40  ;;  %v3420_v59 = vadd.f32 %v7060_v41, %v3291_v26  ;;  %v3092_v17 = vpop.f32.mrb[63].mxu1 }
 0x71e   :  { %v3481_v6 = vmax.f32 %v3417_v16, %v3449_v32  ;;  %v3419_v42 = vadd.f32 %v3286_v27, %v3092_v17  ;;  %7452 = vmatpush1.bf16.msra.mxu0 %v9154_v19  ;;  %7500 = vmatpush1.bf16.msra.mxu1 %v9154_v19 }
 0x71f   :  { %v3452_v14 = vmul.f32 0.2, %v3420_v59  ;;  %7453 = vmatprep.subr.bf16.mxu0 %v8029_v46  ;;  %7501 = vmatprep.subr.bf16.mxu1 %v8029_v46 }
 0x720   :  { %v9160_v43 = vpack.c.bf16 %v3482_v20, %v3481_v6  ;;  %v3451_v45 = vmul.f32 0.2, %v3419_v42  ;;  %v7063_v22 = vpop.f32.mrb[64].mxu1 }
 0x721   :  { %v3484_v47 = vmax.f32 %v3420_v59, %v3452_v14  ;;  %v3422_v48 = vadd.f32 %v7063_v22, %v3301_v28  ;;  %v3102_v49 = vpop.f32.mrb[65].mxu1  ;;  %v3351_v28 = vpop.permute.xlu0 %3350 }
 0x722   :  { %v3483_v36 = vmax.f32 %v3419_v42, %v3451_v45  ;;  %v3421_v25 = vadd.f32 %v3296_v29, %v3102_v49  ;;  %7455 = vmatpush1.bf16.msra.mxu0 %v9160_v43  ;;  %7503 = vmatpush1.bf16.msra.mxu1 %v9160_v43 }
 0x723   :  { %v3454_v53 = vmul.f32 0.2, %v3422_v48  ;;  %7456 = vmatprep.subr.bf16.mxu0 %v8029_v46  ;;  %7504 = vmatprep.subr.bf16.mxu1 %v8029_v46 }
 0x724   :  { %v9166_v55 = vpack.c.bf16 %v3484_v47, %v3483_v36  ;;  %v3453_v50 = vmul.f32 0.2, %v3421_v25  ;;  %v7066_v56 = vpop.f32.mrb[66].mxu1 }
 0x725   :  { %v3486_v57 = vmax.f32 %v3422_v48, %v3454_v53  ;;  %v3424_v58 = vadd.f32 %v7066_v56, %v9140_v30  ;;  %v3112_v21 = vpop.f32.mrb[67].mxu1  ;;  %v3361_v4 = vpop.permute.xlu0 %3360 }
 0x726   :  { %v3485_v23 = vmax.f32 %v3421_v25, %v3453_v50  ;;  %v3423_v26 = vadd.f32 %v9142_v33, %v3112_v21  ;;  %7458 = vmatpush1.bf16.msra.mxu0 %v9166_v55  ;;  %7506 = vmatpush1.bf16.msra.mxu1 %v9166_v55 }
 0x727   :  { %v3456_v27 = vmul.f32 0.2, %v3424_v58  ;;  %7459 = vmatprep.subr.bf16.mxu0 %v8029_v46  ;;  %7507 = vmatprep.subr.bf16.mxu1 %v8029_v46 }
 0x728   :  { %v9174_v29 = vpack.c.bf16 %v3486_v57, %v3485_v23  ;;  %v3455_v31 = vmul.f32 0.2, %v3423_v26  ;;  %v7069_v0 = vpop.f32.mrb[68].mxu1 }
 0x729   :  { %v3488_v30 = vmax.f32 %v3424_v58, %v3456_v27  ;;  %v3426_v34 = vadd.f32 %v7069_v0, %v9144_v62  ;;  %v3122_v35 = vpop.f32.mrb[69].mxu1 }
 0x72a   :  { %v3487_v33 = vmax.f32 %v3423_v26, %v3455_v31  ;;  %v3425_v37 = vadd.f32 %v9146_v8, %v3122_v35  ;;  %7461 = vmatpush1.bf16.msra.mxu0 %v9174_v29  ;;  %7509 = vmatpush1.bf16.msra.mxu1 %v9174_v29  ;;  %v3356_v8 = vpop.permute.xlu1 %3355 }
 0x72b   :  { %v3458_v5 = vmul.f32 0.2, %v3426_v34  ;;  %7462 = vmatprep.subr.bf16.mxu0 %v8029_v46  ;;  %7510 = vmatprep.subr.bf16.mxu1 %v8029_v46 }
 0x72c   :  { %v9182_v7 = vpack.c.bf16 %v3488_v30, %v3487_v33  ;;  %v3457_v60 = vmul.f32 0.2, %v3425_v37  ;;  %v7072_v61 = vpop.f32.mrb[70].mxu1 }
 0x72d   :  { %v3490_v63 = vmax.f32 %v3426_v34, %v3458_v5  ;;  %v3428_v3 = vadd.f32 %v7072_v61, %v3331_v44  ;;  %v3132_v62 = vpop.f32.mrb[71].mxu1 }
 0x72e   :  { %v3489_v11 = vmax.f32 %v3425_v37, %v3457_v60  ;;  %v3427_v13 = vadd.f32 %v3326_v54, %v3132_v62  ;;  %7464 = vmatpush1.bf16.msra.mxu0 %v9182_v7  ;;  %7512 = vmatpush1.bf16.msra.mxu1 %v9182_v7  ;;  %v3371_v54 = vpop.permute.xlu0 %3370  ;;  %v3366_v6 = vpop.permute.xlu1 %3365 }
 0x72f   :  { %v3460_v39 = vmul.f32 0.2, %v3428_v3  ;;  %7465 = vmatprep.subr.bf16.mxu0 %v8029_v46  ;;  %7513 = vmatprep.subr.bf16.mxu1 %v8029_v46 }
 0x730   :  { %v9188_v18 = vpack.c.bf16 %v3490_v63, %v3489_v11  ;;  %v3459_v38 = vmul.f32 0.2, %v3427_v13  ;;  %v7075_v15 = vpop.f32.mrb[72].mxu1 }
 0x731   :  { %v3492_v1 = vmax.f32 %v3428_v3, %v3460_v39  ;;  %v3430_v16 = vadd.f32 %v7075_v15, %v3341_v24  ;;  %v3142_v40 = vpop.f32.mrb[73].mxu1 }
 0x732   :  { %v3491_v44 = vmax.f32 %v3427_v13, %v3459_v38  ;;  %v3429_v32 = vadd.f32 %v3336_v52, %v3142_v40  ;;  %7467 = vmatpush1.bf16.msra.mxu0 %v9188_v18  ;;  %7515 = vmatpush1.bf16.msra.mxu1 %v9188_v18  ;;  %v3381_v50 = vpop.permute.xlu0 %3380  ;;  %v3376_v58 = vpop.permute.xlu1 %3375 }
 0x733   :  { %v3462_v41 = vmul.f32 0.2, %v3430_v16  ;;  %7468 = vmatprep.subr.bf16.mxu0 %v8029_v46  ;;  %7516 = vmatprep.subr.bf16.mxu1 %v8029_v46 }
 0x734   :  { %v9194_v20 = vpack.c.bf16 %v3492_v1, %v3491_v44  ;;  %v3461_v59 = vmul.f32 0.2, %v3429_v32  ;;  %v7078_v17 = vpop.f32.mrb[74].mxu1 }
 0x735   :  { %v3494_v42 = vmax.f32 %v3430_v16, %v3462_v41  ;;  %v3432_v14 = vadd.f32 %v7078_v17, %v3351_v28  ;;  %v3152_v45 = vpop.f32.mrb[75].mxu1 }
 0x736   :  { %v3493_v22 = vmax.f32 %v3429_v32, %v3461_v59  ;;  %v3431_v47 = vadd.f32 %v3346_v9, %v3152_v45  ;;  %7470 = vmatpush1.bf16.msra.mxu0 %v9194_v20  ;;  %7518 = vmatpush1.bf16.msra.mxu1 %v9194_v20  ;;  %v3391_v35 = vpop.permute.xlu0 %3390  ;;  %v3386_v60 = vpop.permute.xlu1 %3385 }
 0x737   :  { %v3464_v48 = vmul.f32 0.2, %v3432_v14  ;;  %7471 = vmatprep.subr.bf16.mxu0 %v8029_v46  ;;  %7519 = vmatprep.subr.bf16.mxu1 %v8029_v46 }
 0x738   :  { %v9200_v49 = vpack.c.bf16 %v3494_v42, %v3493_v22  ;;  %v3463_v24 = vmul.f32 0.2, %v3431_v47  ;;  %v7081_v36 = vpop.f32.mrb[76].mxu1 }
 0x739   :  { %v3496_v25 = vmax.f32 %v3432_v14, %v3464_v48  ;;  %v3434_v52 = vadd.f32 %v7081_v36, %v3361_v4  ;;  %v3162_v53 = vpop.f32.mrb[77].mxu1 }
 0x73a   :  { %v3495_v56 = vmax.f32 %v3431_v47, %v3463_v24  ;;  %v3433_v57 = vadd.f32 %v3356_v8, %v3162_v53  ;;  %7473 = vmatpush1.bf16.msra.mxu0 %v9200_v49  ;;  %7521 = vmatpush1.bf16.msra.mxu1 %v9200_v49  ;;  %v3401_v16 = vpop.permute.xlu0 %3400  ;;  %v3396_v32 = vpop.permute.xlu1 %3395 }
 0x73b   :  { %v3466_v21 = vmul.f32 0.2, %v3434_v52  ;;  %7474 = vmatprep.subr.bf16.mxu0 %v8029_v46  ;;  %7522 = vmatprep.subr.bf16.mxu1 %v8029_v46 }
 0x73c   :  { %v9206_v23 = vpack.c.bf16 %v3496_v25, %v3495_v56  ;;  %v3465_v26 = vmul.f32 0.2, %v3433_v57  ;;  %v7084_v27 = vpop.f32.mrb[78].mxu1 }
 0x73d   :  { %v3498_v28 = vmax.f32 %v3434_v52, %v3466_v21  ;;  %v3436_v31 = vadd.f32 %v7084_v27, %v3371_v54  ;;  %v3172_v0 = vpop.f32.mrb[79].mxu1 }
 0x73e   :  { %v3497_v9 = vmax.f32 %v3433_v57, %v3465_v26  ;;  %v3435_v30 = vadd.f32 %v3366_v6, %v3172_v0  ;;  %7476 = vmatpush1.bf16.msra.mxu0 %v9206_v23  ;;  %7524 = vmatpush1.bf16.msra.mxu1 %v9206_v23  ;;  %v3411_v48 = vpop.permute.xlu0 %3410  ;;  %v3406_v52 = vpop.permute.xlu1 %3405 }
 0x73f   :  { %v3468_v34 = vmul.f32 0.2, %v3436_v31  ;;  %7477 = vmatprep.subr.bf16.mxu0 %v8029_v46  ;;  %7525 = vmatprep.subr.bf16.mxu1 %v8029_v46 }
 0x740   :  { %v9212_v33 = vpack.c.bf16 %v3498_v28, %v3497_v9  ;;  %v3467_v37 = vmul.f32 0.2, %v3435_v30  ;;  %v7087_v5 = vpop.f32.mrb[80].mxu1  ;;  %v3799_v9 = vld [vmem:[#allocation12 + $0x200] sm:$0xff] }
 0x741   :  { %v3500_v61 = vmax.f32 %v3436_v31, %v3468_v34  ;;  %v3438_v63 = vadd.f32 %v7087_v5, %v3381_v50  ;;  %v3182_v3 = vpop.f32.mrb[81].mxu1  ;;  %v3802_v34 = vld [vmem:[#allocation12 + $0x218] sm:$0xff]  ;;  %v3511_v5 = vld [vmem:[#allocation12 + $0x10] sm:$0xff] }
 0x742   :  { %v3499_v62 = vmax.f32 %v3435_v30, %v3467_v37  ;;  %v3437_v4 = vadd.f32 %v3376_v58, %v3182_v3  ;;  %7479 = vmatpush1.bf16.msra.mxu0 %v9212_v33  ;;  %7527 = vmatpush1.bf16.msra.mxu1 %v9212_v33  ;;  %v3509_v30 = vld [vmem:[#allocation12] sm:$0xff]  ;;  %v3801_v37 = vld [vmem:[#allocation12 + $0x210] sm:$0xff] }
 0x743   :  { %v3470_v11 = vmul.f32 0.2, %v3438_v63  ;;  %7480 = vmatprep.subr.bf16.mxu0 %v8029_v46  ;;  %7528 = vmatprep.subr.bf16.mxu1 %v8029_v46  ;;  %v3513_v3 = vld [vmem:[#allocation12 + $0x20] sm:$0xff] }
 0x744   :  { %v9218_v13 = vpack.c.bf16 %v3500_v61, %v3499_v62  ;;  %v3469_v8 = vmul.f32 0.2, %v3437_v4  ;;  %v7090_v39 = vpop.f32.mrb[82].mxu1  ;;  %v3514_v61 = vld [vmem:[#allocation12 + $0x28] sm:$0xff]  ;;  %v3516_v62 = vld [vmem:[#allocation12 + $0x38] sm:$0xff] }
 0x745   :  { %v3502_v38 = vmax.f32 %v3438_v63, %v3470_v11  ;;  %v3440_v15 = vadd.f32 %v7090_v39, %v3391_v35  ;;  %v3192_v1 = vpop.f32.mrb[83].mxu1  ;;  %v3512_v35 = vld [vmem:[#allocation12 + $0x18] sm:$0xff]  ;;  %v3803_v63 = vld [vmem:[#allocation12 + $0x220] sm:$0xff]  ;;  %v3808_v11 = vld [vmem:[#allocation12 + $0x248] sm:$0xff] }
 0x746   :  { %v3501_v40 = vmax.f32 %v3437_v4, %v3469_v8  ;;  %v3439_v44 = vadd.f32 %v3386_v60, %v3192_v1  ;;  %7482 = vmatpush1.bf16.msra.mxu0 %v9218_v13  ;;  %7530 = vmatpush1.bf16.msra.mxu1 %v9218_v13  ;;  %v3804_v60 = vld [vmem:[#allocation12 + $0x228] sm:$0xff]  ;;  %v7827_v4 = vld [vmem:[%s9634_s9 + $0x28] sm:$0x1]  ;;  %v3809_v1 = vld [vmem:[#allocation12 + $0x250] sm:$0xff] }
 0x747   :  { %v3472_v41 = vmul.f32 0.2, %v3440_v15  ;;  %7483 = vmatprep.subr.bf16.mxu0 %v8029_v46  ;;  %7531 = vmatprep.subr.bf16.mxu1 %v8029_v46  ;;  %v3518_v8 = vld [vmem:[#allocation12 + $0x48] sm:$0xff]  ;;  %v3807_v39 = vld [vmem:[#allocation12 + $0x240] sm:$0xff] }
 0x748   :  { %v9224_v54 = vpack.c.bf16 %v3502_v38, %v3501_v40  ;;  %v3471_v59 = vmul.f32 0.2, %v3439_v44  ;;  %v7093_v17 = vpop.f32.mrb[84].mxu1  ;;  %v3517_v38 = vld [vmem:[#allocation12 + $0x40] sm:$0xff]  ;;  %v3522_v40 = vld [vmem:[#allocation12 + $0x68] sm:$0xff] }
 0x749   :  { %v3504_v6 = vmax.f32 %v3440_v15, %v3472_v41  ;;  %v3442_v42 = vadd.f32 %v7093_v17, %v3401_v16  ;;  %v3202_v14 = vpop.f32.mrb[85].mxu1  ;;  %v3520_v15 = vld [vmem:[#allocation12 + $0x58] sm:$0xff]  ;;  %v3519_v16 = vld [vmem:[#allocation12 + $0x50] sm:$0xff] }
 0x74a   :  { %v3503_v45 = vmax.f32 %v3439_v44, %v3471_v59  ;;  %v3441_v22 = vadd.f32 %v3396_v32, %v3202_v14  ;;  %7485 = vmatpush1.bf16.msra.mxu0 %v9224_v54  ;;  %7533 = vmatpush1.bf16.msra.mxu1 %v9224_v54  ;;  %v3811_v44 = vld [vmem:[#allocation12 + $0x260] sm:$0xff]  ;;  %v3814_v41 = vld [vmem:[#allocation12 + $0x278] sm:$0xff]  ;;  %v3813_v59 = vld [vmem:[#allocation12 + $0x270] sm:$0xff] }
 0x74b   :  { %v3474_v47 = vmul.f32 0.2, %v3442_v42  ;;  %7486 = vmatprep.subr.bf16.mxu0 %v8029_v46  ;;  %7534 = vmatprep.subr.bf16.mxu1 %v8029_v46  ;;  %v3521_v32 = vld [vmem:[#allocation12 + $0x60] sm:$0xff]  ;;  %v3523_v17 = vld [vmem:[#allocation12 + $0x70] sm:$0xff] }
 0x74c   :  { %v9230_v24 = vpack.c.bf16 %v3504_v6, %v3503_v45  ;;  %v3473_v36 = vmul.f32 0.2, %v3441_v22  ;;  %v7096_v25 = vpop.f32.mrb[86].mxu1  ;;  %v3816_v6 = vld [vmem:[#allocation12 + $0x288] sm:$0xff]  ;;  %v3525_v14 = vld [vmem:[#allocation12 + $0x80] sm:$0xff]  ;;  %v3818_v45 = vld [vmem:[#allocation12 + $0x298] sm:$0xff] }
 0x74d   :  { %v3506_v53 = vmax.f32 %v3442_v42, %v3474_v47  ;;  %v3444_v50 = vadd.f32 %v7096_v25, %v3411_v48  ;;  %v3212_v56 = vpop.f32.mrb[87].mxu1  ;;  %v3815_v42 = vld [vmem:[#allocation12 + $0x280] sm:$0xff]  ;;  %v3527_v47 = vld [vmem:[#allocation12 + $0x90] sm:$0xff]  ;;  %v3820_v48 = vld [vmem:[#allocation12 + $0x2a8] sm:$0xff] }
 0x74e   :  { %v3505_v57 = vmax.f32 %v3441_v22, %v3473_v36  ;;  %v3443_v58 = vadd.f32 %v3406_v52, %v3212_v56  ;;  %7488 = vmatpush1.bf16.msra.mxu0 %v9230_v24  ;;  %7536 = vmatpush1.bf16.msra.mxu1 %v9230_v24  ;;  %v3817_v22 = vld [vmem:[#allocation12 + $0x290] sm:$0xff]  ;;  %v3819_v36 = vld [vmem:[#allocation12 + $0x2a0] sm:$0xff]  ;;  %v3822_v52 = vld [vmem:[#allocation12 + $0x2b8] sm:$0xff] }
 0x74f   :  { %v3476_v21 = vmul.f32 0.2, %v3444_v50  ;;  %7489 = vmatprep.subr.bf16.mxu0 %v8029_v46  ;;  %7537 = vmatprep.subr.bf16.mxu1 %v8029_v46  ;;  %v3529_v25 = vld [vmem:[#allocation12 + $0xa0] sm:$0xff]  ;;  %v3824_v56 = vld [vmem:[#allocation12 + $0x2c8] sm:$0xff] }
 0x750   :  { %v9236_v26 = vpack.c.bf16 %v3506_v53, %v3505_v57  ;;  %v3475_v27 = vmul.f32 0.2, %v3443_v58  ;;  %v3821_v53 = vld [vmem:[#allocation12 + $0x2b0] sm:$0xff]  ;;  %v3823_v57 = vld [vmem:[#allocation12 + $0x2c0] sm:$0xff] }
 0x751   :  { %v3508_v28 = vmax.f32 %v3444_v50, %v3476_v21  ;;  %v3531_v50 = vld [vmem:[#allocation12 + $0xb0] sm:$0xff]  ;;  %v3826_v21 = vld [vmem:[#allocation12 + $0x2d8] sm:$0xff] }
 0x752   :  { %v3507_v31 = vmax.f32 %v3443_v58, %v3475_v27  ;;  %7491 = vmatpush1.bf16.msra.mxu0 %v9236_v26  ;;  %7539 = vmatpush1.bf16.msra.mxu1 %v9236_v26  ;;  %v3533_v58 = vld [vmem:[#allocation12 + $0xc0] sm:$0xff]  ;;  %v3825_v27 = vld [vmem:[#allocation12 + $0x2d0] sm:$0xff] }
 0x753   :  { %7492 = vmatprep.subr.bf16.mxu0 %v8029_v46  ;;  %7540 = vmatprep.subr.bf16.mxu1 %v8029_v46 }
 0x754   :  { %v9242_v0 = vpack.c.bf16 %v3508_v28, %v3507_v31  ;;  %v3535_v28 = vld [vmem:[#allocation12 + $0xd0] sm:$0xff]  ;;  %v3828_v31 = vld [vmem:[#allocation12 + $0x2e8] sm:$0xff] }
 0x756   :  { %7494 = vmatpush1.bf16.msra.mxu0 %v9242_v0  ;;  %7542 = vmatpush1.bf16.msra.mxu1 %v9242_v0 }
 0x757   :  { %7551 = vmatprep.subr.bf16.mxu1 %v8029_v46  ;;  %7544 = vmatprep.subr.bf16.mxu0 %v8578_v51 }
 0x759   :  { %3928 = vmatmul.mubr.f32.vlgmr.msra.gmra.mrb[88].mxu1 %v3799_v9  ;;  %3638 = vmatmul.mubr.f32.vlgmr.msra.gmra.mrb[120].mxu0 %v3509_v30  ;;  %v3827_v9 = vld [vmem:[#allocation12 + $0x2e0] sm:$0xff] }
 0x75a   :  { %7553 = vmatpush1.bf16.msra.mxu1 %v9148_v12  ;;  %3932 = vmatprep.mubr.f32.mxu1 %v3802_v34  ;;  %v3806_v12 = vld [vmem:[#allocation12 + $0x238] sm:$0xff]  ;;  %v3537_v30 = vld [vmem:[#allocation12 + $0xe0] sm:$0xff] }
 0x75b   :  { %7554 = vmatprep.subr.bf16.mxu1 %v8029_v46  ;;  %3642 = vmatprep.mubr.f32.mxu0 %v3512_v35  ;;  %v3830_v34 = vld [vmem:[#allocation12 + $0x2f8] sm:$0xff]  ;;  %v3829_v35 = vld [vmem:[#allocation12 + $0x2f0] sm:$0xff] }
 0x75c   :  { %7546 = vmatpush3.bf16.msra.mxu0 %v8578_v51  ;;  %v3805_v51 = vld [vmem:[#allocation12 + $0x230] sm:$0xff] }
 0x75d   :  { %3933 = vmatmul.mubr.f32.gmra.mrb[90].mxu1 %v3801_v37  ;;  %3643 = vmatmul.mubr.f32.gmra.mrb[122].mxu0 %v3511_v5  ;;  %v3539_v37 = vld [vmem:[#allocation12 + $0xf0] sm:$0xff]  ;;  %v3832_v5 = vld [vmem:[#allocation12 + $0x308] sm:$0xff] }
 0x75e   :  { %7556 = vmatpush1.bf16.msra.mxu1 %v9154_v19  ;;  %3937 = vmatprep.mubr.f32.mxu1 %v3804_v60  ;;  %v3515_v19 = vld [vmem:[#allocation12 + $0x30] sm:$0xff]  ;;  %v3831_v60 = vld [vmem:[#allocation12 + $0x300] sm:$0xff] }
 0x75f   :  { %7557 = vmatprep.subr.bf16.mxu1 %v8029_v46  ;;  %3647 = vmatprep.mubr.f32.mxu0 %v3514_v61  ;;  %v3541_v61 = vld [vmem:[#allocation12 + $0x100] sm:$0xff] }
 0x760   :  { %7101 = vmatprep.subr.msk.mxu0 %vm2082_vm2, %v7827_v4 }
 0x761   :  { %3938 = vmatmul.mubr.f32.gmra.mrb[92].mxu1 %v3803_v63  ;;  %3648 = vmatmul.mubr.f32.gmra.mrb[124].mxu0 %v3513_v3  ;;  %v3834_v63 = vld [vmem:[#allocation12 + $0x318] sm:$0xff] }
 0x762   :  { %7559 = vmatpush1.bf16.msra.mxu1 %v9160_v43  ;;  %3942 = vmatprep.mubr.f32.mxu1 %v3806_v12  ;;  %v3810_v43 = vld [vmem:[#allocation12 + $0x258] sm:$0xff]  ;;  %v3543_v12 = vld [vmem:[#allocation12 + $0x110] sm:$0xff] }
 0x763   :  { %7560 = vmatprep.subr.bf16.mxu1 %v8029_v46  ;;  %3652 = vmatprep.mubr.f32.mxu0 %v3516_v62  ;;  %v3544_v3 = vld [vmem:[#allocation12 + $0x118] sm:$0xff]  ;;  %v3546_v62 = vld [vmem:[#allocation12 + $0x128] sm:$0xff] }
 0x764   :  { %7102 = vmatpush3.msk.msra.mxu0 %vm2082_vm2, %v7827_v4  ;;  %v3835_v4 = vld [vmem:[#allocation12 + $0x320] sm:$0xff] }
 0x765   :  { %3943 = vmatmul.mubr.f32.gmra.mrb[94].mxu1 %v3805_v51  ;;  %3653 = vmatmul.mubr.f32.gmra.mrb[126].mxu0 %v3515_v19  ;;  %v3838_v51 = vld [vmem:[#allocation12 + $0x338] sm:$0xff] }
 0x766   :  { %7562 = vmatpush1.bf16.msra.mxu1 %v9166_v55  ;;  %3947 = vmatprep.mubr.f32.mxu1 %v3808_v11  ;;  %v3812_v55 = vld [vmem:[#allocation12 + $0x268] sm:$0xff]  ;;  %v3548_v19 = vld [vmem:[#allocation12 + $0x138] sm:$0xff]  ;;  %v3837_v11 = vld [vmem:[#allocation12 + $0x330] sm:$0xff] }
 0x767   :  { %7563 = vmatprep.subr.bf16.mxu1 %v8029_v46  ;;  %3657 = vmatprep.mubr.f32.mxu0 %v3518_v8  ;;  %v3547_v8 = vld [vmem:[#allocation12 + $0x130] sm:$0xff] }
 0x768   :  { %7548 = vmatprep.subr.bf16.mxu0 %v8862_v2 }
 0x769   :  { %3948 = vmatmul.mubr.f32.gmra.mrb[96].mxu1 %v3807_v39  ;;  %3658 = vmatmul.mubr.f32.gmra.mrb[128].mxu0 %v3517_v38  ;;  %v3840_v39 = vld [vmem:[#allocation12 + $0x348] sm:$0xff] }
 0x76a   :  { %7565 = vmatpush1.bf16.msra.mxu1 %v9174_v29  ;;  %3952 = vmatprep.mubr.f32.mxu1 %v3810_v43  ;;  %v3524_v29 = vld [vmem:[#allocation12 + $0x78] sm:$0xff]  ;;  %v3550_v38 = vld [vmem:[#allocation12 + $0x148] sm:$0xff]  ;;  %v3839_v43 = vld [vmem:[#allocation12 + $0x340] sm:$0xff] }
 0x76b   :  { %7566 = vmatprep.subr.bf16.mxu1 %v8029_v46  ;;  %3662 = vmatprep.mubr.f32.mxu0 %v3520_v15  ;;  %v3549_v15 = vld [vmem:[#allocation12 + $0x140] sm:$0xff] }
 0x76d   :  { %3953 = vmatmul.mubr.f32.gmra.mrb[98].mxu1 %v3809_v1  ;;  %3663 = vmatmul.mubr.f32.gmra.mrb[130].mxu0 %v3519_v16  ;;  %v3842_v1 = vld [vmem:[#allocation12 + $0x358] sm:$0xff] }
 0x76e   :  { %7568 = vmatpush1.bf16.msra.mxu1 %v9182_v7  ;;  %3957 = vmatprep.mubr.f32.mxu1 %v3812_v55  ;;  %v3526_v7 = vld [vmem:[#allocation12 + $0x88] sm:$0xff]  ;;  %v3552_v16 = vld [vmem:[#allocation12 + $0x158] sm:$0xff]  ;;  %v3841_v55 = vld [vmem:[#allocation12 + $0x350] sm:$0xff] }
 0x76f   :  { %7569 = vmatprep.subr.bf16.mxu1 %v8029_v46  ;;  %3667 = vmatprep.mubr.f32.mxu0 %v3522_v40  ;;  %v3551_v40 = vld [vmem:[#allocation12 + $0x150] sm:$0xff] }
 0x771   :  { %3958 = vmatmul.mubr.f32.gmra.mrb[100].mxu1 %v3811_v44  ;;  %3668 = vmatmul.mubr.f32.gmra.mrb[132].mxu0 %v3521_v32  ;;  %v3844_v44 = vld [vmem:[#allocation12 + $0x368] sm:$0xff] }
 0x772   :  { %7571 = vmatpush1.bf16.msra.mxu1 %v9188_v18  ;;  %3962 = vmatprep.mubr.f32.mxu1 %v3814_v41  ;;  %v3528_v18 = vld [vmem:[#allocation12 + $0x98] sm:$0xff]  ;;  %v3554_v32 = vld [vmem:[#allocation12 + $0x168] sm:$0xff]  ;;  %v3843_v41 = vld [vmem:[#allocation12 + $0x360] sm:$0xff] }
 0x773   :  { %7572 = vmatprep.subr.bf16.mxu1 %v8029_v46  ;;  %3672 = vmatprep.mubr.f32.mxu0 %v3524_v29  ;;  %v3553_v29 = vld [vmem:[#allocation12 + $0x160] sm:$0xff] }
 0x775   :  { %3963 = vmatmul.mubr.f32.gmra.mrb[102].mxu1 %v3813_v59  ;;  %3673 = vmatmul.mubr.f32.gmra.mrb[134].mxu0 %v3523_v17  ;;  %v3846_v59 = vld [vmem:[#allocation12 + $0x378] sm:$0xff] }
 0x776   :  { %7574 = vmatpush1.bf16.msra.mxu1 %v9194_v20  ;;  %3967 = vmatprep.mubr.f32.mxu1 %v3816_v6  ;;  %v3530_v20 = vld [vmem:[#allocation12 + $0xa8] sm:$0xff]  ;;  %v3556_v17 = vld [vmem:[#allocation12 + $0x178] sm:$0xff]  ;;  %v3845_v6 = vld [vmem:[#allocation12 + $0x370] sm:$0xff] }
 0x777   :  { %7575 = vmatprep.subr.bf16.mxu1 %v8029_v46  ;;  %3677 = vmatprep.mubr.f32.mxu0 %v3526_v7  ;;  %v3555_v7 = vld [vmem:[#allocation12 + $0x170] sm:$0xff] }
 0x779   :  { %3968 = vmatmul.mubr.f32.gmra.mrb[104].mxu1 %v3815_v42  ;;  %3678 = vmatmul.mubr.f32.gmra.mrb[136].mxu0 %v3525_v14  ;;  %v3848_v42 = vld [vmem:[#allocation12 + $0x388] sm:$0xff] }
 0x77a   :  { %7577 = vmatpush1.bf16.msra.mxu1 %v9200_v49  ;;  %3972 = vmatprep.mubr.f32.mxu1 %v3818_v45  ;;  %v3532_v49 = vld [vmem:[#allocation12 + $0xb8] sm:$0xff]  ;;  %v3558_v14 = vld [vmem:[#allocation12 + $0x188] sm:$0xff]  ;;  %v3847_v45 = vld [vmem:[#allocation12 + $0x380] sm:$0xff] }
 0x77b   :  { %7578 = vmatprep.subr.bf16.mxu1 %v8029_v46  ;;  %3682 = vmatprep.mubr.f32.mxu0 %v3528_v18  ;;  %v3557_v18 = vld [vmem:[#allocation12 + $0x180] sm:$0xff] }
 0x77d   :  { %3973 = vmatmul.mubr.f32.gmra.mrb[106].mxu1 %v3817_v22  ;;  %3683 = vmatmul.mubr.f32.gmra.mrb[138].mxu0 %v3527_v47  ;;  %v3850_v22 = vld [vmem:[#allocation12 + $0x398] sm:$0xff] }
 0x77e   :  { %7580 = vmatpush1.bf16.msra.mxu1 %v9206_v23  ;;  %3977 = vmatprep.mubr.f32.mxu1 %v3820_v48  ;;  %v3534_v23 = vld [vmem:[#allocation12 + $0xc8] sm:$0xff]  ;;  %v3560_v47 = vld [vmem:[#allocation12 + $0x198] sm:$0xff]  ;;  %v3849_v48 = vld [vmem:[#allocation12 + $0x390] sm:$0xff] }
 0x77f   :  { %7581 = vmatprep.subr.bf16.mxu1 %v8029_v46  ;;  %3687 = vmatprep.mubr.f32.mxu0 %v3530_v20  ;;  %v3559_v20 = vld [vmem:[#allocation12 + $0x190] sm:$0xff] }
 0x781   :  { %3978 = vmatmul.mubr.f32.gmra.mrb[108].mxu1 %v3819_v36  ;;  %3688 = vmatmul.mubr.f32.gmra.mrb[140].mxu0 %v3529_v25  ;;  %v3852_v36 = vld [vmem:[#allocation12 + $0x3a8] sm:$0xff] }
 0x782   :  { %7583 = vmatpush1.bf16.msra.mxu1 %v9212_v33  ;;  %3982 = vmatprep.mubr.f32.mxu1 %v3822_v52  ;;  %v3536_v33 = vld [vmem:[#allocation12 + $0xd8] sm:$0xff]  ;;  %v3562_v25 = vld [vmem:[#allocation12 + $0x1a8] sm:$0xff]  ;;  %v3851_v52 = vld [vmem:[#allocation12 + $0x3a0] sm:$0xff] }
 0x783   :  { %7584 = vmatprep.subr.bf16.mxu1 %v8029_v46  ;;  %3692 = vmatprep.mubr.f32.mxu0 %v3532_v49  ;;  %v3561_v49 = vld [vmem:[#allocation12 + $0x1a0] sm:$0xff] }
 0x785   :  { %3983 = vmatmul.mubr.f32.gmra.mrb[110].mxu1 %v3821_v53  ;;  %3693 = vmatmul.mubr.f32.gmra.mrb[142].mxu0 %v3531_v50  ;;  %v3854_v53 = vld [vmem:[#allocation12 + $0x3b8] sm:$0xff] }
 0x786   :  { %7586 = vmatpush1.bf16.msra.mxu1 %v9218_v13  ;;  %3987 = vmatprep.mubr.f32.mxu1 %v3824_v56  ;;  %v3538_v13 = vld [vmem:[#allocation12 + $0xe8] sm:$0xff]  ;;  %v3564_v50 = vld [vmem:[#allocation12 + $0x1b8] sm:$0xff]  ;;  %v3853_v56 = vld [vmem:[#allocation12 + $0x3b0] sm:$0xff] }
 0x787   :  { %7587 = vmatprep.subr.bf16.mxu1 %v8029_v46  ;;  %3697 = vmatprep.mubr.f32.mxu0 %v3534_v23  ;;  %v3563_v23 = vld [vmem:[#allocation12 + $0x1b0] sm:$0xff] }
 0x789   :  { %3988 = vmatmul.mubr.f32.gmra.mrb[112].mxu1 %v3823_v57  ;;  %3698 = vmatmul.mubr.f32.gmra.mrb[144].mxu0 %v3533_v58  ;;  %v3856_v57 = vld [vmem:[#allocation12 + $0x3c8] sm:$0xff] }
 0x78a   :  { %7589 = vmatpush1.bf16.msra.mxu1 %v9224_v54  ;;  %3992 = vmatprep.mubr.f32.mxu1 %v3826_v21  ;;  %v3540_v54 = vld [vmem:[#allocation12 + $0xf8] sm:$0xff]  ;;  %v3566_v58 = vld [vmem:[#allocation12 + $0x1c8] sm:$0xff]  ;;  %v3855_v21 = vld [vmem:[#allocation12 + $0x3c0] sm:$0xff] }
 0x78b   :  { %7590 = vmatprep.subr.bf16.mxu1 %v8029_v46  ;;  %3702 = vmatprep.mubr.f32.mxu0 %v3536_v33  ;;  %v3565_v33 = vld [vmem:[#allocation12 + $0x1c0] sm:$0xff] }
 0x78d   :  { %3993 = vmatmul.mubr.f32.gmra.mrb[114].mxu1 %v3825_v27  ;;  %3703 = vmatmul.mubr.f32.gmra.mrb[146].mxu0 %v3535_v28  ;;  %v3858_v27 = vld [vmem:[#allocation12 + $0x3d8] sm:$0xff] }
 0x78e   :  { %7592 = vmatpush1.bf16.msra.mxu1 %v9230_v24  ;;  %3997 = vmatprep.mubr.f32.mxu1 %v3828_v31  ;;  %v3542_v24 = vld [vmem:[#allocation12 + $0x108] sm:$0xff]  ;;  %v3568_v28 = vld [vmem:[#allocation12 + $0x1d8] sm:$0xff]  ;;  %v3857_v31 = vld [vmem:[#allocation12 + $0x3d0] sm:$0xff] }
 0x78f   :  { %7593 = vmatprep.subr.bf16.mxu1 %v8029_v46  ;;  %3707 = vmatprep.mubr.f32.mxu0 %v3538_v13  ;;  %v3567_v13 = vld [vmem:[#allocation12 + $0x1d0] sm:$0xff] }
 0x791   :  { %3998 = vmatmul.mubr.f32.gmra.mrb[116].mxu1 %v3827_v9  ;;  %3708 = vmatmul.mubr.f32.gmra.mrb[148].mxu0 %v3537_v30  ;;  %v3860_v9 = vld [vmem:[#allocation12 + $0x3e8] sm:$0xff] }
 0x792   :  { %7595 = vmatpush1.bf16.msra.mxu1 %v9236_v26  ;;  %4002 = vmatprep.mubr.f32.mxu1 %v3830_v34  ;;  %v3833_v26 = vld [vmem:[#allocation12 + $0x310] sm:$0xff]  ;;  %v3570_v30 = vld [vmem:[#allocation12 + $0x1e8] sm:$0xff]  ;;  %v3859_v34 = vld [vmem:[#allocation12 + $0x3e0] sm:$0xff] }
 0x793   :  { %7596 = vmatprep.subr.bf16.mxu1 %v8029_v46  ;;  %3712 = vmatprep.mubr.f32.mxu0 %v3540_v54  ;;  %v3836_v46 = vld [vmem:[#allocation12 + $0x328] sm:$0xff]  ;;  %v3569_v54 = vld [vmem:[#allocation12 + $0x1e0] sm:$0xff] }
 0x795   :  { %4003 = vmatmul.mubr.f32.gmra.mrb[118].mxu1 %v3829_v35  ;;  %3713 = vmatmul.mubr.f32.gmra.mrb[150].mxu0 %v3539_v37  ;;  %v3862_v35 = vld [vmem:[#allocation12 + $0x3f8] sm:$0xff] }
 0x796   :  { %7598 = vmatpush1.bf16.msra.mxu1 %v9242_v0  ;;  %4007 = vmatprep.mubr.f32.mxu1 %v3832_v5  ;;  %v3545_v0 = vld [vmem:[#allocation12 + $0x120] sm:$0xff]  ;;  %v3572_v37 = vld [vmem:[#allocation12 + $0x1f8] sm:$0xff]  ;;  %v3861_v5 = vld [vmem:[#allocation12 + $0x3f0] sm:$0xff] }
 0x797   :  { %3717 = vmatprep.mubr.f32.mxu0 %v3542_v24  ;;  %v3571_v24 = vld [vmem:[#allocation12 + $0x1f0] sm:$0xff] }
 0x799   :  { %4008 = vmatmul.mubr.f32.gmra.mrb[120].mxu1 %v3831_v60  ;;  %3718 = vmatmul.mubr.f32.gmra.mrb[152].mxu0 %v3541_v61  ;;  %v4732_v60 = vld [vmem:[#allocation12 + $0x408] sm:$0xff]  ;;  %v4731_v61 = vld [vmem:[#allocation12 + $0x400] sm:$0xff] }
 0x79a   :  { %4012 = vmatprep.mubr.f32.mxu1 %v3834_v63  ;;  %3722 = vmatprep.mubr.f32.mxu0 %v3544_v3  ;;  %v4734_v63 = vld [vmem:[#allocation12 + $0x418] sm:$0xff]  ;;  %v4733_v3 = vld [vmem:[#allocation12 + $0x410] sm:$0xff] }
 0x79d   :  { %4013 = vmatmul.mubr.f32.gmra.mrb[122].mxu1 %v3833_v26  ;;  %3723 = vmatmul.mubr.f32.gmra.mrb[154].mxu0 %v3543_v12  ;;  %v4736_v26 = vld [vmem:[#allocation12 + $0x428] sm:$0xff]  ;;  %v4735_v12 = vld [vmem:[#allocation12 + $0x420] sm:$0xff] }
 0x79e   :  { %4017 = vmatprep.mubr.f32.mxu1 %v3836_v46  ;;  %3727 = vmatprep.mubr.f32.mxu0 %v3546_v62  ;;  %v4738_v46 = vld [vmem:[#allocation12 + $0x438] sm:$0xff]  ;;  %v4737_v62 = vld [vmem:[#allocation12 + $0x430] sm:$0xff] }
 0x7a1   :  { %4018 = vmatmul.mubr.f32.gmra.mrb[124].mxu1 %v3835_v4  ;;  %3728 = vmatmul.mubr.f32.gmra.mrb[156].mxu0 %v3545_v0  ;;  %v4740_v4 = vld [vmem:[#allocation12 + $0x448] sm:$0xff]  ;;  %v4739_v0 = vld [vmem:[#allocation12 + $0x440] sm:$0xff] }
 0x7a2   :  { %4022 = vmatprep.mubr.f32.mxu1 %v3838_v51  ;;  %3732 = vmatprep.mubr.f32.mxu0 %v3548_v19  ;;  %v4742_v51 = vld [vmem:[#allocation12 + $0x458] sm:$0xff]  ;;  %v4741_v19 = vld [vmem:[#allocation12 + $0x450] sm:$0xff] }
 0x7a5   :  { %4023 = vmatmul.mubr.f32.gmra.mrb[126].mxu1 %v3837_v11  ;;  %3733 = vmatmul.mubr.f32.gmra.mrb[158].mxu0 %v3547_v8  ;;  %v4744_v11 = vld [vmem:[#allocation12 + $0x468] sm:$0xff]  ;;  %v4743_v8 = vld [vmem:[#allocation12 + $0x460] sm:$0xff] }
 0x7a6   :  { %4027 = vmatprep.mubr.f32.mxu1 %v3840_v39  ;;  %3737 = vmatprep.mubr.f32.mxu0 %v3550_v38  ;;  %v4746_v39 = vld [vmem:[#allocation12 + $0x478] sm:$0xff]  ;;  %v4745_v38 = vld [vmem:[#allocation12 + $0x470] sm:$0xff] }
 0x7a9   :  { %4028 = vmatmul.mubr.f32.gmra.mrb[128].mxu1 %v3839_v43  ;;  %3738 = vmatmul.mubr.f32.gmra.mrb[160].mxu0 %v3549_v15  ;;  %v4748_v43 = vld [vmem:[#allocation12 + $0x488] sm:$0xff]  ;;  %v4747_v15 = vld [vmem:[#allocation12 + $0x480] sm:$0xff] }
 0x7aa   :  { %4032 = vmatprep.mubr.f32.mxu1 %v3842_v1  ;;  %3742 = vmatprep.mubr.f32.mxu0 %v3552_v16  ;;  %v4750_v1 = vld [vmem:[#allocation12 + $0x498] sm:$0xff]  ;;  %v4749_v16 = vld [vmem:[#allocation12 + $0x490] sm:$0xff] }
 0x7ad   :  { %4033 = vmatmul.mubr.f32.gmra.mrb[130].mxu1 %v3841_v55  ;;  %3743 = vmatmul.mubr.f32.gmra.mrb[162].mxu0 %v3551_v40  ;;  %v4752_v55 = vld [vmem:[#allocation12 + $0x4a8] sm:$0xff]  ;;  %v4751_v40 = vld [vmem:[#allocation12 + $0x4a0] sm:$0xff] }
 0x7ae   :  { %4037 = vmatprep.mubr.f32.mxu1 %v3844_v44  ;;  %3747 = vmatprep.mubr.f32.mxu0 %v3554_v32  ;;  %v4754_v44 = vld [vmem:[#allocation12 + $0x4b8] sm:$0xff]  ;;  %v4753_v32 = vld [vmem:[#allocation12 + $0x4b0] sm:$0xff] }
 0x7b1   :  { %4038 = vmatmul.mubr.f32.gmra.mrb[132].mxu1 %v3843_v41  ;;  %3748 = vmatmul.mubr.f32.gmra.mrb[164].mxu0 %v3553_v29  ;;  %v4756_v41 = vld [vmem:[#allocation12 + $0x4c8] sm:$0xff]  ;;  %v4755_v29 = vld [vmem:[#allocation12 + $0x4c0] sm:$0xff] }
 0x7b2   :  { %4042 = vmatprep.mubr.f32.mxu1 %v3846_v59  ;;  %3752 = vmatprep.mubr.f32.mxu0 %v3556_v17  ;;  %v4758_v59 = vld [vmem:[#allocation12 + $0x4d8] sm:$0xff]  ;;  %v4757_v17 = vld [vmem:[#allocation12 + $0x4d0] sm:$0xff] }
 0x7b5   :  { %4043 = vmatmul.mubr.f32.gmra.mrb[134].mxu1 %v3845_v6  ;;  %3753 = vmatmul.mubr.f32.gmra.mrb[166].mxu0 %v3555_v7  ;;  %v4760_v6 = vld [vmem:[#allocation12 + $0x4e8] sm:$0xff]  ;;  %v4759_v7 = vld [vmem:[#allocation12 + $0x4e0] sm:$0xff] }
 0x7b6   :  { %4047 = vmatprep.mubr.f32.mxu1 %v3848_v42  ;;  %3757 = vmatprep.mubr.f32.mxu0 %v3558_v14  ;;  %v4762_v42 = vld [vmem:[#allocation12 + $0x4f8] sm:$0xff]  ;;  %v4761_v14 = vld [vmem:[#allocation12 + $0x4f0] sm:$0xff] }
 0x7b9   :  { %4048 = vmatmul.mubr.f32.gmra.mrb[136].mxu1 %v3847_v45  ;;  %3758 = vmatmul.mubr.f32.gmra.mrb[168].mxu0 %v3557_v18  ;;  %v4764_v45 = vld [vmem:[#allocation12 + $0x508] sm:$0xff]  ;;  %v4763_v18 = vld [vmem:[#allocation12 + $0x500] sm:$0xff] }
 0x7ba   :  { %4052 = vmatprep.mubr.f32.mxu1 %v3850_v22  ;;  %3762 = vmatprep.mubr.f32.mxu0 %v3560_v47  ;;  %v4766_v22 = vld [vmem:[#allocation12 + $0x518] sm:$0xff]  ;;  %v4765_v47 = vld [vmem:[#allocation12 + $0x510] sm:$0xff] }
 0x7bd   :  { %4053 = vmatmul.mubr.f32.gmra.mrb[138].mxu1 %v3849_v48  ;;  %3763 = vmatmul.mubr.f32.gmra.mrb[170].mxu0 %v3559_v20  ;;  %v4768_v48 = vld [vmem:[#allocation12 + $0x528] sm:$0xff]  ;;  %v4767_v20 = vld [vmem:[#allocation12 + $0x520] sm:$0xff] }
 0x7be   :  { %4057 = vmatprep.mubr.f32.mxu1 %v3852_v36  ;;  %3767 = vmatprep.mubr.f32.mxu0 %v3562_v25  ;;  %v4770_v36 = vld [vmem:[#allocation12 + $0x538] sm:$0xff]  ;;  %v4769_v25 = vld [vmem:[#allocation12 + $0x530] sm:$0xff] }
 0x7c1   :  { %4058 = vmatmul.mubr.f32.gmra.mrb[140].mxu1 %v3851_v52  ;;  %3768 = vmatmul.mubr.f32.gmra.mrb[172].mxu0 %v3561_v49  ;;  %v4772_v52 = vld [vmem:[#allocation12 + $0x548] sm:$0xff]  ;;  %v4771_v49 = vld [vmem:[#allocation12 + $0x540] sm:$0xff] }
 0x7c2   :  { %4062 = vmatprep.mubr.f32.mxu1 %v3854_v53  ;;  %3772 = vmatprep.mubr.f32.mxu0 %v3564_v50  ;;  %v4774_v53 = vld [vmem:[#allocation12 + $0x558] sm:$0xff]  ;;  %v4773_v50 = vld [vmem:[#allocation12 + $0x550] sm:$0xff] }
 0x7c5   :  { %4063 = vmatmul.mubr.f32.gmra.mrb[142].mxu1 %v3853_v56  ;;  %3773 = vmatmul.mubr.f32.gmra.mrb[174].mxu0 %v3563_v23  ;;  %v4776_v56 = vld [vmem:[#allocation12 + $0x568] sm:$0xff] }
 0x7c6   :  { %4067 = vmatprep.mubr.f32.mxu1 %v3856_v57  ;;  %3777 = vmatprep.mubr.f32.mxu0 %v3566_v58 }
 0x7c9   :  { %4068 = vmatmul.mubr.f32.gmra.mrb[144].mxu1 %v3855_v21  ;;  %3778 = vmatmul.mubr.f32.gmra.mrb[176].mxu0 %v3565_v33  ;;  %v4775_v33 = vld [vmem:[#allocation12 + $0x560] sm:$0xff] }
 0x7ca   :  { %4072 = vmatprep.mubr.f32.mxu1 %v3858_v27  ;;  %3782 = vmatprep.mubr.f32.mxu0 %v3568_v28  ;;  %v4778_v27 = vld [vmem:[#allocation12 + $0x578] sm:$0xff] }
 0x7cd   :  { %4073 = vmatmul.mubr.f32.gmra.mrb[146].mxu1 %v3857_v31  ;;  %3783 = vmatmul.mubr.f32.gmra.mrb[178].mxu0 %v3567_v13 }
 0x7ce   :  { %4077 = vmatprep.mubr.f32.mxu1 %v3860_v9  ;;  %3787 = vmatprep.mubr.f32.mxu0 %v3570_v30  ;;  %v4777_v30 = vld [vmem:[#allocation12 + $0x570] sm:$0xff] }
 0x7d1   :  { %4078 = vmatmul.mubr.f32.gmra.mrb[148].mxu1 %v3859_v34  ;;  %3788 = vmatmul.mubr.f32.gmra.mrb[180].mxu0 %v3569_v54  ;;  %v4780_v34 = vld [vmem:[#allocation12 + $0x588] sm:$0xff] }
 0x7d2   :  { %4082 = vmatprep.mubr.f32.mxu1 %v3862_v35  ;;  %3792 = vmatprep.mubr.f32.mxu0 %v3572_v37  ;;  %v7828_v54 = vld [vmem:[%s9634_s9 + $0x10] sm:$0x1] }
 0x7d5   :  { %4083 = vmatmul.mubr.f32.gmra.mrb[150].mxu1 %v3861_v5  ;;  %3793 = vmatmul.mubr.f32.gmra.mrb[182].mxu0 %v3571_v24 }
 0x7d6   :  { %4859 = vmatprep.mubr.f32.mxu1 %v4732_v60  ;;  %v4779_v60 = vld [vmem:[#allocation12 + $0x580] sm:$0xff] }
 0x7d9   :  { %4860 = vmatmul.mubr.f32.vlgmr.msra.gmra.mrb[152].mxu1 %v4731_v61 }
 0x7da   :  { %4864 = vmatprep.mubr.f32.mxu1 %v4734_v63 }
 0x7dd   :  { %4865 = vmatmul.mubr.f32.gmra.mrb[154].mxu1 %v4733_v3 }
 0x7de   :  { %4869 = vmatprep.mubr.f32.mxu1 %v4736_v26 }
 0x7e1   :  { %4870 = vmatmul.mubr.f32.gmra.mrb[156].mxu1 %v4735_v12  ;;  %v4781_v12 = vld [vmem:[#allocation12 + $0x590] sm:$0xff] }
 0x7e2   :  { %4874 = vmatprep.mubr.f32.mxu1 %v4738_v46  ;;  %v4784_v46 = vld [vmem:[#allocation12 + $0x5a8] sm:$0xff] }
 0x7e5   :  { %4875 = vmatmul.mubr.f32.gmra.mrb[158].mxu1 %v4737_v62 }
 0x7e6   :  { %4879 = vmatprep.mubr.f32.mxu1 %v4740_v4 }
 0x7e9   :  { %4880 = vmatmul.mubr.f32.gmra.mrb[160].mxu1 %v4739_v0 }
 0x7ea   :  { %4884 = vmatprep.mubr.f32.mxu1 %v4742_v51 }
 0x7ed   :  { %4885 = vmatmul.mubr.f32.gmra.mrb[162].mxu1 %v4741_v19  ;;  %v4783_v19 = vld [vmem:[#allocation12 + $0x5a0] sm:$0xff] }
 0x7ee   :  { %4889 = vmatprep.mubr.f32.mxu1 %v4744_v11  ;;  %v4786_v11 = vld [vmem:[#allocation12 + $0x5b8] sm:$0xff] }
 0x7f1   :  { %4890 = vmatmul.mubr.f32.gmra.mrb[164].mxu1 %v4743_v8 }
 0x7f2   :  { %4894 = vmatprep.mubr.f32.mxu1 %v4746_v39 }
 0x7f5   :  { %4895 = vmatmul.mubr.f32.gmra.mrb[166].mxu1 %v4745_v38 }
 0x7f6   :  { %4899 = vmatprep.mubr.f32.mxu1 %v4748_v43 }
 0x7f9   :  { %4900 = vmatmul.mubr.f32.gmra.mrb[168].mxu1 %v4747_v15  ;;  %v4785_v15 = vld [vmem:[#allocation12 + $0x5b0] sm:$0xff] }
 0x7fa   :  { %4904 = vmatprep.mubr.f32.mxu1 %v4750_v1  ;;  %v4788_v1 = vld [vmem:[#allocation12 + $0x5c8] sm:$0xff] }
 0x7fd   :  { %4905 = vmatmul.mubr.f32.gmra.mrb[170].mxu1 %v4749_v16 }
 0x7fe   :  { %4909 = vmatprep.mubr.f32.mxu1 %v4752_v55 }
 0x801   :  { %4910 = vmatmul.mubr.f32.gmra.mrb[172].mxu1 %v4751_v40 }
 0x802   :  { %4914 = vmatprep.mubr.f32.mxu1 %v4754_v44 }
 0x805   :  { %4915 = vmatmul.mubr.f32.gmra.mrb[174].mxu1 %v4753_v32  ;;  %v4787_v32 = vld [vmem:[#allocation12 + $0x5c0] sm:$0xff] }
 0x806   :  { %4919 = vmatprep.mubr.f32.mxu1 %v4756_v41  ;;  %v4790_v41 = vld [vmem:[#allocation12 + $0x5d8] sm:$0xff] }
 0x809   :  { %4920 = vmatmul.mubr.f32.gmra.mrb[176].mxu1 %v4755_v29 }
 0x80a   :  { %4924 = vmatprep.mubr.f32.mxu1 %v4758_v59 }
 0x80d   :  { %4925 = vmatmul.mubr.f32.gmra.mrb[178].mxu1 %v4757_v17 }
 0x80e   :  { %4929 = vmatprep.mubr.f32.mxu1 %v4760_v6 }
 0x811   :  { %4930 = vmatmul.mubr.f32.gmra.mrb[180].mxu1 %v4759_v7  ;;  %v4789_v7 = vld [vmem:[#allocation12 + $0x5d0] sm:$0xff] }
 0x812   :  { %4934 = vmatprep.mubr.f32.mxu1 %v4762_v42  ;;  %v4792_v42 = vld [vmem:[#allocation12 + $0x5e8] sm:$0xff] }
 0x815   :  { %4935 = vmatmul.mubr.f32.gmra.mrb[182].mxu1 %v4761_v14 }
 0x816   :  { %4939 = vmatprep.mubr.f32.mxu1 %v4764_v45 }
 0x819   :  { %4940 = vmatmul.mubr.f32.gmra.mrb[184].mxu1 %v4763_v18 }
 0x81a   :  { %4944 = vmatprep.mubr.f32.mxu1 %v4766_v22 }
 0x81d   :  { %4945 = vmatmul.mubr.f32.gmra.mrb[186].mxu1 %v4765_v47  ;;  %v4791_v47 = vld [vmem:[#allocation12 + $0x5e0] sm:$0xff] }
 0x81e   :  { %4949 = vmatprep.mubr.f32.mxu1 %v4768_v48  ;;  %v4794_v48 = vld [vmem:[#allocation12 + $0x5f8] sm:$0xff] }
 0x821   :  { %4950 = vmatmul.mubr.f32.gmra.mrb[188].mxu1 %v4767_v20 }
 0x822   :  { %4954 = vmatprep.mubr.f32.mxu1 %v4770_v36 }
 0x825   :  { %4955 = vmatmul.mubr.f32.gmra.mrb[190].mxu1 %v4769_v25 }
 0x826   :  { %4959 = vmatprep.mubr.f32.mxu1 %v4772_v52 }
 0x829   :  { %4960 = vmatmul.mubr.f32.gmra.mrb[192].mxu1 %v4771_v49  ;;  %v4793_v49 = vld [vmem:[#allocation12 + $0x5f0] sm:$0xff] }
 0x82a   :  { %4964 = vmatprep.mubr.f32.mxu1 %v4774_v53 }
 0x82c   :  { %v3929_v23 = vpop.f32.mrb[88].mxu1  ;;  %v9286_v57 = vpop.f32.mrb[120].mxu0 }
 0x82d   :  { %v3931_v58 = vpop.f32.mrb[89].mxu1  ;;  %4965 = vmatmul.mubr.f32.gmra.mrb[194].mxu1 %v4773_v50  ;;  %7103 = vmatprep.mubr.msk.f32.mxu0 %vm1985_vm3, %v3929_v23  ;;  %v3641_v21 = vpop.f32.mrb[121].mxu0 }
 0x82e   :  { %4969 = vmatprep.mubr.f32.mxu1 %v4776_v56 }
 0x830   :  { %v3934_v28 = vpop.f32.mrb[90].mxu1  ;;  %v9289_v31 = vpop.f32.mrb[122].mxu0 }
 0x831   :  { %v3936_v13 = vpop.f32.mrb[91].mxu1  ;;  %4970 = vmatmul.mubr.f32.gmra.mrb[196].mxu1 %v4775_v33  ;;  %7104 = vmatmul.mubr.msk.f32.vlgmr.msra.gmra.mrb[24].mxu0 %vm1985_vm3, %v3934_v28  ;;  %v3646_v9 = vpop.f32.mrb[123].mxu0 }
 0x832   :  { %4974 = vmatprep.mubr.f32.mxu1 %v4778_v27  ;;  %7550 = vmatpush3.bf16.msra.mxu0 %v8862_v2  ;;  %v4782_v2 = vld [vmem:[#allocation12 + $0x598] sm:$0xff] }
 0x833   :  { %7155 = vmatprep.subr.msk.mxu0 %vm2082_vm2, %v7828_v54 }
 0x834   :  { %v3939_v35 = vpop.f32.mrb[92].mxu1  ;;  %v9297_v37 = vpop.f32.mrb[124].mxu0 }
 0x835   :  { %v3941_v5 = vpop.f32.mrb[93].mxu1  ;;  %4975 = vmatmul.mubr.f32.gmra.mrb[198].mxu1 %v4777_v30  ;;  %7106 = vmatprep.mubr.msk.f32.mxu0 %vm1985_vm3, %v3939_v35  ;;  %v3651_v24 = vpop.f32.mrb[125].mxu0 }
 0x836   :  { %4979 = vmatprep.mubr.f32.mxu1 %v4780_v34  ;;  %7156 = vmatpush3.msk.msra.mxu0 %vm2082_vm2, %v7828_v54 }
 0x837   :  { %7600 = vmatprep.subr.bf16.mxu0 %v8993_v10 }
 0x838   :  { %v3944_v61 = vpop.f32.mrb[94].mxu1  ;;  %v9302_v63 = vpop.f32.mrb[126].mxu0 }
 0x839   :  { %v3946_v3 = vpop.f32.mrb[95].mxu1  ;;  %4980 = vmatmul.mubr.f32.gmra.mrb[200].mxu1 %v4779_v60  ;;  %7107 = vmatmul.mubr.msk.f32.gmra.mrb[26].mxu0 %vm1985_vm3, %v3944_v61  ;;  %v3656_v26 = vpop.f32.mrb[127].mxu0 }
 0x83a   :  { %4984 = vmatprep.mubr.f32.mxu1 %v4782_v2 }
 0x83c   :  { %v3949_v62 = vpop.f32.mrb[96].mxu1  ;;  %v9305_v4 = vpop.f32.mrb[128].mxu0 }
 0x83d   :  { %v3951_v0 = vpop.f32.mrb[97].mxu1  ;;  %4985 = vmatmul.mubr.f32.gmra.mrb[202].mxu1 %v4781_v12  ;;  %7109 = vmatprep.mubr.msk.f32.mxu0 %vm1985_vm3, %v3949_v62  ;;  %v3661_v51 = vpop.f32.mrb[129].mxu0 }
 0x83e   :  { %4989 = vmatprep.mubr.f32.mxu1 %v4784_v46 }
 0x840   :  { %v3954_v8 = vpop.f32.mrb[98].mxu1  ;;  %v9308_v39 = vpop.f32.mrb[130].mxu0 }
 0x841   :  { %v3956_v38 = vpop.f32.mrb[99].mxu1  ;;  %4990 = vmatmul.mubr.f32.gmra.mrb[204].mxu1 %v4783_v19  ;;  %7110 = vmatmul.mubr.msk.f32.gmra.mrb[28].mxu0 %vm1985_vm3, %v3954_v8  ;;  %v3666_v43 = vpop.f32.mrb[131].mxu0 }
 0x842   :  { %4994 = vmatprep.mubr.f32.mxu1 %v4786_v11 }
 0x844   :  { %v3959_v16 = vpop.f32.mrb[100].mxu1  ;;  %v9311_v55 = vpop.f32.mrb[132].mxu0 }
 0x845   :  { %v3961_v40 = vpop.f32.mrb[101].mxu1  ;;  %4995 = vmatmul.mubr.f32.gmra.mrb[206].mxu1 %v4785_v15  ;;  %7112 = vmatprep.mubr.msk.f32.mxu0 %vm1985_vm3, %v3959_v16  ;;  %v3671_v44 = vpop.f32.mrb[133].mxu0 }
 0x846   :  { %4999 = vmatprep.mubr.f32.mxu1 %v4788_v1 }
 0x848   :  { %v3964_v29 = vpop.f32.mrb[102].mxu1  ;;  %v9314_v59 = vpop.f32.mrb[134].mxu0 }
 0x849   :  { %v3966_v17 = vpop.f32.mrb[103].mxu1  ;;  %5000 = vmatmul.mubr.f32.gmra.mrb[208].mxu1 %v4787_v32  ;;  %7113 = vmatmul.mubr.msk.f32.gmra.mrb[30].mxu0 %vm1985_vm3, %v3964_v29  ;;  %v3676_v6 = vpop.f32.mrb[135].mxu0 }
 0x84a   :  { %5004 = vmatprep.mubr.f32.mxu1 %v4790_v41 }
 0x84c   :  { %v3969_v14 = vpop.f32.mrb[104].mxu1  ;;  %v9317_v45 = vpop.f32.mrb[136].mxu0 }
 0x84d   :  { %v3971_v18 = vpop.f32.mrb[105].mxu1  ;;  %5005 = vmatmul.mubr.f32.gmra.mrb[210].mxu1 %v4789_v7  ;;  %7115 = vmatprep.mubr.msk.f32.mxu0 %vm1985_vm3, %v3969_v14  ;;  %v3681_v22 = vpop.f32.mrb[137].mxu0 }
 0x84e   :  { %5009 = vmatprep.mubr.f32.mxu1 %v4792_v42 }
 0x850   :  { %v3974_v20 = vpop.f32.mrb[106].mxu1  ;;  %v9320_v36 = vpop.f32.mrb[138].mxu0 }
 0x851   :  { %v3976_v25 = vpop.f32.mrb[107].mxu1  ;;  %5010 = vmatmul.mubr.f32.gmra.mrb[212].mxu1 %v4791_v47  ;;  %7116 = vmatmul.mubr.msk.f32.gmra.mrb[32].mxu0 %vm1985_vm3, %v3974_v20  ;;  %v3686_v52 = vpop.f32.mrb[139].mxu0 }
 0x852   :  { %5014 = vmatprep.mubr.f32.mxu1 %v4794_v48 }
 0x854   :  { %v3979_v53 = vpop.f32.mrb[108].mxu1  ;;  %v9323_v50 = vpop.f32.mrb[140].mxu0 }
 0x855   :  { %v3981_v56 = vpop.f32.mrb[109].mxu1  ;;  %5015 = vmatmul.mubr.f32.gmra.mrb[214].mxu1 %v4793_v49  ;;  %7118 = vmatprep.mubr.msk.f32.mxu0 %vm1985_vm3, %v3979_v53  ;;  %v3691_v23 = vpop.f32.mrb[141].mxu0 }
 0x858   :  { %v3984_v58 = vpop.f32.mrb[110].mxu1  ;;  %v9326_v21 = vpop.f32.mrb[142].mxu0 }
 0x859   :  { %v3986_v33 = vpop.f32.mrb[111].mxu1  ;;  %7119 = vmatmul.mubr.msk.f32.gmra.mrb[34].mxu0 %vm1985_vm3, %v3984_v58  ;;  %v3696_v27 = vpop.f32.mrb[143].mxu0 }
 0x85c   :  { %v3989_v28 = vpop.f32.mrb[112].mxu1  ;;  %v9329_v13 = vpop.f32.mrb[144].mxu0 }
 0x85d   :  { %v3991_v9 = vpop.f32.mrb[113].mxu1  ;;  %7121 = vmatprep.mubr.msk.f32.mxu0 %vm1985_vm3, %v3989_v28  ;;  %v3701_v30 = vpop.f32.mrb[145].mxu0 }
 0x860   :  { %v3994_v34 = vpop.f32.mrb[114].mxu1  ;;  %v9332_v54 = vpop.f32.mrb[146].mxu0 }
 0x861   :  { %v3996_v35 = vpop.f32.mrb[115].mxu1  ;;  %7122 = vmatmul.mubr.msk.f32.gmra.mrb[36].mxu0 %vm1985_vm3, %v3994_v34  ;;  %v3706_v5 = vpop.f32.mrb[147].mxu0 }
 0x864   :  { %v3999_v24 = vpop.f32.mrb[116].mxu1  ;;  %v9335_v60 = vpop.f32.mrb[148].mxu0 }
 0x865   :  { %v4001_v2 = vpop.f32.mrb[117].mxu1  ;;  %7124 = vmatprep.mubr.msk.f32.mxu0 %vm1985_vm3, %v3999_v24  ;;  %v3711_v61 = vpop.f32.mrb[149].mxu0 }
 0x868   :  { %v4004_v3 = vpop.f32.mrb[118].mxu1  ;;  %v9338_v26 = vpop.f32.mrb[150].mxu0 }
 0x869   :  { %v4006_v12 = vpop.f32.mrb[119].mxu1  ;;  %7125 = vmatmul.mubr.msk.f32.gmra.mrb[38].mxu0 %vm1985_vm3, %v4004_v3  ;;  %v3716_v46 = vpop.f32.mrb[151].mxu0 }
 0x86c   :  { %v4009_v62 = vpop.f32.mrb[120].mxu1  ;;  %v9341_v0 = vpop.f32.mrb[152].mxu0 }
 0x86d   :  { %v4011_v51 = vpop.f32.mrb[121].mxu1  ;;  %7127 = vmatprep.mubr.msk.f32.mxu0 %vm1985_vm3, %v4009_v62  ;;  %v3721_v19 = vpop.f32.mrb[153].mxu0 }
 0x870   :  { %v4014_v11 = vpop.f32.mrb[122].mxu1  ;;  %v9344_v8 = vpop.f32.mrb[154].mxu0 }
 0x871   :  { %v4016_v38 = vpop.f32.mrb[123].mxu1  ;;  %7128 = vmatmul.mubr.msk.f32.gmra.mrb[40].mxu0 %vm1985_vm3, %v4014_v11  ;;  %v3726_v43 = vpop.f32.mrb[155].mxu0 }
 0x874   :  { %v4019_v15 = vpop.f32.mrb[124].mxu1  ;;  %v9347_v1 = vpop.f32.mrb[156].mxu0 }
 0x875   :  { %v4021_v16 = vpop.f32.mrb[125].mxu1  ;;  %7130 = vmatprep.mubr.msk.f32.mxu0 %vm1985_vm3, %v4019_v15  ;;  %v3731_v40 = vpop.f32.mrb[157].mxu0 }
 0x878   :  { %v4024_v44 = vpop.f32.mrb[126].mxu1  ;;  %v9350_v32 = vpop.f32.mrb[158].mxu0 }
 0x879   :  { %v4026_v41 = vpop.f32.mrb[127].mxu1  ;;  %7131 = vmatmul.mubr.msk.f32.gmra.mrb[42].mxu0 %vm1985_vm3, %v4024_v44  ;;  %v3736_v29 = vpop.f32.mrb[159].mxu0 }
 0x87c   :  { %v4029_v17 = vpop.f32.mrb[128].mxu1  ;;  %v9353_v6 = vpop.f32.mrb[160].mxu0 }
 0x87d   :  { %v4031_v7 = vpop.f32.mrb[129].mxu1  ;;  %7133 = vmatprep.mubr.msk.f32.mxu0 %vm1985_vm3, %v4029_v17  ;;  %v3741_v42 = vpop.f32.mrb[161].mxu0 }
 0x880   :  { %v4034_v14 = vpop.f32.mrb[130].mxu1  ;;  %v9356_v18 = vpop.f32.mrb[162].mxu0 }
 0x881   :  { %v4036_v22 = vpop.f32.mrb[131].mxu1  ;;  %7134 = vmatmul.mubr.msk.f32.gmra.mrb[44].mxu0 %vm1985_vm3, %v4034_v14  ;;  %v3746_v47 = vpop.f32.mrb[163].mxu0 }
 0x884   :  { %v4039_v48 = vpop.f32.mrb[132].mxu1  ;;  %v9359_v20 = vpop.f32.mrb[164].mxu0 }
 0x885   :  { %v4041_v25 = vpop.f32.mrb[133].mxu1  ;;  %7136 = vmatprep.mubr.msk.f32.mxu0 %vm1985_vm3, %v4039_v48  ;;  %v3751_v52 = vpop.f32.mrb[165].mxu0 }
 0x886   :  { %v7829_v25 = vld [vmem:[%s9634_s9 + $0x40] sm:$0x1] }
 0x888   :  { %v4044_v49 = vpop.f32.mrb[134].mxu1  ;;  %v9362_v53 = vpop.f32.mrb[166].mxu0 }
 0x889   :  { %v4046_v56 = vpop.f32.mrb[135].mxu1  ;;  %7137 = vmatmul.mubr.msk.f32.gmra.mrb[46].mxu0 %vm1985_vm3, %v4044_v49  ;;  %v3756_v23 = vpop.f32.mrb[167].mxu0 }
 0x88c   :  { %v4049_v58 = vpop.f32.mrb[136].mxu1  ;;  %v9365_v33 = vpop.f32.mrb[168].mxu0 }
 0x88d   :  { %v4051_v27 = vpop.f32.mrb[137].mxu1  ;;  %7139 = vmatprep.mubr.msk.f32.mxu0 %vm1985_vm3, %v4049_v58  ;;  %v3761_v28 = vpop.f32.mrb[169].mxu0 }
 0x890   :  { %v4054_v9 = vpop.f32.mrb[138].mxu1  ;;  %v9368_v30 = vpop.f32.mrb[170].mxu0 }
 0x891   :  { %v4056_v34 = vpop.f32.mrb[139].mxu1  ;;  %7140 = vmatmul.mubr.msk.f32.gmra.mrb[48].mxu0 %vm1985_vm3, %v4054_v9  ;;  %v3766_v35 = vpop.f32.mrb[171].mxu0 }
 0x894   :  { %v4059_v5 = vpop.f32.mrb[140].mxu1  ;;  %v9371_v24 = vpop.f32.mrb[172].mxu0 }
 0x895   :  { %v4061_v2 = vpop.f32.mrb[141].mxu1  ;;  %7142 = vmatprep.mubr.msk.f32.mxu0 %vm1985_vm3, %v4059_v5  ;;  %v3771_v61 = vpop.f32.mrb[173].mxu0 }
 0x898   :  { %v4064_v3 = vpop.f32.mrb[142].mxu1  ;;  %v9374_v12 = vpop.f32.mrb[174].mxu0 }
 0x899   :  { %v4066_v46 = vpop.f32.mrb[143].mxu1  ;;  %7143 = vmatmul.mubr.msk.f32.gmra.mrb[50].mxu0 %vm1985_vm3, %v4064_v3  ;;  %v3776_v62 = vpop.f32.mrb[175].mxu0 }
 0x89c   :  { %v4069_v51 = vpop.f32.mrb[144].mxu1  ;;  %v9377_v19 = vpop.f32.mrb[176].mxu0 }
 0x89d   :  { %v4071_v11 = vpop.f32.mrb[145].mxu1  ;;  %7145 = vmatprep.mubr.msk.f32.mxu0 %vm1985_vm3, %v4069_v51  ;;  %v3781_v38 = vpop.f32.mrb[177].mxu0 }
 0x8a0   :  { %v4074_v43 = vpop.f32.mrb[146].mxu1  ;;  %v9380_v15 = vpop.f32.mrb[178].mxu0 }
 0x8a1   :  { %v4076_v16 = vpop.f32.mrb[147].mxu1  ;;  %7146 = vmatmul.mubr.msk.f32.gmra.mrb[52].mxu0 %vm1985_vm3, %v4074_v43  ;;  %v3786_v40 = vpop.f32.mrb[179].mxu0 }
 0x8a4   :  { %v4079_v44 = vpop.f32.mrb[148].mxu1  ;;  %v9383_v41 = vpop.f32.mrb[180].mxu0 }
 0x8a5   :  { %v4081_v29 = vpop.f32.mrb[149].mxu1  ;;  %7148 = vmatprep.mubr.msk.f32.mxu0 %vm1985_vm3, %v4079_v44  ;;  %v3791_v17 = vpop.f32.mrb[181].mxu0 }
 0x8a8   :  { %v4084_v7 = vpop.f32.mrb[150].mxu1  ;;  %v9386_v42 = vpop.f32.mrb[182].mxu0 }
 0x8a9   :  { %v4086_v14 = vpop.f32.mrb[151].mxu1  ;;  %7149 = vmatmul.mubr.msk.f32.gmra.mrb[54].mxu0 %vm1985_vm3, %v4084_v7  ;;  %v3796_v22 = vpop.f32.mrb[183].mxu0 }
 0x8aa   :  { %7157 = vmatprep.mubr.msk.f32.mxu0 %vm1985_vm3, %v9286_v57 }
 0x8ac   :  { %v9391_v47 = vpop.f32.mrb[152].mxu1 }
 0x8ad   :  { %7158 = vmatmul.mubr.msk.f32.vlgmr.msra.gmra.mrb[24].mxu0 %vm1985_vm3, %v9289_v31  ;;  %v4863_v48 = vpop.f32.mrb[153].mxu1 }
 0x8ae   :  { %7160 = vmatprep.mubr.msk.f32.mxu0 %vm1985_vm3, %v9297_v37  ;;  %7602 = vmatpush3.bf16.msra.mxu0 %v8993_v10  ;;  %v5381_v48 = vpop.permute.xlu0 %5380 }
 0x8af   :  { %7209 = vmatprep.subr.msk.mxu0 %vm2082_vm2, %v7829_v25 }
 0x8b0   :  { %v9402_v52 = vpop.f32.mrb[154].mxu1 }
 0x8b1   :  { %7161 = vmatmul.mubr.msk.f32.gmra.mrb[26].mxu0 %vm1985_vm3, %v9302_v63  ;;  %v4868_v57 = vpop.f32.mrb[155].mxu1 }
 0x8b2   :  { %7163 = vmatprep.mubr.msk.f32.mxu0 %vm1985_vm3, %v9305_v4  ;;  %7210 = vmatpush3.msk.msra.mxu0 %vm2082_vm2, %v7829_v25  ;;  %v5376_v25 = vpop.permute.xlu1 %5375 }
 0x8b4   :  { %v4871_v31 = vpop.f32.mrb[156].mxu1 }
 0x8b5   :  { %7164 = vmatmul.mubr.msk.f32.gmra.mrb[28].mxu0 %vm1985_vm3, %v9308_v39  ;;  %v4873_v10 = vpop.f32.mrb[157].mxu1 }
 0x8b6   :  { %7166 = vmatprep.mubr.msk.f32.mxu0 %vm1985_vm3, %v9311_v55  ;;  %v5386_v57 = vpop.permute.xlu1 %5385 }
 0x8b8   :  { %v4876_v37 = vpop.f32.mrb[158].mxu1 }
 0x8b9   :  { %7167 = vmatmul.mubr.msk.f32.gmra.mrb[30].mxu0 %vm1985_vm3, %v9314_v59  ;;  %v4878_v49 = vpop.f32.mrb[159].mxu1 }
 0x8ba   :  { %7169 = vmatprep.mubr.msk.f32.mxu0 %vm1985_vm3, %v9317_v45  ;;  %v5396_v10 = vpop.permute.xlu1 %5395 }
 0x8bc   :  { %v4881_v63 = vpop.f32.mrb[160].mxu1 }
 0x8bd   :  { %7170 = vmatmul.mubr.msk.f32.gmra.mrb[32].mxu0 %vm1985_vm3, %v9320_v36  ;;  %v4883_v4 = vpop.f32.mrb[161].mxu1 }
 0x8be   :  { %7172 = vmatprep.mubr.msk.f32.mxu0 %vm1985_vm3, %v9323_v50  ;;  %v5406_v49 = vpop.permute.xlu1 %5405 }
 0x8c0   :  { %v4886_v39 = vpop.f32.mrb[162].mxu1 }
 0x8c1   :  { %7173 = vmatmul.mubr.msk.f32.gmra.mrb[34].mxu0 %vm1985_vm3, %v9326_v21  ;;  %v4888_v55 = vpop.f32.mrb[163].mxu1 }
 0x8c2   :  { %7175 = vmatprep.mubr.msk.f32.mxu0 %vm1985_vm3, %v9329_v13  ;;  %v5416_v4 = vpop.permute.xlu1 %5415 }
 0x8c4   :  { %v4891_v59 = vpop.f32.mrb[164].mxu1 }
 0x8c5   :  { %7176 = vmatmul.mubr.msk.f32.gmra.mrb[36].mxu0 %vm1985_vm3, %v9332_v54  ;;  %v4893_v45 = vpop.f32.mrb[165].mxu1 }
 0x8c6   :  { %7178 = vmatprep.mubr.msk.f32.mxu0 %vm1985_vm3, %v9335_v60 }
 0x8c8   :  { %v4896_v36 = vpop.f32.mrb[166].mxu1 }
 0x8c9   :  { %7179 = vmatmul.mubr.msk.f32.gmra.mrb[38].mxu0 %vm1985_vm3, %v9338_v26  ;;  %v4898_v50 = vpop.f32.mrb[167].mxu1 }
 0x8ca   :  { %7181 = vmatprep.mubr.msk.f32.mxu0 %vm1985_vm3, %v9341_v0 }
 0x8cc   :  { %v4901_v21 = vpop.f32.mrb[168].mxu1 }
 0x8cd   :  { %7182 = vmatmul.mubr.msk.f32.gmra.mrb[40].mxu0 %vm1985_vm3, %v9344_v8  ;;  %v4903_v13 = vpop.f32.mrb[169].mxu1 }
 0x8ce   :  { %7184 = vmatprep.mubr.msk.f32.mxu0 %vm1985_vm3, %v9347_v1 }
 0x8d0   :  { %v4906_v54 = vpop.f32.mrb[170].mxu1 }
 0x8d1   :  { %7185 = vmatmul.mubr.msk.f32.gmra.mrb[42].mxu0 %vm1985_vm3, %v9350_v32  ;;  %v4908_v60 = vpop.f32.mrb[171].mxu1 }
 0x8d2   :  { %7187 = vmatprep.mubr.msk.f32.mxu0 %vm1985_vm3, %v9353_v6 }
 0x8d4   :  { %v4911_v26 = vpop.f32.mrb[172].mxu1 }
 0x8d5   :  { %7188 = vmatmul.mubr.msk.f32.gmra.mrb[44].mxu0 %vm1985_vm3, %v9356_v18  ;;  %v4913_v0 = vpop.f32.mrb[173].mxu1 }
 0x8d6   :  { %7190 = vmatprep.mubr.msk.f32.mxu0 %vm1985_vm3, %v9359_v20 }
 0x8d8   :  { %v4916_v8 = vpop.f32.mrb[174].mxu1 }
 0x8d9   :  { %7191 = vmatmul.mubr.msk.f32.gmra.mrb[46].mxu0 %vm1985_vm3, %v9362_v53  ;;  %v4918_v1 = vpop.f32.mrb[175].mxu1 }
 0x8da   :  { %7193 = vmatprep.mubr.msk.f32.mxu0 %vm1985_vm3, %v9365_v33 }
 0x8dc   :  { %v4921_v32 = vpop.f32.mrb[176].mxu1 }
 0x8dd   :  { %7194 = vmatmul.mubr.msk.f32.gmra.mrb[48].mxu0 %vm1985_vm3, %v9368_v30  ;;  %v4923_v6 = vpop.f32.mrb[177].mxu1 }
 0x8de   :  { %7196 = vmatprep.mubr.msk.f32.mxu0 %vm1985_vm3, %v9371_v24 }
 0x8e0   :  { %v4926_v18 = vpop.f32.mrb[178].mxu1 }
 0x8e1   :  { %7197 = vmatmul.mubr.msk.f32.gmra.mrb[50].mxu0 %vm1985_vm3, %v9374_v12  ;;  %v4928_v20 = vpop.f32.mrb[179].mxu1 }
 0x8e2   :  { %7199 = vmatprep.mubr.msk.f32.mxu0 %vm1985_vm3, %v9377_v19 }
 0x8e4   :  { %v4931_v53 = vpop.f32.mrb[180].mxu1 }
 0x8e5   :  { %7200 = vmatmul.mubr.msk.f32.gmra.mrb[52].mxu0 %vm1985_vm3, %v9380_v15  ;;  %v4933_v56 = vpop.f32.mrb[181].mxu1 }
 0x8e6   :  { %7202 = vmatprep.mubr.msk.f32.mxu0 %vm1985_vm3, %v9383_v41 }
 0x8e8   :  { %v4936_v23 = vpop.f32.mrb[182].mxu1 }
 0x8e9   :  { %7203 = vmatmul.mubr.msk.f32.gmra.mrb[54].mxu0 %vm1985_vm3, %v9386_v42  ;;  %v4938_v58 = vpop.f32.mrb[183].mxu1 }
 0x8ea   :  { %7211 = vmatprep.mubr.msk.f32.mxu0 %vm1985_vm3, %v9391_v47 }
 0x8ec   :  { %v4941_v33 = vpop.f32.mrb[184].mxu1 }
 0x8ed   :  { %v4943_v27 = vpop.f32.mrb[185].mxu1  ;;  %7212 = vmatmul.mubr.msk.f32.vlgmr.msra.gmra.mrb[24].mxu0 %vm1985_vm3, %v9402_v52  ;;  %v5391_v52 = vpop.permute.xlu0 %5390 }
 0x8ee   :  { %7214 = vmatprep.mubr.msk.f32.mxu0 %vm1985_vm3, %v4871_v31 }
 0x8f0   :  { %v4946_v28 = vpop.f32.mrb[186].mxu1 }
 0x8f1   :  { %v4948_v9 = vpop.f32.mrb[187].mxu1  ;;  %7215 = vmatmul.mubr.msk.f32.gmra.mrb[26].mxu0 %vm1985_vm3, %v4876_v37  ;;  %v5401_v31 = vpop.permute.xlu0 %5400 }
 0x8f2   :  { %7217 = vmatprep.mubr.msk.f32.mxu0 %vm1985_vm3, %v4881_v63 }
 0x8f4   :  { %v4951_v30 = vpop.f32.mrb[188].mxu1 }
 0x8f5   :  { %v4953_v34 = vpop.f32.mrb[189].mxu1  ;;  %7218 = vmatmul.mubr.msk.f32.gmra.mrb[28].mxu0 %vm1985_vm3, %v4886_v39  ;;  %v5411_v37 = vpop.permute.xlu0 %5410 }
 0x8f6   :  { %7220 = vmatprep.mubr.msk.f32.mxu0 %vm1985_vm3, %v4891_v59  ;;  %v5426_v59 = vpop.permute.xlu1 %5425 }
 0x8f8   :  { %v4956_v35 = vpop.f32.mrb[190].mxu1 }
 0x8f9   :  { %v4958_v5 = vpop.f32.mrb[191].mxu1  ;;  %7221 = vmatmul.mubr.msk.f32.gmra.mrb[30].mxu0 %vm1985_vm3, %v4896_v36  ;;  %v5421_v63 = vpop.permute.xlu0 %5420 }
 0x8fa   :  { %7223 = vmatprep.mubr.msk.f32.mxu0 %vm1985_vm3, %v4901_v21  ;;  %v5436_v6 = vpop.permute.xlu1 %5435 }
 0x8fc   :  { %v4961_v24 = vpop.f32.mrb[192].mxu1 }
 0x8fd   :  { %v4963_v2 = vpop.f32.mrb[193].mxu1  ;;  %7224 = vmatmul.mubr.msk.f32.gmra.mrb[32].mxu0 %vm1985_vm3, %v4906_v54  ;;  %v5431_v39 = vpop.permute.xlu0 %5430 }
 0x8fe   :  { %7226 = vmatprep.mubr.msk.f32.mxu0 %vm1985_vm3, %v4911_v26 }
 0x900   :  { %v4966_v61 = vpop.f32.mrb[194].mxu1 }
 0x901   :  { %v4968_v3 = vpop.f32.mrb[195].mxu1  ;;  %7227 = vmatmul.mubr.msk.f32.gmra.mrb[34].mxu0 %vm1985_vm3, %v4916_v8  ;;  %v5441_v8 = vpop.permute.xlu0 %5440 }
 0x902   :  { %7229 = vmatprep.mubr.msk.f32.mxu0 %vm1985_vm3, %v4921_v32 }
 0x904   :  { %v4971_v12 = vpop.f32.mrb[196].mxu1 }
 0x905   :  { %v4973_v46 = vpop.f32.mrb[197].mxu1  ;;  %7230 = vmatmul.mubr.msk.f32.gmra.mrb[36].mxu0 %vm1985_vm3, %v4926_v18  ;;  %v5451_v9 = vpop.permute.xlu0 %5450 }
 0x906   :  { %7232 = vmatprep.mubr.msk.f32.mxu0 %vm1985_vm3, %v4931_v53 }
 0x908   :  { %v4976_v62 = vpop.f32.mrb[198].mxu1 }
 0x909   :  { %v4978_v51 = vpop.f32.mrb[199].mxu1  ;;  %7233 = vmatmul.mubr.msk.f32.gmra.mrb[38].mxu0 %vm1985_vm3, %v4936_v23 }
 0x90a   :  { %7235 = vmatprep.mubr.msk.f32.mxu0 %vm1985_vm3, %v4941_v33 }
 0x90c   :  { %v4981_v19 = vpop.f32.mrb[200].mxu1 }
 0x90d   :  { %v4983_v11 = vpop.f32.mrb[201].mxu1  ;;  %7236 = vmatmul.mubr.msk.f32.gmra.mrb[40].mxu0 %vm1985_vm3, %v4946_v28 }
 0x90e   :  { %7238 = vmatprep.mubr.msk.f32.mxu0 %vm1985_vm3, %v4951_v30 }
 0x910   :  { %v4986_v38 = vpop.f32.mrb[202].mxu1 }
 0x911   :  { %v4988_v43 = vpop.f32.mrb[203].mxu1  ;;  %7239 = vmatmul.mubr.msk.f32.gmra.mrb[42].mxu0 %vm1985_vm3, %v4956_v35  ;;  %v5446_v35 = vpop.permute.xlu1 %5445 }
 0x912   :  { %7241 = vmatprep.mubr.msk.f32.mxu0 %vm1985_vm3, %v4961_v24 }
 0x914   :  { %v4991_v15 = vpop.f32.mrb[204].mxu1 }
 0x915   :  { %v4993_v16 = vpop.f32.mrb[205].mxu1  ;;  %7242 = vmatmul.mubr.msk.f32.gmra.mrb[44].mxu0 %vm1985_vm3, %v4966_v61 }
 0x916   :  { %7244 = vmatprep.mubr.msk.f32.mxu0 %vm1985_vm3, %v4971_v12  ;;  %v5456_v16 = vpop.permute.xlu1 %5455 }
 0x918   :  { %v4996_v40 = vpop.f32.mrb[206].mxu1 }
 0x919   :  { %v4998_v44 = vpop.f32.mrb[207].mxu1  ;;  %7245 = vmatmul.mubr.msk.f32.gmra.mrb[46].mxu0 %vm1985_vm3, %v4976_v62 }
 0x91a   :  { %7247 = vmatprep.mubr.msk.f32.mxu0 %vm1985_vm3, %v4981_v19 }
 0x91c   :  { %v5001_v41 = vpop.f32.mrb[208].mxu1 }
 0x91d   :  { %v5003_v29 = vpop.f32.mrb[209].mxu1  ;;  %7248 = vmatmul.mubr.msk.f32.gmra.mrb[48].mxu0 %vm1985_vm3, %v4986_v38  ;;  %v5461_v38 = vpop.permute.xlu0 %5460 }
 0x91e   :  { %7250 = vmatprep.mubr.msk.f32.mxu0 %vm1985_vm3, %v4991_v15 }
 0x920   :  { %v5006_v17 = vpop.f32.mrb[210].mxu1 }
 0x921   :  { %v5008_v7 = vpop.f32.mrb[211].mxu1  ;;  %7251 = vmatmul.mubr.msk.f32.gmra.mrb[50].mxu0 %vm1985_vm3, %v4996_v40 }
 0x922   :  { %7253 = vmatprep.mubr.msk.f32.mxu0 %vm1985_vm3, %v5001_v41 }
 0x924   :  { %v5011_v42 = vpop.f32.mrb[212].mxu1 }
 0x925   :  { %v5013_v14 = vpop.f32.mrb[213].mxu1  ;;  %7254 = vmatmul.mubr.msk.f32.gmra.mrb[52].mxu0 %vm1985_vm3, %v5006_v17 }
 0x926   :  { %7256 = vmatprep.mubr.msk.f32.mxu0 %vm1985_vm3, %v5011_v42 }
 0x928   :  { %v5016_v22 = vpop.f32.mrb[214].mxu1 }
 0x929   :  { %v5018_v47 = vpop.f32.mrb[215].mxu1  ;;  %7257 = vmatmul.mubr.msk.f32.gmra.mrb[54].mxu0 %vm1985_vm3, %v5016_v22 }
 0x92a   :  { %v5471_v47 = vpop.permute.xlu0 %5470 }
 0x9c0   :  { %v7213_v55 = vpop.f32.mrb[24].mxu0 }
 0x9c1   :  { %v7603_v45 = vadd.f32 %v7213_v55, %v5381_v48  ;;  %v5182_v36 = vpop.f32.mrb[25].mxu0 }
 0x9c2   :  { %v7604_v50 = vadd.f32 %v5376_v25, %v5182_v36  ;;  %v5481_v36 = vpop.permute.xlu0 %5480 }
 0x9c3   :  { %v5598_v21 = vmul.f32 0.2, %v7603_v45 }
 0x9c4   :  { %v5597_v13 = vmul.f32 0.2, %v7604_v50  ;;  %v7216_v54 = vpop.f32.mrb[26].mxu0 }
 0x9c5   :  { %v5630_v60 = vmax.f32 %v7603_v45, %v5598_v21  ;;  %v7605_v26 = vadd.f32 %v7216_v54, %v5391_v52  ;;  %v5192_v0 = vpop.f32.mrb[27].mxu0  ;;  %v5466_v52 = vpop.permute.xlu1 %5465 }
 0x9c6   :  { %v5629_v1 = vmax.f32 %v7604_v50, %v5597_v13  ;;  %v7606_v32 = vadd.f32 %v5386_v57, %v5192_v0 }
 0x9c7   :  { %5662 = vst.msk [vmem:[%s9638_s13 + $0x8] sm:$0xff] %vm1985_vm3, %v5630_v60  ;;  %v5600_v18 = vmul.f32 0.2, %v7605_v26 }
 0x9c8   :  { %5661 = vst.msk [vmem:[%s9638_s13] sm:$0xff] %vm1985_vm3, %v5629_v1  ;;  %v5599_v20 = vmul.f32 0.2, %v7606_v32  ;;  %v7219_v53 = vpop.f32.mrb[28].mxu0 }
 0x9c9   :  { %v5632_v56 = vmax.f32 %v7605_v26, %v5600_v18  ;;  %v7607_v23 = vadd.f32 %v7219_v53, %v5401_v31  ;;  %v5202_v58 = vpop.f32.mrb[29].mxu0  ;;  %v5476_v13 = vpop.permute.xlu1 %5475 }
 0x9ca   :  { %v5631_v33 = vmax.f32 %v7606_v32, %v5599_v20  ;;  %v7608_v27 = vadd.f32 %v5396_v10, %v5202_v58  ;;  %v5491_v20 = vpop.permute.xlu0 %5490 }
 0x9cb   :  { %5664 = vst.msk [vmem:[%s9638_s13 + $0x18] sm:$0xff] %vm1985_vm3, %v5632_v56  ;;  %v5602_v28 = vmul.f32 0.2, %v7607_v23 }
 0x9cc   :  { %5663 = vst.msk [vmem:[%s9638_s13 + $0x10] sm:$0xff] %vm1985_vm3, %v5631_v33  ;;  %v5601_v30 = vmul.f32 0.2, %v7608_v27  ;;  %v7222_v34 = vpop.f32.mrb[30].mxu0 }
 0x9cd   :  { %v5634_v5 = vmax.f32 %v7607_v23, %v5602_v28  ;;  %v7609_v24 = vadd.f32 %v7222_v34, %v5411_v37  ;;  %v5212_v2 = vpop.f32.mrb[31].mxu0  ;;  %v5486_v23 = vpop.permute.xlu1 %5485 }
 0x9ce   :  { %v5633_v61 = vmax.f32 %v7608_v27, %v5601_v30  ;;  %v7610_v3 = vadd.f32 %v5406_v49, %v5212_v2 }
 0x9cf   :  { %5666 = vst.msk [vmem:[%s9638_s13 + $0x28] sm:$0xff] %vm1985_vm3, %v5634_v5  ;;  %v5604_v12 = vmul.f32 0.2, %v7609_v24 }
 0x9d0   :  { %5665 = vst.msk [vmem:[%s9638_s13 + $0x20] sm:$0xff] %vm1985_vm3, %v5633_v61  ;;  %v5603_v46 = vmul.f32 0.2, %v7610_v3  ;;  %v7225_v62 = vpop.f32.mrb[32].mxu0  ;;  %v5501_v61 = vpop.permute.xlu0 %5500 }
 0x9d1   :  { %v5636_v51 = vmax.f32 %v7609_v24, %v5604_v12  ;;  %v7611_v19 = vadd.f32 %v7225_v62, %v5421_v63  ;;  %v5222_v11 = vpop.f32.mrb[33].mxu0 }
 0x9d2   :  { %v5635_v43 = vmax.f32 %v7610_v3, %v5603_v46  ;;  %v7612_v15 = vadd.f32 %v5416_v4, %v5222_v11  ;;  %v5496_v46 = vpop.permute.xlu1 %5495 }
 0x9d3   :  { %5668 = vst.msk [vmem:[%s9638_s13 + $0x38] sm:$0xff] %vm1985_vm3, %v5636_v51  ;;  %v5606_v40 = vmul.f32 0.2, %v7611_v19 }
 0x9d4   :  { %5667 = vst.msk [vmem:[%s9638_s13 + $0x30] sm:$0xff] %vm1985_vm3, %v5635_v43  ;;  %v5605_v44 = vmul.f32 0.2, %v7612_v15  ;;  %v7228_v41 = vpop.f32.mrb[34].mxu0 }
 0x9d5   :  { %v5638_v29 = vmax.f32 %v7611_v19, %v5606_v40  ;;  %v7613_v17 = vadd.f32 %v7228_v41, %v5431_v39  ;;  %v5232_v7 = vpop.f32.mrb[35].mxu0 }
 0x9d6   :  { %v5637_v42 = vmax.f32 %v7612_v15, %v5605_v44  ;;  %v7614_v14 = vadd.f32 %v5426_v59, %v5232_v7  ;;  %v5511_v44 = vpop.permute.xlu0 %5510 }
 0x9d7   :  { %5670 = vst.msk [vmem:[%s9638_s13 + $0x48] sm:$0xff] %vm1985_vm3, %v5638_v29  ;;  %v5608_v22 = vmul.f32 0.2, %v7613_v17 }
 0x9d8   :  { %5669 = vst.msk [vmem:[%s9638_s13 + $0x40] sm:$0xff] %vm1985_vm3, %v5637_v42  ;;  %v5607_v48 = vmul.f32 0.2, %v7614_v14  ;;  %v7231_v25 = vpop.f32.mrb[36].mxu0 }
 0x9d9   :  { %v5640_v57 = vmax.f32 %v7613_v17, %v5608_v22  ;;  %v7615_v31 = vadd.f32 %v7231_v25, %v5441_v8  ;;  %v5242_v10 = vpop.f32.mrb[37].mxu0  ;;  %v5506_v17 = vpop.permute.xlu1 %5505 }
 0x9da   :  { %v5639_v37 = vmax.f32 %v7614_v14, %v5607_v48  ;;  %v7616_v49 = vadd.f32 %v5436_v6, %v5242_v10 }
 0x9db   :  { %5672 = vst.msk [vmem:[%s9638_s13 + $0x58] sm:$0xff] %vm1985_vm3, %v5640_v57  ;;  %v5610_v63 = vmul.f32 0.2, %v7615_v31 }
 0x9dc   :  { %5671 = vst.msk [vmem:[%s9638_s13 + $0x50] sm:$0xff] %vm1985_vm3, %v5639_v37  ;;  %v5609_v4 = vmul.f32 0.2, %v7616_v49  ;;  %v7234_v39 = vpop.f32.mrb[38].mxu0  ;;  %v5521_v37 = vpop.permute.xlu0 %5520 }
 0x9dd   :  { %v5642_v55 = vmax.f32 %v7615_v31, %v5610_v63  ;;  %v7617_v59 = vadd.f32 %v7234_v39, %v5451_v9  ;;  %v5252_v45 = vpop.f32.mrb[39].mxu0 }
 0x9de   :  { %v5641_v50 = vmax.f32 %v7616_v49, %v5609_v4  ;;  %v7618_v21 = vadd.f32 %v5446_v35, %v5252_v45  ;;  %v5516_v4 = vpop.permute.xlu1 %5515 }
 0x9df   :  { %5674 = vst.msk [vmem:[%s9638_s13 + $0x68] sm:$0xff] %vm1985_vm3, %v5642_v55  ;;  %v5612_v54 = vmul.f32 0.2, %v7617_v59 }
 0x9e0   :  { %5673 = vst.msk [vmem:[%s9638_s13 + $0x60] sm:$0xff] %vm1985_vm3, %v5641_v50  ;;  %v5611_v60 = vmul.f32 0.2, %v7618_v21  ;;  %v7237_v26 = vpop.f32.mrb[40].mxu0 }
 0x9e1   :  { %v5644_v0 = vmax.f32 %v7617_v59, %v5612_v54  ;;  %v7619_v8 = vadd.f32 %v7237_v26, %v5461_v38  ;;  %v5262_v1 = vpop.f32.mrb[41].mxu0 }
 0x9e2   :  { %v5643_v32 = vmax.f32 %v7618_v21, %v5611_v60  ;;  %v7620_v6 = vadd.f32 %v5456_v16, %v5262_v1  ;;  %v5531_v60 = vpop.permute.xlu0 %5530 }
 0x9e3   :  { %5676 = vst.msk [vmem:[%s9638_s13 + $0x78] sm:$0xff] %vm1985_vm3, %v5644_v0  ;;  %v5614_v18 = vmul.f32 0.2, %v7619_v8 }
 0x9e4   :  { %5675 = vst.msk [vmem:[%s9638_s13 + $0x70] sm:$0xff] %vm1985_vm3, %v5643_v32  ;;  %v5613_v53 = vmul.f32 0.2, %v7620_v6  ;;  %v7240_v56 = vpop.f32.mrb[42].mxu0 }
 0x9e5   :  { %v5646_v58 = vmax.f32 %v7619_v8, %v5614_v18  ;;  %v7621_v33 = vadd.f32 %v7240_v56, %v5471_v47  ;;  %v5272_v27 = vpop.f32.mrb[43].mxu0  ;;  %v5526_v8 = vpop.permute.xlu1 %5525 }
 0x9e6   :  { %v5645_v28 = vmax.f32 %v7620_v6, %v5613_v53  ;;  %v7622_v9 = vadd.f32 %v5466_v52, %v5272_v27 }
 0x9e7   :  { %5678 = vst.msk [vmem:[%s9638_s13 + $0x88] sm:$0xff] %vm1985_vm3, %v5646_v58  ;;  %v5616_v30 = vmul.f32 0.2, %v7621_v33 }
 0x9e8   :  { %5677 = vst.msk [vmem:[%s9638_s13 + $0x80] sm:$0xff] %vm1985_vm3, %v5645_v28  ;;  %v5615_v34 = vmul.f32 0.2, %v7622_v9  ;;  %v7243_v35 = vpop.f32.mrb[44].mxu0 }
 0x9e9   :  { %v5648_v5 = vmax.f32 %v7621_v33, %v5616_v30  ;;  %v7623_v24 = vadd.f32 %v7243_v35, %v5481_v36  ;;  %v5282_v2 = vpop.f32.mrb[45].mxu0 }
 0x9ea   :  { %v5647_v3 = vmax.f32 %v7622_v9, %v5615_v34  ;;  %v7624_v12 = vadd.f32 %v5476_v13, %v5282_v2 }
 0x9eb   :  { %5680 = vst.msk [vmem:[%s9638_s13 + $0x98] sm:$0xff] %vm1985_vm3, %v5648_v5  ;;  %v5618_v62 = vmul.f32 0.2, %v7623_v24 }
 0x9ec   :  { %5679 = vst.msk [vmem:[%s9638_s13 + $0x90] sm:$0xff] %vm1985_vm3, %v5647_v3  ;;  %v5617_v51 = vmul.f32 0.2, %v7624_v12  ;;  %v7246_v19 = vpop.f32.mrb[46].mxu0 }
 0x9ed   :  { %v5650_v11 = vmax.f32 %v7623_v24, %v5618_v62  ;;  %v7625_v38 = vadd.f32 %v7246_v19, %v5491_v20  ;;  %v5292_v43 = vpop.f32.mrb[47].mxu0 }
 0x9ee   :  { %v5649_v15 = vmax.f32 %v7624_v12, %v5617_v51  ;;  %v7626_v16 = vadd.f32 %v5486_v23, %v5292_v43 }
 0x9ef   :  { %5682 = vst.msk [vmem:[%s9638_s13 + $0xa8] sm:$0xff] %vm1985_vm3, %v5650_v11  ;;  %v5620_v40 = vmul.f32 0.2, %v7625_v38 }
 0x9f0   :  { %5681 = vst.msk [vmem:[%s9638_s13 + $0xa0] sm:$0xff] %vm1985_vm3, %v5649_v15  ;;  %v5619_v41 = vmul.f32 0.2, %v7626_v16  ;;  %v7249_v29 = vpop.f32.mrb[48].mxu0 }
 0x9f1   :  { %v5652_v7 = vmax.f32 %v7625_v38, %v5620_v40  ;;  %v7627_v42 = vadd.f32 %v7249_v29, %v5501_v61  ;;  %v5302_v14 = vpop.f32.mrb[49].mxu0 }
 0x9f2   :  { %v5651_v22 = vmax.f32 %v7626_v16, %v5619_v41  ;;  %v7628_v47 = vadd.f32 %v5496_v46, %v5302_v14 }
 0x9f3   :  { %5684 = vst.msk [vmem:[%s9638_s13 + $0xb8] sm:$0xff] %vm1985_vm3, %v5652_v7  ;;  %v5622_v48 = vmul.f32 0.2, %v7627_v42 }
 0x9f4   :  { %5683 = vst.msk [vmem:[%s9638_s13 + $0xb0] sm:$0xff] %vm1985_vm3, %v5651_v22  ;;  %v5621_v25 = vmul.f32 0.2, %v7628_v47  ;;  %v7252_v52 = vpop.f32.mrb[50].mxu0 }
 0x9f5   :  { %v5654_v57 = vmax.f32 %v7627_v42, %v5622_v48  ;;  %v7629_v31 = vadd.f32 %v7252_v52, %v5511_v44  ;;  %v5312_v10 = vpop.f32.mrb[51].mxu0 }
 0x9f6   :  { %v5653_v49 = vmax.f32 %v7628_v47, %v5621_v25  ;;  %v7630_v63 = vadd.f32 %v5506_v17, %v5312_v10 }
 0x9f7   :  { %5686 = vst.msk [vmem:[%s9638_s13 + $0xc8] sm:$0xff] %vm1985_vm3, %v5654_v57  ;;  %v5624_v39 = vmul.f32 0.2, %v7629_v31 }
 0x9f8   :  { %5685 = vst.msk [vmem:[%s9638_s13 + $0xc0] sm:$0xff] %vm1985_vm3, %v5653_v49  ;;  %v5623_v55 = vmul.f32 0.2, %v7630_v63  ;;  %v7255_v59 = vpop.f32.mrb[52].mxu0 }
 0x9f9   :  { %v5656_v45 = vmax.f32 %v7629_v31, %v5624_v39  ;;  %v7631_v36 = vadd.f32 %v7255_v59, %v5521_v37  ;;  %v5322_v50 = vpop.f32.mrb[53].mxu0 }
 0x9fa   :  { %v5655_v21 = vmax.f32 %v7630_v63, %v5623_v55  ;;  %v7632_v13 = vadd.f32 %v5516_v4, %v5322_v50 }
 0x9fb   :  { %5688 = vst.msk [vmem:[%s9638_s13 + $0xd8] sm:$0xff] %vm1985_vm3, %v5656_v45  ;;  %v5626_v54 = vmul.f32 0.2, %v7631_v36 }
 0x9fc   :  { %5687 = vst.msk [vmem:[%s9638_s13 + $0xd0] sm:$0xff] %vm1985_vm3, %v5655_v21  ;;  %v5625_v26 = vmul.f32 0.2, %v7632_v13  ;;  %v7258_v0 = vpop.f32.mrb[54].mxu0 }
 0x9fd   :  { %v5658_v1 = vmax.f32 %v7631_v36, %v5626_v54  ;;  %v7633_v32 = vadd.f32 %v7258_v0, %v5531_v60  ;;  %v5332_v6 = vpop.f32.mrb[55].mxu0 }
 0x9fe   :  { %v5657_v18 = vmax.f32 %v7632_v13, %v5625_v26  ;;  %v7634_v20 = vadd.f32 %v5526_v8, %v5332_v6 }
 0x9ff   :  { %5690 = vst.msk [vmem:[%s9638_s13 + $0xe8] sm:$0xff] %vm1985_vm3, %v5658_v1  ;;  %v5628_v53 = vmul.f32 0.2, %v7633_v32 }
 0xa00   :  { %5689 = vst.msk [vmem:[%s9638_s13 + $0xe0] sm:$0xff] %vm1985_vm3, %v5657_v18  ;;  %v5627_v56 = vmul.f32 0.2, %v7634_v20 }
 0xa01   :  { %v5660_v23 = vmax.f32 %v7633_v32, %v5628_v53 }
 0xa02   :  { %v5659_v58 = vmax.f32 %v7634_v20, %v5627_v56 }
 0xa03   :  { %5692 = vst.msk [vmem:[%s9638_s13 + $0xf8] sm:$0xff] %vm1985_vm3, %v5660_v23 }
 0xa04   :  { %5691 = vst.msk [vmem:[%s9638_s13 + $0xf0] sm:$0xff] %vm1985_vm3, %v5659_v58 }
 0xa05   :  { %5697 = vsyncpa [#allocation3], 1 }
 0xa06   :  { %5698 = vsyncpa [#allocation5], 1 }
 0xa07   :  { %5699 = vsyncpa [#allocation8], 1 }
 0xa08   :  { %5700 = vsyncpa [#allocation11], 1 }
 0xa09   :  { %5701 = vsyncpa [#allocation14], 1 }

</bundles_post_ra>
